<compile_context>
chip_gen: v7x
topology: tpu7x:2x2x1
jax: 0.10.0
libtpu: 0.0.40
codegen_flags: <defaults>
</compile_context>

<pallas_src>
import math
import numpy as np
import jax
import jax.numpy as jnp
from jax.experimental import pallas as pl
from jax.experimental.pallas import tpu as pltpu

# ----------------------------- problem sizes --------------------------------
BS, N, DX, DE, DY, N_HEAD = 2, 8, 32, 16, 8, 4
assert DX % N_HEAD == 0

# (name, in_dim, out_dim, has_bias).  Weights stored (in, out); biases (1, out).
PARAM_DEFS = [
    ("in_E",          DE,          DE,     True),
    ("x_e_mul1",      DX,          DE,     True),
    ("x_e_mul2",      DX,          DE,     True),
    ("lin_dist1",     2,           DE,     True),
    ("lin_norm_pos1", 1,           DE,     True),
    ("lin_norm_pos2", 1,           DE,     True),
    ("dist_add_e",    DE,          DE,     True),
    ("dist_mul_e",    DE,          DE,     True),
    ("q",             DX,          DX,     True),
    ("k",             DX,          DX,     True),
    ("v",             DX,          DX,     True),
    ("a",             DX,          N_HEAD, False),
    ("out",           DX * N_HEAD, DX,     True),
    ("e_att_mul",     DE,          N_HEAD, True),
    ("pos_att_mul",   DE,          N_HEAD, True),
    ("e_x_mul",       4 * DE,      DX,     True),   # EtoX: Linear(4*de, dx)
    ("pos_x_mul",     4 * DE,      DX,     True),   # EtoX: Linear(4*de, dx)
    ("y_e_mul",       DY,          DE,     True),
    ("y_e_add",       DY,          DE,     True),
    ("y_x_mul",       DY,          DX,     True),
    ("y_x_add",       DY,          DX,     True),
    ("x_out",         DX,          DX,     True),
    ("e_out",         DE,          DE,     True),
]


# ----------------------------- deterministic init ----------------------------
def init_params(key):
    params = {}
    for i, (name, din, dout, has_b) in enumerate(PARAM_DEFS):
        kw, kb = jax.random.split(jax.random.fold_in(key, i))
        s = 1.0 / math.sqrt(din)
        W = jax.random.uniform(kw, (din, dout), jnp.float32, -s, s)
        b = jax.random.uniform(kb, (1, dout), jnp.float32, -s, s) if has_b else None
        params[name] = (W, b)
    return params


# ------------------------ host-side param fusion + slab ----------------------
def pack_params(params):
    """Fuse same-input linears and pack everything into one (R,128) f32 slab.

    Every block's start row is padded to an 8-row (sublane) boundary so all in-kernel
    slab slices are aligned vector loads.
    """
    def W(name):
        return params[name][0]

    def B(name):
        Wm, b = params[name]
        return b if b is not None else jnp.zeros((1, Wm.shape[1]), jnp.float32)

    de, dx = DE, DX
    # Block-diagonal EtoX gate weight: [stats_E | stats_dist] (8*de lanes) -> [gate_e | gate_d].
    W_gate = jnp.zeros((8 * de, 2 * dx), jnp.float32)
    W_gate = W_gate.at[0:4 * de, 0:dx].set(W("e_x_mul"))
    W_gate = W_gate.at[4 * de:8 * de, dx:2 * dx].set(W("pos_x_mul"))

    fused = {
        # weights (all <= 128 columns)
        "W_xgrp":  jnp.concatenate([W("q"), W("k"), W("v"),
                                    W("x_e_mul1"), W("x_e_mul2")], axis=1),   # (32,128)
        "W_dgrp":  jnp.concatenate([W("dist_add_e"), W("dist_mul_e"),
                                    W("pos_att_mul")], axis=1),               # (16,36)
        "W_ygrp":  jnp.concatenate([W("y_e_mul"), W("y_e_add"),
                                    W("y_x_mul"), W("y_x_add")], axis=1),     # (8,96)
        "W_egrp":  jnp.concatenate([W("e_out"), W("e_att_mul")], axis=1),     # (16,20)
        "W_in_E":  W("in_E"),            # (16,16)
        "W_a":     W("a"),               # (32,4)   (no bias)
        "W_out":   W("out"),             # (128,32) single K=128 contraction
        "W_x_out": W("x_out"),           # (32,32)
        "W_gate":  W_gate,               # (128,64) block-diag [e_x_mul ; pos_x_mul]
        "W_d1":    W("lin_dist1"),       # (2,16)
        "W_np1":   W("lin_norm_pos1"),   # (1,16)
        "W_np2":   W("lin_norm_pos2"),   # (1,16)
        # biases (one slab row each)
        "b_xgrp":  jnp.concatenate([B("q"), B("k"), B("v"),
                                    B("x_e_mul1"), B("x_e_mul2")], axis=1),
        "b_dgrp":  jnp.concatenate([B("dist_add_e"), B("dist_mul_e"),
                                    B("pos_att_mul")], axis=1),
        "b_ygrp":  jnp.concatenate([B("y_e_mul"), B("y_e_add"),
                                    B("y_x_mul"), B("y_x_add")], axis=1),
        "b_egrp":  jnp.concatenate([B("e_out"), B("e_att_mul")], axis=1),
        "b_in_E":  B("in_E"),
        "b_out":   B("out"),
        "b_x_out": B("x_out"),
        "b_gate":  jnp.concatenate([B("e_x_mul"), B("pos_x_mul")], axis=1),   # (1,64)
        "b_d1":    B("lin_dist1"),
        "b_np1":   B("lin_norm_pos1"),
        "b_np2":   B("lin_norm_pos2"),
    }

    offsets = {}
    rows = 0
    for name, arr in fused.items():
        r, c = arr.shape
        assert c <= 128
        offsets[name] = (rows, r, c)
        rows += ((r + 7) // 8) * 8          # 8-row (sublane) aligned block starts
    rows_padded = ((rows + 7) // 8) * 8

    slab_np = np.zeros((rows_padded, 128), np.float32)
    for name, arr in fused.items():
        r0, r, c = offsets[name]
        slab_np[r0:r0 + r, :c] = np.asarray(arr)
    return jnp.asarray(slab_np), offsets


# ------------------------------- Pallas kernel -------------------------------
def make_kernel(bt, n, dx, de, n_head, off):
    rows_x = bt * n
    rows_e = bt * n * n
    inv_sqrt_de = 1.0 / math.sqrt(de)

    def kernel(x_ref, e_ref, y_ref, pos_ref, mask_ref, slab_ref, xout_ref, eout_ref):
        def w(name):
            r0, r, c = off[name]
            return slab_ref[r0:r0 + r, 0:c]

        xm3 = mask_ref[...]                       # (bt, n, 1)
        xm2 = xm3.reshape(rows_x, 1)              # (bt*n, 1)
        emi = xm3[:, :, None, :]                  # (bt, n, 1, 1)  mask over node i
        emj = xm3[:, None, :, :]                  # (bt, 1, n, 1)  mask over node j

        # ---- positional features (elementwise; Linear(2->de)/(1->de) stay on VPU) --
        pos = pos_ref[...] * xm3                                              # (bt,n,3)
        norm_pos = jnp.sqrt(jnp.sum(pos * pos, axis=-1, keepdims=True))       # (bt,n,1)
        npos = pos / (norm_pos + 1e-7)
        diff = pos[:, :, None, :] - pos[:, None, :, :]                        # (bt,n,n,3)
        pdist = jnp.sqrt(jnp.sum(diff * diff, axis=-1, keepdims=True))        # (bt,n,n,1)
        cosines = jnp.sum(npos[:, :, None, :] * npos[:, None, :, :],
                          axis=-1, keepdims=True)                             # (bt,n,n,1)

        Wd1 = w("W_d1")                                                       # (2,de)
        dist_lin = pdist * Wd1[0:1, :] + cosines * Wd1[1:2, :] + w("b_d1")    # (bt,n,n,de)
        norm1 = norm_pos * w("W_np1") + w("b_np1")                            # (bt,n,de)
        norm2 = norm_pos * w("W_np2") + w("b_np2")
        dist1 = jax.nn.relu(dist_lin + norm1[:, :, None, :] + norm2[:, None, :, :]) * emi * emj

        # ---- fused GEMMs on shared inputs -----------------------------------------
        x2 = x_ref[...].reshape(rows_x, dx)                                   # (bt*n, dx)
        xg = (jnp.dot(x2, w("W_xgrp"), preferred_element_type=jnp.float32)
              + w("b_xgrp")) * xm2                                            # (bt*n, 128)
        Q = xg[:, 0:dx]
        K = xg[:, dx:2 * dx]
        V = xg[:, 2 * dx:3 * dx]
        # single 32-lane-aligned extract for the two 16-wide x_e_mul outputs
        xem = xg[:, 3 * dx:3 * dx + 2 * de].reshape(bt, n, 2 * de)
        xem1 = xem[:, :, 0:de]
        xem2 = xem[:, :, de:2 * de]

        yg = jnp.dot(y_ref[...], w("W_ygrp"),
                     preferred_element_type=jnp.float32) + w("b_ygrp")        # (bt, 96)
        ye_mul = yg[:, 0:de]
        ye_add = yg[:, de:2 * de]
        yx_mul = yg[:, 2 * de:2 * de + dx]
        yx_add = yg[:, 2 * de + dx:2 * de + 2 * dx]

        dg = jnp.dot(dist1.reshape(rows_e, de), w("W_dgrp"),
                     preferred_element_type=jnp.float32) + w("b_dgrp")        # (bt*n*n, 36)
        dist_add = dg[:, 0:de].reshape(bt, n, n, de)
        dist_mul = dg[:, de:2 * de].reshape(bt, n, n, de)
        pos_att = dg[:, 2 * de:2 * de + n_head].reshape(bt, n, n, n_head)

        # ---- EtoX stat helper (mean / min / max / var over j) ----------------------
        nval = jnp.sum(xm3, axis=1)                                           # (bt,1)
        rec_nval = (1.0 / nval)[:, :, None]                                   # exact divide
        imask = 1.0 - emj

        def stats4(T4):
            m = jnp.sum(T4, axis=2) * rec_nval                                # (bt,n,de)
            # NOTE: +-1e5 sentinels match the torch EtoX exactly (silently wrong if
            # |features| ever exceed ~1e5); "std" is variance (no sqrt) as in torch.
            mi = jnp.min(T4 + 1e5 * imask, axis=2)
            ma = jnp.max(T4 - 1e5 * imask, axis=2)
            var = jnp.sum(((T4 - m[:, :, None, :]) ** 2) * emj, axis=2) * rec_nval
            return jnp.concatenate([m, mi, ma, var], axis=-1)                 # (bt,n,4*de)

        # dist1 dies here (stats kept; only (bt,n,4*de) stays live through the E chain)
        stats_d = stats4(dist1)

        # ---- edge update ------------------------------------------------------------
        Y = (jnp.dot(e_ref[...].reshape(rows_e, de), w("W_in_E"),
                     preferred_element_type=jnp.float32) + w("b_in_E")
             ).reshape(bt, n, n, de)
        Y = Y * xem1[:, None, :, :] * xem2[:, :, None, :] * emi * emj
        Y = (Y + dist_add + Y * dist_mul) * emi * emj
        Enew = (Y + ye_add[:, None, None, :] + Y * ye_mul[:, None, None, :]) * emi * emj

        eg = jnp.dot(Enew.reshape(rows_e, de), w("W_egrp"),
                     preferred_element_type=jnp.float32) + w("b_egrp")        # (bt*n*n, 20)
        eout = eg[:, 0:de].reshape(bt, n, n, de) * emi * emj
        e_att = eg[:, de:de + n_head].reshape(bt, n, n, n_head)

        # Enew dies here; both EtoX gates via ONE block-diagonal K=128 GEMM.
        stats_e = stats4(Enew)
        stats = jnp.concatenate([stats_e, stats_d], axis=-1).reshape(rows_x, 8 * de)
        gates = jnp.dot(stats, w("W_gate"),
                        preferred_element_type=jnp.float32) + w("b_gate")     # (bt*n, 2*dx)
        gate_e = gates[:, 0:dx]
        gate_d = gates[:, dx:2 * dx]

        # ---- attention --------------------------------------------------------------
        prod = (Q.reshape(bt, n, dx)[:, :, None, :] *
                K.reshape(bt, n, dx)[:, None, :, :]) * inv_sqrt_de            # (bt,n,n,dx)
        a4 = jnp.dot(prod.reshape(rows_e, dx), w("W_a"),
                     preferred_element_type=jnp.float32).reshape(bt, n, n, n_head)
        a4 = a4 * emi * emj
        a4 = a4 + e_att * a4
        a4 = a4 + pos_att * a4
        a4 = a4 * emi * emj

        # masked softmax over j (dim=2 in torch).
        # TODO(synk): masked_softmax's global `mask.sum() == 0` early-return is not
        # reproduced; we assume at least one valid node per batch element.
        amask = jnp.where(emj > 0.0, a4, jnp.float32(-1e30))
        amax = jnp.max(amask, axis=2, keepdims=True)
        ex = jnp.exp(amask - amax)
        denom = jnp.sum(ex, axis=2, keepdims=True)
        alpha = ex * pl.reciprocal(denom, approx=True)                        # (bt,n,n,nh)

        # per-head (alpha_h @ V) -> head-major lane concat -> ONE K=128 out projection.
        V3 = V.reshape(bt, n, dx)
        wv_heads = jnp.concatenate(
            [jnp.einsum("bij,bjd->bid", alpha[:, :, :, h], V3,
                        preferred_element_type=jnp.float32)
             for h in range(n_head)], axis=-1)                                # (bt,n,nh*dx)
        wv = (jnp.dot(wv_heads.reshape(rows_x, n_head * dx), w("W_out"),
                      preferred_element_type=jnp.float32) + w("b_out")) * xm2 # (bt*n, dx)

        # ---- EtoX gates + y gates + final projection --------------------------------
        wv = wv + gate_e * wv
        wv = wv + gate_d * wv

        newx = wv.reshape(bt, n, dx) * (yx_mul[:, None, :] + 1.0) + yx_add[:, None, :]
        xout = (jnp.dot(newx.reshape(rows_x, dx), w("W_x_out"),
                        preferred_element_type=jnp.float32) + w("b_x_out")) * xm2

        xout_ref[...] = xout.reshape(bt, n, dx)
        eout_ref[...] = eout
        # TODO(synk): predicts_y=True branch (y_y, Xtoy, Etoy, dist_y, y_out MLP) is
        # not implemented; the module is run with predicts_y=False so y_out is None.
        # TODO(synk): for a fully lane-dense edge path (n*de==128 here), the edge
        # elementwise chain could run in a (bt*n, n*de) layout with block-diagonal
        # in_E / e_out weights; not done to keep relayout risk low at these sizes.

    return kernel


# ---------------------------------- wrapper -----------------------------------
def node_edge_block(X, E, y, pos, node_mask, params, *, batch_tile=None):
    bs, n, dx = X.shape
    de = E.shape[-1]
    dy = y.shape[-1]
    mask3 = node_mask.astype(jnp.float32)[..., None]                          # (bs,n,1)
    slab, off = pack_params(params)

    # Batch amortization: fold `batch_tile` graphs into every GEMM's rows and iterate
    # the grid over batch tiles.  Target ~256 rows per step; "parallel" lets v7x's two
    # TensorCores split the tiles when grid > 1.
    if batch_tile is None:
        batch_tile = max(1, min(bs, 256 // max(n, 1)))
    while bs % batch_tile:
        batch_tile -= 1
    bt = batch_tile
    grid = (bs // bt,)

    kernel = make_kernel(bt, n, dx, de, N_HEAD, off)

    # Params travel as ONE slab block (same block every step -> DMA'd once).
    # Outputs keep their natural shapes: at these sizes masked stores are cheaper than
    # the relayout a lane-dense (>=128-wide) output slab would require.
    # TODO(synk): for large n, tile E over the first node axis and derive
    # vmem_limit_bytes from the tile so double-buffered blocks fit v7x's 64 MiB VMEM;
    # also revisit a lane-dense Xout slab once per-call batches are large.
    in_specs = [
        pl.BlockSpec((bt, n, dx), lambda g: (g, 0, 0)),
        pl.BlockSpec((bt, n, n, de), lambda g: (g, 0, 0, 0)),
        pl.BlockSpec((bt, dy), lambda g: (g, 0)),
        pl.BlockSpec((bt, n, 3), lambda g: (g, 0, 0)),
        pl.BlockSpec((bt, n, 1), lambda g: (g, 0, 0)),
        pl.BlockSpec(tuple(slab.shape), lambda g: (0, 0)),
    ]
    out_specs = [
        pl.BlockSpec((bt, n, dx), lambda g: (g, 0, 0)),
        pl.BlockSpec((bt, n, n, de), lambda g: (g, 0, 0, 0)),
    ]
    out_shapes = (jax.ShapeDtypeStruct((bs, n, dx), jnp.float32),
                  jax.ShapeDtypeStruct((bs, n, n, de), jnp.float32))

    Xout, Eout = pl.pallas_call(
        kernel,
        out_shape=out_shapes,
        grid_spec=pltpu.PrefetchScalarGridSpec(
            num_scalar_prefetch=0,
            grid=grid,
            in_specs=in_specs,
            out_specs=out_specs,
        ),
        compiler_params=pltpu.CompilerParams(
            dimension_semantics=("parallel",),
            vmem_limit_bytes=32 * 1024 * 1024,
        ),
    )(X, E, y, pos, mask3, slab)
    return Xout, Eout, None   # y_out is None (predicts_y=False)


# --------------------- reference: direct JAX port of the torch forward --------
def reference(X, E, y, pos, node_mask, params):
    bs, n, dx = X.shape
    de = E.shape[-1]
    nh = N_HEAD

    def lin(x, name):
        W, b = params[name]
        out = jnp.einsum("...i,io->...o", x, W)
        if b is not None:
            out = out + b.reshape((1,) * (x.ndim - 1) + (W.shape[1],))
        return out

    x_mask = node_mask.astype(jnp.float32)[..., None]        # (bs,n,1)
    e_mask1 = x_mask[:, :, None, :]                          # (bs,n,1,1)
    e_mask2 = x_mask[:, None, :, :]                          # (bs,1,n,1)

    pos = pos * x_mask
    norm_pos = jnp.sqrt(jnp.sum(pos * pos, axis=-1, keepdims=True))
    normalized_pos = pos / (norm_pos + 1e-7)
    pairwise_dist = jnp.sqrt(jnp.sum((pos[:, :, None, :] - pos[:, None, :, :]) ** 2,
                                     axis=-1, keepdims=True))
    cosines = jnp.sum(normalized_pos[:, :, None, :] * normalized_pos[:, None, :, :],
                      axis=-1, keepdims=True)
    pos_info = jnp.concatenate([pairwise_dist, cosines], axis=-1)
    norm1 = lin(norm_pos, "lin_norm_pos1")
    norm2 = lin(norm_pos, "lin_norm_pos2")
    dist1 = jax.nn.relu(lin(pos_info, "lin_dist1")
                        + norm1[:, :, None, :] + norm2[:, None, :, :]) * e_mask1 * e_mask2

    Y = lin(E, "in_E")
    x_e_mul1 = lin(X, "x_e_mul1") * x_mask
    x_e_mul2 = lin(X, "x_e_mul2") * x_mask
    Y = Y * x_e_mul1[:, None, :, :] * x_e_mul2[:, :, None, :] * e_mask1 * e_mask2
    dist_add = lin(dist1, "dist_add_e")
    dist_mul = lin(dist1, "dist_mul_e")
    Y = (Y + dist_add + Y * dist_mul) * e_mask1 * e_mask2
    y_e_add = lin(y, "y_e_add")[:, None, None, :]
    y_e_mul = lin(y, "y_e_mul")[:, None, None, :]
    Enew = (Y + y_e_add + Y * y_e_mul) * e_mask1 * e_mask2
    Eout = lin(Enew, "e_out") * e_mask1 * e_mask2

    Q = (lin(X, "q") * x_mask)[:, :, None, :]
    K = (lin(X, "k") * x_mask)[:, None, :, :]
    prod = Q * K / math.sqrt(de)
    a = lin(prod, "a") * e_mask1 * e_mask2
    a = a + lin(Enew, "e_att_mul") * a
    a = a + lin(dist1, "pos_att_mul") * a
    a = a * e_mask1 * e_mask2
    softmax_mask = jnp.broadcast_to(e_mask2, a.shape) > 0
    a_masked = jnp.where(softmax_mask, a, -jnp.inf)
    alpha = jax.nn.softmax(a_masked, axis=2)[..., None]           # (bs,n,n,nh,1)
    V = (lin(X, "v") * x_mask)[:, None, :, None, :]               # (bs,1,n,1,dx)
    weighted_V = jnp.sum(alpha * V, axis=2).reshape(bs, n, nh * dx)
    weighted_V = lin(weighted_V, "out") * x_mask

    def eto_x(T, name):
        e2 = jnp.broadcast_to(e_mask2, T.shape)
        imask = 1.0 - e2
        denom = jnp.sum(e2, axis=2)
        m = jnp.sum(T, axis=2) / denom
        mi = jnp.min(T + 1e5 * imask, axis=2)
        ma = jnp.max(T - 1e5 * imask, axis=2)
        std = jnp.sum(((T - m[:, :, None, :]) ** 2) * e2, axis=2) / denom
        z = jnp.concatenate([m, mi, ma, std], axis=-1)
        return lin(z, name)

    weighted_V = weighted_V + eto_x(Enew, "e_x_mul") * weighted_V
    weighted_V = weighted_V + eto_x(dist1, "pos_x_mul") * weighted_V
    yx1 = lin(y, "y_x_add")[:, None, :]
    yx2 = lin(y, "y_x_mul")[:, None, :]
    newX = weighted_V * (yx2 + 1.0) + yx1
    Xout = lin(newX, "x_out") * x_mask
    return Xout, Eout


if __name__ == "__main__":
    key = jax.random.PRNGKey(0)
    kx, ke, ky, kp, kparam = jax.random.split(key, 5)
    X = jax.random.normal(kx, (BS, N, DX), jnp.float32)
    E = jax.random.normal(ke, (BS, N, N, DE), jnp.float32)
    y = jax.random.normal(ky, (BS, DY), jnp.float32)
    pos = jax.random.normal(kp, (BS, N, 3), jnp.float32)
    node_mask = jnp.array([[1.0] * N, [1.0] * (N - 2) + [0.0] * 2], jnp.float32)
    params = init_params(kparam)

    Xout, Eout, y_out = node_edge_block(X, E, y, pos, node_mask, params)
    jax.block_until_ready((Xout, Eout))
    assert y_out is None

    Xref, Eref = reference(X, E, y, pos, node_mask, params)
    # tolerance covers the EUP approximate reciprocal used for the softmax denominator
    # (the EtoX 1/n_valid now uses an exact divide).
    np.testing.assert_allclose(np.asarray(Xout), np.asarray(Xref), rtol=2e-2, atol=2e-2)
    np.testing.assert_allclose(np.asarray(Eout), np.asarray(Eref), rtol=2e-2, atol=2e-2)

    # masking sanity (mirrors diffusion_utils.assert_correctly_masked)
    m3 = np.asarray(node_mask)[..., None]
    assert np.allclose(np.asarray(Xout) * (1.0 - m3), 0.0, atol=1e-5)
    emask = m3[:, :, None, :] * m3[:, None, :, :]
    assert np.allclose(np.asarray(Eout) * (1.0 - emask), 0.0, atol=1e-5)

    # ---- batched / grid-tiled path (the amortization lever): 64 graphs, 2 steps of 32
    BSL = 64
    kx2, ke2, ky2, kp2, km2 = jax.random.split(jax.random.PRNGKey(1), 5)
    Xl = jax.random.normal(kx2, (BSL, N, DX), jnp.float32)
    El = jax.random.normal(ke2, (BSL, N, N, DE), jnp.float32)
    yl = jax.random.normal(ky2, (BSL, DY), jnp.float32)
    posl = jax.random.normal(kp2, (BSL, N, 3), jnp.float32)
    ml = (jax.random.uniform(km2, (BSL, N)) > 0.3).astype(jnp.float32)
    ml = ml.at[:, 0].set(1.0)            # at least one valid node per graph
    Xol, Eol, _ = node_edge_block(Xl, El, yl, posl, ml, params)
    jax.block_until_ready((Xol, Eol))
    Xrl, Erl = reference(Xl, El, yl, posl, ml, params)
    np.testing.assert_allclose(np.asarray(Xol), np.asarray(Xrl), rtol=2e-2, atol=2e-2)
    np.testing.assert_allclose(np.asarray(Eol), np.asarray(Erl), rtol=2e-2, atol=2e-2)

    print("KERNEL_OK")
</pallas_src>

<mosaic_0001>
module attributes {stable_mosaic.version = 11 : i64} {
  func.func @kernel(%arg0: i32, %arg1: memref<2x8x32xf32, #tpu.memory_space<vmem>>, %arg2: memref<2x8x8x16xf32, #tpu.memory_space<vmem>>, %arg3: memref<2x8xf32, #tpu.memory_space<vmem>>, %arg4: memref<2x8x3xf32, #tpu.memory_space<vmem>>, %arg5: memref<2x8x1xf32, #tpu.memory_space<vmem>>, %arg6: memref<520x128xf32, #tpu.memory_space<vmem>>, %arg7: memref<2x8x32xf32, #tpu.memory_space<vmem>>, %arg8: memref<2x8x8x16xf32, #tpu.memory_space<vmem>>) attributes {dimension_semantics = [#tpu.dimension_semantics<parallel>], iteration_bounds = array<i64: 1>, scalar_prefetch = 0 : i64, scratch_operands = 0 : i64, tpu.core_type = #tpu.core_type<tc>, window_params = [{transform_indices = @transform_0, window_bounds = array<i64: 2, 8, 32>}, {transform_indices = @transform_1, window_bounds = array<i64: 2, 8, 8, 16>}, {transform_indices = @transform_2, window_bounds = array<i64: 2, 8>}, {transform_indices = @transform_3, window_bounds = array<i64: 2, 8, 3>}, {transform_indices = @transform_4, window_bounds = array<i64: 2, 8, 1>}, {pipeline_mode = #tpu.pipeline_mode<synchronous>, transform_indices = @transform_5, window_bounds = array<i64: 520, 128>}, {transform_indices = @transform_6, window_bounds = array<i64: 2, 8, 32>}, {transform_indices = @transform_7, window_bounds = array<i64: 2, 8, 8, 16>}]} {
    %c0 = arith.constant 0 : index
    %c0_0 = arith.constant 0 : index
    %c0_1 = arith.constant 0 : index
    %0 = vector.load %arg5[%c0, %c0_0, %c0_1] : memref<2x8x1xf32, #tpu.memory_space<vmem>>, vector<2x8x1xf32>
    %1 = vector.shape_cast %0 : vector<2x8x1xf32> to vector<16x1xf32>
    %2 = vector.shape_cast %0 : vector<2x8x1xf32> to vector<2x8x1x1xf32>
    %3 = vector.shape_cast %0 : vector<2x8x1xf32> to vector<2x1x8x1xf32>
    %c0_2 = arith.constant 0 : index
    %c0_3 = arith.constant 0 : index
    %c0_4 = arith.constant 0 : index
    %4 = vector.load %arg4[%c0_2, %c0_3, %c0_4] : memref<2x8x3xf32, #tpu.memory_space<vmem>>, vector<2x8x3xf32>
    %5 = vector.broadcast %0 : vector<2x8x1xf32> to vector<2x8x3xf32>
    %6 = arith.mulf %4, %5 : vector<2x8x3xf32>
    %7 = arith.mulf %6, %6 : vector<2x8x3xf32>
    %cst = arith.constant dense<0.000000e+00> : vector<2x8xf32>
    %8 = vector.multi_reduction <add>, %7, %cst [2] : vector<2x8x3xf32> to vector<2x8xf32>
    %9 = vector.shape_cast %8 : vector<2x8xf32> to vector<2x8x1xf32>
    %10 = math.sqrt %9 : vector<2x8x1xf32>
    %cst_5 = arith.constant 1.000000e-07 : f32
    %11 = vector.broadcast %cst_5 : f32 to vector<2x8x1xf32>
    %12 = arith.addf %10, %11 : vector<2x8x1xf32>
    %13 = vector.broadcast %12 : vector<2x8x1xf32> to vector<2x8x3xf32>
    %14 = arith.divf %6, %13 : vector<2x8x3xf32>
    %15 = vector.shape_cast %6 : vector<2x8x3xf32> to vector<2x8x1x3xf32>
    %16 = vector.shape_cast %6 : vector<2x8x3xf32> to vector<2x1x8x3xf32>
    %17 = vector.broadcast %15 : vector<2x8x1x3xf32> to vector<2x8x8x3xf32>
    %18 = vector.broadcast %16 : vector<2x1x8x3xf32> to vector<2x8x8x3xf32>
    %19 = arith.subf %17, %18 : vector<2x8x8x3xf32>
    %20 = arith.mulf %19, %19 : vector<2x8x8x3xf32>
    %cst_6 = arith.constant dense<0.000000e+00> : vector<2x8x8xf32>
    %21 = vector.multi_reduction <add>, %20, %cst_6 [3] : vector<2x8x8x3xf32> to vector<2x8x8xf32>
    %22 = vector.shape_cast %21 : vector<2x8x8xf32> to vector<2x8x8x1xf32>
    %23 = math.sqrt %22 : vector<2x8x8x1xf32>
    %24 = vector.shape_cast %14 : vector<2x8x3xf32> to vector<2x8x1x3xf32>
    %25 = vector.shape_cast %14 : vector<2x8x3xf32> to vector<2x1x8x3xf32>
    %26 = vector.broadcast %24 : vector<2x8x1x3xf32> to vector<2x8x8x3xf32>
    %27 = vector.broadcast %25 : vector<2x1x8x3xf32> to vector<2x8x8x3xf32>
    %28 = arith.mulf %26, %27 : vector<2x8x8x3xf32>
    %cst_7 = arith.constant dense<0.000000e+00> : vector<2x8x8xf32>
    %29 = vector.multi_reduction <add>, %28, %cst_7 [3] : vector<2x8x8x3xf32> to vector<2x8x8xf32>
    %30 = vector.shape_cast %29 : vector<2x8x8xf32> to vector<2x8x8x1xf32>
    %c408 = arith.constant 408 : index
    %c0_8 = arith.constant 0 : index
    %31 = vector.load %arg6[%c408, %c0_8] : memref<520x128xf32, #tpu.memory_space<vmem>>, vector<2x16xf32>
    %32 = vector.extract_strided_slice %31 {offsets = [0, 0], sizes = [1, 16], strides = [1, 1]} : vector<2x16xf32> to vector<1x16xf32>
    %33 = vector.shape_cast %32 : vector<1x16xf32> to vector<1x1x1x16xf32>
    %34 = vector.broadcast %23 : vector<2x8x8x1xf32> to vector<2x8x8x16xf32>
    %35 = vector.broadcast %33 : vector<1x1x1x16xf32> to vector<2x8x8x16xf32>
    %36 = arith.mulf %34, %35 : vector<2x8x8x16xf32>
    %37 = vector.extract_strided_slice %31 {offsets = [1, 0], sizes = [1, 16], strides = [1, 1]} : vector<2x16xf32> to vector<1x16xf32>
    %38 = vector.shape_cast %37 : vector<1x16xf32> to vector<1x1x1x16xf32>
    %39 = vector.broadcast %30 : vector<2x8x8x1xf32> to vector<2x8x8x16xf32>
    %40 = vector.broadcast %38 : vector<1x1x1x16xf32> to vector<2x8x8x16xf32>
    %41 = arith.mulf %39, %40 : vector<2x8x8x16xf32>
    %42 = arith.addf %36, %41 : vector<2x8x8x16xf32>
    %c496 = arith.constant 496 : index
    %c0_9 = arith.constant 0 : index
    %43 = vector.load %arg6[%c496, %c0_9] : memref<520x128xf32, #tpu.memory_space<vmem>>, vector<1x16xf32>
    %44 = vector.shape_cast %43 : vector<1x16xf32> to vector<1x1x1x16xf32>
    %45 = vector.broadcast %44 : vector<1x1x1x16xf32> to vector<2x8x8x16xf32>
    %46 = arith.addf %42, %45 : vector<2x8x8x16xf32>
    %c416 = arith.constant 416 : index
    %c0_10 = arith.constant 0 : index
    %47 = vector.load %arg6[%c416, %c0_10] : memref<520x128xf32, #tpu.memory_space<vmem>>, vector<1x16xf32>
    %48 = vector.shape_cast %47 : vector<1x16xf32> to vector<1x1x16xf32>
    %49 = vector.broadcast %10 : vector<2x8x1xf32> to vector<2x8x16xf32>
    %50 = vector.broadcast %48 : vector<1x1x16xf32> to vector<2x8x16xf32>
    %51 = arith.mulf %49, %50 : vector<2x8x16xf32>
    %c504 = arith.constant 504 : index
    %c0_11 = arith.constant 0 : index
    %52 = vector.load %arg6[%c504, %c0_11] : memref<520x128xf32, #tpu.memory_space<vmem>>, vector<1x16xf32>
    %53 = vector.shape_cast %52 : vector<1x16xf32> to vector<1x1x16xf32>
    %54 = vector.broadcast %53 : vector<1x1x16xf32> to vector<2x8x16xf32>
    %55 = arith.addf %51, %54 : vector<2x8x16xf32>
    %c424 = arith.constant 424 : index
    %c0_12 = arith.constant 0 : index
    %56 = vector.load %arg6[%c424, %c0_12] : memref<520x128xf32, #tpu.memory_space<vmem>>, vector<1x16xf32>
    %57 = vector.shape_cast %56 : vector<1x16xf32> to vector<1x1x16xf32>
    %58 = vector.broadcast %10 : vector<2x8x1xf32> to vector<2x8x16xf32>
    %59 = vector.broadcast %57 : vector<1x1x16xf32> to vector<2x8x16xf32>
    %60 = arith.mulf %58, %59 : vector<2x8x16xf32>
    %c512 = arith.constant 512 : index
    %c0_13 = arith.constant 0 : index
    %61 = vector.load %arg6[%c512, %c0_13] : memref<520x128xf32, #tpu.memory_space<vmem>>, vector<1x16xf32>
    %62 = vector.shape_cast %61 : vector<1x16xf32> to vector<1x1x16xf32>
    %63 = vector.broadcast %62 : vector<1x1x16xf32> to vector<2x8x16xf32>
    %64 = arith.addf %60, %63 : vector<2x8x16xf32>
    %65 = vector.shape_cast %55 : vector<2x8x16xf32> to vector<2x8x1x16xf32>
    %66 = vector.broadcast %65 : vector<2x8x1x16xf32> to vector<2x8x8x16xf32>
    %67 = arith.addf %46, %66 : vector<2x8x8x16xf32>
    %68 = vector.shape_cast %64 : vector<2x8x16xf32> to vector<2x1x8x16xf32>
    %69 = vector.broadcast %68 : vector<2x1x8x16xf32> to vector<2x8x8x16xf32>
    %70 = arith.addf %67, %69 : vector<2x8x8x16xf32>
    %cst_14 = arith.constant 0.000000e+00 : f32
    %71 = vector.broadcast %cst_14 : f32 to vector<2x8x8x16xf32>
    %72 = arith.maximumf %70, %71 : vector<2x8x8x16xf32>
    %73 = vector.broadcast %2 : vector<2x8x1x1xf32> to vector<2x8x8x16xf32>
    %74 = arith.mulf %72, %73 : vector<2x8x8x16xf32>
    %75 = vector.broadcast %3 : vector<2x1x8x1xf32> to vector<2x8x8x16xf32>
    %76 = arith.mulf %74, %75 : vector<2x8x8x16xf32>
    %c0_15 = arith.constant 0 : index
    %c0_16 = arith.constant 0 : index
    %c0_17 = arith.constant 0 : index
    %77 = vector.load %arg1[%c0_15, %c0_16, %c0_17] : memref<2x8x32xf32, #tpu.memory_space<vmem>>, vector<2x8x32xf32>
    %78 = vector.shape_cast %77 : vector<2x8x32xf32> to vector<16x32xf32>
    %c0_18 = arith.constant 0 : index
    %c0_19 = arith.constant 0 : index
    %79 = vector.load %arg6[%c0_18, %c0_19] : memref<520x128xf32, #tpu.memory_space<vmem>>, vector<32x128xf32>
    %cst_20 = arith.constant dense<0.000000e+00> : vector<16x128xf32>
    %80 = tpu.matmul %78, %79, %cst_20 {dimension_numbers = #tpu.dot_dimension_numbers<[1], [0], [0], [1], [0, 0, 1, 1], [], []>} : vector<16x32xf32>, vector<32x128xf32>, vector<16x128xf32> -> vector<16x128xf32>
    %c432 = arith.constant 432 : index
    %c0_21 = arith.constant 0 : index
    %81 = vector.load %arg6[%c432, %c0_21] : memref<520x128xf32, #tpu.memory_space<vmem>>, vector<1x128xf32>
    %82 = vector.broadcast %81 : vector<1x128xf32> to vector<16x128xf32>
    %83 = arith.addf %80, %82 : vector<16x128xf32>
    %84 = vector.broadcast %1 : vector<16x1xf32> to vector<16x128xf32>
    %85 = arith.mulf %83, %84 : vector<16x128xf32>
    %86 = vector.extract_strided_slice %85 {offsets = [0, 0], sizes = [16, 32], strides = [1, 1]} : vector<16x128xf32> to vector<16x32xf32>
    %87 = vector.extract_strided_slice %85 {offsets = [0, 32], sizes = [16, 32], strides = [1, 1]} : vector<16x128xf32> to vector<16x32xf32>
    %88 = vector.extract_strided_slice %85 {offsets = [0, 64], sizes = [16, 32], strides = [1, 1]} : vector<16x128xf32> to vector<16x32xf32>
    %89 = vector.extract_strided_slice %85 {offsets = [0, 96], sizes = [16, 32], strides = [1, 1]} : vector<16x128xf32> to vector<16x32xf32>
    %90 = vector.shape_cast %89 : vector<16x32xf32> to vector<2x8x32xf32>
    %91 = vector.extract_strided_slice %90 {offsets = [0, 0, 0], sizes = [2, 8, 16], strides = [1, 1, 1]} : vector<2x8x32xf32> to vector<2x8x16xf32>
    %92 = vector.extract_strided_slice %90 {offsets = [0, 0, 16], sizes = [2, 8, 16], strides = [1, 1, 1]} : vector<2x8x32xf32> to vector<2x8x16xf32>
    %c0_22 = arith.constant 0 : index
    %c0_23 = arith.constant 0 : index
    %93 = vector.load %arg3[%c0_22, %c0_23] : memref<2x8xf32, #tpu.memory_space<vmem>>, vector<2x8xf32>
    %c48 = arith.constant 48 : index
    %c0_24 = arith.constant 0 : index
    %94 = vector.load %arg6[%c48, %c0_24] : memref<520x128xf32, #tpu.memory_space<vmem>>, vector<8x96xf32>
    %cst_25 = arith.constant dense<0.000000e+00> : vector<2x96xf32>
    %95 = tpu.matmul %93, %94, %cst_25 {dimension_numbers = #tpu.dot_dimension_numbers<[1], [0], [0], [1], [0, 0, 1, 1], [], []>} : vector<2x8xf32>, vector<8x96xf32>, vector<2x96xf32> -> vector<2x96xf32>
    %c448 = arith.constant 448 : index
    %c0_26 = arith.constant 0 : index
    %96 = vector.load %arg6[%c448, %c0_26] : memref<520x128xf32, #tpu.memory_space<vmem>>, vector<1x96xf32>
    %97 = vector.broadcast %96 : vector<1x96xf32> to vector<2x96xf32>
    %98 = arith.addf %95, %97 : vector<2x96xf32>
    %99 = vector.extract_strided_slice %98 {offsets = [0, 0], sizes = [2, 16], strides = [1, 1]} : vector<2x96xf32> to vector<2x16xf32>
    %100 = vector.extract_strided_slice %98 {offsets = [0, 16], sizes = [2, 16], strides = [1, 1]} : vector<2x96xf32> to vector<2x16xf32>
    %101 = vector.extract_strided_slice %98 {offsets = [0, 32], sizes = [2, 32], strides = [1, 1]} : vector<2x96xf32> to vector<2x32xf32>
    %102 = vector.extract_strided_slice %98 {offsets = [0, 64], sizes = [2, 32], strides = [1, 1]} : vector<2x96xf32> to vector<2x32xf32>
    %103 = vector.shape_cast %76 : vector<2x8x8x16xf32> to vector<128x16xf32>
    %c32 = arith.constant 32 : index
    %c0_27 = arith.constant 0 : index
    %104 = vector.load %arg6[%c32, %c0_27] : memref<520x128xf32, #tpu.memory_space<vmem>>, vector<16x36xf32>
    %cst_28 = arith.constant dense<0.000000e+00> : vector<128x36xf32>
    %105 = tpu.matmul %103, %104, %cst_28 {dimension_numbers = #tpu.dot_dimension_numbers<[1], [0], [0], [1], [0, 0, 1, 1], [], []>} : vector<128x16xf32>, vector<16x36xf32>, vector<128x36xf32> -> vector<128x36xf32>
    %c440 = arith.constant 440 : index
    %c0_29 = arith.constant 0 : index
    %106 = vector.load %arg6[%c440, %c0_29] : memref<520x128xf32, #tpu.memory_space<vmem>>, vector<1x36xf32>
    %107 = vector.broadcast %106 : vector<1x36xf32> to vector<128x36xf32>
    %108 = arith.addf %105, %107 : vector<128x36xf32>
    %109 = vector.extract_strided_slice %108 {offsets = [0, 0], sizes = [128, 16], strides = [1, 1]} : vector<128x36xf32> to vector<128x16xf32>
    %110 = vector.shape_cast %109 : vector<128x16xf32> to vector<2x8x8x16xf32>
    %111 = vector.extract_strided_slice %108 {offsets = [0, 16], sizes = [128, 16], strides = [1, 1]} : vector<128x36xf32> to vector<128x16xf32>
    %112 = vector.shape_cast %111 : vector<128x16xf32> to vector<2x8x8x16xf32>
    %113 = vector.extract_strided_slice %108 {offsets = [0, 32], sizes = [128, 4], strides = [1, 1]} : vector<128x36xf32> to vector<128x4xf32>
    %114 = vector.shape_cast %113 : vector<128x4xf32> to vector<2x8x8x4xf32>
    %cst_30 = arith.constant dense<0.000000e+00> : vector<2x1xf32>
    %115 = vector.multi_reduction <add>, %0, %cst_30 [1] : vector<2x8x1xf32> to vector<2x1xf32>
    %cst_31 = arith.constant 1.000000e+00 : f32
    %116 = vector.broadcast %cst_31 : f32 to vector<2x1xf32>
    %117 = arith.divf %116, %115 : vector<2x1xf32>
    %118 = vector.shape_cast %117 : vector<2x1xf32> to vector<2x1x1xf32>
    %cst_32 = arith.constant 1.000000e+00 : f32
    %119 = vector.broadcast %cst_32 : f32 to vector<2x1x8x1xf32>
    %120 = arith.subf %119, %3 : vector<2x1x8x1xf32>
    %cst_33 = arith.constant dense<0.000000e+00> : vector<2x8x16xf32>
    %121 = vector.multi_reduction <add>, %76, %cst_33 [2] : vector<2x8x8x16xf32> to vector<2x8x16xf32>
    %122 = vector.broadcast %118 : vector<2x1x1xf32> to vector<2x8x16xf32>
    %123 = arith.mulf %121, %122 : vector<2x8x16xf32>
    %cst_34 = arith.constant 1.000000e+05 : f32
    %124 = vector.broadcast %cst_34 : f32 to vector<2x1x8x1xf32>
    %125 = arith.mulf %124, %120 : vector<2x1x8x1xf32>
    %126 = vector.broadcast %125 : vector<2x1x8x1xf32> to vector<2x8x8x16xf32>
    %127 = arith.addf %76, %126 : vector<2x8x8x16xf32>
    %cst_35 = arith.constant dense<0x7F800000> : vector<2x8x16xf32>
    %128 = vector.multi_reduction <minimumf>, %127, %cst_35 [2] : vector<2x8x8x16xf32> to vector<2x8x16xf32>
    %cst_36 = arith.constant 1.000000e+05 : f32
    %129 = vector.broadcast %cst_36 : f32 to vector<2x1x8x1xf32>
    %130 = arith.mulf %129, %120 : vector<2x1x8x1xf32>
    %131 = vector.broadcast %130 : vector<2x1x8x1xf32> to vector<2x8x8x16xf32>
    %132 = arith.subf %76, %131 : vector<2x8x8x16xf32>
    %cst_37 = arith.constant dense<0xFF800000> : vector<2x8x16xf32>
    %133 = vector.multi_reduction <maximumf>, %132, %cst_37 [2] : vector<2x8x8x16xf32> to vector<2x8x16xf32>
    %134 = vector.shape_cast %123 : vector<2x8x16xf32> to vector<2x8x1x16xf32>
    %135 = vector.broadcast %134 : vector<2x8x1x16xf32> to vector<2x8x8x16xf32>
    %136 = arith.subf %76, %135 : vector<2x8x8x16xf32>
    %137 = arith.mulf %136, %136 : vector<2x8x8x16xf32>
    %138 = vector.broadcast %3 : vector<2x1x8x1xf32> to vector<2x8x8x16xf32>
    %139 = arith.mulf %137, %138 : vector<2x8x8x16xf32>
    %cst_38 = arith.constant dense<0.000000e+00> : vector<2x8x16xf32>
    %140 = vector.multi_reduction <add>, %139, %cst_38 [2] : vector<2x8x8x16xf32> to vector<2x8x16xf32>
    %141 = vector.broadcast %118 : vector<2x1x1xf32> to vector<2x8x16xf32>
    %142 = arith.mulf %140, %141 : vector<2x8x16xf32>
    %143 = tpu.concatenate %123, %128, %133, %142 in 2 : vector<2x8x16xf32>, vector<2x8x16xf32>, vector<2x8x16xf32>, vector<2x8x16xf32> -> vector<2x8x64xf32>
    %c0_39 = arith.constant 0 : index
    %c0_40 = arith.constant 0 : index
    %c0_41 = arith.constant 0 : index
    %c0_42 = arith.constant 0 : index
    %144 = vector.load %arg2[%c0_39, %c0_40, %c0_41, %c0_42] : memref<2x8x8x16xf32, #tpu.memory_space<vmem>>, vector<2x8x8x16xf32>
    %145 = vector.shape_cast %144 : vector<2x8x8x16xf32> to vector<128x16xf32>
    %c72 = arith.constant 72 : index
    %c0_43 = arith.constant 0 : index
    %146 = vector.load %arg6[%c72, %c0_43] : memref<520x128xf32, #tpu.memory_space<vmem>>, vector<16x16xf32>
    %cst_44 = arith.constant dense<0.000000e+00> : vector<128x16xf32>
    %147 = tpu.matmul %145, %146, %cst_44 {dimension_numbers = #tpu.dot_dimension_numbers<[1], [0], [0], [1], [0, 0, 1, 1], [], []>} : vector<128x16xf32>, vector<16x16xf32>, vector<128x16xf32> -> vector<128x16xf32>
    %c464 = arith.constant 464 : index
    %c0_45 = arith.constant 0 : index
    %148 = vector.load %arg6[%c464, %c0_45] : memref<520x128xf32, #tpu.memory_space<vmem>>, vector<1x16xf32>
    %149 = vector.broadcast %148 : vector<1x16xf32> to vector<128x16xf32>
    %150 = arith.addf %147, %149 : vector<128x16xf32>
    %151 = vector.shape_cast %150 : vector<128x16xf32> to vector<2x8x8x16xf32>
    %152 = vector.shape_cast %91 : vector<2x8x16xf32> to vector<2x1x8x16xf32>
    %153 = vector.broadcast %152 : vector<2x1x8x16xf32> to vector<2x8x8x16xf32>
    %154 = arith.mulf %151, %153 : vector<2x8x8x16xf32>
    %155 = vector.shape_cast %92 : vector<2x8x16xf32> to vector<2x8x1x16xf32>
    %156 = vector.broadcast %155 : vector<2x8x1x16xf32> to vector<2x8x8x16xf32>
    %157 = arith.mulf %154, %156 : vector<2x8x8x16xf32>
    %158 = vector.broadcast %2 : vector<2x8x1x1xf32> to vector<2x8x8x16xf32>
    %159 = arith.mulf %157, %158 : vector<2x8x8x16xf32>
    %160 = vector.broadcast %3 : vector<2x1x8x1xf32> to vector<2x8x8x16xf32>
    %161 = arith.mulf %159, %160 : vector<2x8x8x16xf32>
    %162 = arith.addf %161, %110 : vector<2x8x8x16xf32>
    %163 = arith.mulf %161, %112 : vector<2x8x8x16xf32>
    %164 = arith.addf %162, %163 : vector<2x8x8x16xf32>
    %165 = vector.broadcast %2 : vector<2x8x1x1xf32> to vector<2x8x8x16xf32>
    %166 = arith.mulf %164, %165 : vector<2x8x8x16xf32>
    %167 = vector.broadcast %3 : vector<2x1x8x1xf32> to vector<2x8x8x16xf32>
    %168 = arith.mulf %166, %167 : vector<2x8x8x16xf32>
    %169 = vector.shape_cast %100 : vector<2x16xf32> to vector<2x1x1x16xf32>
    %170 = vector.broadcast %169 : vector<2x1x1x16xf32> to vector<2x8x8x16xf32>
    %171 = arith.addf %168, %170 : vector<2x8x8x16xf32>
    %172 = vector.shape_cast %99 : vector<2x16xf32> to vector<2x1x1x16xf32>
    %173 = vector.broadcast %172 : vector<2x1x1x16xf32> to vector<2x8x8x16xf32>
    %174 = arith.mulf %168, %173 : vector<2x8x8x16xf32>
    %175 = arith.addf %171, %174 : vector<2x8x8x16xf32>
    %176 = vector.broadcast %2 : vector<2x8x1x1xf32> to vector<2x8x8x16xf32>
    %177 = arith.mulf %175, %176 : vector<2x8x8x16xf32>
    %178 = vector.broadcast %3 : vector<2x1x8x1xf32> to vector<2x8x8x16xf32>
    %179 = arith.mulf %177, %178 : vector<2x8x8x16xf32>
    %180 = vector.shape_cast %179 : vector<2x8x8x16xf32> to vector<128x16xf32>
    %c56 = arith.constant 56 : index
    %c0_46 = arith.constant 0 : index
    %181 = vector.load %arg6[%c56, %c0_46] : memref<520x128xf32, #tpu.memory_space<vmem>>, vector<16x20xf32>
    %cst_47 = arith.constant dense<0.000000e+00> : vector<128x20xf32>
    %182 = tpu.matmul %180, %181, %cst_47 {dimension_numbers = #tpu.dot_dimension_numbers<[1], [0], [0], [1], [0, 0, 1, 1], [], []>} : vector<128x16xf32>, vector<16x20xf32>, vector<128x20xf32> -> vector<128x20xf32>
    %c456 = arith.constant 456 : index
    %c0_48 = arith.constant 0 : index
    %183 = vector.load %arg6[%c456, %c0_48] : memref<520x128xf32, #tpu.memory_space<vmem>>, vector<1x20xf32>
    %184 = vector.broadcast %183 : vector<1x20xf32> to vector<128x20xf32>
    %185 = arith.addf %182, %184 : vector<128x20xf32>
    %186 = vector.extract_strided_slice %185 {offsets = [0, 0], sizes = [128, 16], strides = [1, 1]} : vector<128x20xf32> to vector<128x16xf32>
    %187 = vector.shape_cast %186 : vector<128x16xf32> to vector<2x8x8x16xf32>
    %188 = vector.broadcast %2 : vector<2x8x1x1xf32> to vector<2x8x8x16xf32>
    %189 = arith.mulf %187, %188 : vector<2x8x8x16xf32>
    %190 = vector.broadcast %3 : vector<2x1x8x1xf32> to vector<2x8x8x16xf32>
    %191 = arith.mulf %189, %190 : vector<2x8x8x16xf32>
    %192 = vector.extract_strided_slice %185 {offsets = [0, 16], sizes = [128, 4], strides = [1, 1]} : vector<128x20xf32> to vector<128x4xf32>
    %193 = vector.shape_cast %192 : vector<128x4xf32> to vector<2x8x8x4xf32>
    %cst_49 = arith.constant dense<0.000000e+00> : vector<2x8x16xf32>
    %194 = vector.multi_reduction <add>, %179, %cst_49 [2] : vector<2x8x8x16xf32> to vector<2x8x16xf32>
    %195 = vector.broadcast %118 : vector<2x1x1xf32> to vector<2x8x16xf32>
    %196 = arith.mulf %194, %195 : vector<2x8x16xf32>
    %cst_50 = arith.constant 1.000000e+05 : f32
    %197 = vector.broadcast %cst_50 : f32 to vector<2x1x8x1xf32>
    %198 = arith.mulf %197, %120 : vector<2x1x8x1xf32>
    %199 = vector.broadcast %198 : vector<2x1x8x1xf32> to vector<2x8x8x16xf32>
    %200 = arith.addf %179, %199 : vector<2x8x8x16xf32>
    %cst_51 = arith.constant dense<0x7F800000> : vector<2x8x16xf32>
    %201 = vector.multi_reduction <minimumf>, %200, %cst_51 [2] : vector<2x8x8x16xf32> to vector<2x8x16xf32>
    %cst_52 = arith.constant 1.000000e+05 : f32
    %202 = vector.broadcast %cst_52 : f32 to vector<2x1x8x1xf32>
    %203 = arith.mulf %202, %120 : vector<2x1x8x1xf32>
    %204 = vector.broadcast %203 : vector<2x1x8x1xf32> to vector<2x8x8x16xf32>
    %205 = arith.subf %179, %204 : vector<2x8x8x16xf32>
    %cst_53 = arith.constant dense<0xFF800000> : vector<2x8x16xf32>
    %206 = vector.multi_reduction <maximumf>, %205, %cst_53 [2] : vector<2x8x8x16xf32> to vector<2x8x16xf32>
    %207 = vector.shape_cast %196 : vector<2x8x16xf32> to vector<2x8x1x16xf32>
    %208 = vector.broadcast %207 : vector<2x8x1x16xf32> to vector<2x8x8x16xf32>
    %209 = arith.subf %179, %208 : vector<2x8x8x16xf32>
    %210 = arith.mulf %209, %209 : vector<2x8x8x16xf32>
    %211 = vector.broadcast %3 : vector<2x1x8x1xf32> to vector<2x8x8x16xf32>
    %212 = arith.mulf %210, %211 : vector<2x8x8x16xf32>
    %cst_54 = arith.constant dense<0.000000e+00> : vector<2x8x16xf32>
    %213 = vector.multi_reduction <add>, %212, %cst_54 [2] : vector<2x8x8x16xf32> to vector<2x8x16xf32>
    %214 = vector.broadcast %118 : vector<2x1x1xf32> to vector<2x8x16xf32>
    %215 = arith.mulf %213, %214 : vector<2x8x16xf32>
    %216 = tpu.concatenate %196, %201, %206, %215 in 2 : vector<2x8x16xf32>, vector<2x8x16xf32>, vector<2x8x16xf32>, vector<2x8x16xf32> -> vector<2x8x64xf32>
    %217 = tpu.concatenate %216, %143 in 2 : vector<2x8x64xf32>, vector<2x8x64xf32> -> vector<2x8x128xf32>
    %218 = vector.shape_cast %217 : vector<2x8x128xf32> to vector<16x128xf32>
    %c280 = arith.constant 280 : index
    %c0_55 = arith.constant 0 : index
    %219 = vector.load %arg6[%c280, %c0_55] : memref<520x128xf32, #tpu.memory_space<vmem>>, vector<128x64xf32>
    %cst_56 = arith.constant dense<0.000000e+00> : vector<16x64xf32>
    %220 = tpu.matmul %218, %219, %cst_56 {dimension_numbers = #tpu.dot_dimension_numbers<[1], [0], [0], [1], [0, 0, 1, 1], [], []>} : vector<16x128xf32>, vector<128x64xf32>, vector<16x64xf32> -> vector<16x64xf32>
    %c488 = arith.constant 488 : index
    %c0_57 = arith.constant 0 : index
    %221 = vector.load %arg6[%c488, %c0_57] : memref<520x128xf32, #tpu.memory_space<vmem>>, vector<1x64xf32>
    %222 = vector.broadcast %221 : vector<1x64xf32> to vector<16x64xf32>
    %223 = arith.addf %220, %222 : vector<16x64xf32>
    %224 = vector.extract_strided_slice %223 {offsets = [0, 0], sizes = [16, 32], strides = [1, 1]} : vector<16x64xf32> to vector<16x32xf32>
    %225 = vector.extract_strided_slice %223 {offsets = [0, 32], sizes = [16, 32], strides = [1, 1]} : vector<16x64xf32> to vector<16x32xf32>
    %226 = vector.shape_cast %86 : vector<16x32xf32> to vector<2x8x32xf32>
    %227 = vector.shape_cast %226 : vector<2x8x32xf32> to vector<2x8x1x32xf32>
    %228 = vector.shape_cast %87 : vector<16x32xf32> to vector<2x8x32xf32>
    %229 = vector.shape_cast %228 : vector<2x8x32xf32> to vector<2x1x8x32xf32>
    %230 = vector.broadcast %227 : vector<2x8x1x32xf32> to vector<2x8x8x32xf32>
    %231 = vector.broadcast %229 : vector<2x1x8x32xf32> to vector<2x8x8x32xf32>
    %232 = arith.mulf %230, %231 : vector<2x8x8x32xf32>
    %cst_58 = arith.constant 2.500000e-01 : f32
    %233 = vector.broadcast %cst_58 : f32 to vector<2x8x8x32xf32>
    %234 = arith.mulf %232, %233 : vector<2x8x8x32xf32>
    %235 = vector.shape_cast %234 : vector<2x8x8x32xf32> to vector<128x32xf32>
    %c88 = arith.constant 88 : index
    %c0_59 = arith.constant 0 : index
    %236 = vector.load %arg6[%c88, %c0_59] : memref<520x128xf32, #tpu.memory_space<vmem>>, vector<32x4xf32>
    %cst_60 = arith.constant dense<0.000000e+00> : vector<128x4xf32>
    %237 = tpu.matmul %235, %236, %cst_60 {dimension_numbers = #tpu.dot_dimension_numbers<[1], [0], [0], [1], [0, 0, 1, 1], [], []>} : vector<128x32xf32>, vector<32x4xf32>, vector<128x4xf32> -> vector<128x4xf32>
    %238 = vector.shape_cast %237 : vector<128x4xf32> to vector<2x8x8x4xf32>
    %239 = vector.broadcast %2 : vector<2x8x1x1xf32> to vector<2x8x8x4xf32>
    %240 = arith.mulf %238, %239 : vector<2x8x8x4xf32>
    %241 = vector.broadcast %3 : vector<2x1x8x1xf32> to vector<2x8x8x4xf32>
    %242 = arith.mulf %240, %241 : vector<2x8x8x4xf32>
    %243 = arith.mulf %193, %242 : vector<2x8x8x4xf32>
    %244 = arith.addf %242, %243 : vector<2x8x8x4xf32>
    %245 = arith.mulf %114, %244 : vector<2x8x8x4xf32>
    %246 = arith.addf %244, %245 : vector<2x8x8x4xf32>
    %247 = vector.broadcast %2 : vector<2x8x1x1xf32> to vector<2x8x8x4xf32>
    %248 = arith.mulf %246, %247 : vector<2x8x8x4xf32>
    %249 = vector.broadcast %3 : vector<2x1x8x1xf32> to vector<2x8x8x4xf32>
    %250 = arith.mulf %248, %249 : vector<2x8x8x4xf32>
    %cst_61 = arith.constant 0.000000e+00 : f32
    %251 = vector.broadcast %cst_61 : f32 to vector<2x1x8x1xf32>
    %252 = arith.cmpf ogt, %3, %251 : vector<2x1x8x1xf32>
    %cst_62 = arith.constant -1.000000e+30 : f32
    %253 = vector.shape_cast %252 : vector<2x1x8x1xi1> to vector<2x1x8x1xi1>
    %254 = vector.broadcast %253 : vector<2x1x8x1xi1> to vector<2x8x8x4xi1>
    %255 = vector.broadcast %cst_62 : f32 to vector<2x8x8x4xf32>
    %256 = arith.select %254, %250, %255 : vector<2x8x8x4xi1>, vector<2x8x8x4xf32>
    %cst_63 = arith.constant dense<0xFF800000> : vector<2x8x4xf32>
    %257 = vector.multi_reduction <maximumf>, %256, %cst_63 [2] : vector<2x8x8x4xf32> to vector<2x8x4xf32>
    %258 = vector.shape_cast %257 : vector<2x8x4xf32> to vector<2x8x1x4xf32>
    %259 = vector.broadcast %258 : vector<2x8x1x4xf32> to vector<2x8x8x4xf32>
    %260 = arith.subf %256, %259 : vector<2x8x8x4xf32>
    %261 = math.exp %260 : vector<2x8x8x4xf32>
    %cst_64 = arith.constant dense<0.000000e+00> : vector<2x8x4xf32>
    %262 = vector.multi_reduction <add>, %261, %cst_64 [2] : vector<2x8x8x4xf32> to vector<2x8x4xf32>
    %263 = vector.shape_cast %262 : vector<2x8x4xf32> to vector<2x8x1x4xf32>
    %264 = tpu.reciprocal %263 {approx = true} : vector<2x8x1x4xf32> -> vector<2x8x1x4xf32>
    %265 = vector.broadcast %264 : vector<2x8x1x4xf32> to vector<2x8x8x4xf32>
    %266 = arith.mulf %261, %265 : vector<2x8x8x4xf32>
    %267 = vector.shape_cast %88 : vector<16x32xf32> to vector<2x8x32xf32>
    %268 = vector.extract_strided_slice %266 {offsets = [0, 0, 0, 0], sizes = [2, 8, 8, 1], strides = [1, 1, 1, 1]} : vector<2x8x8x4xf32> to vector<2x8x8x1xf32>
    %269 = vector.shape_cast %268 : vector<2x8x8x1xf32> to vector<2x8x8xf32>
    "tpu.trace_start"() <{level = 10 : i32, message = "bij,bjd->bid"}> : () -> ()
    %cst_65 = arith.constant dense<0.000000e+00> : vector<2x8x32xf32>
    %270 = tpu.matmul %269, %267, %cst_65 {dimension_numbers = #tpu.dot_dimension_numbers<[2], [1], [1], [2], [0, 0, 0, 1, 1, 2], [0], [0]>} : vector<2x8x8xf32>, vector<2x8x32xf32>, vector<2x8x32xf32> -> vector<2x8x32xf32>
    "tpu.trace_stop"() : () -> ()
    %271 = vector.extract_strided_slice %266 {offsets = [0, 0, 0, 1], sizes = [2, 8, 8, 1], strides = [1, 1, 1, 1]} : vector<2x8x8x4xf32> to vector<2x8x8x1xf32>
    %272 = vector.shape_cast %271 : vector<2x8x8x1xf32> to vector<2x8x8xf32>
    "tpu.trace_start"() <{level = 10 : i32, message = "bij,bjd->bid"}> : () -> ()
    %cst_66 = arith.constant dense<0.000000e+00> : vector<2x8x32xf32>
    %273 = tpu.matmul %272, %267, %cst_66 {dimension_numbers = #tpu.dot_dimension_numbers<[2], [1], [1], [2], [0, 0, 0, 1, 1, 2], [0], [0]>} : vector<2x8x8xf32>, vector<2x8x32xf32>, vector<2x8x32xf32> -> vector<2x8x32xf32>
    "tpu.trace_stop"() : () -> ()
    %274 = vector.extract_strided_slice %266 {offsets = [0, 0, 0, 2], sizes = [2, 8, 8, 1], strides = [1, 1, 1, 1]} : vector<2x8x8x4xf32> to vector<2x8x8x1xf32>
    %275 = vector.shape_cast %274 : vector<2x8x8x1xf32> to vector<2x8x8xf32>
    "tpu.trace_start"() <{level = 10 : i32, message = "bij,bjd->bid"}> : () -> ()
    %cst_67 = arith.constant dense<0.000000e+00> : vector<2x8x32xf32>
    %276 = tpu.matmul %275, %267, %cst_67 {dimension_numbers = #tpu.dot_dimension_numbers<[2], [1], [1], [2], [0, 0, 0, 1, 1, 2], [0], [0]>} : vector<2x8x8xf32>, vector<2x8x32xf32>, vector<2x8x32xf32> -> vector<2x8x32xf32>
    "tpu.trace_stop"() : () -> ()
    %277 = vector.extract_strided_slice %266 {offsets = [0, 0, 0, 3], sizes = [2, 8, 8, 1], strides = [1, 1, 1, 1]} : vector<2x8x8x4xf32> to vector<2x8x8x1xf32>
    %278 = vector.shape_cast %277 : vector<2x8x8x1xf32> to vector<2x8x8xf32>
    "tpu.trace_start"() <{level = 10 : i32, message = "bij,bjd->bid"}> : () -> ()
    %cst_68 = arith.constant dense<0.000000e+00> : vector<2x8x32xf32>
    %279 = tpu.matmul %278, %267, %cst_68 {dimension_numbers = #tpu.dot_dimension_numbers<[2], [1], [1], [2], [0, 0, 0, 1, 1, 2], [0], [0]>} : vector<2x8x8xf32>, vector<2x8x32xf32>, vector<2x8x32xf32> -> vector<2x8x32xf32>
    "tpu.trace_stop"() : () -> ()
    %280 = tpu.concatenate %270, %273, %276, %279 in 2 : vector<2x8x32xf32>, vector<2x8x32xf32>, vector<2x8x32xf32>, vector<2x8x32xf32> -> vector<2x8x128xf32>
    %281 = vector.shape_cast %280 : vector<2x8x128xf32> to vector<16x128xf32>
    %c120 = arith.constant 120 : index
    %c0_69 = arith.constant 0 : index
    %282 = vector.load %arg6[%c120, %c0_69] : memref<520x128xf32, #tpu.memory_space<vmem>>, vector<128x32xf32>
    %cst_70 = arith.constant dense<0.000000e+00> : vector<16x32xf32>
    %283 = tpu.matmul %281, %282, %cst_70 {dimension_numbers = #tpu.dot_dimension_numbers<[1], [0], [0], [1], [0, 0, 1, 1], [], []>} : vector<16x128xf32>, vector<128x32xf32>, vector<16x32xf32> -> vector<16x32xf32>
    %c472 = arith.constant 472 : index
    %c0_71 = arith.constant 0 : index
    %284 = vector.load %arg6[%c472, %c0_71] : memref<520x128xf32, #tpu.memory_space<vmem>>, vector<1x32xf32>
    %285 = vector.broadcast %284 : vector<1x32xf32> to vector<16x32xf32>
    %286 = arith.addf %283, %285 : vector<16x32xf32>
    %287 = vector.broadcast %1 : vector<16x1xf32> to vector<16x32xf32>
    %288 = arith.mulf %286, %287 : vector<16x32xf32>
    %289 = arith.mulf %224, %288 : vector<16x32xf32>
    %290 = arith.addf %288, %289 : vector<16x32xf32>
    %291 = arith.mulf %225, %290 : vector<16x32xf32>
    %292 = arith.addf %290, %291 : vector<16x32xf32>
    %293 = vector.shape_cast %292 : vector<16x32xf32> to vector<2x8x32xf32>
    %294 = vector.shape_cast %101 : vector<2x32xf32> to vector<2x1x32xf32>
    %cst_72 = arith.constant 1.000000e+00 : f32
    %295 = vector.broadcast %cst_72 : f32 to vector<2x1x32xf32>
    %296 = arith.addf %294, %295 : vector<2x1x32xf32>
    %297 = vector.broadcast %296 : vector<2x1x32xf32> to vector<2x8x32xf32>
    %298 = arith.mulf %293, %297 : vector<2x8x32xf32>
    %299 = vector.shape_cast %102 : vector<2x32xf32> to vector<2x1x32xf32>
    %300 = vector.broadcast %299 : vector<2x1x32xf32> to vector<2x8x32xf32>
    %301 = arith.addf %298, %300 : vector<2x8x32xf32>
    %302 = vector.shape_cast %301 : vector<2x8x32xf32> to vector<16x32xf32>
    %c248 = arith.constant 248 : index
    %c0_73 = arith.constant 0 : index
    %303 = vector.load %arg6[%c248, %c0_73] : memref<520x128xf32, #tpu.memory_space<vmem>>, vector<32x32xf32>
    %cst_74 = arith.constant dense<0.000000e+00> : vector<16x32xf32>
    %304 = tpu.matmul %302, %303, %cst_74 {dimension_numbers = #tpu.dot_dimension_numbers<[1], [0], [0], [1], [0, 0, 1, 1], [], []>} : vector<16x32xf32>, vector<32x32xf32>, vector<16x32xf32> -> vector<16x32xf32>
    %c480 = arith.constant 480 : index
    %c0_75 = arith.constant 0 : index
    %305 = vector.load %arg6[%c480, %c0_75] : memref<520x128xf32, #tpu.memory_space<vmem>>, vector<1x32xf32>
    %306 = vector.broadcast %305 : vector<1x32xf32> to vector<16x32xf32>
    %307 = arith.addf %304, %306 : vector<16x32xf32>
    %308 = vector.broadcast %1 : vector<16x1xf32> to vector<16x32xf32>
    %309 = arith.mulf %307, %308 : vector<16x32xf32>
    %310 = vector.shape_cast %309 : vector<16x32xf32> to vector<2x8x32xf32>
    %c0_76 = arith.constant 0 : index
    %c0_77 = arith.constant 0 : index
    %c0_78 = arith.constant 0 : index
    %311 = vector.load %arg7[%c0_76, %c0_77, %c0_78] : memref<2x8x32xf32, #tpu.memory_space<vmem>>, vector<2x8x32xf32>
    tpu.vector_store %arg7[%c0_76, %c0_77, %c0_78], %310 {strides = array<i32>} : memref<2x8x32xf32, #tpu.memory_space<vmem>>, vector<2x8x32xf32>,
    %c0_79 = arith.constant 0 : index
    %c0_80 = arith.constant 0 : index
    %c0_81 = arith.constant 0 : index
    %c0_82 = arith.constant 0 : index
    %312 = vector.load %arg8[%c0_79, %c0_80, %c0_81, %c0_82] : memref<2x8x8x16xf32, #tpu.memory_space<vmem>>, vector<2x8x8x16xf32>
    tpu.vector_store %arg8[%c0_79, %c0_80, %c0_81, %c0_82], %191 {strides = array<i32>} : memref<2x8x8x16xf32, #tpu.memory_space<vmem>>, vector<2x8x8x16xf32>,
    return
  }
  func.func @transform_0(%arg0: i32) -> (i32, i32, i32) {
    %c0_i32 = arith.constant 0 : i32
    %c0_i32_0 = arith.constant 0 : i32
    %c0_i32_1 = arith.constant 0 : i32
    return %arg0, %c0_i32, %c0_i32_0 : i32, i32, i32
  }
  func.func @transform_1(%arg0: i32) -> (i32, i32, i32, i32) {
    %c0_i32 = arith.constant 0 : i32
    %c0_i32_0 = arith.constant 0 : i32
    %c0_i32_1 = arith.constant 0 : i32
    %c0_i32_2 = arith.constant 0 : i32
    return %arg0, %c0_i32, %c0_i32_0, %c0_i32_1 : i32, i32, i32, i32
  }
  func.func @transform_2(%arg0: i32) -> (i32, i32) {
    %c0_i32 = arith.constant 0 : i32
    %c0_i32_0 = arith.constant 0 : i32
    return %arg0, %c0_i32 : i32, i32
  }
  func.func @transform_3(%arg0: i32) -> (i32, i32, i32) {
    %c0_i32 = arith.constant 0 : i32
    %c0_i32_0 = arith.constant 0 : i32
    %c0_i32_1 = arith.constant 0 : i32
    return %arg0, %c0_i32, %c0_i32_0 : i32, i32, i32
  }
  func.func @transform_4(%arg0: i32) -> (i32, i32, i32) {
    %c0_i32 = arith.constant 0 : i32
    %c0_i32_0 = arith.constant 0 : i32
    %c0_i32_1 = arith.constant 0 : i32
    return %arg0, %c0_i32, %c0_i32_0 : i32, i32, i32
  }
  func.func @transform_5(%arg0: i32) -> (i32, i32) {
    %c0_i32 = arith.constant 0 : i32
    %c0_i32_0 = arith.constant 0 : i32
    %c0_i32_1 = arith.constant 0 : i32
    return %c0_i32, %c0_i32_0 : i32, i32
  }
  func.func @transform_6(%arg0: i32) -> (i32, i32, i32) {
    %c0_i32 = arith.constant 0 : i32
    %c0_i32_0 = arith.constant 0 : i32
    %c0_i32_1 = arith.constant 0 : i32
    return %arg0, %c0_i32, %c0_i32_0 : i32, i32, i32
  }
  func.func @transform_7(%arg0: i32) -> (i32, i32, i32, i32) {
    %c0_i32 = arith.constant 0 : i32
    %c0_i32_0 = arith.constant 0 : i32
    %c0_i32_1 = arith.constant 0 : i32
    %c0_i32_2 = arith.constant 0 : i32
    return %arg0, %c0_i32, %c0_i32_0, %c0_i32_1 : i32, i32, i32, i32
  }
}

</mosaic_0001>

<bundles_post_ra>
// kernel: tpu_custom_call.1
= control target key start
LH: loop header
LB: loop body
LE: loop exit
PB: predicated region body
PF: predicated region fallthrough
CT: control target
= control target key end

     0   :  { %13 = vsyncpa [#allocation3], 0  ;;  %s11026_s0 = inlined_call_operand.vmem [shape: f32[2,8,32], index: 0, kind: input, shape index: {}]   ;;  %s11027_s1 = inlined_call_operand.hbm [shape: f32[2,8,8,16], index: 1, kind: input, shape index: {}]   ;;  %s11028_s2 = inlined_call_operand.vmem [shape: f32[2,8], index: 2, kind: input, shape index: {}]   ;;  %s11029_s3 = inlined_call_operand.vmem [shape: f32[2,8,3], index: 3, kind: input, shape index: {}]   ;;  %s11030_s4 = inlined_call_operand.vmem [shape: f32[2,8,1], index: 4, kind: input, shape index: {}]   ;;  %s11031_s5 = inlined_call_operand.hbm [shape: f32[520,128], index: 5, kind: input, shape index: {}]   ;;  %s11032_s6 = inlined_call_operand.hbm [shape: f32[2,8,32], index: 6, kind: output, shape index: {0}]   ;;  %s11033_s7 = inlined_call_operand.hbm [shape: f32[2,8,8,16], index: 7, kind: output, shape index: {1}]  }
   0x1   :  { %14 = vsyncpa [#allocation6], 0 }
   0x2   :  { %15 = vsyncpa [#allocation4], 0 }
   0x3   :  { %16 = vsyncpa [#allocation9], 0  ;;  %s7567_s24 = smov [#allocation2]   ;;  %s7471_s28 = scalar_lea.hbm %s11027_s1, 2048 }
   0x4   :  { %s24_s25 = sshll.u32 %s7567_s24, 4  ;;  %p7472_p0 = scmp.ne.s32.totalorder %s11027_s1, %s7471_s28  ;;  %s25_s25 = int_to_ptr.vmem [resolvable:$true] %s24_s25 }
   0x5   :  { %p7475_p1 = scmp.lt.u32.totalorder %s7471_s28, %s11027_s1 }
   0x7   :  { %p7477_p2 = pnand %p7475_p1, %p7472_p0 }
   0x9   :  { %7480 = shalt.err (!%p7477_p2)
}
   0xa   :  { %s7481_s10 = scalar_lea.vmem %s25_s25, 2048  ;;  %p7486_p4 = scmp.lt.s32.totalorder %s25_s25, %s25_s25 }
   0xb   :  { %p7482_p3 = scmp.ne.s32.totalorder %s25_s25, %s7481_s10  ;;  %p7487_p5 = scmp.lt.s32.totalorder %s7481_s10, %s7481_s10 }
   0xd   :  { %p7488_p6 = por %p7487_p5, %p7486_p4 }
   0xf   :  { %p7489_p7 = pnand %p7488_p6, %p7482_p3 }
  0x11   :  { %7492 = shalt.err (!%p7489_p7)
}
  0x12   :  { %s7568_s11 = smov 128   ;;  %s7569_s12 = smov 8  }
  0x13   :  { %30 = dma.hbm_to_vmem [thread:$0]  %s11027_s1, 2048, %s25_s25, [#allocation3], %s7568_s11, %s7568_s11, %s7569_s12  }
  0x14   :  { %s7570_s15 = smov [#allocation5]   ;;  %s7493_s19 = scalar_lea.hbm %s11031_s5, 8320 }
  0x15   :  { %s42_s16 = sshll.u32 %s7570_s15, 4  ;;  %p7494_p8 = scmp.ne.s32.totalorder %s11031_s5, %s7493_s19  ;;  %s43_s16 = int_to_ptr.vmem [resolvable:$true] %s42_s16 }
  0x16   :  { %p7497_p9 = scmp.lt.u32.totalorder %s7493_s19, %s11031_s5 }
  0x18   :  { %p7499_p10 = pnand %p7497_p9, %p7494_p8 }
  0x1a   :  { %7502 = shalt.err (!%p7499_p10)
}
  0x1b   :  { %s7503_s24 = scalar_lea.vmem %s43_s16, 8320  ;;  %p7508_p12 = scmp.lt.s32.totalorder %s43_s16, %s43_s16 }
  0x1c   :  { %p7504_p11 = scmp.ne.s32.totalorder %s43_s16, %s7503_s24  ;;  %p7509_p13 = scmp.lt.s32.totalorder %s7503_s24, %s7503_s24 }
  0x1e   :  { %p7510_p0 = por %p7509_p13, %p7508_p12 }
  0x20   :  { %p7511_p1 = pnand %p7510_p0, %p7504_p11 }
  0x22   :  { %7514 = shalt.err (!%p7511_p1)
}
  0x23   :  { %48 = dma.hbm_to_vmem [thread:$0]  %s11031_s5, 8320, %s43_s16, [#allocation6], %s7568_s11, %s7568_s11, %s7569_s12  }
  0x24   :  { %7559 = dma.done.wait [#allocation3], 2048  }
  0x25   :  { %7560 = vsyncadd [#allocation3], 4294965248 }
  0x26   :  { %7561 = dma.done.wait [#allocation6], 8320  }
  0x27   :  { %7562 = vsyncadd [#allocation6], 4294958976  ;;  %v11034_v0 = vlaneseq  ;;  %v11035_v1 = vmov 0   ;;  %v7572_v2 = vmov 1966171168   ;;  %v7667_v7 = vld [vmem:[%s11030_s4] sm:$0xff] }
  0x28   :  { %7249 = vset.pattern.permute.xlu0 %v11035_v1  ;;  %v61_v3 = vunpack.c.l.s4 %v7572_v2  ;;  %7250 = vset.pattern.permute.xlu1 %v11035_v1  ;;  %v1310_v8 = vld [vmem:[#allocation5] sm:$0xff]  ;;  %v1311_v9 = vld [vmem:[#allocation5 + $0x8] sm:$0xff]  ;;  %vm1319_vm0 = vcmask 261120   ;;  %v1312_v11 = vld [vmem:[#allocation5 + $0x10] sm:$0xff]  ;;  %v59_v14 = vcombine.high %v7667_v7, %v7667_v7  ;;  %vm1491_vm1 = vcmask 130048   ;;  %s7576_s16 = smov 16  }
  0x29   :  { %v7659_v4 = vshrl.u32 %v11034_v0, 7  ;;  %160 = vperm.xlu0 %7249, %v7667_v7   ;;  %v7130_v10 = vpack.c.bf16 %v1311_v9, %v1310_v8  ;;  %v1313_v12 = vld [vmem:[#allocation5 + $0x18] sm:$0xff]  ;;  %v7677_v15 = vld [vmem:[%s11030_s4 + $0x8] sm:$0xff]  ;;  %v1308_v17 = vld [vmem:[%s11026_s0] sm:$0xff]  ;;  %vm171_vm2 = vcmask 23552   ;;  %vm1685_vm7 = vcmask 7168  }
  0x2a   :  { %v62_v5 = vunpack.c.0.s8 %v61_v3  ;;  %v7134_v16 = vpack.c.bf16 %v1313_v12, %v1312_v11  ;;  %6885 = vmatprep.mubr.msk.f32.mxu1 %vm1319_vm0, %v1308_v17  ;;  %v1309_v28 = vld [vmem:[%s11026_s0 + $0x8] sm:$0xff]  ;;  %v108_v43 = vcombine.high %v7677_v15, %v7677_v15  ;;  %v2459_v54 = vld [vmem:[#allocation5 + $0x50] sm:$0xff]  ;;  %v2442_v55 = vld [vmem:[#allocation2] sm:$0xff]  ;;  %vm1410_vm8 = vcmask 64512   ;;  %s7577_s17 = smov 112   ;;  %s7578_s18 = smov 48  }
  0x2b   :  { %11179 = vst [vmem:[#allocation14_spill] sm:$0xff] %v7659_v4  ;;  %7131 = vmatprep.subr.bf16.mxu1 %v7130_v10  ;;  %v7683_v19 = vsub.s32 0, %v7659_v4  ;;  %v2458_v53 = vld [vmem:[#allocation5 + $0x48] sm:$0xff]  ;;  %6925 = vmatprep.mubr.msk.f32.mxu0 %vm1491_vm1, %v2442_v55  ;;  %v2444_v58 = vld [vmem:[#allocation2 + $0x10] sm:$0xff]  ;;  %v2445_v59 = vld [vmem:[#allocation2 + $0x18] sm:$0xff]  ;;  %vm7574_vm9 = vmmov 0  }
  0x2c   :  { %v7662_v6 = vsub.s32 %v62_v5, %v7659_v4  ;;  %7133 = vmatpush3.bf16.msra.mxu1 %v7130_v10  ;;  %v7142_v56 = vpack.c.bf16 %v2459_v54, %v2458_v53  ;;  %v2443_v57 = vld [vmem:[#allocation2 + $0x8] sm:$0xff]  ;;  %v157_v60 = vld [vmem:[%s11029_s3] sm:$0xff]  ;;  %s7579_s19 = smov 64   ;;  %s7580_s20 = smov 96  }
  0x2d   :  { %11180 = vst [vmem:[#allocation15_spill] sm:$0xff] %v7683_v19  ;;  %164 = vperm.xlu0 %7249, %v7677_v15   ;;  %7135 = vmatprep.subr.bf16.mxu1 %v7134_v16  ;;  %v158_v63 = vld [vmem:[%s11029_s3 + $0x8] sm:$0xff] }
  0x2e   :  { %v66_v13 = vrot.slane %v7667_v7, %v7662_v6  ;;  %v73_v21 = vrot.slane %v59_v14, %v7662_v6  ;;  %v115_v32 = vrot.slane %v7677_v15, %v7662_v6  ;;  %v7714_v49 = vrot.slane %v108_v43, %v7662_v6  ;;  %7143 = vmatprep.subr.bf16.mxu0 %v7142_v56 }
  0x2f   :  { %7145 = vmatpush3.bf16.msra.mxu0 %v7142_v56 }
  0x30   :  { %v74_v18 = vcombine.high %v66_v13, %v66_v13  ;;  %v82_v20 = vrot.slane %v66_v13, %v7662_v6  ;;  %v89_v25 = vrot.slane %v73_v21, %v7662_v6  ;;  %v75_v26 = vcombine.high %v73_v21, %v73_v21  ;;  %7137 = vmatpush3.bf16.msra.mxu1 %v7134_v16 }
  0x31   :  { %v123_v35 = vcombine.high %v115_v32, %v115_v32  ;;  %v131_v39 = vrot.slane %v115_v32, %v7662_v6  ;;  %v7719_v51 = vrot.slane %v7714_v49, %v7662_v6 }
  0x32   :  { %v96_v22 = vrot.slane %v74_v18, %v7662_v6  ;;  %v104_v23 = vcombine.high %v82_v20, %v82_v20  ;;  %v1151_v27 = vrot.slane %v82_v20, %v7683_v19  ;;  %v105_v31 = vcombine.high %v89_v25, %v89_v25  ;;  %6926 = vmatmul.mubr.msk.f32.vlgmr.msra.gmra.mrb[0].mxu0 %vm1491_vm1, %v2443_v57 }
  0x33   :  { %6886 = vmatmul.mubr.msk.f32.vlgmr.msra.gmra.mrb[0].mxu1 %vm1319_vm0, %v1309_v28  ;;  %v103_v34 = vrot.slane %v75_v26, %v7662_v6  ;;  %v1167_v36 = vrot.slane %v89_v25, %v7683_v19  ;;  %v145_v42 = vrot.slane %v123_v35, %v7662_v6  ;;  %v1183_v44 = vrot.slane %v131_v39, %v7683_v19 }
  0x34   :  { %v1155_v24 = vrot.slane %v96_v22, %v7683_v19  ;;  %v106_v29 = vcombine.high %v96_v22, %v96_v22  ;;  %v1159_v30 = vrot.slane %v104_v23, %v7683_v19  ;;  %1213 = vperm.xlu1 %7250, %v1151_v27   ;;  %v1175_v37 = vrot.slane %v105_v31, %v7683_v19 }
  0x35   :  { %v107_v38 = vcombine.high %v103_v34, %v103_v34  ;;  %v1171_v40 = vrot.slane %v103_v34, %v7683_v19  ;;  %v1187_v45 = vrot.slane %v145_v42, %v7683_v19  ;;  %v153_v46 = vcombine.high %v131_v39, %v131_v39  ;;  %6928 = vmatprep.mubr.msk.f32.mxu0 %vm1491_vm1, %v2444_v58 }
  0x36   :  { %1217 = vperm.xlu0 %7249, %v1155_v24   ;;  %v1163_v33 = vrot.slane %v106_v29, %v7683_v19  ;;  %v155_v48 = vcombine.high %v145_v42, %v145_v42  ;;  %v1199_v52 = vrot.slane %v7719_v51, %v7683_v19  ;;  %6929 = vmatmul.mubr.msk.f32.gmra.mrb[2].mxu0 %vm1491_vm1, %v2445_v59 }
  0x37   :  { %v1179_v41 = vrot.slane %v107_v38, %v7683_v19  ;;  %v1191_v47 = vrot.slane %v153_v46, %v7683_v19 }
  0x38   :  { %1225 = vperm.xlu1 %7250, %v1163_v33   ;;  %v1195_v50 = vrot.slane %v155_v48, %v7683_v19  ;;  %v124_v33 = vcombine.high %v7714_v49, %v7714_v49 }
  0x3a   :  { %1221 = vperm.xlu0 %7249, %v1159_v30  }
  0x3c   :  { %1237 = vperm.xlu1 %7250, %v1175_v37  }
  0x3e   :  { %1229 = vperm.xlu0 %7249, %v1167_v36  }
  0x40   :  { %1241 = vperm.xlu1 %7250, %v1179_v41  }
  0x42   :  { %1233 = vperm.xlu0 %7249, %v1171_v40   ;;  %v7780_v40 = vrot.slane %v124_v33, %v7662_v6 }
  0x44   :  { %1249 = vperm.xlu1 %7250, %v1187_v45   ;;  %v1203_v46 = vrot.slane %v7780_v40, %v7683_v19 }
  0x46   :  { %1245 = vperm.xlu0 %7249, %v1183_v44  }
  0x48   :  { %1253 = vperm.xlu1 %7250, %v1191_v47  }
  0x4c   :  { %1257 = vperm.xlu1 %7250, %v1195_v50  }
  0x50   :  { %1261 = vperm.xlu1 %7250, %v1199_v52  }
  0xa8   :  { %v7730_v61 = vpop.permute.xlu0 %160 }
  0xa9   :  { %11181 = vst [vmem:[#allocation16_spill] sm:$0xff] %v7730_v61  ;;  %v7733_v62 = vmul.f32 %v7730_v61, %v157_v60 }
  0xab   :  { %v169_v2 = vmul.f32 %v7733_v62, %v7733_v62  ;;  %v7742_v3 = vrot.slane %v7733_v62, %v7662_v6 }
  0xac   :  { %v7744_v5 = vpop.permute.xlu0 %164 }
  0xad   :  { %11182 = vst [vmem:[#allocation17_spill] sm:$0xff] %v7744_v5  ;;  %v172_v8 = vsel %vm171_vm2, %v169_v2, 0.0  ;;  %v7748_v9 = vmul.f32 %v7744_v5, %v158_v63  ;;  %v7752_v10 = vrot.slane %v7742_v3, %v7662_v6  ;;  %v2446_v2 = vld [vmem:[#allocation2 + $0x20] sm:$0xff] }
  0xae   :  { %173 = vadd.xlane.f32.xlu1 %v172_v8  ;;  %6931 = vmatprep.mubr.msk.f32.mxu0 %vm1491_vm1, %v2446_v2  ;;  %v2447_v8 = vld [vmem:[#allocation2 + $0x28] sm:$0xff] }
  0xaf   :  { %v170_v11 = vmul.f32 %v7748_v9, %v7748_v9  ;;  %v301_v12 = vrot.slane %v7752_v10, %v7683_v19  ;;  %v256_v13 = vrot.slane %v7748_v9, %v7662_v6  ;;  %v249_v14 = vcombine.high %v7748_v9, %v7748_v9  ;;  %6932 = vmatmul.mubr.msk.f32.gmra.mrb[4].mxu0 %vm1491_vm1, %v2447_v8 }
  0xb1   :  { %v175_v16 = vsel %vm171_vm2, %v170_v11, 0.0  ;;  %v378_v17 = vsub.f32 %v301_v12, %v7733_v62  ;;  %v272_v18 = vrot.slane %v256_v13, %v7662_v6  ;;  %v264_v20 = vcombine.high %v256_v13, %v256_v13 }
  0xb2   :  { %176 = vadd.xlane.f32.xlu1 %v175_v16  ;;  %v263_v21 = vrot.slane %v249_v14, %v7662_v6  ;;  %v2448_v14 = vld [vmem:[#allocation2 + $0x30] sm:$0xff]  ;;  %v2449_v16 = vld [vmem:[#allocation2 + $0x38] sm:$0xff] }
  0xb3   :  { %v394_v22 = vmul.f32 %v378_v17, %v378_v17  ;;  %v333_v23 = vrot.slane %v272_v18, %v7683_v19  ;;  %v286_v24 = vrot.slane %v264_v20, %v7662_v6  ;;  %v294_v25 = vcombine.high %v272_v18, %v272_v18  ;;  %6934 = vmatprep.mubr.msk.f32.mxu0 %vm1491_vm1, %v2448_v14 }
  0xb4   :  { %v279_v26 = vrot.slane %v263_v21, %v7662_v6  ;;  %v265_v35 = vcombine.high %v263_v21, %v263_v21  ;;  %6935 = vmatmul.mubr.msk.f32.gmra.mrb[6].mxu0 %vm1491_vm1, %v2449_v16  ;;  %v215_v20 = vcombine.high %v7742_v3, %v7742_v3  ;;  %v2450_v21 = vld [vmem:[#allocation2 + $0x40] sm:$0xff]  ;;  %v245_v3 = vcombine.high %v7752_v10, %v7752_v10  ;;  %v2457_v10 = vld [vmem:[#allocation2 + $0x78] sm:$0xff] }
  0xb5   :  { %v410_v27 = vsel %vm171_vm2, %v394_v22, 0.0  ;;  %v386_v28 = vsub.f32 %v333_v23, %v7748_v9  ;;  %v337_v29 = vrot.slane %v286_v24, %v7683_v19  ;;  %v341_v30 = vrot.slane %v294_v25, %v7683_v19  ;;  %6937 = vmatprep.mubr.msk.f32.mxu0 %vm1491_vm1, %v2450_v21  ;;  %v2451_v22 = vld [vmem:[#allocation2 + $0x48] sm:$0xff] }
  0xb6   :  { %411 = vadd.xlane.f32.xlu0 %v410_v27  ;;  %v349_v34 = vrot.slane %v279_v26, %v7683_v19  ;;  %v296_v39 = vcombine.high %v286_v24, %v286_v24  ;;  %v293_v41 = vrot.slane %v265_v35, %v7662_v6  ;;  %v295_v47 = vcombine.high %v279_v26, %v279_v26  ;;  %v2452_v26 = vld [vmem:[#allocation2 + $0x50] sm:$0xff]  ;;  %v2453_v27 = vld [vmem:[#allocation2 + $0x58] sm:$0xff] }
  0xb7   :  { %v402_v31 = vmul.f32 %v386_v28, %v386_v28  ;;  %v387_v32 = vsub.f32 %v337_v29, %v7748_v9  ;;  %v388_v38 = vsub.f32 %v341_v30, %v7748_v9  ;;  %v237_v24 = vrot.slane %v215_v20, %v7662_v6  ;;  %v2454_v30 = vld [vmem:[#allocation2 + $0x60] sm:$0xff] }
  0xb8   :  { %v390_v44 = vsub.f32 %v349_v34, %v7748_v9  ;;  %v345_v45 = vrot.slane %v296_v39, %v7683_v19  ;;  %v353_v52 = vrot.slane %v293_v41, %v7683_v19  ;;  %v357_v53 = vrot.slane %v295_v47, %v7683_v19  ;;  %6938 = vmatmul.mubr.msk.f32.gmra.mrb[8].mxu0 %vm1491_vm1, %v2451_v22 }
  0xb9   :  { %v434_v36 = vsel %vm171_vm2, %v402_v31, 0.0  ;;  %v403_v37 = vmul.f32 %v387_v32, %v387_v32  ;;  %v404_v43 = vmul.f32 %v388_v38, %v388_v38  ;;  %v297_v57 = vcombine.high %v293_v41, %v293_v41  ;;  %6940 = vmatprep.mubr.msk.f32.mxu0 %vm1491_vm1, %v2452_v26  ;;  %v2455_v31 = vld [vmem:[#allocation2 + $0x68] sm:$0xff]  ;;  %v2456_v32 = vld [vmem:[#allocation2 + $0x70] sm:$0xff] }
  0xba   :  { %435 = vadd.xlane.f32.xlu0 %v434_v36  ;;  %v406_v49 = vmul.f32 %v390_v44, %v390_v44  ;;  %v389_v50 = vsub.f32 %v345_v45, %v7748_v9  ;;  %v391_v56 = vsub.f32 %v353_v52, %v7748_v9  ;;  %v392_v60 = vsub.f32 %v357_v53, %v7748_v9 }
  0xbb   :  { %v437_v42 = vsel %vm171_vm2, %v403_v37, 0.0  ;;  %v440_v48 = vsel %vm171_vm2, %v404_v43, 0.0  ;;  %v361_v63 = vrot.slane %v297_v57, %v7683_v19  ;;  %v200_v25 = vcombine.high %v7733_v62, %v7733_v62 }
  0xbc   :  { %v446_v54 = vsel %vm171_vm2, %v406_v49, 0.0  ;;  %v405_v55 = vmul.f32 %v389_v50, %v389_v50  ;;  %v407_v59 = vmul.f32 %v391_v56, %v391_v56  ;;  %v408_v12 = vmul.f32 %v392_v60, %v392_v60  ;;  %6941 = vmatmul.mubr.msk.f32.gmra.mrb[10].mxu0 %vm1491_vm1, %v2453_v27 }
  0xbd   :  { %v393_v13 = vsub.f32 %v361_v63, %v7748_v9  ;;  %v305_v28 = vrot.slane %v237_v24, %v7683_v19  ;;  %v214_v29 = vrot.slane %v200_v25, %v7662_v6  ;;  %6943 = vmatprep.mubr.msk.f32.mxu0 %vm1491_vm1, %v2454_v30  ;;  %v309_v33 = vrot.slane %v245_v3, %v7683_v19 }
  0xbe   :  { %438 = vadd.xlane.f32.xlu0 %v437_v42  ;;  %v443_v58 = vsel %vm171_vm2, %v405_v55, 0.0  ;;  %v449_v11 = vsel %vm171_vm2, %v407_v59, 0.0  ;;  %v452_v17 = vsel %vm171_vm2, %v408_v12, 0.0  ;;  %v247_v39 = vcombine.high %v237_v24, %v237_v24 }
  0xbf   :  { %v409_v18 = vmul.f32 %v393_v13, %v393_v13  ;;  %v379_v34 = vsub.f32 %v305_v28, %v7733_v62  ;;  %v230_v35 = vrot.slane %v214_v29, %v7662_v6  ;;  %v380_v36 = vsub.f32 %v309_v33, %v7733_v62 }
  0xc0   :  { %6944 = vmatmul.mubr.msk.f32.gmra.mrb[12].mxu0 %vm1491_vm1, %v2455_v31  ;;  %v216_v41 = vcombine.high %v214_v29, %v214_v29  ;;  %v313_v45 = vrot.slane %v247_v39, %v7683_v19 }
  0xc1   :  { %v455_v23 = vsel %vm171_vm2, %v409_v18, 0.0  ;;  %6946 = vmatprep.mubr.msk.f32.mxu0 %vm1491_vm1, %v2456_v32  ;;  %v395_v37 = vmul.f32 %v379_v34, %v379_v34  ;;  %v317_v38 = vrot.slane %v230_v35, %v7683_v19  ;;  %v396_v42 = vmul.f32 %v380_v36, %v380_v36  ;;  %v7848_v18 = vpop.permute.xlu1 %1213 }
  0xc2   :  { %441 = vadd.xlane.f32.xlu0 %v440_v48  ;;  %v381_v49 = vsub.f32 %v313_v45, %v7733_v62  ;;  %v246_v52 = vcombine.high %v230_v35, %v230_v35  ;;  %11183 = vst [vmem:[#allocation18_spill] sm:$0xff] %v7848_v18 }
  0xc3   :  { %1265 = vperm.xlu1 %7250, %v1203_v46   ;;  %v413_v43 = vsel %vm171_vm2, %v395_v37, 0.0  ;;  %v382_v44 = vsub.f32 %v317_v38, %v7733_v62  ;;  %v244_v46 = vrot.slane %v216_v41, %v7662_v6  ;;  %v416_v47 = vsel %vm171_vm2, %v396_v42, 0.0 }
  0xc4   :  { %6947 = vmatmul.mubr.msk.f32.gmra.mrb[14].mxu0 %vm1491_vm1, %v2457_v10  ;;  %v397_v55 = vmul.f32 %v381_v49, %v381_v49  ;;  %v325_v57 = vrot.slane %v246_v52, %v7683_v19 }
  0xc5   :  { %v398_v48 = vmul.f32 %v382_v44, %v382_v44  ;;  %v321_v50 = vrot.slane %v244_v46, %v7683_v19  ;;  %v248_v53 = vcombine.high %v244_v46, %v244_v46  ;;  %v7850_v20 = vpop.permute.xlu1 %1225 }
  0xc6   :  { %447 = vadd.xlane.f32.xlu0 %v446_v54  ;;  %v384_v60 = vsub.f32 %v325_v57, %v7733_v62  ;;  %11184 = vst [vmem:[#allocation19_spill] sm:$0xff] %v7850_v20 }
  0xc7   :  { %v422_v54 = vsel %vm171_vm2, %v398_v48, 0.0  ;;  %v383_v56 = vsub.f32 %v321_v50, %v7733_v62  ;;  %v329_v63 = vrot.slane %v248_v53, %v7683_v19 }
  0xc8   :  { %v400_v8 = vmul.f32 %v384_v60, %v384_v60 }
  0xc9   :  { %v399_v59 = vmul.f32 %v383_v56, %v383_v56  ;;  %v7852_v21 = vpop.permute.xlu1 %1237 }
  0xca   :  { %444 = vadd.xlane.f32.xlu0 %v443_v58  ;;  %v419_v58 = vsel %vm171_vm2, %v397_v55, 0.0  ;;  %v428_v12 = vsel %vm171_vm2, %v400_v8, 0.0  ;;  %11185 = vst [vmem:[#allocation20_spill] sm:$0xff] %v7852_v21 }
  0xcb   :  { %v425_v2 = vsel %vm171_vm2, %v399_v59, 0.0 }
  0xcd   :  { %v7854_v22 = vpop.permute.xlu1 %1241 }
  0xce   :  { %450 = vadd.xlane.f32.xlu0 %v449_v11  ;;  %v385_v11 = vsub.f32 %v329_v63, %v7733_v62  ;;  %11186 = vst [vmem:[#allocation21_spill] sm:$0xff] %v7854_v22 }
  0xd0   :  { %v401_v13 = vmul.f32 %v385_v11, %v385_v11 }
  0xd2   :  { %453 = vadd.xlane.f32.xlu0 %v452_v17  ;;  %v431_v14 = vsel %vm171_vm2, %v401_v13, 0.0 }
  0xd6   :  { %456 = vadd.xlane.f32.xlu0 %v455_v23  ;;  %v7856_v23 = vpop.permute.xlu1 %1249 }
  0xd7   :  { %11187 = vst [vmem:[#allocation22_spill] sm:$0xff] %v7856_v23 }
  0xda   :  { %v7858_v24 = vpop.permute.xlu1 %1253 }
  0xdb   :  { %11188 = vst [vmem:[#allocation23_spill] sm:$0xff] %v7858_v24 }
  0xde   :  { %v7860_v25 = vpop.permute.xlu1 %1257 }
  0xdf   :  { %11189 = vst [vmem:[#allocation24_spill] sm:$0xff] %v7860_v25 }
  0xe2   :  { %v7862_v26 = vpop.permute.xlu1 %1261 }
  0xe3   :  { %11190 = vst [vmem:[#allocation25_spill] sm:$0xff] %v7862_v26 }
  0xe7   :  { %414 = vadd.xlane.f32.xlu1 %v413_v43 }
  0xeb   :  { %417 = vadd.xlane.f32.xlu1 %v416_v47 }
  0xef   :  { %423 = vadd.xlane.f32.xlu1 %v422_v54 }
  0xf3   :  { %420 = vadd.xlane.f32.xlu1 %v419_v58 }
  0xf7   :  { %426 = vadd.xlane.f32.xlu1 %v425_v2 }
  0xfb   :  { %429 = vadd.xlane.f32.xlu1 %v428_v12 }
  0xff   :  { %432 = vadd.xlane.f32.xlu1 %v431_v14 }
 0x106   :  { %v7844_v16 = vpop.f32.mrb[0].mxu1 }
 0x107   :  { %v7846_v17 = vpop.f32.mrb[1].mxu1 }
 0x13b   :  { %v174_v27 = vpop.xlane.xlu1 %173 }
 0x13c   :  { %7361 = vrsqrt.f32 %v174_v27  ;;  %vm180_vm3 = vcmp.eq.f32.partialorder %v174_v27, inf  ;;  %v183_v30 = vand.u32 2147483648, %v174_v27  ;;  %vm182_vm4 = vcmp.eq.f32.partialorder %v174_v27, 0.0 }
 0x13f   :  { %v177_v3 = vpop.xlane.xlu1 %176 }
 0x140   :  { %7363 = vrsqrt.f32 %v177_v3  ;;  %vm187_vm5 = vcmp.eq.f32.partialorder %v177_v3, inf  ;;  %v190_v10 = vand.u32 2147483648, %v177_v3  ;;  %vm189_vm6 = vcmp.eq.f32.partialorder %v177_v3, 0.0 }
 0x146   :  { %v7362_v28 = vpop.eup %7361 }
 0x147   :  { %v179_v29 = vmul.f32 %v7362_v28, %v174_v27 }
 0x149   :  { %v181_v31 = vsel %vm180_vm3, %v174_v27, %v179_v29 }
 0x14a   :  { %v7364_v32 = vpop.eup %7363  ;;  %v7864_v33 = vsel %vm182_vm4, %v183_v30, %v181_v31 }
 0x14b   :  { %v192_v34 = vadd.f32 1e-07, %v7864_v33  ;;  %v186_v35 = vmul.f32 %v7364_v32, %v177_v3 }
 0x14d   :  { %7365 = vrcp.f32 %v192_v34  ;;  %v188_v36 = vsel %vm187_vm5, %v177_v3, %v186_v35  ;;  %v1686_v35 = vsel %vm1685_vm7, %v7667_v7, 0.0 }
 0x14e   :  { %v7867_v37 = vsel %vm189_vm6, %v190_v10, %v188_v36 }
 0x14f   :  { %v193_v38 = vadd.f32 1e-07, %v7867_v37 }
 0x151   :  { %7367 = vrcp.f32 %v193_v38 }
 0x157   :  { %v7366_v39 = vpop.eup %7365 }
 0x158   :  { %v7871_v41 = vmul.f32 %v7366_v39, %v7733_v62 }
 0x15a   :  { %v579_v42 = vrot.slane %v7871_v41, %v7662_v6  ;;  %v572_v47 = vcombine.high %v7871_v41, %v7871_v41 }
 0x15b   :  { %v7368_v43 = vpop.eup %7367 }
 0x15c   :  { %v7876_v44 = vmul.f32 %v7368_v43, %v7748_v9  ;;  %v595_v45 = vrot.slane %v579_v42, %v7662_v6  ;;  %v587_v46 = vcombine.high %v579_v42, %v579_v42  ;;  %v586_v57 = vrot.slane %v572_v47, %v7662_v6 }
 0x15e   :  { %v673_v48 = vrot.slane %v595_v45, %v7683_v19  ;;  %v628_v49 = vrot.slane %v7876_v44, %v7662_v6  ;;  %v609_v62 = vrot.slane %v587_v46, %v7662_v6  ;;  %v621_v50 = vcombine.high %v7876_v44, %v7876_v44 }
 0x15f   :  { %v617_v55 = vcombine.high %v595_v45, %v595_v45  ;;  %v602_v14 = vrot.slane %v586_v57, %v7662_v6  ;;  %v588_v10 = vcombine.high %v586_v57, %v586_v57 }
 0x160   :  { %v750_v52 = vmul.f32 %v673_v48, %v7871_v41  ;;  %v644_v9 = vrot.slane %v628_v49, %v7662_v6  ;;  %v636_v53 = vcombine.high %v628_v49, %v628_v49  ;;  %v677_v54 = vrot.slane %v609_v62, %v7683_v19 }
 0x161   :  { %v635_v56 = vrot.slane %v621_v50, %v7662_v6  ;;  %v681_v13 = vrot.slane %v617_v55, %v7683_v19  ;;  %v689_v39 = vrot.slane %v602_v14, %v7683_v19  ;;  %v619_v42 = vcombine.high %v609_v62, %v609_v62 }
 0x162   :  { %v766_v58 = vsel %vm171_vm2, %v750_v52, 0.0  ;;  %v705_v59 = vrot.slane %v644_v9, %v7683_v19  ;;  %v7895_v60 = vrot.slane %v636_v53, %v7662_v6  ;;  %v666_v63 = vcombine.high %v644_v9, %v644_v9 }
 0x163   :  { %767 = vadd.xlane.f32.xlu1 %v766_v58  ;;  %v7902_v12 = vrot.slane %v635_v56, %v7662_v6  ;;  %v751_v28 = vmul.f32 %v677_v54, %v7871_v41  ;;  %v637_v29 = vcombine.high %v635_v56, %v635_v56  ;;  %v752_v38 = vmul.f32 %v681_v13, %v7871_v41 }
 0x164   :  { %v758_v2 = vmul.f32 %v705_v59, %v7876_v44  ;;  %v709_v8 = vrot.slane %v7895_v60, %v7683_v19  ;;  %v713_v11 = vrot.slane %v666_v63, %v7683_v19  ;;  %v1687_v48 = vrot.slane %v1686_v35, 4 }
 0x165   :  { %v721_v32 = vrot.slane %v7902_v12, %v7683_v19  ;;  %v665_v34 = vrot.slane %v637_v29, %v7662_v6  ;;  %v769_v36 = vsel %vm171_vm2, %v751_v28, 0.0  ;;  %v772_v49 = vsel %vm171_vm2, %v752_v38, 0.0 }
 0x166   :  { %v790_v27 = vsel %vm171_vm2, %v758_v2, 0.0  ;;  %v759_v3 = vmul.f32 %v709_v8, %v7876_v44  ;;  %v760_v31 = vmul.f32 %v713_v11, %v7876_v44  ;;  %v754_v50 = vmul.f32 %v689_v39, %v7871_v41 }
 0x167   :  { %791 = vadd.xlane.f32.xlu1 %v790_v27  ;;  %v762_v45 = vmul.f32 %v721_v32, %v7876_v44  ;;  %v725_v46 = vrot.slane %v665_v34, %v7683_v19  ;;  %v669_v47 = vcombine.high %v665_v34, %v665_v34  ;;  %v685_v52 = vrot.slane %v619_v42, %v7683_v19 }
 0x168   :  { %v793_v30 = vsel %vm171_vm2, %v759_v3, 0.0  ;;  %v796_v43 = vsel %vm171_vm2, %v760_v31, 0.0  ;;  %v616_v9 = vrot.slane %v588_v10, %v7662_v6  ;;  %v1688_v55 = vadd.f32 %v1687_v48, %v1686_v35 }
 0x169   :  { %794 = vadd.xlane.f32.xlu0 %v793_v30  ;;  %v802_v62 = vsel %vm171_vm2, %v762_v45, 0.0  ;;  %v763_v53 = vmul.f32 %v725_v46, %v7876_v44  ;;  %v733_v54 = vrot.slane %v669_v47, %v7683_v19  ;;  %v778_v56 = vsel %vm171_vm2, %v754_v50, 0.0 }
 0x16a   :  { %v753_v57 = vmul.f32 %v685_v52, %v7871_v41  ;;  %v693_v58 = vrot.slane %v616_v9, %v7683_v19  ;;  %v618_v59 = vcombine.high %v602_v14, %v602_v14  ;;  %v1689_v8 = vrot.slane %v1688_v55, 2 }
 0x16b   :  { %770 = vadd.xlane.f32.xlu1 %v769_v36  ;;  %v805_v63 = vsel %vm171_vm2, %v763_v53, 0.0  ;;  %v765_v2 = vmul.f32 %v733_v54, %v7876_v44  ;;  %v668_v3 = vcombine.high %v7895_v60, %v7895_v60  ;;  %v1693_v14 = vsel %vm1685_vm7, %v7677_v15, 0.0 }
 0x16c   :  { %v775_v11 = vsel %vm171_vm2, %v753_v57, 0.0  ;;  %v755_v13 = vmul.f32 %v693_v58, %v7871_v41  ;;  %v697_v27 = vrot.slane %v618_v59, %v7683_v19  ;;  %v1690_v29 = vadd.f32 %v1689_v8, %v1688_v55  ;;  %v1404_v55 = vld [vmem:[#allocation5 + $0x30] sm:$0xff]  ;;  %v1485_v8 = vld [vmem:[#allocation5 + $0x28] sm:$0xff] }
 0x16d   :  { %797 = vadd.xlane.f32.xlu0 %v796_v43  ;;  %v811_v28 = vsel %vm171_vm2, %v765_v2, 0.0  ;;  %v717_v32 = vrot.slane %v668_v3, %v7683_v19  ;;  %v667_v34 = vcombine.high %v7902_v12, %v7902_v12  ;;  %v1694_v35 = vrot.slane %v1693_v14, 4  ;;  %v1484_v2 = vld [vmem:[#allocation5 + $0x20] sm:$0xff] }
 0x16e   :  { %v781_v30 = vsel %vm171_vm2, %v755_v13, 0.0  ;;  %v756_v31 = vmul.f32 %v697_v27, %v7871_v41  ;;  %v1691_v60 = vrot.slane %v1690_v29, 1  ;;  %v620_v39 = vcombine.high %v616_v9, %v616_v9  ;;  %v6652_v9 = vld [vmem:[#allocation5 + $0x1b0] ss:$0 sm:$0xff] }
 0x16f   :  { %773 = vadd.xlane.f32.xlu1 %v772_v49  ;;  %v761_v36 = vmul.f32 %v717_v32, %v7876_v44  ;;  %v729_v38 = vrot.slane %v667_v34, %v7683_v19  ;;  %v1695_v42 = vadd.f32 %v1694_v35, %v1693_v14  ;;  %v154_v52 = vcombine.high %v7719_v51, %v7719_v51  ;;  %v7993_v35 = vpop.f32.mrb[0].mxu0 }
 0x170   :  { %v784_v10 = vsel %vm171_vm2, %v756_v31, 0.0  ;;  %v1692_v43 = vadd.f32 %v1691_v60, %v1690_v29  ;;  %v701_v47 = vrot.slane %v620_v39, %v7683_v19  ;;  %v11037_v54 = vmov 0.0   ;;  %11196 = vst [vmem:[#allocation31_spill] sm:$0xff] %v7993_v35  ;;  %v7997_v60 = vpop.f32.mrb[1].mxu0 }
 0x171   :  { %803 = vadd.xlane.f32.xlu0 %v802_v62  ;;  %v799_v45 = vsel %vm171_vm2, %v761_v36, 0.0  ;;  %v764_v46 = vmul.f32 %v729_v38, %v7876_v44  ;;  %v1696_v12 = vrot.slane %v1695_v42, 2  ;;  %v1207_v44 = vrot.slane %v154_v52, %v7683_v19  ;;  %6888 = vmatprep.subr.mxu1 %v11037_v54  ;;  %11197 = vst [vmem:[#allocation32_spill] sm:$0xff] %v7997_v60  ;;  %v7999_v36 = vpop.f32.mrb[2].mxu0 }
 0x172   :  { %7369 = vrcp.f32 %v1692_v43  ;;  %v757_v49 = vmul.f32 %v701_v47, %v7871_v41  ;;  %v1403_v41 = vld [vmem:[%s11028_s2] sm:$0x3]  ;;  %6889 = vmatpush3.msra.mxu1 %v1404_v55  ;;  %6890 = vmatprep.mubr.msk.f32.mxu1 %vm7574_vm9, %v11037_v54  ;;  %v1393_v51 = vadd.f32 %v6652_v9, %v7846_v17  ;;  %v1704_v57 = vsub.f32 1.0, %v7667_v7  ;;  %s7575_s2 = smov 32   ;;  %11198 = vst [vmem:[#allocation33_spill] sm:$0xff] %v7999_v36 }
 0x173   :  { %779 = vadd.xlane.f32.xlu1 %v778_v56  ;;  %v808_v48 = vsel %vm171_vm2, %v764_v46, 0.0  ;;  %v1697_v50 = vadd.f32 %v1696_v12, %v1695_v42  ;;  %6891 = vmatmul.mubr.msk.f32.vlgmr.msra.gmra.mrb[2].mxu1 %vm1410_vm8, %v1403_v41  ;;  %v1398_v59 = vadd.f32 %v7844_v16, %v6652_v9  ;;  %v156_v17 = vcombine.high %v7780_v40, %v7780_v40  ;;  %v7979_v16 = vpop.permute.xlu0 %1217  ;;  %v8006_v42 = vpop.f32.mrb[3].mxu0 }
 0x174   :  { %v787_v62 = vsel %vm171_vm2, %v757_v49, 0.0  ;;  %v1844_v13 = vmul.f32 100000.0, %v1704_v57  ;;  %11193 = vst [vmem:[#allocation28_spill] sm:$0xff] %v7979_v16  ;;  %v1705_v40 = vsub.f32 1.0, %v7677_v15  ;;  %11200 = vst [vmem:[#allocation35_spill] sm:$0xff] %v8006_v42 }
 0x175   :  { %806 = vadd.xlane.f32.xlu0 %v805_v63  ;;  %v1698_v53 = vrot.slane %v1697_v50, 1  ;;  %v7970_v63 = vmul.f32 %v1393_v51, %v7730_v61  ;;  %v7975_v27 = vmul.f32 %v1398_v59, %v7744_v5  ;;  %v1211_v3 = vrot.slane %v156_v17, %v7683_v19 }
 0x177   :  { %776 = vadd.xlane.f32.xlu1 %v775_v11  ;;  %v1699_v56 = vadd.f32 %v1698_v53, %v1697_v50  ;;  %11191 = vst [vmem:[#allocation26_spill] sm:$0xff] %v7970_v63  ;;  %v7138_v11 = vpack.c.bf16 %v1485_v8, %v1484_v2  ;;  %11192 = vst [vmem:[#allocation27_spill] sm:$0xff] %v7975_v27  ;;  %v2689_v7 = vrot.slane %v7970_v63, %v7662_v6  ;;  %v7991_v34 = vpop.permute.xlu0 %1221 }
 0x178   :  { %11195 = vst [vmem:[#allocation30_spill] sm:$0xff] %v7991_v34  ;;  %v2731_v12 = vcombine.high %v7975_v27, %v7975_v27  ;;  %v2682_v53 = vcombine.high %v7970_v63, %v7970_v63 }
 0x179   :  { %812 = vadd.xlane.f32.xlu0 %v811_v28  ;;  %7371 = vrcp.f32 %v1699_v56  ;;  %7139 = vmatprep.subr.bf16.mxu1 %v7138_v11  ;;  %v2705_v14 = vrot.slane %v2689_v7, %v7662_v6  ;;  %v2738_v28 = vrot.slane %v7975_v27, %v7662_v6  ;;  %v2697_v43 = vcombine.high %v2689_v7, %v2689_v7 }
 0x17a   :  { %7141 = vmatpush3.bf16.msra.mxu1 %v7138_v11  ;;  %v2745_v52 = vrot.slane %v2731_v12, %v7662_v6  ;;  %v2696_v8 = vrot.slane %v2682_v53, %v7662_v6 }
 0x17b   :  { %782 = vadd.xlane.f32.xlu1 %v781_v30  ;;  %v7989_v30 = vrot.slane %v2705_v14, %v7683_v19  ;;  %v2727_v31 = vcombine.high %v2705_v14, %v2705_v14  ;;  %v2746_v32 = vcombine.high %v2738_v28, %v2738_v28  ;;  %v2754_v39 = vrot.slane %v2738_v28, %v7662_v6 }
 0x17c   :  { %v7370_v58 = vpop.eup %7369  ;;  %v2761_v56 = vrot.slane %v2745_v52, %v7662_v6  ;;  %v2747_v57 = vcombine.high %v2745_v52, %v2745_v52 }
 0x17d   :  { %11194 = vst [vmem:[#allocation29_spill] sm:$0xff] %v7989_v30  ;;  %v8002_v15 = vrot.slane %v2727_v31, %v7683_v19  ;;  %v2768_v38 = vrot.slane %v2746_v32, %v7662_v6  ;;  %v2776_v47 = vcombine.high %v2754_v39, %v2754_v39  ;;  %v8050_v59 = vrot.slane %v2754_v39, %v7683_v19 }
 0x17e   :  { %v2775_v14 = vrot.slane %v2747_v57, %v7662_v6  ;;  %v2698_v31 = vcombine.high %v2696_v8, %v2696_v8 }
 0x17f   :  { %785 = vadd.xlane.f32.xlu1 %v784_v10  ;;  %v1845_v10 = vmul.f32 100000.0, %v1705_v40  ;;  %11199 = vst [vmem:[#allocation34_spill] sm:$0xff] %v8002_v15  ;;  %v8013_v46 = vrot.slane %v2768_v38, %v7683_v19  ;;  %v8023_v49 = vrot.slane %v2776_v47, %v7683_v19  ;;  %v2778_v50 = vcombine.high %v2768_v38, %v2768_v38 }
 0x180   :  { %11211 = vst [vmem:[#allocation46_spill] sm:$0xff] %v8050_v59  ;;  %v2777_v47 = vcombine.high %v2761_v56, %v2761_v56  ;;  %v2779_v0 = vcombine.high %v2775_v14, %v2775_v14 }
 0x181   :  { %11202 = vst [vmem:[#allocation37_spill] sm:$0xff] %v8013_v46  ;;  %11203 = vst [vmem:[#allocation38_spill] sm:$0xff] %v8023_v49  ;;  %v8044_v51 = vrot.slane %v2778_v50, %v7683_v19  ;;  %v2726_v50 = vrot.slane %v2698_v31, %v7662_v6 }
 0x182   :  { %v8101_v52 = vrot.slane %v2777_v47, %v7683_v19 }
 0x183   :  { %800 = vadd.xlane.f32.xlu1 %v799_v45  ;;  %v7372_v29 = vpop.eup %7371  ;;  %v8010_v45 = vpop.permute.xlu0 %1229  ;;  %11209 = vst [vmem:[#allocation44_spill] sm:$0xff] %v8044_v51 }
 0x184   :  { %11201 = vst [vmem:[#allocation36_spill] sm:$0xff] %v8010_v45  ;;  %11225 = vst [vmem:[#allocation60_spill] sm:$0xff] %v8101_v52 }
 0x187   :  { %809 = vadd.xlane.f32.xlu1 %v808_v48  ;;  %v2719_v48 = vrot.slane %v2697_v43, %v7662_v6  ;;  %v8026_v9 = vpop.permute.xlu0 %1233  ;;  %v8088_v43 = vrot.slane %v2775_v14, %v7683_v19 }
 0x188   :  { %11204 = vst [vmem:[#allocation39_spill] sm:$0xff] %v8026_v9 }
 0x189   :  { %v2729_v2 = vcombine.high %v2719_v48, %v2719_v48  ;;  %11222 = vst [vmem:[#allocation57_spill] sm:$0xff] %v8088_v43 }
 0x18b   :  { %788 = vadd.xlane.f32.xlu1 %v787_v62  ;;  %v8029_v62 = vrot.slane %v2719_v48, %v7683_v19  ;;  %v8059_v17 = vpop.permute.xlu0 %1245  ;;  %v8072_v40 = vrot.slane %v2729_v2, %v7683_v19 }
 0x18c   :  { %11214 = vst [vmem:[#allocation49_spill] sm:$0xff] %v8059_v17 }
 0x18d   :  { %11205 = vst [vmem:[#allocation40_spill] sm:$0xff] %v8029_v62  ;;  %11218 = vst [vmem:[#allocation53_spill] sm:$0xff] %v8072_v40 }
 0x18f   :  { %1269 = vperm.xlu0 %7249, %v1207_v44   ;;  %v8033_v44 = vpop.f32.mrb[4].mxu0  ;;  %v8081_v38 = vpop.xlane.xlu0 %411 }
 0x190   :  { %11206 = vst [vmem:[#allocation41_spill] sm:$0xff] %v8033_v44  ;;  %v8037_v55 = vpop.f32.mrb[5].mxu0  ;;  %7373 = vrsqrt.f32 %v8081_v38  ;;  %vm460_vm10 = vcmp.eq.f32.partialorder %v8081_v38, inf  ;;  %vm462_vm11 = vcmp.eq.f32.partialorder %v8081_v38, 0.0 }
 0x191   :  { %11207 = vst [vmem:[#allocation42_spill] sm:$0xff] %v8037_v55  ;;  %v8041_v41 = vpop.f32.mrb[6].mxu0 }
 0x192   :  { %11208 = vst [vmem:[#allocation43_spill] sm:$0xff] %v8041_v41 }
 0x193   :  { %1820 = vperm.xlu0 %7249, %v7370_v58   ;;  %v8047_v58 = vpop.f32.mrb[7].mxu0  ;;  %v8103_v53 = vpop.xlane.xlu0 %435 }
 0x194   :  { %11210 = vst [vmem:[#allocation45_spill] sm:$0xff] %v8047_v58  ;;  %v8053_v11 = vpop.f32.mrb[8].mxu0  ;;  %7375 = vrsqrt.f32 %v8103_v53  ;;  %vm516_vm12 = vcmp.eq.f32.partialorder %v8103_v53, inf  ;;  %vm518_vm13 = vcmp.eq.f32.partialorder %v8103_v53, 0.0 }
 0x195   :  { %11212 = vst [vmem:[#allocation47_spill] sm:$0xff] %v8053_v11 }
 0x197   :  { %1848 = vperm.xlu0 %7249, %v1844_v13   ;;  %v8057_v13 = vpop.f32.mrb[9].mxu0  ;;  %v8115_v31 = vpop.xlane.xlu0 %438 }
 0x198   :  { %11213 = vst [vmem:[#allocation48_spill] sm:$0xff] %v8057_v13  ;;  %v8063_v7 = vpop.f32.mrb[10].mxu0  ;;  %7377 = vrsqrt.f32 %v8115_v31  ;;  %vm523_vm14 = vcmp.eq.f32.partialorder %v8115_v31, inf  ;;  %vm525_vm15 = vcmp.eq.f32.partialorder %v8115_v31, 0.0 }
 0x199   :  { %11215 = vst [vmem:[#allocation50_spill] sm:$0xff] %v8063_v7  ;;  %v8069_v28 = vpop.f32.mrb[11].mxu0 }
 0x19a   :  { %11217 = vst [vmem:[#allocation52_spill] sm:$0xff] %v8069_v28  ;;  %v8075_v32 = vpop.f32.mrb[12].mxu0 }
 0x19b   :  { %2660 = vrot.lane.b32.xlu0 %v7970_v63, %s7575_s2  ;;  %11219 = vst [vmem:[#allocation54_spill] sm:$0xff] %v8075_v32  ;;  %v8126_v1 = vpop.xlane.xlu0 %441 }
 0x19c   :  { %1273 = vperm.xlu1 %7250, %v1211_v3   ;;  %v8066_v3 = vrot.slane %v2761_v56, %v7683_v19  ;;  %v8106_v56 = vrot.slane %v2726_v50, %v7683_v19  ;;  %7379 = vrsqrt.f32 %v8126_v1  ;;  %vm530_vm2 = vcmp.eq.f32.partialorder %v8126_v1, inf }
 0x19d   :  { %vm532_vm3 = vcmp.eq.f32.partialorder %v8126_v1, 0.0 }
 0x19e   :  { %11216 = vst [vmem:[#allocation51_spill] sm:$0xff] %v8066_v3  ;;  %11226 = vst [vmem:[#allocation61_spill] sm:$0xff] %v8106_v56 }
 0x19f   :  { %2844 = vrot.lane.b32.xlu0 %v7989_v30, %s7576_s16  ;;  %v8135_v54 = vpop.xlane.xlu0 %447 }
 0x1a0   :  { %1825 = vperm.xlu1 %7250, %v7372_v29   ;;  %v2712_v29 = vrot.slane %v2696_v8, %v7662_v6  ;;  %v2730_v8 = vcombine.high %v2726_v50, %v2726_v50 }
 0x1a2   :  { %v8093_v48 = vrot.slane %v2712_v29, %v7683_v19  ;;  %v2728_v57 = vcombine.high %v2712_v29, %v2712_v29  ;;  %v8120_v47 = vrot.slane %v2730_v8, %v7683_v19  ;;  %v8122_v29 = vpop.permute.xlu1 %1265 }
 0x1a3   :  { %2848 = vrot.lane.b32.xlu0 %v8002_v15, %s7576_s16  ;;  %11229 = vst [vmem:[#allocation64_spill] sm:$0xff] %v8122_v29  ;;  %v8139_v14 = vpop.xlane.xlu0 %444 }
 0x1a4   :  { %1853 = vperm.xlu1 %7250, %v1845_v10   ;;  %v8079_v10 = vpop.f32.mrb[13].mxu0  ;;  %11224 = vst [vmem:[#allocation59_spill] sm:$0xff] %v8093_v48  ;;  %v8113_v2 = vrot.slane %v2728_v57, %v7683_v19  ;;  %11228 = vst [vmem:[#allocation63_spill] sm:$0xff] %v8120_v47  ;;  %v8129_v57 = vrot.slane %v2779_v0, %v7683_v19 }
 0x1a5   :  { %11220 = vst [vmem:[#allocation55_spill] sm:$0xff] %v8079_v10  ;;  %v8085_v39 = vpop.f32.mrb[14].mxu0 }
 0x1a6   :  { %11221 = vst [vmem:[#allocation56_spill] sm:$0xff] %v8085_v39  ;;  %v8090_v12 = vpop.f32.mrb[15].mxu0  ;;  %11227 = vst [vmem:[#allocation62_spill] sm:$0xff] %v8113_v2  ;;  %v8131_v50 = vpop.xlane.xlu1 %414  ;;  %v519_v39 = vand.u32 2147483648, %v8103_v53 }
 0x1a7   :  { %2862 = vrot.lane.b32.xlu0 %v8013_v46, %s7576_s16  ;;  %11223 = vst [vmem:[#allocation58_spill] sm:$0xff] %v8090_v12  ;;  %11230 = vst [vmem:[#allocation65_spill] sm:$0xff] %v8129_v57  ;;  %v8145_v0 = vpop.xlane.xlu0 %450  ;;  %7381 = vrsqrt.f32 %v8131_v50  ;;  %vm467_vm4 = vcmp.eq.f32.partialorder %v8131_v50, inf  ;;  %v470_v42 = vand.u32 2147483648, %v8131_v50  ;;  %vm469_vm5 = vcmp.eq.f32.partialorder %v8131_v50, 0.0 }
 0x1a8   :  { %2662 = vrot.lane.b32.xlu1 %v7975_v27, %s7575_s2  ;;  %7383 = vrsqrt.f32 %v8135_v54 }
 0x1aa   :  { %v8137_v8 = vpop.xlane.xlu1 %417 }
 0x1ab   :  { %2864 = vrot.lane.b32.xlu0 %v8023_v49, %s7576_s16  ;;  %7385 = vrsqrt.f32 %v8137_v8  ;;  %vm474_vm6 = vcmp.eq.f32.partialorder %v8137_v8, inf  ;;  %v477_v26 = vand.u32 2147483648, %v8137_v8 }
 0x1ac   :  { %2846 = vrot.lane.b32.xlu1 %v8029_v62, %s7576_s16 }
 0x1af   :  { %2866 = vrot.lane.b32.xlu0 %v8044_v51, %s7576_s16  ;;  %v6649_v51 = vld [vmem:[#allocation5 + $0x1f8] ss:$0 sm:$0xff] }
 0x1b0   :  { %2860 = vrot.lane.b32.xlu1 %v8050_v59, %s7576_s16  ;;  %v8155_v59 = vpop.xlane.xlu0 %453 }
 0x1b3   :  { %2868 = vrot.lane.b32.xlu0 %v8066_v3, %s7576_s16 }
 0x1b4   :  { %2850 = vrot.lane.b32.xlu1 %v8072_v40, %s7576_s16  ;;  %v837_v40 = vsub.s32 1, %v7659_v4  ;;  %v8173_v4 = vpop.xlane.xlu0 %456 }
 0x1b5   :  { %7387 = vrsqrt.f32 %v8173_v4  ;;  %vm565_vm7 = vcmp.eq.f32.partialorder %v8173_v4, inf }
 0x1b6   :  { %7389 = vrsqrt.f32 %v8145_v0 }
 0x1b7   :  { %2870 = vrot.lane.b32.xlu0 %v8088_v43, %s7576_s16  ;;  %v6648_v43 = vld [vmem:[#allocation5 + $0x1a0] ss:$0 sm:$0xff] }
 0x1b8   :  { %2852 = vrot.lane.b32.xlu1 %v8093_v48, %s7576_s16  ;;  %v897_v3 = vmul.f32 %v6648_v43, %v7864_v33  ;;  %v898_v49 = vmul.f32 %v6648_v43, %v7867_v37  ;;  %v6651_v43 = vld [vmem:[#allocation5 + $0x200] ss:$0 sm:$0xff] }
 0x1ba   :  { %v8153_v46 = vadd.f32 %v6649_v51, %v897_v3  ;;  %v905_v15 = vadd.f32 %v6649_v51, %v898_v49  ;;  %v463_v49 = vand.u32 2147483648, %v8081_v38 }
 0x1bb   :  { %2872 = vrot.lane.b32.xlu0 %v8101_v52, %s7576_s16  ;;  %v8141_v52 = vpop.xlane.xlu1 %423 }
 0x1bc   :  { %2854 = vrot.lane.b32.xlu1 %v8106_v56, %s7576_s16  ;;  %v7374_v56 = vpop.eup %7373  ;;  %v929_v63 = vrot.slane %v8153_v46, %v7662_v6  ;;  %v978_v11 = vrot.slane %v905_v15, %v7662_v6  ;;  %v971_v55 = vcombine.high %v905_v15, %v905_v15  ;;  %7391 = vrsqrt.f32 %v8141_v52 }
 0x1bd   :  { %v7376_v62 = vpop.eup %7375  ;;  %v459_v27 = vmul.f32 %v7374_v56, %v8081_v38 }
 0x1be   :  { %v7378_v51 = vpop.eup %7377  ;;  %v8182_v56 = vrot.slane %v929_v63, %v7662_v6  ;;  %v986_v28 = vcombine.high %v978_v11, %v978_v11 }
 0x1bf   :  { %v7380_v32 = vpop.eup %7379  ;;  %v461_v13 = vsel %vm460_vm10, %v8081_v38, %v459_v27  ;;  %v522_v41 = vmul.f32 %v7378_v51, %v8115_v31  ;;  %vm567_vm10 = vcmp.eq.f32.partialorder %v8173_v4, 0.0 }
 0x1c0   :  { %2856 = vrot.lane.b32.xlu1 %v8113_v2, %s7576_s16  ;;  %v6650_v2 = vld [vmem:[#allocation5 + $0x1a8] ss:$0 sm:$0xff]  ;;  %v529_v7 = vmul.f32 %v7380_v32, %v8126_v1  ;;  %v464_v27 = vsel %vm462_vm11, %v463_v49, %v461_v13  ;;  %v8226_v13 = vrot.slane %v978_v11, %v7662_v6  ;;  %v8229_v38 = vrot.slane %v986_v28, %v7662_v6 }
 0x1c1   :  { %v911_v3 = vmul.f32 %v6650_v2, %v7864_v33  ;;  %v515_v33 = vmul.f32 %v7376_v62, %v8103_v53  ;;  %v526_v62 = vand.u32 2147483648, %v8115_v31  ;;  %v912_v10 = vmul.f32 %v6650_v2, %v7867_v37 }
 0x1c2   :  { %v967_v37 = vcombine.high %v8182_v56, %v8182_v56  ;;  %v524_v51 = vsel %vm523_vm14, %v8115_v31, %v522_v41  ;;  %v1023_v41 = vrot.slane %v8182_v56, %v7683_v19  ;;  %vm476_vm11 = vcmp.eq.f32.partialorder %v8137_v8, 0.0 }
 0x1c3   :  { %v8186_v58 = vadd.f32 %v6651_v43, %v911_v3  ;;  %v517_v3 = vsel %vm516_vm12, %v8103_v53, %v515_v33  ;;  %v8215_v15 = vadd.f32 %v6651_v43, %v912_v10  ;;  %v7382_v33 = vpop.eup %7381  ;;  %v531_v10 = vsel %vm530_vm2, %v8126_v1, %v529_v7 }
 0x1c4   :  { %2858 = vrot.lane.b32.xlu1 %v8120_v47, %s7576_s16  ;;  %v814_v47 = vld [vmem:[#allocation5 + $0x198] sm:$0x3]  ;;  %v520_v32 = vsel %vm518_vm13, %v519_v39, %v517_v3  ;;  %v985_v53 = vrot.slane %v971_v55, %v7662_v6  ;;  %v8237_v43 = vrot.slane %v967_v37, %v7683_v19  ;;  %v527_v11 = vsel %vm525_vm15, %v526_v62, %v524_v51  ;;  %v7384_v28 = vpop.eup %7383 }
 0x1c5   :  { %v8161_v30 = vrot.slane %v814_v47, %v7683_v19  ;;  %v8175_v12 = vrot.slane %v814_v47, %v837_v40  ;;  %v937_v47 = vcombine.high %v929_v63, %v929_v63  ;;  %v922_v63 = vcombine.high %v8153_v46, %v8153_v46  ;;  %v7386_v37 = vpop.eup %7385 }
 0x1c6   :  { %v533_v46 = vand.u32 2147483648, %v8126_v1  ;;  %v987_v51 = vcombine.high %v985_v53, %v985_v53  ;;  %v7388_v55 = vpop.eup %7387  ;;  %v8266_v1 = vrot.slane %v985_v53, %v7662_v6  ;;  %v473_v31 = vmul.f32 %v7386_v37, %v8137_v8 }
 0x1c7   :  { %v8212_v2 = vrot.slane %v937_v47, %v7662_v6  ;;  %v819_v39 = vmul.f32 %v8161_v30, %v464_v27  ;;  %v8240_v49 = vrot.slane %v922_v63, %v7662_v6  ;;  %v8250_v56 = vmul.f32 %v8161_v30, %v520_v32 }
 0x1c8   :  { %2874 = vrot.lane.b32.xlu1 %v8129_v57, %s7576_s16  ;;  %v8149_v57 = vpop.xlane.xlu1 %420  ;;  %v466_v47 = vmul.f32 %v7382_v33, %v8131_v50  ;;  %v534_v3 = vsel %vm532_vm3, %v533_v46, %v531_v10  ;;  %v8263_v33 = vmul.f32 %v8161_v30, %v527_v11  ;;  %v8273_v10 = vld [vmem:[#allocation5 + $0x1f0] ss:$0 sm:$0xff]  ;;  %v564_v35 = vmul.f32 %v7388_v55, %v8173_v4 }
 0x1c9   :  { %7393 = vrsqrt.f32 %v8149_v57  ;;  %v8270_v46 = vrot.slane %v8240_v49, %v7662_v6  ;;  %v8277_v27 = vmul.f32 %v8161_v30, %v534_v3  ;;  %v969_v11 = vcombine.high %v8212_v2, %v8212_v2 }
 0x1ca   :  { %7395 = vrsqrt.f32 %v8139_v14  ;;  %v468_v62 = vsel %vm467_vm4, %v8131_v50, %v466_v47  ;;  %v8289_v3 = vrot.slane %v987_v51, %v7662_v6  ;;  %vm488_vm12 = vcmp.eq.f32.partialorder %v8141_v52, inf }
 0x1cb   :  { %7397 = vrsqrt.f32 %v8155_v59  ;;  %v938_v25 = vcombine.high %v8240_v49, %v8240_v49  ;;  %vm490_vm13 = vcmp.eq.f32.partialorder %v8141_v52, 0.0  ;;  %vm481_vm14 = vcmp.eq.f32.partialorder %v8149_v57, inf }
 0x1cc   :  { %v8157_v48 = vpop.xlane.xlu1 %426  ;;  %11231 = vst [vmem:[#allocation66_spill] sm:$0xff] %v8289_v3  ;;  %vm483_vm15 = vcmp.eq.f32.partialorder %v8149_v57, 0.0  ;;  %vm537_vm4 = vcmp.eq.f32.partialorder %v8139_v14, inf }
 0x1cd   :  { %7399 = vrsqrt.f32 %v8157_v48  ;;  %vm495_vm2 = vcmp.eq.f32.partialorder %v8157_v48, inf }
 0x1d0   :  { %v8189_v40 = vpop.xlane.xlu1 %429 }
 0x1d1   :  { %7401 = vrsqrt.f32 %v8189_v40  ;;  %vm502_vm3 = vcmp.eq.f32.partialorder %v8189_v40, inf }
 0x1d4   :  { %v8223_v44 = vpop.xlane.xlu1 %432 }
 0x1d5   :  { %7403 = vrsqrt.f32 %v8223_v44 }
 0x1f0   :  { %v768_v63 = vpop.xlane.xlu1 %767 }
 0x1f1   :  { %v839_v32 = vmul.f32 %v8175_v12, %v768_v63  ;;  %v7390_v63 = vpop.eup %7389 }
 0x1f2   :  { %v7392_v7 = vpop.eup %7391  ;;  %v8303_v51 = vmul.f32 %v7390_v63, %v8145_v0 }
 0x1f3   :  { %v855_v53 = vadd.f32 %v839_v32, %v819_v39  ;;  %v8295_v39 = vmul.f32 %v7384_v28, %v8135_v54  ;;  %v471_v32 = vsel %vm469_vm5, %v470_v42, %v468_v62  ;;  %v487_v50 = vmul.f32 %v7392_v7, %v8141_v52  ;;  %v7394_v29 = vpop.eup %7393 }
 0x1f4   :  { %v8285_v36 = vpop.xlane.xlu1 %791  ;;  %v8309_v28 = vrot.slane %v969_v11, %v7683_v19  ;;  %v566_v42 = vsel %vm565_vm7, %v8173_v4, %v564_v35  ;;  %v1019_v62 = vcombine.high %v8289_v3, %v8289_v3  ;;  %v7396_v63 = vpop.eup %7395  ;;  %v568_v35 = vand.u32 2147483648, %v8173_v4 }
 0x1f5   :  { %v876_v60 = vadd.f32 %v8273_v10, %v855_v53  ;;  %v475_v53 = vsel %vm474_vm6, %v8137_v8, %v473_v31  ;;  %v7398_v3 = vpop.eup %7397  ;;  %v491_v8 = vand.u32 2147483648, %v8141_v52  ;;  %v8334_v23 = vmul.f32 %v7396_v63, %v8139_v14 }
 0x1f6   :  { %v8299_v37 = vpop.xlane.xlu0 %794  ;;  %v478_v11 = vsel %vm476_vm11, %v477_v26, %v475_v53  ;;  %v569_v26 = vsel %vm567_vm10, %v568_v35, %v566_v42  ;;  %v7400_v49 = vpop.eup %7399  ;;  %vm497_vm5 = vcmp.eq.f32.partialorder %v8157_v48, 0.0  ;;  %vm504_vm6 = vcmp.eq.f32.partialorder %v8189_v40, 0.0 }
 0x1f7   :  { %v1100_v55 = vadd.f32 %v1023_v41, %v876_v60  ;;  %v820_v41 = vmul.f32 %v8161_v30, %v471_v32  ;;  %v480_v32 = vmul.f32 %v7394_v29, %v8149_v57  ;;  %v8340_v29 = vrot.slane %v1019_v62, %v7683_v19 }
 0x1f8   :  { %v771_v47 = vpop.xlane.xlu1 %770  ;;  %v821_v4 = vmul.f32 %v8161_v30, %v478_v11  ;;  %vm539_vm7 = vcmp.eq.f32.partialorder %v8139_v14, 0.0  ;;  %vm558_vm10 = vcmp.eq.f32.partialorder %v8155_v59, inf  ;;  %vm560_vm11 = vcmp.eq.f32.partialorder %v8155_v59, 0.0 }
 0x1f9   :  { %v1116_v60 = vadd.f32 %v1100_v55, %v8186_v58  ;;  %v840_v7 = vmul.f32 %v8175_v12, %v771_v47  ;;  %v489_v55 = vsel %vm488_vm12, %v8141_v52, %v487_v50  ;;  %v834_v52 = vmul.f32 %v8161_v30, %v569_v26 }
 0x1fa   :  { %v8320_v31 = vpop.xlane.xlu0 %797  ;;  %v492_v35 = vsel %vm490_vm13, %v491_v8, %v489_v55  ;;  %v494_v55 = vmul.f32 %v7400_v49, %v8157_v48  ;;  %vm544_vm12 = vcmp.eq.f32.partialorder %v8135_v54, inf  ;;  %vm551_vm13 = vcmp.eq.f32.partialorder %v8145_v0, inf }
 0x1fb   :  { %v1132_v24 = vmax.f32 %v1116_v60, 0.0  ;;  %v856_v5 = vadd.f32 %v840_v7, %v820_v41  ;;  %v7402_v41 = vpop.eup %7401 }
 0x1fc   :  { %v774_v47 = vpop.xlane.xlu1 %773 }
 0x1fd   :  { %v1276_v60 = vmul.f32 %v7848_v18, %v1132_v24  ;;  %v877_v50 = vadd.f32 %v8273_v10, %v856_v5  ;;  %v841_v42 = vmul.f32 %v8175_v12, %v774_v47  ;;  %v11232_v24 = vrot.slane %v8212_v2, %v7683_v19 }
 0x1fe   :  { %v8344_v7 = vpop.xlane.xlu0 %803  ;;  %v482_v5 = vsel %vm481_vm14, %v8149_v57, %v480_v32  ;;  %v484_v47 = vand.u32 2147483648, %v8149_v57  ;;  %v823_v2 = vmul.f32 %v8161_v30, %v492_v35  ;;  %v501_v32 = vmul.f32 %v7402_v41, %v8189_v40 }
 0x1ff   :  { %v1101_v63 = vadd.f32 %v11232_v24, %v877_v50  ;;  %v857_v53 = vadd.f32 %v841_v42, %v821_v4  ;;  %v8354_v11 = vmul.f32 %v1276_v60, %v7730_v61  ;;  %v8371_v4 = vrot.slane %v938_v25, %v7662_v6 }
 0x200   :  { %v780_v18 = vpop.xlane.xlu1 %779  ;;  %v485_v49 = vsel %vm483_vm15, %v484_v47, %v482_v5  ;;  %v557_v57 = vmul.f32 %v7398_v3, %v8155_v59  ;;  %v496_v35 = vsel %vm495_vm2, %v8157_v48, %v494_v55  ;;  %v498_v5 = vand.u32 2147483648, %v8157_v48 }
 0x201   :  { %v1117_v8 = vadd.f32 %v1101_v63, %v8186_v58  ;;  %v878_v26 = vadd.f32 %v8273_v10, %v857_v53  ;;  %v843_v50 = vmul.f32 %v8175_v12, %v780_v18  ;;  %6897 = vmatprep.mubr.msk.f32.mxu1 %vm1491_vm1, %v8354_v11  ;;  %v822_v24 = vmul.f32 %v8161_v30, %v485_v49 }
 0x202   :  { %v8367_v60 = vpop.xlane.xlu0 %806  ;;  %v503_v25 = vsel %vm502_vm3, %v8189_v40, %v501_v32  ;;  %v11233_v49 = vrot.slane %v8270_v46, %v7683_v19  ;;  %vm546_vm14 = vcmp.eq.f32.partialorder %v8135_v54, 0.0  ;;  %vm509_vm15 = vcmp.eq.f32.partialorder %v8223_v44, inf }
 0x203   :  { %v1133_v41 = vmax.f32 %v1117_v8, 0.0  ;;  %v1102_v53 = vadd.f32 %v8237_v43, %v878_v26  ;;  %v859_v42 = vadd.f32 %v843_v50, %v823_v2  ;;  %v505_v43 = vand.u32 2147483648, %v8189_v40 }
 0x204   :  { %v777_v18 = vpop.xlane.xlu1 %776  ;;  %v499_v26 = vsel %vm497_vm5, %v498_v5, %v496_v35  ;;  %vm553_vm2 = vcmp.eq.f32.partialorder %v8145_v0, 0.0  ;;  %vm511_vm3 = vcmp.eq.f32.partialorder %v8223_v44, 0.0  ;;  %vm2306_vm5 = vcmask 1042434  }
 0x205   :  { %v842_v63 = vmul.f32 %v8175_v12, %v777_v18  ;;  %v1118_v47 = vadd.f32 %v1102_v53, %v8186_v58  ;;  %v880_v3 = vadd.f32 %v8273_v10, %v859_v42  ;;  %v1277_v50 = vmul.f32 %v7979_v16, %v1133_v41 }
 0x206   :  { %v813_v8 = vpop.xlane.xlu0 %812  ;;  %v506_v42 = vsel %vm504_vm6, %v505_v43, %v503_v25  ;;  %v824_v41 = vmul.f32 %v8161_v30, %v499_v26  ;;  %v559_v25 = vsel %vm558_vm10, %v8155_v59, %v557_v57  ;;  %v847_v26 = vmul.f32 %v8175_v12, %v8285_v36 }
 0x207   :  { %v858_v55 = vadd.f32 %v842_v63, %v822_v24  ;;  %v854_v2 = vmul.f32 %v8175_v12, %v813_v8  ;;  %v1134_v32 = vmax.f32 %v1118_v47, 0.0  ;;  %v1104_v53 = vadd.f32 %v11233_v49, %v880_v3  ;;  %v7404_v47 = vpop.eup %7403 }
 0x208   :  { %v783_v18 = vpop.xlane.xlu1 %782  ;;  %v561_v24 = vand.u32 2147483648, %v8155_v59  ;;  %v538_v36 = vsel %vm537_vm4, %v8139_v14, %v8334_v23  ;;  %vm2304_vm4 = vcmask 1041409   ;;  %vm2308_vm6 = vcmask 1043459  }
 0x209   :  { %v879_v62 = vadd.f32 %v8273_v10, %v858_v55  ;;  %v870_v48 = vadd.f32 %v854_v2, %v834_v52  ;;  %v1120_v40 = vadd.f32 %v1104_v53, %v8186_v58  ;;  %v844_v35 = vmul.f32 %v8175_v12, %v783_v18 }
 0x20a   :  { %v825_v52 = vmul.f32 %v8161_v30, %v506_v42  ;;  %v1278_v3 = vmul.f32 %v7991_v34, %v1134_v32  ;;  %v8406_v55 = vmul.f32 %v1277_v50, %v7730_v61  ;;  %v1043_v32 = vrot.slane %v8371_v4, %v7683_v19 }
 0x20b   :  { %v1103_v63 = vadd.f32 %v8309_v28, %v879_v62  ;;  %v891_v5 = vadd.f32 %v8273_v10, %v870_v48  ;;  %v1136_v8 = vmax.f32 %v1120_v40, 0.0  ;;  %v860_v43 = vadd.f32 %v844_v35, %v824_v41 }
 0x20c   :  { %v786_v2 = vpop.xlane.xlu1 %785  ;;  %6898 = vmatmul.mubr.msk.f32.vlgmr.msra.gmra.mrb[4].mxu1 %vm1491_vm1, %v8406_v55  ;;  %v562_v50 = vsel %vm560_vm11, %v561_v24, %v559_v25  ;;  %v508_v42 = vmul.f32 %v7404_v47, %v8223_v44  ;;  %v848_v48 = vmul.f32 %v8175_v12, %v8299_v37  ;;  %v8434_v23 = vmul.f32 %v1278_v3, %v7730_v61 }
 0x20d   :  { %v1119_v28 = vadd.f32 %v1103_v63, %v8186_v58  ;;  %v1115_v62 = vadd.f32 %v8340_v29, %v891_v5  ;;  %v845_v57 = vmul.f32 %v8175_v12, %v786_v2  ;;  %v881_v49 = vadd.f32 %v8273_v10, %v860_v43 }
 0x20e   :  { %v1280_v40 = vmul.f32 %v8010_v45, %v1136_v8  ;;  %v863_v35 = vadd.f32 %v847_v26, %v8250_v56  ;;  %v11234_v63 = vcombine.high %v8270_v46, %v8270_v46  ;;  %6900 = vmatprep.mubr.msk.f32.mxu1 %vm1491_vm1, %v8434_v23  ;;  %v11235_v25 = vand.u32 2147483648, %v8139_v14 }
 0x20f   :  { %v1135_v29 = vmax.f32 %v1119_v28, 0.0  ;;  %v8427_v53 = vadd.f32 %v1115_v62, %v8215_v15  ;;  %v861_v18 = vadd.f32 %v845_v57, %v825_v52  ;;  %v1105_v41 = vadd.f32 %v1043_v32, %v881_v49 }
 0x210   :  { %v801_v59 = vpop.xlane.xlu1 %800  ;;  %v1047_v5 = vrot.slane %v11234_v63, %v7683_v19  ;;  %v541_v47 = vsel %vm539_vm7, %v11235_v25, %v538_v36  ;;  %v833_v56 = vmul.f32 %v8161_v30, %v562_v50  ;;  %v1017_v3 = vcombine.high %v8266_v1, %v8266_v1 }
 0x211   :  { %v1279_v24 = vmul.f32 %v7850_v20, %v1135_v29  ;;  %v882_v52 = vadd.f32 %v8273_v10, %v861_v18  ;;  %v1121_v37 = vadd.f32 %v1105_v41, %v8186_v58  ;;  %v512_v43 = vand.u32 2147483648, %v8223_v44 }
 0x212   :  { %v864_v2 = vadd.f32 %v848_v48, %v8263_v33  ;;  %v8461_v28 = vmul.f32 %v1280_v40, %v7730_v61  ;;  %v510_v62 = vsel %vm509_vm15, %v8223_v44, %v508_v42  ;;  %v884_v57 = vadd.f32 %v8273_v10, %v863_v35 }
 0x213   :  { %v1106_v46 = vadd.f32 %v1047_v5, %v882_v52  ;;  %v8455_v8 = vmul.f32 %v1279_v24, %v7730_v61  ;;  %v1137_v26 = vmax.f32 %v1121_v37, 0.0  ;;  %v849_v32 = vmul.f32 %v8175_v12, %v8320_v31 }
 0x214   :  { %v810_v14 = vpop.xlane.xlu1 %809  ;;  %v545_v33 = vsel %vm544_vm12, %v8135_v54, %v8295_v39  ;;  %v850_v50 = vmul.f32 %v8175_v12, %v801_v59  ;;  %v513_v42 = vsel %vm511_vm3, %v512_v43, %v510_v62  ;;  %v885_v48 = vadd.f32 %v8273_v10, %v864_v2 }
 0x215   :  { %v1122_v49 = vadd.f32 %v1106_v46, %v8186_v58  ;;  %v853_v36 = vmul.f32 %v8175_v12, %v810_v14  ;;  %6901 = vmatmul.mubr.msk.f32.gmra.mrb[6].mxu1 %vm1491_vm1, %v8455_v8  ;;  %v1281_v31 = vmul.f32 %v8026_v9, %v1137_v26  ;;  %v552_v39 = vsel %vm551_vm13, %v8145_v0, %v8303_v51 }
 0x216   :  { %6903 = vmatprep.mubr.msk.f32.mxu1 %vm1491_vm1, %v8461_v28  ;;  %v830_v40 = vmul.f32 %v8161_v30, %v541_v47  ;;  %v1079_v41 = vrot.slane %v1017_v3, %v7683_v19  ;;  %v11236_v44 = vrot.slane %v8226_v13, %v7683_v19  ;;  %v865_v24 = vadd.f32 %v849_v32, %v8277_v27 }
 0x217   :  { %v1138_v29 = vmax.f32 %v1122_v49, 0.0  ;;  %v869_v18 = vadd.f32 %v853_v36, %v833_v56  ;;  %v826_v37 = vmul.f32 %v8161_v30, %v513_v42  ;;  %v970_v51 = vcombine.high %v8371_v4, %v8371_v4 }
 0x218   :  { %v789_v59 = vpop.xlane.xlu1 %788  ;;  %v1108_v35 = vadd.f32 %v11236_v44, %v884_v57  ;;  %v866_v52 = vadd.f32 %v850_v50, %v830_v40  ;;  %v554_v47 = vand.u32 2147483648, %v8145_v0  ;;  %v8500_v3 = vmul.f32 %v1281_v31, %v7730_v61 }
 0x219   :  { %v1282_v63 = vmul.f32 %v7852_v21, %v1138_v29  ;;  %v890_v5 = vadd.f32 %v8273_v10, %v869_v18  ;;  %v846_v25 = vmul.f32 %v8175_v12, %v789_v59  ;;  %v11237_v46 = vrot.slane %v8229_v38, %v7683_v19 }
 0x21a   :  { %v11238_v2 = vand.u32 2147483648, %v8135_v54  ;;  %v1018_v26 = vcombine.high %v8229_v38, %v8229_v38  ;;  %v1124_v62 = vadd.f32 %v1108_v35, %v8215_v15  ;;  %v886_v57 = vadd.f32 %v8273_v10, %v865_v24  ;;  %6904 = vmatmul.mubr.msk.f32.gmra.mrb[8].mxu1 %vm1491_vm1, %v8500_v3 }
 0x21b   :  { %v1114_v56 = vadd.f32 %v1079_v41, %v890_v5  ;;  %v8503_v27 = vmul.f32 %v1282_v63, %v7730_v61  ;;  %v1109_v43 = vadd.f32 %v11237_v46, %v885_v48  ;;  %v862_v14 = vadd.f32 %v846_v25, %v826_v37 }
 0x21c   :  { %v548_v4 = vsel %vm546_vm14, %v11238_v2, %v545_v33  ;;  %v555_v32 = vsel %vm553_vm2, %v554_v47, %v552_v39  ;;  %v851_v54 = vmul.f32 %v8175_v12, %v8344_v7  ;;  %v887_v36 = vadd.f32 %v8273_v10, %v866_v52 }
 0x21d   :  { %v1130_v49 = vadd.f32 %v1114_v56, %v8215_v15  ;;  %v1051_v38 = vrot.slane %v970_v51, %v7683_v19  ;;  %v883_v33 = vadd.f32 %v8273_v10, %v862_v14  ;;  %6906 = vmatprep.mubr.msk.f32.mxu1 %vm1491_vm1, %v8503_v27  ;;  %v11239_v0 = vcombine.high %v8226_v13, %v8226_v13  ;;  %v11241_v56 = vld [vmem:[#allocation66_spill] sm:$0xff]  ;;  %v11243_v14 = vld [vmem:[#allocation23_spill] sm:$0xff] }
 0x21e   :  { %v852_v31 = vmul.f32 %v8175_v12, %v8367_v60  ;;  %v1125_v29 = vadd.f32 %v1109_v43, %v8215_v15  ;;  %v831_v7 = vmul.f32 %v8161_v30, %v548_v4  ;;  %v1067_v18 = vrot.slane %v1018_v26, %v7683_v19  ;;  %v11242_v43 = vld [vmem:[#allocation17_spill] sm:$0xff] }
 0x21f   :  { %v1063_v50 = vrot.slane %v11239_v0, %v7683_v19  ;;  %v1107_v42 = vadd.f32 %v1051_v38, %v883_v33  ;;  %v1140_v48 = vmax.f32 %v1124_v62, 0.0  ;;  %v832_v40 = vmul.f32 %v8161_v30, %v555_v32  ;;  %v11240_v30 = vld [vmem:[#allocation22_spill] sm:$0xff]  ;;  %v11244_v32 = vld [vmem:[#allocation24_spill] sm:$0xff] }
 0x220   :  { %v867_v41 = vadd.f32 %v851_v54, %v831_v7  ;;  %v1111_v59 = vadd.f32 %v1067_v18, %v887_v36  ;;  %v1141_v35 = vmax.f32 %v1125_v29, 0.0  ;;  %v1075_v46 = vrot.slane %v11241_v56, %v7683_v19  ;;  %v11246_v7 = vld [vmem:[#allocation64_spill] sm:$0xff] }
 0x221   :  { %v1110_v39 = vadd.f32 %v1063_v50, %v886_v57  ;;  %v1123_v44 = vadd.f32 %v1107_v42, %v8186_v58  ;;  %v868_v13 = vadd.f32 %v852_v31, %v832_v40  ;;  %v1284_v12 = vmul.f32 %v8059_v17, %v1140_v48  ;;  %v11245_v31 = vld [vmem:[#allocation25_spill] sm:$0xff] }
 0x222   :  { %v888_v63 = vadd.f32 %v8273_v10, %v867_v41  ;;  %v1127_v5 = vadd.f32 %v1111_v59, %v8215_v15  ;;  %v1285_v51 = vmul.f32 %v11240_v30, %v1141_v35  ;;  %v1071_v58 = vrot.slane %v8266_v1, %v7683_v19  ;;  %v8592_v41 = vpop.permute.xlu1 %1273 }
 0x223   :  { %v1139_v24 = vmax.f32 %v1123_v44, 0.0  ;;  %v1126_v60 = vadd.f32 %v1110_v39, %v8215_v15  ;;  %v889_v37 = vadd.f32 %v8273_v10, %v868_v13  ;;  %v8554_v2 = vmul.f32 %v1284_v12, %v11242_v43  ;;  %11248 = vst [vmem:[#allocation67_spill] sm:$0xff] %v8592_v41 }
 0x224   :  { %v1112_v4 = vadd.f32 %v1071_v58, %v888_v63  ;;  %v1143_v26 = vmax.f32 %v1127_v5, 0.0  ;;  %v8561_v1 = vmul.f32 %v1285_v51, %v11242_v43  ;;  %v1146_v42 = vmax.f32 %v1130_v49, 0.0 }
 0x225   :  { %v1283_v52 = vmul.f32 %v7854_v22, %v1139_v24  ;;  %v1142_v47 = vmax.f32 %v1126_v60, 0.0  ;;  %v1113_v10 = vadd.f32 %v1075_v46, %v889_v37  ;;  %v1147_v59 = vmax.f32 %v8427_v53, 0.0 }
 0x226   :  { %v1128_v57 = vadd.f32 %v1112_v4, %v8215_v15  ;;  %v1287_v54 = vmul.f32 %v11244_v32, %v1143_v26  ;;  %v8602_v44 = vpop.permute.xlu1 %1825  ;;  %vm2310_vm7 = vcmask 1044484   ;;  %vm2312_vm10 = vcmask 1045509  }
 0x227   :  { %v8549_v25 = vmul.f32 %v1283_v52, %v7730_v61  ;;  %v1286_v62 = vmul.f32 %v11243_v14, %v1142_v47  ;;  %v1129_v36 = vadd.f32 %v1113_v10, %v8215_v15  ;;  %v8581_v15 = vpop.permute.xlu0 %1269  ;;  %11249 = vst [vmem:[#allocation68_spill] sm:$0xff] %v8602_v44  ;;  %v1291_v13 = vmul.f32 %v8592_v41, %v1147_v59 }
 0x228   :  { %v1144_v33 = vmax.f32 %v1128_v57, 0.0  ;;  %v8573_v0 = vmul.f32 %v1287_v54, %v11242_v43  ;;  %11247 = vst [vmem:[#allocation66_spill] sm:$0xff] %v8581_v15  ;;  %v1290_v39 = vmul.f32 %v8581_v15, %v1146_v42  ;;  %vm2314_vm11 = vcmask 1046534  }
 0x229   :  { %6907 = vmatmul.mubr.msk.f32.gmra.mrb[10].mxu1 %vm1491_vm1, %v8549_v25  ;;  %v8570_v38 = vmul.f32 %v1286_v62, %v11242_v43  ;;  %v1145_v50 = vmax.f32 %v1129_v36, 0.0  ;;  %v8606_v35 = vmul.f32 %v1291_v13, %v11242_v43  ;;  %vm2316_vm12 = vcmask 1047559  }
 0x22a   :  { %6909 = vmatprep.mubr.msk.f32.mxu1 %vm1491_vm1, %v8554_v2  ;;  %v1288_v29 = vmul.f32 %v11245_v31, %v1144_v33  ;;  %v8597_v49 = vmul.f32 %v1290_v39, %v11242_v43  ;;  %v8610_v24 = vpop.permute.xlu1 %1853  ;;  %vm2439_vm13 = vcmask 392192   ;;  %vm4149_vm14 = vcmask 523264  }
 0x22b   :  { %v1289_v18 = vmul.f32 %v11246_v7, %v1145_v50  ;;  %11250 = vst [vmem:[#allocation69_spill] sm:$0xff] %v8610_v24  ;;  %v1992_v12 = vsub.f32 %v8554_v2, %v8610_v24  ;;  %v1993_v53 = vsub.f32 %v8561_v1, %v8610_v24  ;;  %v1994_v60 = vsub.f32 %v8570_v38, %v8610_v24 }
 0x22c   :  { %v8584_v48 = vmul.f32 %v1288_v29, %v11242_v43  ;;  %v1995_v58 = vsub.f32 %v8573_v0, %v8610_v24  ;;  %vm4911_vm2 = vcmask 31744  }
 0x22d   :  { %6910 = vmatmul.mubr.msk.f32.gmra.mrb[12].mxu1 %vm1491_vm1, %v8561_v1  ;;  %v8588_v40 = vmul.f32 %v1289_v18, %v11242_v43  ;;  %v2056_v63 = vsel %vm1491_vm1, %v1992_v12, -inf  ;;  %v2063_v5 = vsel %vm1491_vm1, %v1993_v53, -inf  ;;  %v2070_v52 = vsel %vm1491_vm1, %v1994_v60, -inf }
 0x22e   :  { %6912 = vmatprep.mubr.msk.f32.mxu1 %vm1491_vm1, %v8570_v38  ;;  %v2057_v37 = vrot.slane %v2056_v63, 4  ;;  %v2064_v51 = vrot.slane %v2063_v5, 4  ;;  %v2071_v47 = vrot.slane %v2070_v52, 4  ;;  %v2077_v4 = vsel %vm1491_vm1, %v1995_v58, -inf }
 0x22f   :  { %v2078_v10 = vrot.slane %v2077_v4, 4  ;;  %v1996_v54 = vsub.f32 %v8584_v48, %v8610_v24  ;;  %v1997_v36 = vsub.f32 %v8588_v40, %v8610_v24 }
 0x230   :  { %v2058_v56 = vmax.f32 %v2056_v63, %v2057_v37  ;;  %v2065_v46 = vmax.f32 %v2063_v5, %v2064_v51  ;;  %v2072_v26 = vmax.f32 %v2070_v52, %v2071_v47 }
 0x231   :  { %6913 = vmatmul.mubr.msk.f32.gmra.mrb[14].mxu1 %vm1491_vm1, %v8573_v0  ;;  %v2079_v50 = vmax.f32 %v2077_v4, %v2078_v10  ;;  %v2084_v42 = vsel %vm1491_vm1, %v1996_v54, -inf  ;;  %v2091_v53 = vsel %vm1491_vm1, %v1997_v36, -inf }
 0x232   :  { %6915 = vmatprep.mubr.msk.f32.mxu1 %vm1491_vm1, %v8584_v48  ;;  %v2059_v62 = vrot.slane %v2058_v56, 2  ;;  %v2066_v57 = vrot.slane %v2065_v46, 2  ;;  %v2073_v33 = vrot.slane %v2072_v26, 2  ;;  %v2085_v12 = vrot.slane %v2084_v42, 4 }
 0x233   :  { %v2080_v13 = vrot.slane %v2079_v50, 2  ;;  %v2092_v5 = vrot.slane %v2091_v53, 4 }
 0x234   :  { %v2060_v29 = vmax.f32 %v2058_v56, %v2059_v62  ;;  %v2067_v18 = vmax.f32 %v2065_v46, %v2066_v57  ;;  %v2074_v59 = vmax.f32 %v2072_v26, %v2073_v33  ;;  %v2086_v63 = vmax.f32 %v2084_v42, %v2085_v12 }
 0x235   :  { %6916 = vmatmul.mubr.msk.f32.gmra.mrb[16].mxu1 %vm1491_vm1, %v8588_v40  ;;  %v2081_v51 = vmax.f32 %v2079_v50, %v2080_v13  ;;  %v2093_v4 = vmax.f32 %v2091_v53, %v2092_v5 }
 0x236   :  { %6918 = vmatprep.mubr.msk.f32.mxu1 %vm1491_vm1, %v8597_v49  ;;  %v2061_v52 = vrot.slane %v2060_v29, 1  ;;  %v2068_v37 = vrot.slane %v2067_v18, 1  ;;  %v2075_v58 = vrot.slane %v2074_v59, 1  ;;  %v2087_v47 = vrot.slane %v2086_v63, 2 }
 0x237   :  { %v2094_v46 = vrot.slane %v2093_v4, 2  ;;  %v2082_v57 = vrot.slane %v2081_v51, 1 }
 0x238   :  { %v2088_v56 = vmax.f32 %v2086_v63, %v2087_v47  ;;  %v2062_v10 = vmax.f32 %v2060_v29, %v2061_v52  ;;  %v2069_v62 = vmax.f32 %v2067_v18, %v2068_v37  ;;  %v2076_v54 = vmax.f32 %v2074_v59, %v2075_v58 }
 0x239   :  { %6919 = vmatmul.mubr.msk.f32.gmra.mrb[18].mxu1 %vm1491_vm1, %v8606_v35  ;;  %v2095_v33 = vmax.f32 %v2093_v4, %v2094_v46  ;;  %v2083_v36 = vmax.f32 %v2081_v51, %v2082_v57  ;;  %v1762_v59 = vsel %vm1491_vm1, %v8554_v2, 0.0  ;;  %v1769_v63 = vsel %vm1491_vm1, %v8561_v1, 0.0 }
 0x23a   :  { %v2089_v26 = vrot.slane %v2088_v56, 1  ;;  %v2386_v42 = vsel %vm2304_vm4, %v2069_v62, %v2062_v10  ;;  %v1763_v5 = vrot.slane %v1762_v59, 4  ;;  %v1770_v52 = vrot.slane %v1769_v63, 4 }
 0x23b   :  { %v2096_v30 = vrot.slane %v2095_v33, 1  ;;  %v2387_v50 = vsel %vm2306_vm5, %v2076_v54, %v2386_v42  ;;  %v1866_v46 = vadd.f32 %v8610_v24, %v8570_v38  ;;  %v1783_v10 = vsel %vm1491_vm1, %v8573_v0, 0.0 }
 0x23c   :  { %v2090_v12 = vmax.f32 %v2088_v56, %v2089_v26  ;;  %v2388_v53 = vsel %vm2308_vm6, %v2083_v36, %v2387_v50  ;;  %v1764_v58 = vadd.f32 %v1763_v5, %v1762_v59  ;;  %v1771_v4 = vadd.f32 %v1770_v52, %v1769_v63 }
 0x23d   :  { %v2097_v13 = vmax.f32 %v2095_v33, %v2096_v30  ;;  %v1865_v30 = vadd.f32 %v8610_v24, %v8561_v1  ;;  %v1867_v62 = vadd.f32 %v8610_v24, %v8573_v0  ;;  %v1868_v57 = vadd.f32 %v8610_v24, %v8584_v48 }
 0x23e   :  { %v2389_v29 = vsel %vm2310_vm7, %v2090_v12, %v2388_v53  ;;  %v1765_v54 = vrot.slane %v1764_v58, 2  ;;  %v1772_v26 = vrot.slane %v1771_v4, 2  ;;  %v1869_v33 = vadd.f32 %v8610_v24, %v8588_v40 }
 0x23f   :  { %v8637_v18 = vsel %vm2312_vm10, %v2097_v13, %v2389_v29  ;;  %v1935_v51 = vsel %vm1491_vm1, %v1865_v30, inf  ;;  %v1776_v42 = vsel %vm1491_vm1, %v8570_v38, 0.0  ;;  %v1784_v12 = vrot.slane %v1783_v10, 4 }
 0x240   :  { %11251 = vst [vmem:[#allocation70_spill] sm:$0xff] %v8637_v18  ;;  %v1936_v56 = vrot.slane %v1935_v51, 4  ;;  %v1942_v13 = vsel %vm1491_vm1, %v1866_v46, inf  ;;  %v1790_v53 = vsel %vm1491_vm1, %v8584_v48, 0.0  ;;  %v1797_v63 = vsel %vm1491_vm1, %v8588_v40, 0.0 }
 0x241   :  { %v1943_v59 = vrot.slane %v1942_v13, 4  ;;  %v1956_v52 = vsel %vm1491_vm1, %v1868_v57, inf  ;;  %v1791_v7 = vrot.slane %v1790_v53, 4  ;;  %v1798_v14 = vrot.slane %v1797_v63, 4 }
 0x242   :  { %v1937_v50 = vmin.f32 %v1935_v51, %v1936_v56  ;;  %v1957_v41 = vrot.slane %v1956_v52, 4  ;;  %v1963_v51 = vsel %vm1491_vm1, %v1869_v33, inf  ;;  %v1777_v56 = vrot.slane %v1776_v42, 4 }
 0x243   :  { %v1964_v31 = vrot.slane %v1963_v51, 4  ;;  %v1766_v45 = vadd.f32 %v1765_v54, %v1764_v58  ;;  %v1785_v20 = vadd.f32 %v1784_v12, %v1783_v10  ;;  %v1799_v16 = vadd.f32 %v1798_v14, %v1797_v63 }
 0x244   :  { %v1938_v30 = vrot.slane %v1937_v50, 2 }
 0x245   :  { %v1965_v9 = vmin.f32 %v1963_v51, %v1964_v31  ;;  %v1786_v19 = vrot.slane %v1785_v20, 2 }
 0x246   :  { %v8629_v39 = vpop.f32.mrb[2].mxu1  ;;  %v1939_v46 = vmin.f32 %v1937_v50, %v1938_v30 }
 0x247   :  { %v6892_v60 = vpop.f32.mrb[3].mxu1  ;;  %v1966_v33 = vrot.slane %v1965_v9, 2 }
 0x248   :  { %v1864_v60 = vadd.f32 %v8610_v24, %v8554_v2  ;;  %v1940_v22 = vrot.slane %v1939_v46, 1 }
 0x24a   :  { %v1928_v37 = vsel %vm1491_vm1, %v1864_v60, inf  ;;  %v1949_v60 = vsel %vm1491_vm1, %v1867_v62, inf  ;;  %v1958_v62 = vmin.f32 %v1956_v52, %v1957_v41  ;;  %v1941_v50 = vmin.f32 %v1939_v46, %v1940_v22 }
 0x24b   :  { %v1929_v47 = vrot.slane %v1928_v37, 4  ;;  %v1950_v5 = vrot.slane %v1949_v60, 4  ;;  %v1967_v41 = vmin.f32 %v1965_v9, %v1966_v33  ;;  %v1767_v52 = vrot.slane %v1766_v45, 1 }
 0x24d   :  { %v1930_v36 = vmin.f32 %v1928_v37, %v1929_v47  ;;  %v1944_v47 = vmin.f32 %v1942_v13, %v1943_v59  ;;  %v1951_v15 = vmin.f32 %v1949_v60, %v1950_v5  ;;  %v1773_v13 = vadd.f32 %v1772_v26, %v1771_v4 }
 0x24e   :  { %v1792_v5 = vadd.f32 %v1791_v7, %v1790_v53  ;;  %v1768_v26 = vadd.f32 %v1767_v52, %v1766_v45  ;;  %v1787_v7 = vadd.f32 %v1786_v19, %v1785_v20 }
 0x24f   :  { %v1931_v29 = vrot.slane %v1930_v36, 2  ;;  %v1945_v32 = vrot.slane %v1944_v47, 2  ;;  %v1952_v21 = vrot.slane %v1951_v15, 2  ;;  %v1774_v58 = vrot.slane %v1773_v13, 1 }
 0x250   :  { %v8674_v63 = vmul.f32 %v8602_v44, %v1768_v26  ;;  %v1788_v45 = vrot.slane %v1787_v7, 1 }
 0x251   :  { %v1932_v37 = vmin.f32 %v1930_v36, %v1931_v29  ;;  %v1946_v57 = vmin.f32 %v1944_v47, %v1945_v32  ;;  %v1959_v36 = vrot.slane %v1958_v62, 2  ;;  %v1778_v29 = vadd.f32 %v1777_v56, %v1776_v42 }
 0x252   :  { %v1953_v59 = vmin.f32 %v1951_v15, %v1952_v21  ;;  %v1968_v32 = vrot.slane %v1967_v41, 1  ;;  %v1793_v21 = vrot.slane %v1792_v5, 2  ;;  %v1800_v15 = vrot.slane %v1799_v16, 2 }
 0x253   :  { %v1933_v17 = vrot.slane %v1932_v37, 1  ;;  %v1947_v60 = vrot.slane %v1946_v57, 1  ;;  %v1960_v30 = vmin.f32 %v1958_v62, %v1959_v36  ;;  %v1779_v10 = vrot.slane %v1778_v29, 2 }
 0x254   :  { %v1954_v18 = vrot.slane %v1953_v59, 1  ;;  %v1969_v14 = vmin.f32 %v1967_v41, %v1968_v32  ;;  %v1775_v42 = vadd.f32 %v1774_v58, %v1773_v13  ;;  %v2120_v20 = vsub.f32 %v8554_v2, %v8674_v63 }
 0x255   :  { %v1934_v34 = vmin.f32 %v1932_v37, %v1933_v17  ;;  %v1948_v61 = vmin.f32 %v1946_v57, %v1947_v60  ;;  %v1961_v31 = vrot.slane %v1960_v30, 1  ;;  %v1780_v12 = vadd.f32 %v1779_v10, %v1778_v29 }
 0x256   :  { %v1955_v54 = vmin.f32 %v1953_v59, %v1954_v18  ;;  %v1794_v37 = vadd.f32 %v1793_v21, %v1792_v5  ;;  %v1789_v46 = vadd.f32 %v1788_v45, %v1787_v7  ;;  %v1706_v62 = vsel %vm1491_vm1, %v8354_v11, 0.0 }
 0x257   :  { %v2350_v4 = vsel %vm2304_vm4, %v1941_v50, %v1934_v34  ;;  %v1962_v17 = vmin.f32 %v1960_v30, %v1961_v31  ;;  %v8680_v34 = vmul.f32 %v8602_v44, %v1775_v42  ;;  %v1781_v19 = vrot.slane %v1780_v12, 1 }
 0x258   :  { %v2351_v22 = vsel %vm2306_vm5, %v1948_v61, %v2350_v4  ;;  %v1801_v61 = vadd.f32 %v1800_v15, %v1799_v16  ;;  %v1795_v51 = vrot.slane %v1794_v37, 1  ;;  %v1713_v57 = vsel %vm1491_vm1, %v8406_v55, 0.0 }
 0x259   :  { %v2352_v9 = vsel %vm2308_vm6, %v1955_v54, %v2351_v22  ;;  %v2121_v47 = vsub.f32 %v8561_v1, %v8680_v34  ;;  %v1782_v36 = vadd.f32 %v1781_v19, %v1780_v12  ;;  %v1720_v16 = vsel %vm1491_vm1, %v8434_v23, 0.0 }
 0x25a   :  { %v2353_v53 = vsel %vm2310_vm7, %v1962_v17, %v2352_v9  ;;  %v1802_v56 = vrot.slane %v1801_v61, 1  ;;  %v2136_v13 = vmul.f32 %v2120_v20, %v2120_v20  ;;  %v1796_v59 = vadd.f32 %v1795_v51, %v1794_v37 }
 0x25b   :  { %v8677_v18 = vsel %vm2312_vm10, %v1969_v14, %v2353_v53  ;;  %v2137_v29 = vmul.f32 %v2121_v47, %v2121_v47  ;;  %v8693_v2 = vmul.f32 %v8602_v44, %v1782_v36  ;;  %v1707_v33 = vrot.slane %v1706_v62, 4 }
 0x25c   :  { %11252 = vst [vmem:[#allocation71_spill] sm:$0xff] %v8677_v18  ;;  %v1803_v1 = vadd.f32 %v1802_v56, %v1801_v61  ;;  %v1714_v50 = vrot.slane %v1713_v57, 4  ;;  %v8696_v60 = vmul.f32 %v8602_v44, %v1789_v46  ;;  %v1721_v30 = vrot.slane %v1720_v16, 4 }
 0x25d   :  { %v8699_v5 = vmul.f32 %v8602_v44, %v1796_v59  ;;  %v1734_v41 = vsel %vm1491_vm1, %v8461_v28, 0.0  ;;  %v2152_v52 = vmul.f32 %v2136_v13, %v11242_v43  ;;  %v2153_v31 = vmul.f32 %v2137_v29, %v11242_v43 }
 0x25e   :  { %v2122_v58 = vsub.f32 %v8570_v38, %v8693_v2  ;;  %v8708_v10 = vmul.f32 %v8602_v44, %v1803_v1  ;;  %v1708_v32 = vadd.f32 %v1707_v33, %v1706_v62  ;;  %v1715_v54 = vadd.f32 %v1714_v50, %v1713_v57 }
 0x25f   :  { %v2123_v4 = vsub.f32 %v8573_v0, %v8696_v60  ;;  %v1722_v21 = vadd.f32 %v1721_v30, %v1720_v16  ;;  %v1735_v15 = vrot.slane %v1734_v41, 4  ;;  %v2124_v17 = vsub.f32 %v8584_v48, %v8699_v5 }
 0x260   :  { %v2216_v22 = vsel %vm1491_vm1, %v2152_v52, 0.0  ;;  %v2223_v26 = vsel %vm1491_vm1, %v2153_v31, 0.0  ;;  %v2138_v7 = vmul.f32 %v2122_v58, %v2122_v58  ;;  %v2125_v38 = vsub.f32 %v8588_v40, %v8708_v10 }
 0x261   :  { %v1709_v14 = vrot.slane %v1708_v32, 2  ;;  %v1716_v9 = vrot.slane %v1715_v54, 2  ;;  %v2139_v42 = vmul.f32 %v2123_v4, %v2123_v4  ;;  %v1723_v12 = vrot.slane %v1722_v21, 2 }
 0x262   :  { %v8718_v53 = vadd.f32 %v1735_v15, %v1734_v41  ;;  %v2140_v0 = vmul.f32 %v2124_v17, %v2124_v17  ;;  %v1727_v37 = vsel %vm1491_vm1, %v8455_v8, 0.0  ;;  %v2217_v61 = vrot.slane %v2216_v22, 4 }
 0x263   :  { %v2224_v48 = vrot.slane %v2223_v26, 4  ;;  %v1741_v45 = vsel %vm1491_vm1, %v8500_v3, 0.0  ;;  %v2154_v19 = vmul.f32 %v2138_v7, %v11242_v43  ;;  %v2141_v20 = vmul.f32 %v2125_v38, %v2125_v38 }
 0x264   :  { %v8725_v47 = vadd.f32 %v1709_v14, %v1708_v32  ;;  %v8727_v40 = vadd.f32 %v1716_v9, %v1715_v54  ;;  %v1748_v51 = vsel %vm1491_vm1, %v8503_v27, 0.0  ;;  %v2155_v56 = vmul.f32 %v2139_v42, %v11242_v43 }
 0x265   :  { %v8732_v46 = vadd.f32 %v1723_v12, %v1722_v21  ;;  %v1728_v62 = vrot.slane %v1727_v37, 4  ;;  %v1737_v57 = vrot.slane %v8718_v53, 2  ;;  %v2156_v36 = vmul.f32 %v2140_v0, %v11242_v43 }
 0x266   :  { %v1742_v16 = vrot.slane %v1741_v45, 4  ;;  %v1804_v13 = vsel %vm1491_vm1, %v8597_v49, 0.0  ;;  %v2218_v29 = vadd.f32 %v2217_v61, %v2216_v22  ;;  %v2225_v59 = vadd.f32 %v2224_v48, %v2223_v26 }
 0x267   :  { %v1749_v1 = vrot.slane %v1748_v51, 4  ;;  %v1755_v33 = vsel %vm1491_vm1, %v8549_v25, 0.0  ;;  %v2157_v50 = vmul.f32 %v2141_v20, %v11242_v43  ;;  %v2230_v30 = vsel %vm1491_vm1, %v2154_v19, 0.0 }
 0x268   :  { %v2219_v41 = vrot.slane %v2218_v29, 2  ;;  %v2226_v52 = vrot.slane %v2225_v59, 2  ;;  %v2231_v31 = vrot.slane %v2230_v30, 4  ;;  %v2237_v58 = vsel %vm1491_vm1, %v2155_v56, 0.0 }
 0x269   :  { %v1805_v32 = vrot.slane %v1804_v13, 4  ;;  %v1811_v54 = vsel %vm1491_vm1, %v8606_v35, 0.0  ;;  %v2238_v4 = vrot.slane %v2237_v58, 4  ;;  %v2244_v21 = vsel %vm1491_vm1, %v2156_v36, 0.0 }
 0x26a   :  { %v2220_v15 = vadd.f32 %v2219_v41, %v2218_v29  ;;  %v2227_v17 = vadd.f32 %v2226_v52, %v2225_v59  ;;  %v2232_v22 = vadd.f32 %v2231_v31, %v2230_v30  ;;  %v2245_v26 = vrot.slane %v2244_v21, 4 }
 0x26b   :  { %v1729_v7 = vadd.f32 %v1728_v62, %v1727_v37  ;;  %v1756_v38 = vrot.slane %v1755_v33, 4  ;;  %v2239_v14 = vadd.f32 %v2238_v4, %v2237_v58  ;;  %v2251_v9 = vsel %vm1491_vm1, %v2157_v50, 0.0 }
 0x26c   :  { %v1743_v42 = vadd.f32 %v1742_v16, %v1741_v45  ;;  %v1750_v12 = vadd.f32 %v1749_v1, %v1748_v51  ;;  %v2233_v0 = vrot.slane %v2232_v22, 2  ;;  %v2246_v61 = vadd.f32 %v2245_v26, %v2244_v21 }
 0x26d   :  { %v1806_v48 = vadd.f32 %v1805_v32, %v1804_v13  ;;  %v1812_v19 = vrot.slane %v1811_v54, 4  ;;  %v2240_v20 = vrot.slane %v2239_v14, 2  ;;  %v2252_v56 = vrot.slane %v2251_v9, 4 }
 0x26e   :  { %v2221_v18 = vrot.slane %v2220_v15, 1  ;;  %v2228_v43 = vrot.slane %v2227_v17, 1  ;;  %v2234_v36 = vadd.f32 %v2233_v0, %v2232_v22  ;;  %v2247_v29 = vrot.slane %v2246_v61, 2 }
 0x26f   :  { %v1730_v59 = vrot.slane %v1729_v7, 2  ;;  %v1757_v30 = vadd.f32 %v1756_v38, %v1755_v33  ;;  %v2241_v41 = vadd.f32 %v2240_v20, %v2239_v14  ;;  %v2253_v37 = vadd.f32 %v2252_v56, %v2251_v9 }
 0x270   :  { %v1744_v62 = vrot.slane %v1743_v42, 2  ;;  %v1751_v52 = vrot.slane %v1750_v12, 2  ;;  %v2235_v31 = vrot.slane %v2234_v36, 1  ;;  %v2248_v50 = vadd.f32 %v2247_v29, %v2246_v61 }
 0x271   :  { %v1807_v45 = vrot.slane %v1806_v48, 2  ;;  %v1813_v51 = vadd.f32 %v1812_v19, %v1811_v54  ;;  %v2242_v16 = vrot.slane %v2241_v41, 1  ;;  %v2254_v1 = vrot.slane %v2253_v37, 2 }
 0x272   :  { %v2222_v13 = vadd.f32 %v2221_v18, %v2220_v15  ;;  %v2229_v58 = vadd.f32 %v2228_v43, %v2227_v17  ;;  %v2236_v32 = vadd.f32 %v2235_v31, %v2234_v36  ;;  %v2249_v4 = vrot.slane %v2248_v50, 1 }
 0x273   :  { %v1731_v21 = vadd.f32 %v1730_v59, %v1729_v7  ;;  %v1758_v26 = vrot.slane %v1757_v30, 2  ;;  %v2243_v22 = vadd.f32 %v2242_v16, %v2241_v41  ;;  %v2255_v0 = vadd.f32 %v2254_v1, %v2253_v37 }
 0x274   :  { %v1718_v33 = vrot.slane %v8727_v40, 1  ;;  %v1725_v38 = vrot.slane %v8732_v46, 1  ;;  %v1738_v14 = vadd.f32 %v1737_v57, %v8718_v53  ;;  %v1745_v9 = vadd.f32 %v1744_v62, %v1743_v42 }
 0x275   :  { %v1752_v61 = vadd.f32 %v1751_v52, %v1750_v12  ;;  %v1808_v20 = vadd.f32 %v1807_v45, %v1806_v48  ;;  %v1814_v54 = vrot.slane %v1813_v51, 2  ;;  %v2256_v19 = vrot.slane %v2255_v0, 1 }
 0x276   :  { %v2250_v56 = vadd.f32 %v2249_v4, %v2248_v50  ;;  %v2280_v43 = vmul.f32 %v2222_v13, %v8602_v44  ;;  %v2281_v18 = vmul.f32 %v2229_v58, %v8602_v44  ;;  %v2282_v15 = vmul.f32 %v2236_v32, %v8602_v44  ;;  %v8763_v13 = vpop.permute.xlu0 %1820 }
 0x277   :  { %v1732_v17 = vrot.slane %v1731_v21, 1  ;;  %v1759_v7 = vadd.f32 %v1758_v26, %v1757_v30  ;;  %v2257_v36 = vadd.f32 %v2256_v19, %v2255_v0  ;;  %v2283_v29 = vmul.f32 %v2243_v22, %v8602_v44  ;;  %11253 = vst [vmem:[#allocation72_spill] sm:$0xff] %v8763_v13 }
 0x278   :  { %v1711_v59 = vrot.slane %v8725_v47, 1  ;;  %v1739_v53 = vrot.slane %v1738_v14, 1  ;;  %v2422_v57 = vsel %vm2304_vm4, %v2281_v18, %v2280_v43  ;;  %v1719_v42 = vadd.f32 %v1718_v33, %v8727_v40 }
 0x279   :  { %v1726_v12 = vadd.f32 %v1725_v38, %v8732_v46  ;;  %v1746_v48 = vrot.slane %v1745_v9, 1  ;;  %v1815_v41 = vadd.f32 %v1814_v54, %v1813_v51  ;;  %v1753_v37 = vrot.slane %v1752_v61, 1 }
 0x27a   :  { %v1809_v62 = vrot.slane %v1808_v20, 1  ;;  %v2284_v52 = vmul.f32 %v2250_v56, %v8602_v44  ;;  %v2423_v30 = vsel %vm2306_vm5, %v2282_v15, %v2422_v57  ;;  %v1733_v31 = vadd.f32 %v1732_v17, %v1731_v21 }
 0x27b   :  { %v1760_v50 = vrot.slane %v1759_v7, 1  ;;  %v2285_v45 = vmul.f32 %v2257_v36, %v8602_v44  ;;  %v2424_v16 = vsel %vm2308_vm6, %v2283_v29, %v2423_v30  ;;  %v1712_v1 = vadd.f32 %v1711_v59, %v8725_v47 }
 0x27c   :  { %v1740_v40 = vadd.f32 %v1739_v53, %v1738_v14  ;;  %v2425_v46 = vsel %vm2310_vm7, %v2284_v52, %v2424_v16  ;;  %v1747_v51 = vadd.f32 %v1746_v48, %v1745_v9  ;;  %v1816_v58 = vrot.slane %v1815_v41, 1 }
 0x27d   :  { %v8767_v32 = vmul.f32 %v8763_v13, %v1719_v42  ;;  %v8770_v4 = vsel %vm2312_vm10, %v2285_v45, %v2425_v46  ;;  %v1754_v21 = vadd.f32 %v1753_v37, %v1752_v61  ;;  %v1810_v26 = vadd.f32 %v1809_v62, %v1808_v20 }
 0x27e   :  { %v8773_v22 = vmul.f32 %v8763_v13, %v1726_v12  ;;  %v8776_v47 = vmul.f32 %v8763_v13, %v1733_v31  ;;  %v1761_v0 = vadd.f32 %v1760_v50, %v1759_v7  ;;  %v8779_v33 = vmul.f32 %v8763_v13, %v1712_v1 }
 0x27f   :  { %v8782_v38 = vmul.f32 %v8763_v13, %v1740_v40  ;;  %v8785_v14 = vmul.f32 %v8763_v13, %v1747_v51  ;;  %v1817_v9 = vadd.f32 %v1816_v58, %v1815_v41  ;;  %v2318_v20 = vsel %vm2304_vm4, %v8680_v34, %v8674_v63  ;;  %v8810_v34 = vpop.permute.xlu0 %1848 }
 0x280   :  { %v2305_v61 = vsel %vm2304_vm4, %v8767_v32, %v8779_v33  ;;  %v8794_v54 = vmul.f32 %v8763_v13, %v1754_v21  ;;  %v8797_v19 = vmul.f32 %v8602_v44, %v1810_v26  ;;  %v2319_v43 = vsel %vm2306_vm5, %v8693_v2, %v2318_v20  ;;  %11254 = vst [vmem:[#allocation73_spill] sm:$0xff] %v8810_v34 }
 0x281   :  { %v2307_v56 = vsel %vm2306_vm5, %v8773_v22, %v2305_v61  ;;  %v8804_v18 = vmul.f32 %v8763_v13, %v1761_v0  ;;  %v2320_v63 = vsel %vm2308_vm6, %v8696_v60, %v2319_v43  ;;  %v8817_v2 = vmul.f32 %v8602_v44, %v1817_v9 }
 0x282   :  { %v2309_v15 = vsel %vm2308_vm6, %v8776_v47, %v2307_v56  ;;  %v2321_v7 = vsel %vm2310_vm7, %v8699_v5, %v2320_v63  ;;  %v1984_v53 = vsub.f32 %v8354_v11, %v8810_v34  ;;  %v1985_v5 = vsub.f32 %v8406_v55, %v8810_v34 }
 0x283   :  { %v2311_v17 = vsel %vm2310_vm7, %v8782_v38, %v2309_v15  ;;  %v2322_v29 = vsel %vm2312_vm10, %v8708_v10, %v2321_v7  ;;  %v1986_v10 = vsub.f32 %v8434_v23, %v8810_v34  ;;  %v1987_v12 = vsub.f32 %v8455_v8, %v8810_v34 }
 0x284   :  { %v2313_v36 = vsel %vm2312_vm10, %v8785_v14, %v2311_v17  ;;  %v2323_v59 = vsel %vm2314_vm11, %v8797_v19, %v2322_v29  ;;  %v2000_v48 = vsel %vm1491_vm1, %v1984_v53, -inf  ;;  %v2007_v41 = vsel %vm1491_vm1, %v1985_v5, -inf }
 0x285   :  { %v2315_v60 = vsel %vm2314_vm11, %v8794_v54, %v2313_v36  ;;  %v8837_v42 = vsel %vm2316_vm12, %v8817_v2, %v2323_v59  ;;  %v2014_v37 = vsel %vm1491_vm1, %v1986_v10, -inf  ;;  %v1988_v62 = vsub.f32 %v8461_v28, %v8810_v34 }
 0x286   :  { %v8833_v57 = vsel %vm2316_vm12, %v8804_v18, %v2315_v60  ;;  %11256 = vst [vmem:[#allocation75_spill] sm:$0xff] %v8837_v42  ;;  %v2001_v52 = vrot.slane %v2000_v48, 4  ;;  %v2008_v30 = vrot.slane %v2007_v41, 4  ;;  %v2021_v31 = vsel %vm1491_vm1, %v1987_v12, -inf }
 0x287   :  { %11255 = vst [vmem:[#allocation74_spill] sm:$0xff] %v8833_v57  ;;  %v1989_v50 = vsub.f32 %v8500_v3, %v8810_v34  ;;  %v2015_v45 = vrot.slane %v2014_v37, 4  ;;  %v1990_v16 = vsub.f32 %v8503_v27, %v8810_v34  ;;  %v2022_v1 = vrot.slane %v2021_v31, 4 }
 0x288   :  { %v1991_v40 = vsub.f32 %v8549_v25, %v8810_v34  ;;  %v2002_v46 = vmax.f32 %v2000_v48, %v2001_v52  ;;  %v2009_v51 = vmax.f32 %v2007_v41, %v2008_v30  ;;  %v2028_v58 = vsel %vm1491_vm1, %v1988_v62, -inf  ;;  %v6655_v41 = vld [vmem:[#allocation5 + $0x1c0] ss:$0 sm:$0xff] }
 0x289   :  { %v2035_v21 = vsel %vm1491_vm1, %v1989_v50, -inf  ;;  %v2016_v26 = vmax.f32 %v2014_v37, %v2015_v45  ;;  %v1998_v0 = vsub.f32 %v8597_v49, %v8610_v24  ;;  %v2023_v9 = vmax.f32 %v2021_v31, %v2022_v1  ;;  %v8867_v31 = vld [vmem:[#allocation5 + $0x1b8] ss:$0 sm:$0xff] }
 0x28a   :  { %v2029_v61 = vrot.slane %v2028_v58, 4  ;;  %v2042_v20 = vsel %vm1491_vm1, %v1990_v16, -inf  ;;  %v2003_v56 = vrot.slane %v2002_v46, 2  ;;  %v2010_v43 = vrot.slane %v2009_v51, 2 }
 0x28b   :  { %v2036_v15 = vrot.slane %v2035_v21, 4  ;;  %v2049_v63 = vsel %vm1491_vm1, %v1991_v40, -inf  ;;  %v1999_v17 = vsub.f32 %v8606_v35, %v8610_v24  ;;  %v2017_v7 = vrot.slane %v2016_v26, 2 }
 0x28c   :  { %v2043_v36 = vrot.slane %v2042_v20, 4  ;;  %v2024_v29 = vrot.slane %v2023_v9, 2  ;;  %v2030_v60 = vmax.f32 %v2028_v58, %v2029_v61  ;;  %v2050_v59 = vrot.slane %v2049_v63, 4 }
 0x28d   :  { %v2098_v53 = vsel %vm1491_vm1, %v1998_v0, -inf  ;;  %v2004_v5 = vmax.f32 %v2002_v46, %v2003_v56  ;;  %v2011_v10 = vmax.f32 %v2009_v51, %v2010_v43  ;;  %v2037_v12 = vmax.f32 %v2035_v21, %v2036_v15 }
 0x28e   :  { %v2115_v48 = vsub.f32 %v8455_v8, %v8776_v47  ;;  %v2018_v37 = vmax.f32 %v2016_v26, %v2017_v7  ;;  %v2044_v62 = vmax.f32 %v2042_v20, %v2043_v36  ;;  %v2099_v52 = vrot.slane %v2098_v53, 4 }
 0x28f   :  { %v2105_v30 = vsel %vm1491_vm1, %v1999_v17, -inf  ;;  %v2025_v50 = vmax.f32 %v2023_v9, %v2024_v29  ;;  %v2031_v45 = vrot.slane %v2030_v60, 2  ;;  %v2051_v16 = vmax.f32 %v2049_v63, %v2050_v59  ;;  %v11259_v29 = vld [vmem:[#allocation16_spill] sm:$0xff] }
 0x290   :  { %v1481_v1 = vadd.f32 %v6655_v41, %v8629_v39  ;;  %v2005_v40 = vrot.slane %v2004_v5, 1  ;;  %v2012_v46 = vrot.slane %v2011_v10, 1  ;;  %v2038_v51 = vrot.slane %v2037_v12, 2 }
 0x291   :  { %v2131_v58 = vmul.f32 %v2115_v48, %v2115_v48  ;;  %v2116_v47 = vsub.f32 %v8461_v28, %v8782_v38  ;;  %v2106_v26 = vrot.slane %v2105_v30, 4  ;;  %v2019_v20 = vrot.slane %v2018_v37, 1 }
 0x292   :  { %v2045_v56 = vrot.slane %v2044_v62, 2  ;;  %v2100_v9 = vmax.f32 %v2098_v53, %v2099_v52  ;;  %v2026_v39 = vrot.slane %v2025_v50, 1  ;;  %v2032_v15 = vmax.f32 %v2030_v60, %v2031_v45 }
 0x293   :  { %v2052_v63 = vrot.slane %v2051_v16, 2  ;;  %v3091_v17 = vrot.slane %v1481_v1, %v7662_v6  ;;  %v2006_v38 = vmax.f32 %v2004_v5, %v2005_v40  ;;  %v2013_v7 = vmax.f32 %v2011_v10, %v2012_v46 }
 0x294   :  { %v2039_v36 = vmax.f32 %v2037_v12, %v2038_v51  ;;  %v8882_v59 = vmul.f32 %v2131_v58, %v11259_v29  ;;  %v8884_v48 = vmul.f32 %v2116_v47, %v2116_v47  ;;  %v2107_v53 = vmax.f32 %v2105_v30, %v2106_v26 }
 0x295   :  { %v1856_v60 = vadd.f32 %v8810_v34, %v8354_v11  ;;  %v8892_v41 = vsub.f32 %v8500_v3, %v8785_v14  ;;  %v2020_v52 = vmax.f32 %v2018_v37, %v2019_v20  ;;  %v2046_v5 = vmax.f32 %v2044_v62, %v2045_v56 }
 0x296   :  { %v2101_v10 = vrot.slane %v2100_v9, 2  ;;  %v2027_v12 = vmax.f32 %v2025_v50, %v2026_v39  ;;  %v2033_v45 = vrot.slane %v2032_v15, 1  ;;  %v2053_v1 = vmax.f32 %v2051_v16, %v2052_v63 }
 0x297   :  { %v1857_v40 = vadd.f32 %v8810_v34, %v8406_v55  ;;  %v3092_v46 = vcombine.high %v3091_v17, %v3091_v17  ;;  %v2040_v58 = vrot.slane %v2039_v36, 1  ;;  %v2379_v30 = vsel %vm2304_vm4, %v2013_v7, %v2006_v38 }
 0x298   :  { %v1858_v47 = vadd.f32 %v8810_v34, %v8434_v23  ;;  %v2108_v62 = vrot.slane %v2107_v53, 2  ;;  %v1859_v50 = vadd.f32 %v8810_v34, %v8455_v8  ;;  %v1872_v16 = vsel %vm1491_vm1, %v1856_v60, inf }
 0x299   :  { %v2047_v26 = vrot.slane %v2046_v5, 1  ;;  %v1860_v20 = vadd.f32 %v8810_v34, %v8461_v28  ;;  %v8911_v56 = vrot.slane %v3091_v17, %v7662_v6  ;;  %v2034_v39 = vmax.f32 %v2032_v15, %v2033_v45 }
 0x29a   :  { %v2054_v63 = vrot.slane %v2053_v1, 1  ;;  %v1879_v8 = vsel %vm1491_vm1, %v1857_v40, inf  ;;  %v2380_v38 = vsel %vm2306_vm5, %v2020_v52, %v2379_v30  ;;  %v1873_v7 = vrot.slane %v1872_v16, 4 }
 0x29b   :  { %11262 = vst [vmem:[#allocation79_spill] sm:$0xff] %v8911_v56  ;;  %v1886_v28 = vsel %vm1491_vm1, %v1858_v47, inf  ;;  %v8923_v17 = vrot.slane %v3092_v46, %v7662_v6  ;;  %v2041_v60 = vmax.f32 %v2039_v36, %v2040_v58  ;;  %v1893_v15 = vsel %vm1491_vm1, %v1859_v50, inf  ;;  %v11264_v6 = vld [vmem:[#allocation15_spill] sm:$0xff] }
 0x29c   :  { %v8926_v45 = vmax.f32 %v2046_v5, %v2047_v26  ;;  %v8929_v52 = vmax.f32 %v2053_v1, %v2054_v63  ;;  %v1862_v30 = vadd.f32 %v8810_v34, %v8503_v27  ;;  %v1887_v47 = vrot.slane %v1886_v28, 4 }
 0x29d   :  { %11263 = vst [vmem:[#allocation80_spill] sm:$0xff] %v8923_v17  ;;  %v8936_v36 = vrot.slane %v8911_v56, %v11264_v6  ;;  %v1874_v46 = vmin.f32 %v1872_v16, %v1873_v7  ;;  %v1894_v5 = vrot.slane %v1893_v15, 4  ;;  %v2113_v16 = vsub.f32 %v8406_v55, %v8767_v32 }
 0x29e   :  { %v1863_v56 = vadd.f32 %v8810_v34, %v8549_v25 }
 0x29f   :  { %11265 = vst [vmem:[#allocation81_spill] sm:$0xff] %v8936_v36 }
 0x2df   :  { %v6899_v21 = vpop.f32.mrb[4].mxu1 }
 0x2e0   :  { %v8873_v0 = vadd.f32 %v6899_v21, %v8867_v31  ;;  %v1606_v61 = vpop.f32.mrb[5].mxu1 }
 0x2e1   :  { %v8876_v43 = vadd.f32 %v8867_v31, %v1606_v61  ;;  %v2102_v61 = vmax.f32 %v2100_v9, %v2101_v10  ;;  %v1861_v9 = vadd.f32 %v8810_v34, %v8500_v3  ;;  %v2109_v10 = vmax.f32 %v2107_v53, %v2108_v62 }
 0x2e2   :  { %11257 = vst [vmem:[#allocation76_spill] sm:$0xff] %v8873_v0  ;;  %2974 = vrot.lane.b32.xlu0 %v8873_v0, %s7577_s17  ;;  %v2381_v3 = vsel %vm2308_vm6, %v2027_v12, %v2380_v38  ;;  %v8941_v62 = vrot.slane %v8923_v17, %v11264_v6  ;;  %v1914_v6 = vsel %vm1491_vm1, %v1862_v30, inf  ;;  %v2129_v30 = vmul.f32 %v2113_v16, %v2113_v16 }
 0x2e3   :  { %11258 = vst [vmem:[#allocation77_spill] sm:$0xff] %v8876_v43  ;;  %2972 = vrot.lane.b32.xlu1 %v8876_v43, %s7577_s17  ;;  %v2103_v40 = vrot.slane %v2102_v61, 1  ;;  %v1907_v58 = vsel %vm1491_vm1, %v1861_v9, inf  ;;  %v2110_v50 = vrot.slane %v2109_v10, 1  ;;  %v2382_v63 = vsel %vm2310_vm7, %v2034_v39, %v2381_v3 }
 0x2e4   :  { %11266 = vst [vmem:[#allocation82_spill] sm:$0xff] %v8941_v62  ;;  %v1888_v9 = vmin.f32 %v1886_v28, %v1887_v47  ;;  %v1908_v7 = vrot.slane %v1907_v58, 4  ;;  %v2112_v39 = vsub.f32 %v8354_v11, %v8779_v33  ;;  %v1915_v3 = vrot.slane %v1914_v6, 4 }
 0x2e5   :  { %v8961_v32 = vmax.f32 %v2109_v10, %v2110_v50  ;;  %v1870_v11 = vadd.f32 %v8610_v24, %v8597_v49 }
 0x2e6   :  { %v1889_v33 = vrot.slane %v1888_v9, 2  ;;  %v1909_v10 = vmin.f32 %v1907_v58, %v1908_v7  ;;  %v8985_v58 = vmin.f32 %v1914_v6, %v1915_v3 }
 0x2e8   :  { %v6902_v51 = vpop.f32.mrb[6].mxu1  ;;  %v8990_v16 = vmin.f32 %v1888_v9, %v1889_v33  ;;  %v1910_v7 = vrot.slane %v1909_v10, 2 }
 0x2e9   :  { %v8900_v14 = vadd.f32 %v6902_v51, %v8867_v31  ;;  %v1616_v37 = vpop.f32.mrb[7].mxu1  ;;  %v1880_v51 = vrot.slane %v1879_v8, 4 }
 0x2ea   :  { %v8906_v21 = vadd.f32 %v8867_v31, %v1616_v37  ;;  %v1900_v37 = vsel %vm1491_vm1, %v1860_v20, inf  ;;  %v2104_v20 = vmax.f32 %v2102_v61, %v2103_v40  ;;  %v1875_v61 = vrot.slane %v1874_v46, 2 }
 0x2eb   :  { %11260 = vst [vmem:[#allocation16_spill] sm:$0xff] %v8900_v14  ;;  %2978 = vrot.lane.b32.xlu1 %v8900_v14, %s7577_s17  ;;  %v1901_v26 = vrot.slane %v1900_v37, 4  ;;  %v1881_v38 = vmin.f32 %v1879_v8, %v1880_v51  ;;  %v1895_v40 = vmin.f32 %v1893_v15, %v1894_v5  ;;  %v8964_v8 = vsel %vm2312_vm10, %v2041_v60, %v2382_v63  ;;  %v11269_v51 = vld [vmem:[#allocation70_spill] sm:$0xff] }
 0x2ec   :  { %11261 = vst [vmem:[#allocation78_spill] sm:$0xff] %v8906_v21  ;;  %2976 = vrot.lane.b32.xlu0 %v8906_v21, %s7577_s17  ;;  %v1876_v47 = vmin.f32 %v1874_v46, %v1875_v61  ;;  %v2128_v5 = vmul.f32 %v2112_v39, %v2112_v39  ;;  %v2119_v46 = vsub.f32 %v8549_v25, %v8804_v18 }
 0x2ed   :  { %v6905_v53 = vpop.f32.mrb[8].mxu1  ;;  %v1902_v28 = vmin.f32 %v1900_v37, %v1901_v26  ;;  %v1896_v60 = vrot.slane %v1895_v40, 2  ;;  %v1921_v37 = vsel %vm1491_vm1, %v1863_v56, inf  ;;  %v2118_v26 = vsub.f32 %v8503_v27, %v8794_v54 }
 0x2ee   :  { %v8944_v1 = vadd.f32 %v6905_v53, %v8867_v31  ;;  %v1626_v12 = vpop.f32.mrb[9].mxu1  ;;  %v2114_v53 = vsub.f32 %v8434_v23, %v8773_v22  ;;  %v8968_v23 = vsel %vm2314_vm11, %v2104_v20, %v11269_v51  ;;  %v1882_v22 = vrot.slane %v1881_v38, 2 }
 0x2ef   :  { %v8959_v55 = vadd.f32 %v8867_v31, %v1626_v12  ;;  %v8977_v12 = vadd.f32 %v8610_v24, %v8606_v35  ;;  %v1903_v50 = vrot.slane %v1902_v28, 2  ;;  %v2126_v20 = vsub.f32 %v8597_v49, %v8797_v19 }
 0x2f0   :  { %11267 = vst [vmem:[#allocation83_spill] sm:$0xff] %v8944_v1  ;;  %2982 = vrot.lane.b32.xlu1 %v8944_v1, %s7577_s17  ;;  %v2130_v15 = vmul.f32 %v2114_v53, %v2114_v53  ;;  %v8983_v63 = vmin.f32 %v1881_v38, %v1882_v22  ;;  %v2145_v56 = vmul.f32 %v2129_v30, %v11259_v29  ;;  %v1922_v53 = vrot.slane %v1921_v37, 4 }
 0x2f1   :  { %11268 = vst [vmem:[#allocation84_spill] sm:$0xff] %v8959_v55  ;;  %v1877_v39 = vrot.slane %v1876_v47, 1  ;;  %v8993_v27 = vmin.f32 %v1895_v40, %v1896_v60  ;;  %v2133_v49 = vmul.f32 %v8892_v41, %v8892_v41  ;;  %v2144_v54 = vmul.f32 %v2128_v5, %v11259_v29 }
 0x2f2   :  { %v2146_v61 = vmul.f32 %v2130_v15, %v11259_v29  ;;  %v8998_v6 = vmin.f32 %v1902_v28, %v1903_v50  ;;  %v2127_v25 = vsub.f32 %v8606_v35, %v8817_v2  ;;  %v2134_v18 = vmul.f32 %v2118_v26, %v2118_v26 }
 0x2f3   :  { %v2142_v38 = vmul.f32 %v2126_v20, %v2126_v20  ;;  %v1917_v40 = vrot.slane %v8985_v58, 2  ;;  %v2135_v22 = vmul.f32 %v2119_v46, %v2119_v46  ;;  %v2167_v3 = vsel %vm1491_vm1, %v2145_v56, 0.0 }
 0x2f4   :  { %2980 = vrot.lane.b32.xlu1 %v8959_v55, %s7577_s17  ;;  %v1884_v41 = vrot.slane %v8983_v63, 1  ;;  %v1970_v28 = vsel %vm1491_vm1, %v1870_v11, inf  ;;  %v2174_v33 = vsel %vm1491_vm1, %v2146_v61, 0.0  ;;  %v2148_v35 = vmul.f32 %v8884_v48, %v11259_v29  ;;  %v11271_v11 = vld [vmem:[#allocation17_spill] sm:$0xff] }
 0x2f5   :  { %v2149_v2 = vmul.f32 %v2133_v49, %v11259_v29  ;;  %v2160_v15 = vsel %vm1491_vm1, %v2144_v54, 0.0  ;;  %v2181_v60 = vsel %vm1491_vm1, %v8882_v59, 0.0  ;;  %v2143_v50 = vmul.f32 %v2127_v25, %v2127_v25 }
 0x2f6   :  { %v2150_v26 = vmul.f32 %v2134_v18, %v11259_v29  ;;  %v2158_v20 = vmul.f32 %v2142_v38, %v11271_v11  ;;  %v2168_v46 = vrot.slane %v2167_v3, 4  ;;  %v2151_v49 = vmul.f32 %v2135_v22, %v11259_v29 }
 0x2f7   :  { %v2175_v54 = vrot.slane %v2174_v33, 4  ;;  %v9030_v59 = vmin.f32 %v1921_v37, %v1922_v53  ;;  %v2161_v25 = vrot.slane %v2160_v15, 4  ;;  %v2182_v30 = vrot.slane %v2181_v60, 4 }
 0x2f8   :  { %v1878_v18 = vmin.f32 %v1876_v47, %v1877_v39  ;;  %v1898_v38 = vrot.slane %v8993_v27, 1  ;;  %v2169_v22 = vadd.f32 %v2168_v46, %v2167_v3  ;;  %v2202_v37 = vsel %vm1491_vm1, %v2150_v26, 0.0 }
 0x2f9   :  { %v2159_v17 = vmul.f32 %v2143_v50, %v11271_v11  ;;  %v2176_v24 = vadd.f32 %v2175_v54, %v2174_v33  ;;  %v2209_v47 = vsel %vm1491_vm1, %v2151_v49, 0.0  ;;  %v1977_v34 = vsel %vm1491_vm1, %v8977_v12, inf }
 0x2fa   :  { %v2183_v3 = vadd.f32 %v2182_v30, %v2181_v60  ;;  %v1905_v33 = vrot.slane %v8998_v6, 1  ;;  %v9055_v49 = vmin.f32 %v8985_v58, %v1917_v40  ;;  %v2170_v54 = vrot.slane %v2169_v22, 2 }
 0x2fb   :  { %v2210_v12 = vrot.slane %v2209_v47, 4  ;;  %v2177_v60 = vrot.slane %v2176_v24, 2 }
 0x2fc   :  { %v6908_v19 = vpop.f32.mrb[10].mxu1  ;;  %v2184_v42 = vrot.slane %v2183_v3, 2 }
 0x2fd   :  { %v9003_v9 = vadd.f32 %v6908_v19, %v8867_v31  ;;  %v1636_v51 = vpop.f32.mrb[11].mxu1  ;;  %v9028_v19 = vmin.f32 %v1909_v10, %v1910_v7  ;;  %v2188_v10 = vsel %vm1491_vm1, %v2148_v35, 0.0  ;;  %v2258_v7 = vsel %vm1491_vm1, %v2158_v20, 0.0 }
 0x2fe   :  { %v9022_v56 = vadd.f32 %v8867_v31, %v1636_v51  ;;  %v1971_v51 = vrot.slane %v1970_v28, 4  ;;  %v2189_v20 = vrot.slane %v2188_v10, 4  ;;  %v2259_v50 = vrot.slane %v2258_v7, 4 }
 0x2ff   :  { %11270 = vst [vmem:[#allocation70_spill] sm:$0xff] %v9003_v9  ;;  %2986 = vrot.lane.b32.xlu1 %v9003_v9, %s7577_s17  ;;  %v11277_v9 = vrot.slane %v8990_v16, 1 }
 0x300   :  { %v6911_v5 = vpop.f32.mrb[12].mxu1  ;;  %11272 = vst [vmem:[#allocation85_spill] sm:$0xff] %v9022_v56  ;;  %v1972_v30 = vmin.f32 %v1970_v28, %v1971_v51  ;;  %v2190_v58 = vadd.f32 %v2189_v20, %v2188_v10  ;;  %v2171_v28 = vadd.f32 %v2170_v54, %v2169_v22  ;;  %v2211_v51 = vadd.f32 %v2210_v12, %v2209_v47 }
 0x301   :  { %v9025_v61 = vadd.f32 %v6911_v5, %v8867_v31  ;;  %v1646_v48 = vpop.f32.mrb[13].mxu1  ;;  %v2195_v5 = vsel %vm1491_vm1, %v2149_v2, 0.0  ;;  %v2162_v2 = vadd.f32 %v2161_v25, %v2160_v15  ;;  %v1978_v15 = vrot.slane %v1977_v34, 4 }
 0x302   :  { %v9042_v53 = vadd.f32 %v8867_v31, %v1646_v48  ;;  %v2196_v46 = vrot.slane %v2195_v5, 4  ;;  %v2203_v48 = vrot.slane %v2202_v37, 4  ;;  %v2265_v25 = vsel %vm1491_vm1, %v2159_v17, 0.0 }
 0x303   :  { %11273 = vst [vmem:[#allocation86_spill] sm:$0xff] %v9025_v61  ;;  %2990 = vrot.lane.b32.xlu0 %v9025_v61, %s7577_s17  ;;  %2984 = vrot.lane.b32.xlu1 %v9022_v56, %s7577_s17  ;;  %v2163_v57 = vrot.slane %v2162_v2, 2  ;;  %v2260_v61 = vadd.f32 %v2259_v50, %v2258_v7  ;;  %v2266_v55 = vrot.slane %v2265_v25, 4  ;;  %v2172_v50 = vrot.slane %v2171_v28, 1 }
 0x304   :  { %11274 = vst [vmem:[#allocation87_spill] sm:$0xff] %v9042_v53  ;;  %v6914_v39 = vpop.f32.mrb[14].mxu1  ;;  %v2204_v40 = vadd.f32 %v2203_v48, %v2202_v37  ;;  %v2185_v37 = vadd.f32 %v2184_v42, %v2183_v3  ;;  %v2212_v54 = vrot.slane %v2211_v51, 2 }
 0x305   :  { %v9049_v35 = vadd.f32 %v6914_v39, %v8867_v31  ;;  %v1656_v26 = vpop.f32.mrb[15].mxu1  ;;  %v1885_v39 = vmin.f32 %v8983_v63, %v1884_v41  ;;  %v1973_v63 = vrot.slane %v1972_v30, 2  ;;  %v1979_v41 = vmin.f32 %v1977_v34, %v1978_v15 }
 0x306   :  { %v9062_v56 = vadd.f32 %v8867_v31, %v1656_v26  ;;  %v2164_v10 = vadd.f32 %v2163_v57, %v2162_v2  ;;  %v2261_v22 = vrot.slane %v2260_v61, 2  ;;  %v2267_v12 = vadd.f32 %v2266_v55, %v2265_v25 }
 0x307   :  { %11275 = vst [vmem:[#allocation88_spill] sm:$0xff] %v9049_v35  ;;  %2988 = vrot.lane.b32.xlu1 %v9042_v53, %s7577_s17  ;;  %2994 = vrot.lane.b32.xlu0 %v9049_v35, %s7577_s17  ;;  %v2197_v53 = vadd.f32 %v2196_v46, %v2195_v5  ;;  %v1892_v35 = vmin.f32 %v8990_v16, %v11277_v9  ;;  %v1924_v46 = vrot.slane %v9030_v59, 2  ;;  %v2191_v16 = vrot.slane %v2190_v58, 2 }
 0x308   :  { %11276 = vst [vmem:[#allocation89_spill] sm:$0xff] %v9062_v56  ;;  %v2178_v5 = vadd.f32 %v2177_v60, %v2176_v24  ;;  %v6917_v26 = vpop.f32.mrb[16].mxu1  ;;  %v2343_v20 = vsel %vm2304_vm4, %v1885_v39, %v1878_v18  ;;  %v2205_v9 = vrot.slane %v2204_v40, 2  ;;  %v1899_v24 = vmin.f32 %v8993_v27, %v1898_v38 }
 0x309   :  { %v2198_v7 = vrot.slane %v2197_v53, 2  ;;  %v9073_v47 = vadd.f32 %v6917_v26, %v8867_v31  ;;  %v1666_v48 = vpop.f32.mrb[17].mxu1  ;;  %v1974_v34 = vmin.f32 %v1972_v30, %v1973_v63  ;;  %v1980_v15 = vrot.slane %v1979_v41, 2 }
 0x30a   :  { %v2179_v57 = vrot.slane %v2178_v5, 1  ;;  %v1925_v42 = vmin.f32 %v9030_v59, %v1924_v46  ;;  %v2165_v18 = vrot.slane %v2164_v10, 1  ;;  %v2186_v2 = vrot.slane %v2185_v37, 1 }
 0x30b   :  { %2992 = vrot.lane.b32.xlu0 %v9062_v56, %s7577_s17  ;;  %11278 = vst [vmem:[#allocation90_spill] sm:$0xff] %v9073_v47  ;;  %v2199_v3 = vadd.f32 %v2198_v7, %v2197_v53  ;;  %v2344_v60 = vsel %vm2306_vm5, %v1892_v35, %v2343_v20  ;;  %v2192_v39 = vadd.f32 %v2191_v16, %v2190_v58  ;;  %v2268_v30 = vrot.slane %v2267_v12, 2 }
 0x30c   :  { %v2206_v26 = vadd.f32 %v2205_v9, %v2204_v40  ;;  %v2262_v17 = vadd.f32 %v2261_v22, %v2260_v61  ;;  %v9081_v55 = vadd.f32 %v8867_v31, %v1666_v48  ;;  %v2173_v27 = vadd.f32 %v2172_v50, %v2171_v28 }
 0x30d   :  { %v2213_v38 = vadd.f32 %v2212_v54, %v2211_v51  ;;  %v1906_v25 = vmin.f32 %v8998_v6, %v1905_v33  ;;  %v1975_v63 = vrot.slane %v1974_v34, 1  ;;  %v2180_v56 = vadd.f32 %v2179_v57, %v2178_v5  ;;  %v6920_v33 = vpop.f32.mrb[18].mxu1 }
 0x30e   :  { %11279 = vst [vmem:[#allocation91_spill] sm:$0xff] %v9081_v55  ;;  %v2345_v59 = vsel %vm2308_vm6, %v1899_v24, %v2344_v60  ;;  %v2166_v53 = vadd.f32 %v2165_v18, %v2164_v10  ;;  %v2187_v35 = vadd.f32 %v2186_v2, %v2185_v37  ;;  %v2200_v58 = vrot.slane %v2199_v3, 1  ;;  %v1676_v37 = vpop.f32.mrb[19].mxu1  ;;  %v11283_v60 = vld [vmem:[#allocation71_spill] sm:$0xff] }
 0x30f   :  { %2998 = vrot.lane.b32.xlu0 %v9073_v47, %s7577_s17  ;;  %v1981_v47 = vmin.f32 %v1979_v41, %v1980_v15  ;;  %v1919_v61 = vrot.slane %v9055_v49, 1  ;;  %v2193_v40 = vrot.slane %v2192_v39, 1  ;;  %v2207_v46 = vrot.slane %v2206_v26, 1 }
 0x310   :  { %v2263_v28 = vrot.slane %v2262_v17, 1  ;;  %v1926_v51 = vrot.slane %v1925_v42, 1  ;;  %v2214_v7 = vrot.slane %v2213_v38, 1  ;;  %v2269_v20 = vadd.f32 %v2268_v30, %v2267_v12 }
 0x311   :  { %v2273_v6 = vmul.f32 %v2173_v27, %v8763_v13  ;;  %v1976_v41 = vmin.f32 %v1974_v34, %v1975_v63  ;;  %v1982_v5 = vrot.slane %v1981_v47, 1  ;;  %v2346_v16 = vsel %vm2310_vm7, %v1906_v25, %v2345_v59 }
 0x312   :  { %v2274_v9 = vmul.f32 %v2180_v56, %v8763_v13  ;;  %v9092_v10 = vadd.f32 %v6920_v33, %v8867_v31  ;;  %v2201_v22 = vadd.f32 %v2200_v58, %v2199_v3  ;;  %v2272_v48 = vmul.f32 %v2166_v53, %v8763_v13 }
 0x313   :  { %2996 = vrot.lane.b32.xlu0 %v9081_v55, %s7577_s17  ;;  %v2275_v50 = vmul.f32 %v2187_v35, %v8763_v13  ;;  %v9097_v54 = vadd.f32 %v8867_v31, %v1676_v37  ;;  %v2194_v12 = vadd.f32 %v2193_v40, %v2192_v39  ;;  %v2208_v24 = vadd.f32 %v2207_v46, %v2206_v26 }
 0x314   :  { %11280 = vst [vmem:[#allocation92_spill] sm:$0xff] %v9092_v10  ;;  %v2264_v34 = vadd.f32 %v2263_v28, %v2262_v17  ;;  %3002 = vrot.lane.b32.xlu1 %v9092_v10, %s7577_s17  ;;  %v11282_v56 = vrot.slane %v9028_v19, 1  ;;  %v2215_v57 = vadd.f32 %v2214_v7, %v2213_v38  ;;  %v2270_v18 = vrot.slane %v2269_v20, 1 }
 0x315   :  { %11281 = vst [vmem:[#allocation93_spill] sm:$0xff] %v9097_v54  ;;  %v2415_v2 = vsel %vm2304_vm4, %v2273_v6, %v2272_v48  ;;  %v1920_v31 = vmin.f32 %v9055_v49, %v1919_v61  ;;  %v1927_v3 = vmin.f32 %v1925_v42, %v1926_v51  ;;  %v2355_v17 = vsel %vm2314_vm11, %v1976_v41, %v11283_v60  ;;  %v3204_v6 = vld [vmem:[#allocation5 + $0x40] sm:$0xff]  ;;  %v9144_v41 = vpop.permute.xlu1 %2662 }
 0x316   :  { %v1913_v15 = vmin.f32 %v9028_v19, %v11282_v56  ;;  %v2416_v39 = vsel %vm2306_vm5, %v2274_v9, %v2415_v2  ;;  %v1983_v26 = vmin.f32 %v1981_v47, %v1982_v5  ;;  %v2277_v19 = vmul.f32 %v2201_v22, %v8763_v13  ;;  %v2661_v9 = vpop.permute.xlu0 %2660 }
 0x317   :  { %3000 = vrot.lane.b32.xlu0 %v9097_v54, %s7577_s17  ;;  %v2417_v38 = vsel %vm2308_vm6, %v2275_v50, %v2416_v39  ;;  %v2392_v30 = vsel %vm2316_vm12, %v8961_v32, %v8968_v23  ;;  %v2276_v25 = vmul.f32 %v2194_v12, %v8763_v13  ;;  %v2278_v49 = vmul.f32 %v2208_v24, %v8763_v13  ;;  %v11285_v39 = vld [vmem:[#allocation32_spill] sm:$0xff] }
 0x318   :  { %v2347_v27 = vsel %vm2312_vm10, %v1913_v15, %v2346_v16  ;;  %v2286_v42 = vmul.f32 %v2264_v34, %v8602_v44  ;;  %3117 = vrot.lane.b32.xlu1 %v8941_v62, %s7577_s17  ;;  %v2384_v47 = vsel %vm2314_vm11, %v8926_v45, %v8964_v8  ;;  %v2356_v63 = vsel %vm2316_vm12, %v1983_v26, %v2355_v17  ;;  %v6674_v17 = vld [vmem:[#allocation5 + $0x1d0] ss:$0 sm:$0xff]  ;;  %v11320_v62 = vld [vmem:[#allocation86_spill] sm:$0xff] }
 0x319   :  { %v2271_v59 = vadd.f32 %v2270_v18, %v2269_v20  ;;  %v2279_v53 = vmul.f32 %v2215_v57, %v8763_v13  ;;  %v2385_v32 = vsel %vm2316_vm12, %v8929_v52, %v2384_v47  ;;  %v2348_v23 = vsel %vm2314_vm11, %v1920_v31, %v2347_v27  ;;  %v3203_v20 = vld [vmem:[#allocation5 + $0x38] sm:$0xff]  ;;  %v2847_v5 = vpop.permute.xlu1 %2846  ;;  %v11286_v27 = vld [vmem:[#allocation31_spill] sm:$0xff] }
 0x31a   :  { %v2418_v35 = vsel %vm2310_vm7, %v2276_v25, %v2417_v38  ;;  %v7256_v58 = vpack.i.bf16 %v2392_v30, %v2385_v32  ;;  %v2349_v61 = vsel %vm2316_vm12, %v1927_v3, %v2348_v23  ;;  %v2427_v46 = vsel %vm2314_vm11, %v2286_v42, %v8770_v4  ;;  %v2845_v22 = vpop.permute.xlu0 %2844  ;;  %v11287_v38 = vld [vmem:[#allocation35_spill] sm:$0xff]  ;;  %v11288_v25 = vld [vmem:[#allocation33_spill] sm:$0xff]  ;;  %v11291_v23 = vld [vmem:[#allocation50_spill] sm:$0xff] }
 0x31b   :  { %3115 = vrot.lane.b32.xlu0 %v8936_v36, %s7577_s17  ;;  %v2419_v45 = vsel %vm2312_vm10, %v2277_v19, %v2418_v35  ;;  %v7251_v8 = vpack.i.bf16 %v2356_v63, %v2349_v61  ;;  %v2287_v52 = vmul.f32 %v2271_v59, %v8602_v44  ;;  %v7146_v33 = vpack.c.bf16 %v3204_v6, %v3203_v20  ;;  %v11289_v63 = vld [vmem:[#allocation41_spill] sm:$0xff]  ;;  %v11303_v13 = vld [vmem:[#allocation30_spill] sm:$0xff] }
 0x31c   :  { %v2420_v40 = vsel %vm2314_vm11, %v2278_v49, %v2419_v45  ;;  %7257 = vrot.lane.b32.xlu1 %v7256_v58, %s7575_s2  ;;  %v11284_v4 = vmov 0.0   ;;  %v2580_v26 = vadd.f32 %v6674_v17, %v11285_v39  ;;  %v2585_v19 = vadd.f32 %v11286_v27, %v6674_v17  ;;  %v11292_v58 = vld [vmem:[#allocation52_spill] sm:$0xff]  ;;  %v11293_v45 = vld [vmem:[#allocation43_spill] sm:$0xff] }
 0x31d   :  { %v2421_v28 = vsel %vm2316_vm12, %v2279_v53, %v2420_v40  ;;  %v2428_v51 = vsel %vm2316_vm12, %v2287_v52, %v2427_v46  ;;  %7147 = vmatprep.subr.bf16.mxu1 %v7146_v33  ;;  %v9147_v16 = vpop.permute.xlu1 %2860  ;;  %v2590_v30 = vadd.f32 %v6674_v17, %v11287_v38  ;;  %v2595_v49 = vadd.f32 %v11288_v25, %v6674_v17  ;;  %v11290_v53 = vld [vmem:[#allocation42_spill] sm:$0xff]  ;;  %v11294_v46 = vld [vmem:[#allocation48_spill] sm:$0xff]  ;;  %v11298_v25 = vld [vmem:[#allocation47_spill] sm:$0xff] }
 0x31e   :  { %v7261_v7 = vpack.i.bf16 %v2428_v51, %v2421_v28  ;;  %7149 = vmatpush3.bf16.msra.mxu1 %v7146_v33  ;;  %v2849_v50 = vpop.permute.xlu0 %2848  ;;  %v2605_v59 = vadd.f32 %v11289_v63, %v6674_v17  ;;  %v2600_v32 = vadd.f32 %v6674_v17, %v11290_v53  ;;  %v2635_v35 = vadd.f32 %v11291_v23, %v6674_v17  ;;  %v11295_v28 = vld [vmem:[#allocation55_spill] sm:$0xff]  ;;  %v11297_v33 = vld [vmem:[#allocation54_spill] sm:$0xff]  ;;  %v11299_v53 = vld [vmem:[#allocation56_spill] sm:$0xff] }
 0x31f   :  { %7252 = vrot.lane.b32.xlu0 %v7251_v8, %s7576_s16  ;;  %7044 = vmatprep.subr.mxu1 %v11284_v4  ;;  %v2630_v61 = vadd.f32 %v6674_v17, %v11292_v58  ;;  %v2615_v8 = vadd.f32 %v11293_v45, %v6674_v17  ;;  %v2666_v40 = vmul.f32 %v2661_v9, %v2580_v26  ;;  %v11300_v4 = vld [vmem:[#allocation58_spill] sm:$0xff] }
 0x320   :  { %v2620_v52 = vadd.f32 %v6674_v17, %v11294_v46  ;;  %v2640_v51 = vadd.f32 %v6674_v17, %v11295_v28  ;;  %v2668_v6 = vmul.f32 %v2661_v9, %v2590_v30  ;;  %v2645_v39 = vadd.f32 %v11297_v33, %v6674_v17 }
 0x321   :  { %v2851_v37 = vpop.permute.xlu1 %2850  ;;  %v2667_v27 = vmul.f32 %v2661_v9, %v2585_v19  ;;  %v2892_v38 = vmul.f32 %v2845_v22, %v2666_v40  ;;  %v2625_v63 = vadd.f32 %v11298_v25, %v6674_v17  ;;  %v2655_v23 = vadd.f32 %v11299_v53, %v6674_v17 }
 0x322   :  { %v9149_v24 = vpop.permute.xlu0 %2862  ;;  %v2650_v58 = vadd.f32 %v6674_v17, %v11300_v4  ;;  %v2894_v26 = vmul.f32 %v2849_v50, %v2668_v6  ;;  %v2676_v45 = vmul.f32 %v9144_v41, %v2630_v61  ;;  %v2677_v28 = vmul.f32 %v9144_v41, %v2635_v35 }
 0x323   :  { %7262 = vrot.lane.b32.xlu0 %v7261_v7, %s7578_s18  ;;  %v11296_v7 = vld [vmem:[#allocation45_spill] sm:$0xff]  ;;  %v2893_v46 = vmul.f32 %v2847_v5, %v2667_v27  ;;  %v2674_v30 = vmul.f32 %v9144_v41, %v2620_v52  ;;  %v2669_v19 = vmul.f32 %v2661_v9, %v2595_v49  ;;  %v2670_v22 = vmul.f32 %v2661_v9, %v2600_v32 }
 0x324   :  { %v2610_v20 = vadd.f32 %v6674_v17, %v11296_v7  ;;  %v2678_v7 = vmul.f32 %v9144_v41, %v2640_v51  ;;  %v2679_v33 = vmul.f32 %v9144_v41, %v2645_v39  ;;  %v2671_v25 = vmul.f32 %v2661_v9, %v2605_v59 }
 0x325   :  { %v2853_v48 = vpop.permute.xlu1 %2852  ;;  %v2673_v17 = vmul.f32 %v2661_v9, %v2615_v8  ;;  %v2895_v53 = vmul.f32 %v2851_v37, %v2669_v19  ;;  %v2680_v61 = vmul.f32 %v9144_v41, %v2650_v58  ;;  %v2675_v35 = vmul.f32 %v9144_v41, %v2625_v63  ;;  %v11302_v19 = vld [vmem:[#allocation18_spill] sm:$0xff] }
 0x326   :  { %v2865_v56 = vpop.permute.xlu0 %2864  ;;  %v2672_v4 = vmul.f32 %v2661_v9, %v2610_v20  ;;  %v2896_v50 = vmul.f32 %v2853_v48, %v2670_v22  ;;  %v2681_v49 = vmul.f32 %v9144_v41, %v2655_v23  ;;  %v2900_v39 = vmul.f32 %v9147_v16, %v2674_v30  ;;  %v11301_v9 = vld [vmem:[#allocation28_spill] sm:$0xff]  ;;  %v11306_v23 = vld [vmem:[#allocation39_spill] sm:$0xff] }
 0x327   :  { %v2902_v32 = vmul.f32 %v2865_v56, %v2676_v45  ;;  %v2909_v37 = vmul.f32 %v2893_v46, %v11301_v9  ;;  %v2908_v22 = vmul.f32 %v2892_v38, %v11302_v19  ;;  %v2910_v63 = vmul.f32 %v2894_v26, %v11303_v13  ;;  %v11305_v56 = vld [vmem:[#allocation36_spill] sm:$0xff]  ;;  %v11311_v38 = vld [vmem:[#allocation49_spill] sm:$0xff] }
 0x328   :  { %v2901_v41 = vmul.f32 %v9149_v24, %v2675_v35  ;;  %v11312_v26 = vld [vmem:[#allocation64_spill] sm:$0xff] }
 0x329   :  { %v2855_v12 = vpop.permute.xlu1 %2854  ;;  %v2924_v35 = vmul.f32 %v2908_v22, %v11259_v29 }
 0x32a   :  { %v2867_v57 = vpop.permute.xlu0 %2866  ;;  %v2897_v52 = vmul.f32 %v2855_v12, %v2671_v25  ;;  %v11304_v12 = vld [vmem:[#allocation19_spill] sm:$0xff]  ;;  %v11313_v25 = vld [vmem:[#allocation25_spill] sm:$0xff] }
 0x32b   :  { %v2903_v27 = vmul.f32 %v2867_v57, %v2677_v28  ;;  %v2912_v57 = vmul.f32 %v2896_v50, %v11305_v56  ;;  %v11308_v28 = vld [vmem:[#allocation21_spill] sm:$0xff] }
 0x32c   :  { %v2913_v16 = vmul.f32 %v2897_v52, %v11306_v23 }
 0x32d   :  { %v2857_v34 = vpop.permute.xlu1 %2856 }
 0x32e   :  { %v2869_v2 = vpop.permute.xlu0 %2868  ;;  %v2898_v6 = vmul.f32 %v2857_v34, %v2672_v4  ;;  %v2911_v34 = vmul.f32 %v2895_v53, %v11304_v12  ;;  %v11315_v53 = vld [vmem:[#allocation67_spill] sm:$0xff] }
 0x32f   :  { %v2904_v48 = vmul.f32 %v2869_v2, %v2678_v7  ;;  %v11309_v2 = vld [vmem:[#allocation23_spill] sm:$0xff]  ;;  %v2916_v7 = vmul.f32 %v2900_v39, %v11311_v38  ;;  %v2928_v39 = vmul.f32 %v2912_v57, %v11259_v29 }
 0x330   :  { %v2927_v52 = vmul.f32 %v2911_v34, %v11259_v29 }
 0x331   :  { %v2859_v15 = vpop.permute.xlu1 %2858  ;;  %v2920_v4 = vmul.f32 %v2904_v48, %v11313_v25 }
 0x332   :  { %v2871_v3 = vpop.permute.xlu0 %2870  ;;  %v2899_v51 = vmul.f32 %v2859_v15, %v2673_v17  ;;  %v11314_v17 = vld [vmem:[#allocation66_spill] sm:$0xff] }
 0x333   :  { %v2905_v59 = vmul.f32 %v2871_v3, %v2679_v33  ;;  %v11307_v3 = vld [vmem:[#allocation20_spill] sm:$0xff]  ;;  %v2936_v57 = vmul.f32 %v2920_v4, %v11271_v11 }
 0x334   :  { %v2914_v45 = vmul.f32 %v2898_v6, %v11307_v3  ;;  %v2915_v46 = vmul.f32 %v2899_v51, %v11308_v28  ;;  %v2926_v6 = vmul.f32 %v2910_v63, %v11259_v29  ;;  %v11316_v51 = vld [vmem:[#allocation22_spill] sm:$0xff] }
 0x335   :  { %v2875_v18 = vpop.permute.xlu1 %2874  ;;  %v2921_v33 = vmul.f32 %v2905_v59, %v11312_v26 }
 0x336   :  { %v2873_v42 = vpop.permute.xlu0 %2872  ;;  %v2907_v58 = vmul.f32 %v2875_v18, %v2681_v49  ;;  %v11310_v18 = vld [vmem:[#allocation24_spill] sm:$0xff]  ;;  %v2917_v49 = vmul.f32 %v2901_v41, %v11316_v51  ;;  %v2931_v59 = vmul.f32 %v2915_v46, %v11259_v29  ;;  %v2930_v48 = vmul.f32 %v2914_v45, %v11259_v29 }
 0x337   :  { %v2906_v8 = vmul.f32 %v2873_v42, %v2680_v61  ;;  %v2918_v42 = vmul.f32 %v2902_v32, %v11309_v2  ;;  %v2919_v30 = vmul.f32 %v2903_v27, %v11310_v18  ;;  %v2925_v61 = vmul.f32 %v2909_v37, %v11259_v29  ;;  %v11324_v2 = vld [vmem:[#allocation89_spill] sm:$0xff] }
 0x338   :  { %v2923_v50 = vmul.f32 %v2907_v58, %v11315_v53  ;;  %v2929_v27 = vmul.f32 %v2913_v16, %v11259_v29  ;;  %v2932_v58 = vmul.f32 %v2916_v7, %v11271_v11  ;;  %v2937_v63 = vmul.f32 %v2921_v33, %v11271_v11 }
 0x339   :  { %v2922_v24 = vmul.f32 %v2906_v8, %v11314_v17  ;;  %v2935_v37 = vmul.f32 %v2919_v30, %v11271_v11  ;;  %v2934_v22 = vmul.f32 %v2918_v42, %v11271_v11  ;;  %v2941_v45 = vadd.f32 %v2925_v61, %v8873_v0  ;;  %v11321_v0 = vld [vmem:[#allocation85_spill] sm:$0xff] }
 0x33a   :  { %v9219_v41 = vmul.f32 %v2923_v50, %v11271_v11  ;;  %v2940_v46 = vadd.f32 %v2924_v35, %v8876_v43  ;;  %v2943_v30 = vadd.f32 %v2927_v52, %v8900_v14  ;;  %v2933_v42 = vmul.f32 %v2917_v49, %v11271_v11  ;;  %v11318_v50 = vld [vmem:[#allocation84_spill] sm:$0xff] }
 0x33b   :  { %v9223_v16 = vmul.f32 %v2922_v24, %v11271_v11  ;;  %v2945_v33 = vadd.f32 %v2929_v27, %v8944_v1  ;;  %v2944_v17 = vadd.f32 %v2928_v39, %v11318_v50  ;;  %v11319_v24 = vld [vmem:[#allocation70_spill] sm:$0xff]  ;;  %v2946_v43 = vadd.f32 %v2930_v48, %v11321_v0  ;;  %v11322_v50 = vld [vmem:[#allocation88_spill] sm:$0xff] }
 0x33c   :  { %v2947_v53 = vadd.f32 %v2931_v59, %v11319_v24  ;;  %v2951_v11 = vadd.f32 %v2935_v37, %v11322_v50  ;;  %v2950_v38 = vadd.f32 %v2934_v22, %v11324_v2 }
 0x33d   :  { %11317 = vst [vmem:[#allocation71_spill] sm:$0xff] %v9223_v16 }
 0x354   :  { %v9173_v44 = vpop.permute.xlu0 %2974 }
 0x355   :  { %v9151_v31 = vpop.permute.xlu1 %2972  ;;  %v3021_v34 = vmul.f32 %v9173_v44, %v2925_v61  ;;  %v2942_v44 = vadd.f32 %v2926_v6, %v8906_v21  ;;  %v2949_v61 = vadd.f32 %v2933_v42, %v11320_v62 }
 0x356   :  { %v3020_v7 = vmul.f32 %v9151_v31, %v2924_v35 }
 0x357   :  { %v3037_v36 = vadd.f32 %v3021_v34, %v2941_v45  ;;  %v11325_v45 = vld [vmem:[#allocation90_spill] sm:$0xff] }
 0x358   :  { %v3036_v24 = vadd.f32 %v3020_v7, %v2940_v46  ;;  %v2952_v46 = vadd.f32 %v2936_v57, %v9081_v55  ;;  %v11327_v7 = vld [vmem:[#allocation23_spill] sm:$0xff] }
 0x35d   :  { %v9153_v60 = vpop.permute.xlu1 %2978 }
 0x35e   :  { %v9183_v5 = vpop.permute.xlu0 %2976  ;;  %v3023_v4 = vmul.f32 %v9153_v60, %v2927_v52  ;;  %v11323_v60 = vld [vmem:[#allocation87_spill] sm:$0xff] }
 0x35f   :  { %v3022_v49 = vmul.f32 %v9183_v5, %v2926_v6  ;;  %v2948_v52 = vadd.f32 %v2932_v58, %v11323_v60  ;;  %v2953_v5 = vadd.f32 %v2937_v63, %v11325_v45 }
 0x360   :  { %v3039_v0 = vadd.f32 %v3023_v4, %v2943_v30  ;;  %v11328_v4 = vld [vmem:[#allocation93_spill] sm:$0xff] }
 0x361   :  { %v3038_v6 = vadd.f32 %v3022_v49, %v2942_v44  ;;  %v11330_v49 = vld [vmem:[#allocation81_spill] sm:$0xff] }
 0x362   :  { %v9159_v47 = vpop.permute.xlu1 %2982 }
 0x363   :  { %v3025_v31 = vmul.f32 %v9159_v47, %v2929_v27  ;;  %v3053_v47 = vmul.f32 %v3037_v36, %v11301_v9  ;;  %v2955_v36 = vadd.f32 %v9219_v41, %v9092_v10 }
 0x366   :  { %v9179_v40 = vpop.permute.xlu1 %2980 }
 0x367   :  { %v3024_v35 = vmul.f32 %v9179_v40, %v2928_v39  ;;  %v3041_v40 = vadd.f32 %v3025_v31, %v2945_v33 }
 0x371   :  { %v2987_v20 = vpop.permute.xlu1 %2986 }
 0x372   :  { %v3027_v1 = vmul.f32 %v2987_v20, %v2931_v59  ;;  %v3040_v20 = vadd.f32 %v3024_v35, %v2944_v17  ;;  %v3069_v17 = vmul.f32 %v3053_v47, %v11259_v29 }
 0x374   :  { %v3043_v27 = vadd.f32 %v3027_v1, %v2947_v53  ;;  %v3054_v1 = vmul.f32 %v3038_v6, %v11303_v13  ;;  %v3056_v53 = vmul.f32 %v3040_v20, %v11305_v56  ;;  %v3140_v31 = vmul.f32 %v11330_v49, %v3069_v17 }
 0x375   :  { %v2991_v15 = vpop.permute.xlu0 %2990  ;;  %v2985_v32 = vpop.permute.xlu1 %2984 }
 0x376   :  { %v3029_v21 = vmul.f32 %v2991_v15, %v2933_v42  ;;  %v3026_v16 = vmul.f32 %v2985_v32, %v2930_v48  ;;  %v3052_v32 = vmul.f32 %v3036_v24, %v11302_v19  ;;  %v11329_v24 = vld [vmem:[#allocation71_spill] sm:$0xff] }
 0x378   :  { %v3045_v39 = vadd.f32 %v3029_v21, %v2949_v61  ;;  %v3057_v21 = vmul.f32 %v3041_v40, %v11306_v23  ;;  %v2954_v61 = vadd.f32 %v11329_v24, %v11328_v4  ;;  %v11332_v40 = vld [vmem:[#allocation25_spill] sm:$0xff] }
 0x379   :  { %v2995_v8 = vpop.permute.xlu0 %2994  ;;  %v2989_v25 = vpop.permute.xlu1 %2988 }
 0x37a   :  { %v3031_v62 = vmul.f32 %v2995_v8, %v2935_v37  ;;  %v3028_v54 = vmul.f32 %v2989_v25, %v2932_v58  ;;  %v3042_v25 = vadd.f32 %v3026_v16, %v2946_v43  ;;  %v3059_v43 = vmul.f32 %v3043_v27, %v11308_v28  ;;  %v11326_v16 = vld [vmem:[#allocation49_spill] sm:$0xff] }
 0x37b   :  { %v9268_v35 = vmul.f32 %v3057_v21, %v11259_v29 }
 0x37c   :  { %v3047_v48 = vadd.f32 %v3031_v62, %v2951_v11  ;;  %v3044_v8 = vadd.f32 %v3028_v54, %v2948_v52  ;;  %v3061_v62 = vmul.f32 %v3045_v39, %v11316_v51  ;;  %v3068_v54 = vmul.f32 %v3052_v32, %v11259_v29 }
 0x37d   :  { %v2993_v14 = vpop.permute.xlu0 %2992  ;;  %v3072_v52 = vmul.f32 %v3056_v53, %v11259_v29 }
 0x37e   :  { %v3030_v34 = vmul.f32 %v2993_v14, %v2934_v22  ;;  %v3055_v14 = vmul.f32 %v3039_v0, %v11304_v12  ;;  %v3060_v30 = vmul.f32 %v3044_v8, %v11326_v16 }
 0x380   :  { %v3046_v37 = vadd.f32 %v3030_v34, %v2950_v38  ;;  %v3058_v38 = vmul.f32 %v3042_v25, %v11307_v3  ;;  %v3071_v42 = vmul.f32 %v3055_v14, %v11259_v29  ;;  %v9272_v34 = vmul.f32 %v3059_v43, %v11259_v29 }
 0x381   :  { %v2999_v15 = vpop.permute.xlu0 %2998 }
 0x382   :  { %v3033_v59 = vmul.f32 %v2999_v15, %v2937_v63  ;;  %v3063_v63 = vmul.f32 %v3047_v48, %v11310_v18  ;;  %v3062_v44 = vmul.f32 %v3046_v37, %v11327_v7  ;;  %v3139_v15 = vmul.f32 %v11330_v49, %v3068_v54 }
 0x383   :  { %v9279_v27 = vmul.f32 %v3058_v38, %v11259_v29  ;;  %v3142_v32 = vmul.f32 %v11330_v49, %v3071_v42  ;;  %v9304_v53 = vmul.f32 %v11330_v49, %v9272_v34 }
 0x384   :  { %v3049_v58 = vadd.f32 %v3033_v59, %v2953_v5  ;;  %v11331_v5 = vld [vmem:[#allocation17_spill] sm:$0xff] }
 0x385   :  { %v2997_v22 = vpop.permute.xlu0 %2996  ;;  %v3077_v47 = vmul.f32 %v3061_v62, %v11331_v5  ;;  %v9282_v39 = vmul.f32 %v3063_v63, %v11331_v5  ;;  %v3076_v59 = vmul.f32 %v3060_v30, %v11331_v5  ;;  %v9287_v25 = vmul.f32 %v3062_v44, %v11331_v5 }
 0x386   :  { %v3065_v0 = vmul.f32 %v3049_v58, %v11312_v26  ;;  %v3032_v11 = vmul.f32 %v2997_v22, %v2936_v57  ;;  %v3070_v57 = vmul.f32 %v3054_v1, %v11259_v29  ;;  %v9296_v58 = vmul.f32 %v11330_v49, %v9268_v35 }
 0x387   :  { %v9299_v1 = vmul.f32 %v11330_v49, %v3072_v52 }
 0x388   :  { %v3048_v33 = vadd.f32 %v3032_v11, %v2952_v46  ;;  %v3081_v6 = vmul.f32 %v3065_v0, %v11331_v5  ;;  %v3003_v46 = vpop.permute.xlu1 %3002  ;;  %v3141_v37 = vmul.f32 %v11330_v49, %v3070_v57  ;;  %v9312_v0 = vmul.f32 %v11330_v49, %v9279_v27 }
 0x389   :  { %v3035_v48 = vmul.f32 %v3003_v46, %v9219_v41  ;;  %v3001_v14 = vpop.permute.xlu0 %3000  ;;  %v11333_v41 = vld [vmem:[#allocation82_spill] sm:$0xff] }
 0x38a   :  { %v3064_v20 = vmul.f32 %v3048_v33, %v11332_v40  ;;  %v3034_v21 = vmul.f32 %v3001_v14, %v11329_v24  ;;  %v9307_v22 = vmul.f32 %v11333_v41, %v3077_v47  ;;  %v3152_v43 = vmul.f32 %v11333_v41, %v3081_v6  ;;  %v11334_v33 = vld [vmem:[#allocation67_spill] sm:$0xff] }
 0x38b   :  { %v3051_v62 = vadd.f32 %v3035_v48, %v2955_v36  ;;  %v9316_v11 = vmul.f32 %v11333_v41, %v9282_v39  ;;  %v9319_v38 = vmul.f32 %v11333_v41, %v3076_v59  ;;  %v9325_v44 = vmul.f32 %v11333_v41, %v9287_v25  ;;  %v11335_v48 = vld [vmem:[#allocation66_spill] sm:$0xff] }
 0x38c   :  { %v9291_v8 = vmul.f32 %v3064_v20, %v11331_v5  ;;  %v9321_v63 = vpop.permute.xlu1 %3117  ;;  %v3050_v30 = vadd.f32 %v3034_v21, %v2954_v61 }
 0x38d   :  { %v3067_v36 = vmul.f32 %v3051_v62, %v11334_v33  ;;  %v3134_v20 = vadd.f32 %v9321_v63, %v3081_v6  ;;  %v9333_v46 = vpop.permute.xlu0 %3115  ;;  %v9341_v62 = vadd.f32 %v9321_v63, %v3076_v59  ;;  %v9344_v45 = vadd.f32 %v9321_v63, %v3077_v47 }
 0x38e   :  { %v9330_v24 = vmul.f32 %v11333_v41, %v9291_v8  ;;  %v3066_v14 = vmul.f32 %v3050_v30, %v11335_v48  ;;  %v3121_v49 = vadd.f32 %v9333_v46, %v3068_v54  ;;  %v3122_v61 = vadd.f32 %v9333_v46, %v3069_v17 }
 0x38f   :  { %v3123_v21 = vadd.f32 %v9333_v46, %v3070_v57  ;;  %v3083_v10 = vmul.f32 %v3067_v36, %v11331_v5  ;;  %v3168_v4 = vadd.f32 %v3152_v43, %v3134_v20  ;;  %v3124_v59 = vadd.f32 %v9333_v46, %v3071_v42 }
 0x390   :  { %v3082_v6 = vmul.f32 %v3066_v14, %v11331_v5  ;;  %v9347_v55 = vpop.permute.xlu1 %7257  ;;  %v3155_v30 = vadd.f32 %v3139_v15, %v3121_v49  ;;  %v3156_v2 = vadd.f32 %v3140_v31, %v3122_v61  ;;  %v3125_v14 = vadd.f32 %v9333_v46, %v3072_v52  ;;  %v11337_v52 = vld [vmem:[#allocation75_spill] sm:$0xff] }
 0x391   :  { %11336 = vst [vmem:[#allocation32_spill] sm:$0xff] %v9347_v55  ;;  %v3157_v54 = vadd.f32 %v3141_v37, %v3123_v21  ;;  %v3154_v17 = vmul.f32 %v11333_v41, %v3083_v10  ;;  %v3136_v57 = vadd.f32 %v9321_v63, %v3083_v10  ;;  %v3184_v36 = vmul.f32 %v3168_v4, %v11312_v26  ;;  %v7253_v43 = vpop.permute.xlu0 %7252 }
 0x392   :  { %v3135_v20 = vadd.f32 %v9321_v63, %v3082_v6  ;;  %v3153_v47 = vmul.f32 %v11333_v41, %v3082_v6  ;;  %v7255_v60 = vunpack.i.h.bf16 %v7253_v43  ;;  %v7254_v31 = vunpack.i.l.bf16 %v7253_v43  ;;  %v11342_v43 = vld [vmem:[#allocation73_spill] sm:$0xff] }
 0x393   :  { %v3170_v50 = vadd.f32 %v3154_v17, %v3136_v57  ;;  %v3171_v15 = vmul.f32 %v3155_v30, %v11302_v19  ;;  %v3172_v4 = vmul.f32 %v3156_v2, %v11301_v9  ;;  %v3173_v42 = vmul.f32 %v3157_v54, %v11303_v13  ;;  %v11340_v2 = vld [vmem:[#allocation74_spill] sm:$0xff] }
 0x394   :  { %v3169_v37 = vadd.f32 %v3153_v47, %v3135_v20  ;;  %v9365_v21 = vmul.f32 %v3184_v36, %v11331_v5  ;;  %v9369_v6 = vsel %vm1491_vm1, %v11337_v52, %v7255_v60  ;;  %v9379_v54 = vsel %vm1491_vm1, %v11340_v2, %v7254_v31 }
 0x395   :  { %v9362_v61 = vmul.f32 %v3170_v50, %v11334_v33  ;;  %11338 = vst [vmem:[#allocation31_spill] sm:$0xff] %v9369_v6  ;;  %v9371_v17 = vpop.permute.xlu0 %7262  ;;  %v9374_v30 = vmul.f32 %v3171_v15, %v11259_v29  ;;  %11341 = vst [vmem:[#allocation33_spill] sm:$0xff] %v9379_v54  ;;  %v9382_v50 = vmul.f32 %v3172_v4, %v11259_v29 }
 0x396   :  { %11339 = vst [vmem:[#allocation35_spill] sm:$0xff] %v9371_v17  ;;  %v3185_v57 = vmul.f32 %v3169_v37, %v11335_v48  ;;  %v3158_v36 = vadd.f32 %v3142_v32, %v3124_v59  ;;  %v9393_v15 = vmul.f32 %v3173_v42, %v11259_v29  ;;  %v3159_v55 = vadd.f32 %v9299_v1, %v3125_v14 }
 0x397   :  { %6953 = vmatprep.mubr.msk.f32.mxu1 %vm1491_vm1, %v9374_v30  ;;  %v3435_v60 = vsel %vm1491_vm1, %v9374_v30, 0.0  ;;  %v3563_v20 = vadd.f32 %v9374_v30, %v11342_v43  ;;  %v3691_v47 = vsub.f32 %v9374_v30, %v11342_v43  ;;  %v3442_v37 = vsel %vm1491_vm1, %v9382_v50, 0.0 }
 0x398   :  { %v9396_v31 = vmul.f32 %v3185_v57, %v11331_v5  ;;  %v3436_v59 = vrot.slane %v3435_v60, 4  ;;  %6954 = vmatmul.mubr.msk.f32.vlgmr.msra.gmra.mrb[20].mxu1 %vm1491_vm1, %v9382_v50  ;;  %v3443_v2 = vrot.slane %v3442_v37, 4  ;;  %v3449_v42 = vsel %vm1491_vm1, %v9393_v15, 0.0 }
 0x399   :  { %v3579_v52 = vsel %vm1491_vm1, %v3563_v20, inf  ;;  %6956 = vmatprep.mubr.msk.f32.mxu1 %vm1491_vm1, %v9393_v15  ;;  %v9412_v10 = vsel %vm1491_vm1, %v3691_v47, -inf  ;;  %v3450_v4 = vrot.slane %v3449_v42, 4  ;;  %v3565_v20 = vadd.f32 %v9393_v15, %v11342_v43 }
 0x39a   :  { %v3533_v57 = vsel %vm1491_vm1, %v9396_v31, 0.0  ;;  %v3437_v32 = vadd.f32 %v3436_v59, %v3435_v60  ;;  %v3580_v49 = vrot.slane %v3579_v52, 4  ;;  %11343 = vst [vmem:[#allocation41_spill] sm:$0xff] %v9412_v10  ;;  %v3444_v48 = vadd.f32 %v3443_v2, %v3442_v37 }
 0x39b   :  { %v3534_v41 = vrot.slane %v3533_v57, 4  ;;  %v9420_v13 = vadd.f32 %v9382_v50, %v11342_v43  ;;  %v3174_v19 = vmul.f32 %v3158_v36, %v11304_v12  ;;  %v3451_v9 = vadd.f32 %v3450_v4, %v3449_v42  ;;  %v11345_v12 = vld [vmem:[#allocation72_spill] sm:$0xff] }
 0x39c   :  { %v3438_v33 = vrot.slane %v3437_v32, 2  ;;  %v9416_v26 = vmin.f32 %v3579_v52, %v3580_v49  ;;  %v3445_v59 = vrot.slane %v3444_v48, 2  ;;  %v3593_v47 = vsel %vm1491_vm1, %v3565_v20, inf }
 0x39d   :  { %11344 = vst [vmem:[#allocation42_spill] sm:$0xff] %v9420_v13  ;;  %v3535_v60 = vadd.f32 %v3534_v41, %v3533_v57  ;;  %v3594_v2 = vrot.slane %v3593_v47, 4  ;;  %v9426_v6 = vmul.f32 %v3174_v19, %v11259_v29  ;;  %v3452_v54 = vrot.slane %v3451_v9, 2 }
 0x39e   :  { %v3439_v17 = vadd.f32 %v3438_v33, %v3437_v32  ;;  %v3446_v52 = vadd.f32 %v3445_v59, %v3444_v48  ;;  %v3175_v57 = vmul.f32 %v3159_v55, %v11305_v56 }
 0x39f   :  { %v3536_v49 = vrot.slane %v3535_v60, 2  ;;  %6957 = vmatmul.mubr.msk.f32.gmra.mrb[22].mxu1 %vm1491_vm1, %v9426_v6  ;;  %v3456_v33 = vsel %vm1491_vm1, %v9426_v6, 0.0  ;;  %v3566_v36 = vadd.f32 %v9426_v6, %v11342_v43  ;;  %v3453_v48 = vadd.f32 %v3452_v54, %v3451_v9 }
 0x3a0   :  { %v3440_v13 = vrot.slane %v3439_v17, 1  ;;  %v3447_v32 = vrot.slane %v3446_v52, 1  ;;  %v3457_v4 = vrot.slane %v3456_v33, 4  ;;  %v9440_v14 = vmin.f32 %v3593_v47, %v3594_v2 }
 0x3a1   :  { %v9438_v42 = vadd.f32 %v3536_v49, %v3535_v60  ;;  %v3454_v59 = vrot.slane %v3453_v48, 1  ;;  %v9444_v37 = vsel %vm1491_vm1, %v3566_v36, inf  ;;  %v9450_v19 = vmul.f32 %v3175_v57, %v11259_v29 }
 0x3a2   :  { %v3441_v1 = vadd.f32 %v3440_v13, %v3439_v17  ;;  %v3448_v20 = vadd.f32 %v3447_v32, %v3446_v52  ;;  %v3458_v41 = vadd.f32 %v3457_v4, %v3456_v33  ;;  %v3126_v9 = vadd.f32 %v9333_v46, %v9268_v35 }
 0x3a3   :  { %v3127_v13 = vadd.f32 %v9333_v46, %v9279_v27  ;;  %v3455_v17 = vadd.f32 %v3454_v59, %v3453_v48  ;;  %v3128_v60 = vadd.f32 %v9333_v46, %v9272_v34  ;;  %6959 = vmatprep.mubr.msk.f32.mxu1 %vm1491_vm1, %v9450_v19  ;;  %v3463_v35 = vsel %vm1491_vm1, %v9450_v19, 0.0 }
 0x3a4   :  { %v9447_v10 = vmul.f32 %v3441_v1, %v11345_v12  ;;  %v9457_v55 = vmul.f32 %v3448_v20, %v11345_v12  ;;  %v3459_v54 = vrot.slane %v3458_v41, 2  ;;  %v3160_v27 = vadd.f32 %v9296_v58, %v3126_v9 }
 0x3a5   :  { %v9473_v52 = vmul.f32 %v3455_v17, %v11345_v12  ;;  %v3464_v46 = vrot.slane %v3463_v35, 4  ;;  %v3161_v36 = vadd.f32 %v9312_v0, %v3127_v13  ;;  %v3162_v32 = vadd.f32 %v9304_v53, %v3128_v60 }
 0x3a6   :  { %11346 = vst [vmem:[#allocation50_spill] sm:$0xff] %v9447_v10  ;;  %11347 = vst [vmem:[#allocation52_spill] sm:$0xff] %v9457_v55  ;;  %v3819_v47 = vsub.f32 %v9374_v30, %v9447_v10  ;;  %v3820_v49 = vsub.f32 %v9382_v50, %v9457_v55  ;;  %v3460_v34 = vadd.f32 %v3459_v54, %v3458_v41 }
 0x3a7   :  { %11348 = vst [vmem:[#allocation43_spill] sm:$0xff] %v9473_v52  ;;  %v3176_v33 = vmul.f32 %v3160_v27, %v11306_v23  ;;  %v3821_v48 = vsub.f32 %v9393_v15, %v9473_v52  ;;  %v3465_v1 = vadd.f32 %v3464_v46, %v3463_v35  ;;  %v3177_v41 = vmul.f32 %v3161_v36, %v11307_v3 }
 0x3a8   :  { %v3835_v30 = vmul.f32 %v3819_v47, %v3819_v47  ;;  %v3461_v4 = vrot.slane %v3460_v34, 1  ;;  %v3178_v59 = vmul.f32 %v3162_v32, %v11308_v28  ;;  %v3836_v9 = vmul.f32 %v3820_v49, %v3820_v49 }
 0x3a9   :  { %v9483_v20 = vmul.f32 %v3176_v33, %v11259_v29  ;;  %v3837_v0 = vmul.f32 %v3821_v48, %v3821_v48  ;;  %v3466_v53 = vrot.slane %v3465_v1, 2  ;;  %v9493_v60 = vmul.f32 %v3177_v41, %v11259_v29 }
 0x3aa   :  { %v3851_v57 = vmul.f32 %v3835_v30, %v11259_v29  ;;  %v3462_v13 = vadd.f32 %v3461_v4, %v3460_v34  ;;  %v9496_v47 = vmul.f32 %v3178_v59, %v11259_v29  ;;  %v3163_v36 = vadd.f32 %v9319_v38, %v9341_v62 }
 0x3ab   :  { %6960 = vmatmul.mubr.msk.f32.gmra.mrb[24].mxu1 %vm1491_vm1, %v9483_v20  ;;  %v3470_v54 = vsel %vm1491_vm1, %v9483_v20, 0.0  ;;  %v3853_v27 = vmul.f32 %v3837_v0, %v11259_v29  ;;  %v3467_v34 = vadd.f32 %v3466_v53, %v3465_v1  ;;  %v3477_v30 = vsel %vm1491_vm1, %v9493_v60, 0.0 }
 0x3ac   :  { %v3867_v17 = vsel %vm1491_vm1, %v3851_v57, 0.0  ;;  %v9500_v49 = vmul.f32 %v3462_v13, %v11345_v12  ;;  %v3471_v46 = vrot.slane %v3470_v54, 4  ;;  %6962 = vmatprep.mubr.msk.f32.mxu1 %vm1491_vm1, %v9493_v60  ;;  %v3484_v33 = vsel %vm1491_vm1, %v9496_v47, 0.0 }
 0x3ad   :  { %v3868_v35 = vrot.slane %v3867_v17, 4  ;;  %v3881_v48 = vsel %vm1491_vm1, %v3853_v27, 0.0  ;;  %v3468_v1 = vrot.slane %v3467_v34, 1  ;;  %v9517_v57 = vadd.f32 %v9450_v19, %v11342_v43 }
 0x3ae   :  { %11349 = vst [vmem:[#allocation48_spill] sm:$0xff] %v9500_v49  ;;  %v3822_v4 = vsub.f32 %v9426_v6, %v9500_v49  ;;  %v3472_v41 = vadd.f32 %v3471_v46, %v3470_v54  ;;  %v3478_v59 = vrot.slane %v3477_v30, 4  ;;  %v3485_v0 = vrot.slane %v3484_v33, 4 }
 0x3af   :  { %v9510_v32 = vadd.f32 %v3868_v35, %v3867_v17  ;;  %6963 = vmatmul.mubr.msk.f32.gmra.mrb[26].mxu1 %vm1491_vm1, %v9496_v47  ;;  %v9522_v38 = vmul.f32 %v3836_v9, %v11259_v29  ;;  %v3882_v62 = vrot.slane %v3881_v48, 4  ;;  %v3469_v13 = vadd.f32 %v3468_v1, %v3467_v34 }
 0x3b0   :  { %v3179_v53 = vmul.f32 %v3163_v36, %v11326_v16  ;;  %v3473_v35 = vrot.slane %v3472_v41, 2  ;;  %v3479_v27 = vadd.f32 %v3478_v59, %v3477_v30  ;;  %v3486_v58 = vadd.f32 %v3485_v0, %v3484_v33 }
 0x3b1   :  { %v3838_v2 = vmul.f32 %v3822_v4, %v3822_v4  ;;  %v9527_v54 = vmul.f32 %v3469_v13, %v11345_v12  ;;  %v3164_v9 = vadd.f32 %v9307_v22, %v9344_v45  ;;  %v3131_v36 = vadd.f32 %v9321_v63, %v9287_v25  ;;  %v11351_v4 = vld [vmem:[#allocation69_spill] sm:$0xff] }
 0x3b2   :  { %v9530_v46 = vmul.f32 %v3179_v53, %v11331_v5  ;;  %v3474_v49 = vadd.f32 %v3473_v35, %v3472_v41  ;;  %v3480_v52 = vrot.slane %v3479_v27, 2  ;;  %v3487_v34 = vrot.slane %v3486_v58, 2 }
 0x3b3   :  { %11350 = vst [vmem:[#allocation55_spill] sm:$0xff] %v9527_v54  ;;  %v3823_v30 = vsub.f32 %v9450_v19, %v9527_v54  ;;  %v9548_v0 = vadd.f32 %v3882_v62, %v3881_v48  ;;  %v9551_v13 = vmul.f32 %v3838_v2, %v11259_v29  ;;  %v3180_v35 = vmul.f32 %v3164_v9, %v11316_v51 }
 0x3b4   :  { %6965 = vmatprep.mubr.msk.f32.mxu1 %vm1491_vm1, %v9530_v46  ;;  %v3491_v33 = vsel %vm1491_vm1, %v9530_v46, 0.0  ;;  %v3571_v1 = vadd.f32 %v9530_v46, %v11351_v4  ;;  %v3699_v45 = vsub.f32 %v9530_v46, %v11351_v4  ;;  %v3475_v22 = vrot.slane %v3474_v49, 1 }
 0x3b5   :  { %v3481_v41 = vadd.f32 %v3480_v52, %v3479_v27  ;;  %v9546_v59 = vadd.f32 %v3487_v34, %v3486_v58  ;;  %v3492_v25 = vrot.slane %v3491_v33, 4  ;;  %11352 = vst [vmem:[#allocation45_spill] sm:$0xff] %v9551_v13  ;;  %v3839_v17 = vmul.f32 %v3823_v30, %v3823_v30 }
 0x3b6   :  { %v3635_v53 = vsel %vm1491_vm1, %v3571_v1, inf  ;;  %v3476_v54 = vadd.f32 %v3475_v22, %v3474_v49  ;;  %v9557_v52 = vsel %vm1491_vm1, %v3699_v45, -inf  ;;  %v9560_v58 = vmul.f32 %v3180_v35, %v11331_v5 }
 0x3b7   :  { %v3482_v55 = vrot.slane %v3481_v41, 1  ;;  %v3493_v10 = vadd.f32 %v3492_v25, %v3491_v33  ;;  %v3636_v3 = vrot.slane %v3635_v53, 4  ;;  %v3165_v27 = vadd.f32 %v9325_v44, %v3131_v36 }
 0x3b8   :  { %v9563_v2 = vmul.f32 %v3476_v54, %v11345_v12  ;;  %6966 = vmatmul.mubr.msk.f32.gmra.mrb[28].mxu1 %vm1491_vm1, %v9560_v58  ;;  %v3498_v49 = vsel %vm1491_vm1, %v9560_v58, 0.0  ;;  %v3572_v34 = vadd.f32 %v9560_v58, %v11351_v4  ;;  %v3700_v30 = vsub.f32 %v9560_v58, %v11351_v4 }
 0x3b9   :  { %v3483_v48 = vadd.f32 %v3482_v55, %v3481_v41  ;;  %v3494_v62 = vrot.slane %v3493_v10, 2  ;;  %v9566_v9 = vmin.f32 %v3635_v53, %v3636_v3  ;;  %v3499_v44 = vrot.slane %v3498_v49, 4 }
 0x3ba   :  { %11353 = vst [vmem:[#allocation54_spill] sm:$0xff] %v9563_v2  ;;  %v3824_v55 = vsub.f32 %v9483_v20, %v9563_v2  ;;  %v9582_v36 = vmul.f32 %v3839_v17, %v11259_v29  ;;  %v3642_v1 = vsel %vm1491_vm1, %v3572_v34, inf  ;;  %v3181_v45 = vmul.f32 %v3165_v27, %v11327_v7 }
 0x3bb   :  { %v9579_v54 = vmul.f32 %v3483_v48, %v11345_v12  ;;  %v3495_v3 = vadd.f32 %v3494_v62, %v3493_v10  ;;  %v3500_v25 = vadd.f32 %v3499_v44, %v3498_v49  ;;  %v9589_v53 = vsel %vm1491_vm1, %v3700_v30, -inf }
 0x3bc   :  { %11355 = vst [vmem:[#allocation56_spill] sm:$0xff] %v9582_v36  ;;  %v3643_v35 = vrot.slane %v3642_v1, 4  ;;  %v9594_v17 = vmul.f32 %v3181_v45, %v11331_v5  ;;  %v3132_v48 = vadd.f32 %v9321_v63, %v9282_v39  ;;  %v9598_v62 = vmul.f32 %v3824_v55, %v3824_v55  ;;  %v11356_v55 = vld [vmem:[#allocation68_spill] sm:$0xff] }
 0x3bd   :  { %11354 = vst [vmem:[#allocation47_spill] sm:$0xff] %v9579_v54  ;;  %v3496_v22 = vrot.slane %v3495_v3, 1  ;;  %v3825_v10 = vsub.f32 %v9493_v60, %v9579_v54  ;;  %v3501_v34 = vrot.slane %v3500_v25, 2  ;;  %v3133_v49 = vadd.f32 %v9321_v63, %v9291_v8 }
 0x3be   :  { %v9602_v44 = vmin.f32 %v3642_v1, %v3643_v35  ;;  %6968 = vmatprep.mubr.msk.f32.mxu1 %vm1491_vm1, %v9594_v17  ;;  %v3505_v45 = vsel %vm1491_vm1, %v9594_v17, 0.0  ;;  %v3573_v39 = vadd.f32 %v9594_v17, %v11351_v4  ;;  %v3166_v8 = vadd.f32 %v9316_v11, %v3132_v48 }
 0x3bf   :  { %v3497_v27 = vadd.f32 %v3496_v22, %v3495_v3  ;;  %v3502_v3 = vadd.f32 %v3501_v34, %v3500_v25  ;;  %v3506_v22 = vrot.slane %v3505_v45, 4  ;;  %v9615_v63 = vmul.f32 %v3825_v10, %v3825_v10 }
 0x3c0   :  { %v3649_v1 = vsel %vm1491_vm1, %v3573_v39, inf  ;;  %v3167_v41 = vadd.f32 %v9330_v24, %v3133_v49  ;;  %v3182_v34 = vmul.f32 %v3166_v8, %v11310_v18  ;;  %v9628_v10 = vmul.f32 %v9362_v61, %v11331_v5 }
 0x3c1   :  { %v9612_v16 = vmul.f32 %v3497_v27, %v11356_v55  ;;  %11358 = vst [vmem:[#allocation71_spill] sm:$0xff] %v9615_v63  ;;  %v3503_v33 = vrot.slane %v3502_v3, 1  ;;  %v3507_v54 = vadd.f32 %v3506_v22, %v3505_v45  ;;  %v3650_v27 = vrot.slane %v3649_v1, 4 }
 0x3c2   :  { %v3183_v11 = vmul.f32 %v3167_v41, %v11332_v40  ;;  %v3692_v24 = vsub.f32 %v9382_v50, %v11342_v43  ;;  %v9635_v49 = vmul.f32 %v3182_v34, %v11331_v5 }
 0x3c3   :  { %11357 = vst [vmem:[#allocation58_spill] sm:$0xff] %v9612_v16  ;;  %v3827_v30 = vsub.f32 %v9530_v46, %v9612_v16  ;;  %v3504_v39 = vadd.f32 %v3503_v33, %v3502_v3  ;;  %v3508_v35 = vrot.slane %v3507_v54, 2  ;;  %v9632_v46 = vmin.f32 %v3649_v1, %v3650_v27 }
 0x3c4   :  { %v9638_v45 = vmul.f32 %v3183_v11, %v11331_v5  ;;  %6969 = vmatmul.mubr.msk.f32.gmra.mrb[30].mxu1 %vm1491_vm1, %v9635_v49  ;;  %v3512_v3 = vsel %vm1491_vm1, %v9635_v49, 0.0  ;;  %v3574_v22 = vadd.f32 %v9635_v49, %v11351_v4 }
 0x3c5   :  { %v3843_v48 = vmul.f32 %v3827_v30, %v3827_v30  ;;  %v9644_v30 = vmul.f32 %v3504_v39, %v11356_v55  ;;  %v3509_v33 = vadd.f32 %v3508_v35, %v3507_v54  ;;  %v3513_v34 = vrot.slane %v3512_v3, 4 }
 0x3c6   :  { %v3519_v8 = vsel %vm1491_vm1, %v9638_v45, 0.0  ;;  %6971 = vmatprep.mubr.msk.f32.mxu1 %vm1491_vm1, %v9638_v45  ;;  %v9675_v7 = vadd.f32 %v9638_v45, %v11351_v4 }
 0x3c7   :  { %v3859_v61 = vmul.f32 %v3843_v48, %v11331_v5  ;;  %11359 = vst [vmem:[#allocation75_spill] sm:$0xff] %v9644_v30  ;;  %v3828_v35 = vsub.f32 %v9560_v58, %v9644_v30  ;;  %v3510_v27 = vrot.slane %v3509_v33, 1  ;;  %v9664_v48 = vsel %vm1491_vm1, %v3574_v22, inf }
 0x3c8   :  { %v3520_v39 = vrot.slane %v3519_v8, 4  ;;  %v3514_v41 = vadd.f32 %v3513_v34, %v3512_v3  ;;  %6972 = vmatmul.mubr.msk.f32.gmra.mrb[32].mxu1 %vm1491_vm1, %v9365_v21  ;;  %v11362_v34 = vld [vmem:[#allocation41_spill] sm:$0xff] }
 0x3c9   :  { %v3923_v54 = vsel %vm1491_vm1, %v3859_v61, 0.0  ;;  %v3844_v50 = vmul.f32 %v3828_v35, %v3828_v35  ;;  %v3511_v1 = vadd.f32 %v3510_v27, %v3509_v33  ;;  %6974 = vmatprep.mubr.msk.f32.mxu1 %vm1491_vm1, %v9396_v31 }
 0x3ca   :  { %v3924_v11 = vrot.slane %v3923_v54, 4  ;;  %v3521_v40 = vadd.f32 %v3520_v39, %v3519_v8  ;;  %v3515_v3 = vrot.slane %v3514_v41, 2 }
 0x3cb   :  { %v3860_v22 = vmul.f32 %v3844_v50, %v11331_v5  ;;  %v9681_v33 = vmul.f32 %v3511_v1, %v11356_v55 }
 0x3cc   :  { %v9670_v58 = vadd.f32 %v3924_v11, %v3923_v54  ;;  %v3522_v8 = vrot.slane %v3521_v40, 2  ;;  %v11363_v11 = vrot.slane %v11362_v34, 4  ;;  %v3516_v2 = vadd.f32 %v3515_v3, %v3514_v41  ;;  %6975 = vmatmul.mubr.msk.f32.gmra.mrb[34].mxu1 %vm1491_vm1, %v9628_v10 }
 0x3cd   :  { %11361 = vst [vmem:[#allocation73_spill] sm:$0xff] %v9681_v33  ;;  %v3930_v1 = vsel %vm1491_vm1, %v3860_v22, 0.0  ;;  %v3829_v39 = vsub.f32 %v9594_v17, %v9681_v33  ;;  %v3714_v54 = vsel %vm1491_vm1, %v3692_v24, -inf  ;;  %v11366_v24 = vmov 0.0  }
 0x3ce   :  { %11360 = vst [vmem:[#allocation74_spill] sm:$0xff] %v9670_v58  ;;  %v3709_v50 = vmax.f32 %v11362_v34, %v11363_v11  ;;  %v3931_v61 = vrot.slane %v3930_v1, 4  ;;  %v3523_v25 = vadd.f32 %v3522_v8, %v3521_v40  ;;  %v3715_v51 = vrot.slane %v3714_v54, 4  ;;  %7046 = vmatprep.mubr.msk.f32.mxu1 %vm7574_vm9, %v11366_v24 }
 0x3cf   :  { %v3845_v27 = vmul.f32 %v3829_v39, %v3829_v39  ;;  %v3517_v35 = vrot.slane %v3516_v2, 1  ;;  %v11364_v34 = vsub.f32 %v9393_v15, %v11342_v43  ;;  %v11365_v11 = vsub.f32 %v9426_v6, %v11342_v43 }
 0x3d0   :  { %v3710_v18 = vrot.slane %v3709_v50, 2  ;;  %v3524_v3 = vrot.slane %v3523_v25, 1  ;;  %v3716_v28 = vmax.f32 %v3714_v54, %v3715_v51  ;;  %v9712_v33 = vadd.f32 %v3931_v61, %v3930_v1 }
 0x3d1   :  { %v3721_v22 = vsel %vm1491_vm1, %v11364_v34, -inf  ;;  %v3728_v41 = vsel %vm1491_vm1, %v11365_v11, -inf  ;;  %v3861_v39 = vmul.f32 %v3845_v27, %v11331_v5  ;;  %v3518_v56 = vadd.f32 %v3517_v35, %v3516_v2 }
 0x3d2   :  { %v3711_v8 = vmax.f32 %v3709_v50, %v3710_v18  ;;  %v3722_v23 = vrot.slane %v3721_v22, 4  ;;  %v3729_v15 = vrot.slane %v3728_v41, 4  ;;  %11367 = vst [vmem:[#allocation72_spill] sm:$0xff] %v9712_v33  ;;  %v3525_v34 = vadd.f32 %v3524_v3, %v3523_v25 }
 0x3d3   :  { %v3717_v11 = vrot.slane %v3716_v28, 2  ;;  %v3937_v30 = vsel %vm1491_vm1, %v3861_v39, 0.0  ;;  %v9718_v24 = vmul.f32 %v3518_v56, %v11356_v55  ;;  %v11370_v50 = vsub.f32 %v9450_v19, %v11342_v43 }
 0x3d4   :  { %v3723_v40 = vmax.f32 %v3721_v22, %v3722_v23  ;;  %v3730_v18 = vmax.f32 %v3728_v41, %v3729_v15  ;;  %v3938_v51 = vrot.slane %v3937_v30, 4  ;;  %v9721_v54 = vmul.f32 %v3525_v34, %v11356_v55 }
 0x3d5   :  { %11368 = vst [vmem:[#allocation69_spill] sm:$0xff] %v9718_v24  ;;  %v3712_v2 = vrot.slane %v3711_v8, 1  ;;  %v3718_v35 = vmax.f32 %v3716_v28, %v3717_v11  ;;  %v3830_v25 = vsub.f32 %v9635_v49, %v9718_v24  ;;  %v3735_v1 = vsel %vm1491_vm1, %v11370_v50, -inf }
 0x3d6   :  { %11369 = vst [vmem:[#allocation68_spill] sm:$0xff] %v9721_v54  ;;  %v3724_v61 = vrot.slane %v3723_v40, 2  ;;  %v3731_v27 = vrot.slane %v3730_v18, 2  ;;  %v3831_v23 = vsub.f32 %v9638_v45, %v9721_v54  ;;  %v3736_v41 = vrot.slane %v3735_v1, 4 }
 0x3d7   :  { %v3719_v22 = vrot.slane %v3718_v35, 1  ;;  %v3846_v3 = vmul.f32 %v3830_v25, %v3830_v25  ;;  %v11371_v15 = vsub.f32 %v9483_v20, %v11342_v43  ;;  %v9736_v6 = vmax.f32 %v3711_v8, %v3712_v2 }
 0x3d8   :  { %v3725_v39 = vmax.f32 %v3723_v40, %v3724_v61  ;;  %v3732_v28 = vmax.f32 %v3730_v18, %v3731_v27  ;;  %v3847_v11 = vmul.f32 %v3831_v23, %v3831_v23  ;;  %v3737_v19 = vmax.f32 %v3735_v1, %v3736_v41 }
 0x3d9   :  { %v3742_v34 = vsel %vm1491_vm1, %v11371_v15, -inf  ;;  %v9738_v24 = vadd.f32 %v3938_v51, %v3937_v30  ;;  %v9741_v56 = vmul.f32 %v3846_v3, %v11331_v5  ;;  %v3720_v54 = vmax.f32 %v3718_v35, %v3719_v22 }
 0x3da   :  { %v3743_v50 = vrot.slane %v3742_v34, 4  ;;  %v11374_v40 = vsub.f32 %v9493_v60, %v11342_v43  ;;  %v3726_v25 = vrot.slane %v3725_v39, 1  ;;  %v3738_v61 = vrot.slane %v3737_v19, 2 }
 0x3db   :  { %11372 = vst [vmem:[#allocation41_spill] sm:$0xff] %v9738_v24  ;;  %11373 = vst [vmem:[#allocation94_spill] sm:$0xff] %v9741_v56  ;;  %v9748_v8 = vmul.f32 %v3847_v11, %v11331_v5  ;;  %v3733_v2 = vrot.slane %v3732_v28, 1  ;;  %v11376_v30 = vsub.f32 %v9496_v47, %v11342_v43  ;;  %v11377_v35 = vrot.slane %v9557_v52, 4 }
 0x3dc   :  { %v3749_v18 = vsel %vm1491_vm1, %v11374_v40, -inf  ;;  %v3744_v27 = vmax.f32 %v3742_v34, %v3743_v50  ;;  %v3739_v23 = vmax.f32 %v3737_v19, %v3738_v61  ;;  %v11378_v34 = vrot.slane %v9589_v53, 4 }
 0x3dd   :  { %v3750_v15 = vrot.slane %v3749_v18, 4  ;;  %11375 = vst [vmem:[#allocation95_spill] sm:$0xff] %v9748_v8  ;;  %v3756_v51 = vsel %vm1491_vm1, %v11376_v30, -inf  ;;  %v3765_v1 = vmax.f32 %v9557_v52, %v11377_v35  ;;  %v11379_v50 = vsub.f32 %v9594_v17, %v11351_v4 }
 0x3de   :  { %v3745_v22 = vrot.slane %v3744_v27, 2  ;;  %v3757_v3 = vrot.slane %v3756_v51, 4  ;;  %v3772_v11 = vmax.f32 %v9589_v53, %v11378_v34  ;;  %v11380_v30 = vsub.f32 %v9635_v49, %v11351_v4 }
 0x3df   :  { %v3751_v41 = vmax.f32 %v3749_v18, %v3750_v15  ;;  %v3766_v40 = vrot.slane %v3765_v1, 2  ;;  %v3777_v16 = vsel %vm1491_vm1, %v11379_v50, -inf  ;;  %v3740_v52 = vrot.slane %v3739_v23, 1 }
 0x3e0   :  { %v3784_v8 = vsel %vm1491_vm1, %v11380_v30, -inf  ;;  %v3746_v19 = vmax.f32 %v3744_v27, %v3745_v22  ;;  %v3758_v18 = vmax.f32 %v3756_v51, %v3757_v3  ;;  %v3773_v35 = vrot.slane %v3772_v11, 2 }
 0x3e1   :  { %v3752_v61 = vrot.slane %v3751_v41, 2  ;;  %v3767_v15 = vmax.f32 %v3765_v1, %v3766_v40  ;;  %v3778_v56 = vrot.slane %v3777_v16, 4  ;;  %v3785_v24 = vrot.slane %v3784_v8, 4 }
 0x3e2   :  { %v3727_v33 = vmax.f32 %v3725_v39, %v3726_v25  ;;  %v3747_v53 = vrot.slane %v3746_v19, 1  ;;  %v3759_v58 = vrot.slane %v3758_v18, 2  ;;  %v3774_v5 = vmax.f32 %v3772_v11, %v3773_v35 }
 0x3e3   :  { %v3753_v34 = vmax.f32 %v3751_v41, %v3752_v61  ;;  %v3768_v17 = vrot.slane %v3767_v15, 1  ;;  %v3779_v50 = vmax.f32 %v3777_v16, %v3778_v56  ;;  %v3786_v36 = vmax.f32 %v3784_v8, %v3785_v24 }
 0x3e4   :  { %v3734_v13 = vmax.f32 %v3732_v28, %v3733_v2  ;;  %v3741_v49 = vmax.f32 %v3739_v23, %v3740_v52  ;;  %v11381_v27 = vsub.f32 %v9638_v45, %v11351_v4  ;;  %v3748_v1 = vmax.f32 %v3746_v19, %v3747_v53 }
 0x3e5   :  { %v3754_v63 = vrot.slane %v3753_v34, 1  ;;  %v3775_v22 = vrot.slane %v3774_v5, 1  ;;  %v3780_v3 = vrot.slane %v3779_v50, 2  ;;  %v3787_v40 = vrot.slane %v3786_v36, 2 }
 0x3e6   :  { %v3791_v51 = vsel %vm1491_vm1, %v11381_v27, -inf  ;;  %v3760_v39 = vmax.f32 %v3758_v18, %v3759_v58  ;;  %v3769_v25 = vmax.f32 %v3767_v15, %v3768_v17  ;;  %v11382_v11 = vsub.f32 %v9365_v21, %v11351_v4 }
 0x3e7   :  { %v3792_v41 = vrot.slane %v3791_v51, 4  ;;  %v3776_v24 = vmax.f32 %v3774_v5, %v3775_v22  ;;  %v3781_v56 = vmax.f32 %v3779_v50, %v3780_v3  ;;  %v3788_v28 = vmax.f32 %v3786_v36, %v3787_v40 }
 0x3e8   :  { %v3798_v16 = vsel %vm1491_vm1, %v11382_v11, -inf  ;;  %v3755_v2 = vmax.f32 %v3753_v34, %v3754_v63  ;;  %v11383_v23 = vsub.f32 %v9396_v31, %v11351_v4  ;;  %v11384_v58 = vsub.f32 %v9628_v10, %v11351_v4 }
 0x3e9   :  { %v3799_v8 = vrot.slane %v3798_v16, 4  ;;  %v3793_v45 = vmax.f32 %v3791_v51, %v3792_v41  ;;  %v3782_v19 = vrot.slane %v3781_v56, 1  ;;  %v3789_v61 = vrot.slane %v3788_v28, 1 }
 0x3ea   :  { %v3805_v30 = vsel %vm1491_vm1, %v11383_v23, -inf  ;;  %v3812_v52 = vsel %vm1491_vm1, %v11384_v58, -inf  ;;  %v4079_v36 = vsel %vm2304_vm4, %v3720_v54, %v9736_v6  ;;  %v4086_v63 = vsel %vm2304_vm4, %v3776_v24, %v3769_v25 }
 0x3eb   :  { %v3800_v18 = vmax.f32 %v3798_v16, %v3799_v8  ;;  %v3806_v15 = vrot.slane %v3805_v30, 4  ;;  %v3794_v5 = vrot.slane %v3793_v45, 2  ;;  %v3813_v35 = vrot.slane %v3812_v52, 4 }
 0x3ec   :  { %v3761_v53 = vrot.slane %v3760_v39, 1  ;;  %v3783_v34 = vmax.f32 %v3781_v56, %v3782_v19  ;;  %v3790_v27 = vmax.f32 %v3788_v28, %v3789_v61  ;;  %v4080_v3 = vsel %vm2306_vm5, %v3727_v33, %v4079_v36 }
 0x3ed   :  { %v3801_v17 = vrot.slane %v3800_v18, 2  ;;  %v3807_v50 = vmax.f32 %v3805_v30, %v3806_v15  ;;  %v3795_v51 = vmax.f32 %v3793_v45, %v3794_v5  ;;  %v3814_v22 = vmax.f32 %v3812_v52, %v3813_v35 }
 0x3ee   :  { %v4081_v11 = vsel %vm2308_vm6, %v3734_v13, %v4080_v3  ;;  %v4087_v16 = vsel %vm2306_vm5, %v3783_v34, %v4086_v63  ;;  %v3762_v25 = vmax.f32 %v3760_v39, %v3761_v53  ;;  %v3568_v13 = vadd.f32 %v9483_v20, %v11342_v43 }
 0x3ef   :  { %v3802_v40 = vmax.f32 %v3800_v18, %v3801_v17  ;;  %v3808_v41 = vrot.slane %v3807_v50, 2  ;;  %v3796_v8 = vrot.slane %v3795_v51, 1  ;;  %v3815_v23 = vrot.slane %v3814_v22, 2 }
 0x3f0   :  { %v4082_v6 = vsel %vm2310_vm7, %v3741_v49, %v4081_v11  ;;  %v4088_v54 = vsel %vm2308_vm6, %v3790_v27, %v4087_v16  ;;  %v3569_v19 = vadd.f32 %v9493_v60, %v11342_v43  ;;  %v3570_v49 = vadd.f32 %v9496_v47, %v11342_v43  ;;  %v11386_v60 = vld [vmem:[#allocation42_spill] sm:$0xff] }
 0x3f1   :  { %v3803_v24 = vrot.slane %v3802_v40, 1  ;;  %v3809_v56 = vmax.f32 %v3807_v50, %v3808_v41  ;;  %v4083_v28 = vsel %vm2312_vm10, %v3748_v1, %v4082_v6  ;;  %v3797_v45 = vmax.f32 %v3795_v51, %v3796_v8 }
 0x3f2   :  { %v3816_v30 = vmax.f32 %v3814_v22, %v3815_v23  ;;  %v4084_v33 = vsel %vm2314_vm11, %v3755_v2, %v4083_v28  ;;  %v9804_v18 = vadd.f32 %v9365_v21, %v11351_v4  ;;  %v11385_v15 = vrot.slane %v9416_v26, 2 }
 0x3f3   :  { %v3804_v58 = vmax.f32 %v3802_v40, %v3803_v24  ;;  %v3810_v52 = vrot.slane %v3809_v56, 1  ;;  %v4085_v61 = vsel %vm2316_vm12, %v3762_v25, %v4084_v33  ;;  %v4089_v1 = vsel %vm2310_vm7, %v3797_v45, %v4088_v54 }
 0x3f4   :  { %v3817_v39 = vrot.slane %v3816_v30, 1  ;;  %v3583_v5 = vmin.f32 %v9416_v26, %v11385_v15  ;;  %v3586_v35 = vsel %vm1491_vm1, %v11386_v60, inf  ;;  %v3596_v63 = vrot.slane %v9440_v14, 2 }
 0x3f5   :  { %v3811_v2 = vmax.f32 %v3809_v56, %v3810_v52  ;;  %v4090_v20 = vsel %vm2312_vm10, %v3804_v58, %v4089_v1  ;;  %v3587_v36 = vrot.slane %v3586_v35, 4  ;;  %v11387_v53 = vrot.slane %v9444_v37, 4 }
 0x3f6   :  { %v3818_v43 = vmax.f32 %v3816_v30, %v3817_v39  ;;  %v3577_v50 = vadd.f32 %v9396_v31, %v11351_v4  ;;  %v3607_v27 = vsel %vm1491_vm1, %v9517_v57, inf  ;;  %v3614_v26 = vsel %vm1491_vm1, %v3568_v13, inf }
 0x3f7   :  { %v3602_v34 = vmin.f32 %v9444_v37, %v11387_v53  ;;  %v4091_v17 = vsel %vm2314_vm11, %v3811_v2, %v4090_v20  ;;  %v3588_v22 = vmin.f32 %v3586_v35, %v3587_v36  ;;  %v3597_v3 = vmin.f32 %v9440_v14, %v3596_v63 }
 0x3f8   :  { %v4092_v51 = vsel %vm2316_vm12, %v3818_v43, %v4091_v17  ;;  %v3578_v37 = vadd.f32 %v9628_v10, %v11351_v4  ;;  %v3608_v11 = vrot.slane %v3607_v27, 4  ;;  %v3615_v16 = vrot.slane %v3614_v26, 4 }
 0x3f9   :  { %v3603_v40 = vrot.slane %v3602_v34, 2  ;;  %v7271_v41 = vpack.i.bf16 %v4092_v51, %v4085_v61  ;;  %v3584_v8 = vrot.slane %v3583_v5, 1  ;;  %v3589_v23 = vrot.slane %v3588_v22, 2 }
 0x3fa   :  { %v3621_v54 = vsel %vm1491_vm1, %v3569_v19, inf  ;;  %v3609_v57 = vmin.f32 %v3607_v27, %v3608_v11  ;;  %v3616_v25 = vmin.f32 %v3614_v26, %v3615_v16  ;;  %v3628_v56 = vsel %vm1491_vm1, %v3570_v49, inf }
 0x3fb   :  { %v3604_v6 = vmin.f32 %v3602_v34, %v3603_v40  ;;  %7272 = vrot.lane.b32.xlu0 %v7271_v41, %s7575_s2  ;;  %v3622_v24 = vrot.slane %v3621_v54, 4  ;;  %v3590_v14 = vmin.f32 %v3588_v22, %v3589_v23  ;;  %v3598_v28 = vrot.slane %v3597_v3, 1 }
 0x3fc   :  { %v3629_v30 = vrot.slane %v3628_v56, 4  ;;  %v3610_v33 = vrot.slane %v3609_v57, 2  ;;  %v3617_v4 = vrot.slane %v3616_v25, 2  ;;  %v11388_v58 = vrot.slane %v9566_v9, 2 }
 0x3fd   :  { %v3605_v45 = vrot.slane %v3604_v6, 1  ;;  %v3623_v13 = vmin.f32 %v3621_v54, %v3622_v24  ;;  %v3585_v39 = vmin.f32 %v3583_v5, %v3584_v8  ;;  %v3591_v19 = vrot.slane %v3590_v14, 1 }
 0x3fe   :  { %v3639_v52 = vmin.f32 %v9566_v9, %v11388_v58  ;;  %v3630_v61 = vmin.f32 %v3628_v56, %v3629_v30  ;;  %v11389_v1 = vrot.slane %v9602_v44, 2  ;;  %v3611_v20 = vmin.f32 %v3609_v57, %v3610_v33 }
 0x3ff   :  { %v3618_v49 = vmin.f32 %v3616_v25, %v3617_v4  ;;  %v3624_v15 = vrot.slane %v3623_v13, 2  ;;  %v3599_v35 = vmin.f32 %v3597_v3, %v3598_v28  ;;  %v3652_v63 = vrot.slane %v9632_v46, 2 }
 0x400   :  { %v3646_v2 = vmin.f32 %v9602_v44, %v11389_v1  ;;  %v3640_v60 = vrot.slane %v3639_v52, 1  ;;  %v3631_v43 = vrot.slane %v3630_v61, 2  ;;  %v3606_v53 = vmin.f32 %v3604_v6, %v3605_v45 }
 0x401   :  { %v3612_v34 = vrot.slane %v3611_v20, 1  ;;  %v3619_v17 = vrot.slane %v3618_v49, 1  ;;  %v3625_v9 = vmin.f32 %v3623_v13, %v3624_v15  ;;  %v3592_v5 = vmin.f32 %v3590_v14, %v3591_v19 }
 0x402   :  { %v3647_v36 = vrot.slane %v3646_v2, 1  ;;  %v3641_v27 = vmin.f32 %v3639_v52, %v3640_v60  ;;  %v3653_v26 = vmin.f32 %v9632_v46, %v3652_v63  ;;  %v11390_v51 = vrot.slane %v9664_v48, 4 }
 0x403   :  { %v3626_v22 = vrot.slane %v3625_v9, 1  ;;  %v3632_v40 = vmin.f32 %v3630_v61, %v3631_v43  ;;  %v3663_v3 = vsel %vm1491_vm1, %v9675_v7, inf  ;;  %v3613_v11 = vmin.f32 %v3611_v20, %v3612_v34  ;;  %v11391_v34 = vld [vmem:[#allocation32_spill] sm:$0xff] }
 0x404   :  { %v3658_v44 = vmin.f32 %v9664_v48, %v11390_v51  ;;  %v3648_v41 = vmin.f32 %v3646_v2, %v3647_v36  ;;  %v3654_v16 = vrot.slane %v3653_v26, 1  ;;  %v3664_v23 = vrot.slane %v3663_v3, 4  ;;  %v11395_v51 = vld [vmem:[#allocation31_spill] sm:$0xff] }
 0x405   :  { %v3620_v6 = vmin.f32 %v3618_v49, %v3619_v17  ;;  %v3670_v54 = vsel %vm1491_vm1, %v9804_v18, inf  ;;  %v3677_v46 = vsel %vm1491_vm1, %v3577_v50, inf  ;;  %v3684_v57 = vsel %vm1491_vm1, %v3578_v37, inf }
 0x406   :  { %v3659_v8 = vrot.slane %v3658_v44, 2  ;;  %v3627_v25 = vmin.f32 %v3625_v9, %v3626_v22  ;;  %v3655_v48 = vmin.f32 %v3653_v26, %v3654_v16  ;;  %v3665_v56 = vmin.f32 %v3663_v3, %v3664_v23  ;;  %v11393_v9 = vld [vmem:[#allocation33_spill] sm:$0xff] }
 0x407   :  { %v3671_v14 = vrot.slane %v3670_v54, 4  ;;  %v3678_v28 = vrot.slane %v3677_v46, 4  ;;  %v3685_v45 = vrot.slane %v3684_v57, 4  ;;  %v4043_v7 = vsel %vm2304_vm4, %v3592_v5, %v3585_v39 }
 0x408   :  { %v3660_v24 = vmin.f32 %v3658_v44, %v3659_v8  ;;  %v3666_v33 = vrot.slane %v3665_v56, 2  ;;  %v4044_v4 = vsel %vm2306_vm5, %v3599_v35, %v4043_v7  ;;  %v4050_v13 = vsel %vm2304_vm4, %v3648_v41, %v3641_v27  ;;  %v11397_v8 = vld [vmem:[#allocation35_spill] sm:$0xff] }
 0x409   :  { %v3672_v18 = vmin.f32 %v3670_v54, %v3671_v14  ;;  %v3679_v58 = vmin.f32 %v3677_v46, %v3678_v28  ;;  %v3686_v50 = vmin.f32 %v3684_v57, %v3685_v45  ;;  %v4045_v37 = vsel %vm2308_vm6, %v3606_v53, %v4044_v4 }
 0x40a   :  { %v3661_v30 = vrot.slane %v3660_v24, 1  ;;  %v3667_v19 = vmin.f32 %v3665_v56, %v3666_v33  ;;  %v4046_v61 = vsel %vm2310_vm7, %v3613_v11, %v4045_v37  ;;  %v4051_v1 = vsel %vm2306_vm5, %v3655_v48, %v4050_v13 }
 0x40b   :  { %v3673_v2 = vrot.slane %v3672_v18, 2  ;;  %v3680_v20 = vrot.slane %v3679_v58, 2  ;;  %v3687_v39 = vrot.slane %v3686_v50, 2  ;;  %v4047_v49 = vsel %vm2312_vm10, %v3620_v6, %v4046_v61 }
 0x40c   :  { %v3662_v52 = vmin.f32 %v3660_v24, %v3661_v30  ;;  %v3633_v15 = vrot.slane %v3632_v40, 1  ;;  %v3668_v60 = vrot.slane %v3667_v19, 1  ;;  %v4048_v35 = vsel %vm2314_vm11, %v3627_v25, %v4047_v49 }
 0x40d   :  { %v3674_v36 = vmin.f32 %v3672_v18, %v3673_v2  ;;  %v3681_v63 = vmin.f32 %v3679_v58, %v3680_v20  ;;  %v3688_v53 = vmin.f32 %v3686_v50, %v3687_v39  ;;  %v11392_v17 = vunpack.i.l.bf16 %v11391_v34 }
 0x40e   :  { %v4052_v43 = vsel %vm2308_vm6, %v3662_v52, %v4051_v1  ;;  %v3669_v27 = vmin.f32 %v3667_v19, %v3668_v60  ;;  %v11394_v26 = vunpack.i.h.bf16 %v11391_v34  ;;  %v11396_v22 = vrot.slane %v9546_v59, 1 }
 0x40f   :  { %v2437_v5 = vsel %vm1319_vm0, %v11393_v9, %v11392_v17  ;;  %v3675_v3 = vrot.slane %v3674_v36, 1  ;;  %v3682_v11 = vrot.slane %v3681_v63, 1  ;;  %v3689_v16 = vrot.slane %v3688_v53, 1 }
 0x410   :  { %v2438_v44 = vsel %vm1319_vm0, %v11395_v51, %v11394_v26  ;;  %v3490_v41 = vadd.f32 %v11396_v22, %v9546_v59  ;;  %v11398_v23 = vunpack.i.l.bf16 %v11397_v8  ;;  %v4053_v54 = vsel %vm2310_vm7, %v3669_v27, %v4052_v43 }
 0x411   :  { %v11399_v46 = vunpack.i.h.bf16 %v11397_v8  ;;  %v3526_v25 = vsel %vm1491_vm1, %v9365_v21, 0.0  ;;  %v3538_v48 = vrot.slane %v9438_v42, 1  ;;  %v3634_v24 = vmin.f32 %v3632_v40, %v3633_v15  ;;  %v11401_v15 = vld [vmem:[#allocation27_spill] sm:$0xff] }
 0x412   :  { %v2440_v6 = vsel %vm2439_vm13, %v2437_v5, %v11398_v23  ;;  %v3676_v59 = vmin.f32 %v3674_v36, %v3675_v3  ;;  %v3683_v56 = vmin.f32 %v3681_v63, %v3682_v11  ;;  %v3527_v28 = vrot.slane %v3526_v25, 4  ;;  %v11402_v36 = vld [vmem:[#allocation71_spill] sm:$0xff] }
 0x413   :  { %v2441_v57 = vsel %vm2439_vm13, %v2438_v44, %v11399_v46  ;;  %v3539_v45 = vadd.f32 %v3538_v48, %v9438_v42  ;;  %v3540_v7 = vsel %vm1491_vm1, %v9628_v10, 0.0  ;;  %v9880_v30 = vmul.f32 %v3490_v41, %v11345_v12  ;;  %v11404_v44 = vld [vmem:[#allocation56_spill] sm:$0xff] }
 0x414   :  { %v7281_v14 = vpack.i.bf16 %v2441_v57, %v2440_v6  ;;  %v3690_v33 = vmin.f32 %v3688_v53, %v3689_v16  ;;  %v4049_v4 = vsel %vm2316_vm12, %v3634_v24, %v4048_v35  ;;  %v4054_v13 = vsel %vm2312_vm10, %v3676_v59, %v4053_v54 }
 0x415   :  { %v3541_v40 = vrot.slane %v3540_v7, 4  ;;  %v4055_v18 = vsel %vm2314_vm11, %v3683_v56, %v4054_v13  ;;  %v3528_v58 = vadd.f32 %v3527_v28, %v3526_v25  ;;  %v9887_v42 = vmul.f32 %v3539_v45, %v11356_v55 }
 0x416   :  { %7282 = vrot.lane.b32.xlu0 %v7281_v14, %s7579_s19  ;;  %v3826_v50 = vsub.f32 %v9496_v47, %v9880_v30  ;;  %v4056_v37 = vsel %vm2316_vm12, %v3690_v33, %v4055_v18  ;;  %v11400_v19 = vrot.slane %v9510_v32, 2  ;;  %v3874_v1 = vsel %vm1491_vm1, %v9522_v38, 0.0  ;;  %v11405_v18 = vld [vmem:[#allocation17_spill] sm:$0xff] }
 0x417   :  { %v3542_v52 = vadd.f32 %v3541_v40, %v3540_v7  ;;  %v7266_v2 = vpack.i.bf16 %v4056_v37, %v4049_v4  ;;  %v3529_v20 = vrot.slane %v3528_v58, 2  ;;  %v3833_v39 = vsub.f32 %v9396_v31, %v9887_v42  ;;  %v11403_v31 = vld [vmem:[#allocation45_spill] sm:$0xff] }
 0x418   :  { %v3871_v61 = vadd.f32 %v11400_v19, %v9510_v32  ;;  %v3842_v49 = vmul.f32 %v3826_v50, %v3826_v50  ;;  %v3875_v35 = vrot.slane %v3874_v1, 4  ;;  %v3884_v43 = vrot.slane %v9548_v0, 2 }
 0x419   :  { %v3543_v47 = vrot.slane %v3542_v52, 2  ;;  %7267 = vrot.lane.b32.xlu1 %v7266_v2, %s7576_s16  ;;  %v3530_v32 = vadd.f32 %v3529_v20, %v3528_v58  ;;  %v3856_v38 = vmul.f32 %v9598_v62, %v11259_v29  ;;  %v3857_v63 = vmul.f32 %v11402_v36, %v11259_v29 }
 0x41a   :  { %4266 = vrot.lane.b32.xlu0 %v11401_v15, %s7580_s20  ;;  %v3872_v60 = vrot.slane %v3871_v61, 1  ;;  %v3888_v53 = vsel %vm1491_vm1, %v11403_v31, 0.0  ;;  %v3849_v17 = vmul.f32 %v3833_v39, %v3833_v39  ;;  %v3876_v9 = vadd.f32 %v3875_v35, %v3874_v1 }
 0x41b   :  { %v3544_v34 = vadd.f32 %v3543_v47, %v3542_v52  ;;  %v3885_v5 = vadd.f32 %v3884_v43, %v9548_v0  ;;  %v3531_v27 = vrot.slane %v3530_v32, 1  ;;  %v3858_v26 = vmul.f32 %v3842_v49, %v11259_v29  ;;  %v11406_v49 = vld [vmem:[#allocation74_spill] sm:$0xff] }
 0x41c   :  { %v3889_v51 = vrot.slane %v3888_v53, 4  ;;  %v3895_v22 = vsel %vm1491_vm1, %v11404_v44, 0.0  ;;  %v9913_v62 = vadd.f32 %v3872_v60, %v3871_v61  ;;  %v3877_v3 = vrot.slane %v3876_v9, 2  ;;  %v11411_v44 = vld [vmem:[#allocation94_spill] sm:$0xff] }
 0x41d   :  { %v3545_v41 = vrot.slane %v3544_v34, 1  ;;  %v3896_v11 = vrot.slane %v3895_v22, 4  ;;  %v3532_v16 = vadd.f32 %v3531_v27, %v3530_v32  ;;  %v3902_v23 = vsel %vm1491_vm1, %v3856_v38, 0.0 }
 0x41e   :  { %v3890_v8 = vadd.f32 %v3889_v51, %v3888_v53  ;;  %v3909_v6 = vsel %vm1491_vm1, %v3857_v63, 0.0  ;;  %v3878_v0 = vadd.f32 %v3877_v3, %v3876_v9  ;;  %v3886_v46 = vrot.slane %v3885_v5, 1 }
 0x41f   :  { %v3546_v54 = vadd.f32 %v3545_v41, %v3544_v34  ;;  %v3897_v57 = vadd.f32 %v3896_v11, %v3895_v22  ;;  %v9918_v25 = vmul.f32 %v3532_v16, %v11356_v55  ;;  %v3903_v24 = vrot.slane %v3902_v23, 4  ;;  %v11408_v34 = vld [vmem:[#allocation72_spill] sm:$0xff]  ;;  %v11412_v41 = vld [vmem:[#allocation95_spill] sm:$0xff] }
 0x420   :  { %v3891_v48 = vrot.slane %v3890_v8, 2  ;;  %v3910_v59 = vrot.slane %v3909_v6, 4  ;;  %v3879_v14 = vrot.slane %v3878_v0, 1  ;;  %v3916_v45 = vsel %vm1491_vm1, %v3858_v26, 0.0 }
 0x421   :  { %v9921_v56 = vmul.f32 %v3546_v54, %v11356_v55  ;;  %v3898_v28 = vrot.slane %v3897_v57, 2  ;;  %v3832_v7 = vsub.f32 %v9365_v21, %v9918_v25  ;;  %v3904_v4 = vadd.f32 %v3903_v24, %v3902_v23 }
 0x422   :  { %v3892_v33 = vadd.f32 %v3891_v48, %v3890_v8  ;;  %v3911_v13 = vadd.f32 %v3910_v59, %v3909_v6  ;;  %v3865_v58 = vmul.f32 %v3849_v17, %v11405_v18  ;;  %v3917_v37 = vrot.slane %v3916_v45, 4 }
 0x423   :  { %v3834_v40 = vsub.f32 %v9628_v10, %v9921_v56  ;;  %v3899_v50 = vadd.f32 %v3898_v28, %v3897_v57  ;;  %v3848_v52 = vmul.f32 %v3832_v7, %v3832_v7  ;;  %v3905_v61 = vrot.slane %v3904_v4, 2 }
 0x424   :  { %v3893_v19 = vrot.slane %v3892_v33, 1  ;;  %v3912_v1 = vrot.slane %v3911_v13, 2  ;;  %v3887_v20 = vadd.f32 %v3886_v46, %v3885_v5  ;;  %v3918_v39 = vadd.f32 %v3917_v37, %v3916_v45  ;;  %v11410_v5 = vld [vmem:[#allocation41_spill] sm:$0xff] }
 0x425   :  { %v3850_v2 = vmul.f32 %v3834_v40, %v3834_v40  ;;  %v11407_v21 = vrot.slane %v11406_v49, 2  ;;  %v3880_v60 = vadd.f32 %v3879_v14, %v3878_v0  ;;  %v3900_v35 = vrot.slane %v3899_v50, 1 }
 0x426   :  { %v3906_v43 = vadd.f32 %v3905_v61, %v3904_v4  ;;  %v3913_v32 = vadd.f32 %v3912_v1, %v3911_v13  ;;  %v3864_v10 = vmul.f32 %v3848_v52, %v11405_v18  ;;  %v3894_v38 = vadd.f32 %v3893_v19, %v3892_v33 }
 0x427   :  { %v3927_v47 = vadd.f32 %v11407_v21, %v11406_v49  ;;  %v3919_v36 = vrot.slane %v3918_v39, 2  ;;  %v3866_v31 = vmul.f32 %v3850_v2, %v11405_v18  ;;  %v11409_v17 = vrot.slane %v11408_v34, 2 }
 0x428   :  { %v3907_v53 = vrot.slane %v3906_v43, 1  ;;  %v3940_v27 = vrot.slane %v11410_v5, 2  ;;  %v3914_v26 = vrot.slane %v3913_v32, 1  ;;  %v3944_v22 = vsel %vm1491_vm1, %v11411_v44, 0.0 }
 0x429   :  { %v3928_v63 = vrot.slane %v3927_v47, 1  ;;  %v3934_v9 = vadd.f32 %v11409_v17, %v11408_v34  ;;  %v3920_v51 = vadd.f32 %v3919_v36, %v3918_v39  ;;  %v3951_v3 = vsel %vm1491_vm1, %v11412_v41, 0.0 }
 0x42a   :  { %v3901_v11 = vadd.f32 %v3900_v35, %v3899_v50  ;;  %v3941_v23 = vadd.f32 %v3940_v27, %v11410_v5  ;;  %v3945_v54 = vrot.slane %v3944_v22, 4  ;;  %v3952_v0 = vrot.slane %v3951_v3, 4 }
 0x42b   :  { %v3929_v16 = vadd.f32 %v3928_v63, %v3927_v47  ;;  %v3935_v8 = vrot.slane %v3934_v9, 1  ;;  %v3921_v6 = vrot.slane %v3920_v51, 1  ;;  %v3958_v46 = vsel %vm1491_vm1, %v3864_v10, 0.0 }
 0x42c   :  { %v3908_v57 = vadd.f32 %v3907_v53, %v3906_v43  ;;  %v3942_v48 = vrot.slane %v3941_v23, 1  ;;  %v3959_v24 = vrot.slane %v3958_v46, 4  ;;  %v3965_v59 = vsel %vm1491_vm1, %v3865_v58, 0.0 }
 0x42d   :  { %v3915_v14 = vadd.f32 %v3914_v26, %v3913_v32  ;;  %v3946_v28 = vadd.f32 %v3945_v54, %v3944_v22  ;;  %v3953_v45 = vadd.f32 %v3952_v0, %v3951_v3  ;;  %v3966_v7 = vrot.slane %v3965_v59, 4 }
 0x42e   :  { %v3922_v33 = vadd.f32 %v3921_v6, %v3920_v51  ;;  %v3936_v4 = vadd.f32 %v3935_v8, %v3934_v9  ;;  %v3960_v13 = vadd.f32 %v3959_v24, %v3958_v46  ;;  %v3972_v40 = vsel %vm1491_vm1, %v3866_v31, 0.0  ;;  %v4153_v51 = vld [vmem:[#allocation5 + $0x120] sm:$0xff]  ;;  %v4155_v6 = vld [vmem:[#allocation5 + $0x130] sm:$0xff] }
 0x42f   :  { %v3947_v50 = vrot.slane %v3946_v28, 2  ;;  %v3954_v37 = vrot.slane %v3953_v45, 2  ;;  %v3967_v52 = vadd.f32 %v3966_v7, %v3965_v59  ;;  %v3973_v19 = vrot.slane %v3972_v40, 4 }
 0x430   :  { %v3943_v61 = vadd.f32 %v3942_v48, %v3941_v23  ;;  %v3961_v1 = vrot.slane %v3960_v13, 2  ;;  %v3979_v2 = vmul.f32 %v9913_v62, %v11345_v12  ;;  %v3980_v58 = vmul.f32 %v3880_v60, %v11345_v12  ;;  %v4154_v23 = vld [vmem:[#allocation5 + $0x128] sm:$0xff] }
 0x431   :  { %v3948_v39 = vadd.f32 %v3947_v50, %v3946_v28  ;;  %v3955_v49 = vadd.f32 %v3954_v37, %v3953_v45  ;;  %v3968_v21 = vrot.slane %v3967_v52, 2  ;;  %v3974_v47 = vadd.f32 %v3973_v19, %v3972_v40  ;;  %v4156_v19 = vld [vmem:[#allocation5 + $0x138] sm:$0xff] }
 0x432   :  { %v3962_v35 = vadd.f32 %v3961_v1, %v3960_v13  ;;  %v3981_v43 = vmul.f32 %v3887_v20, %v11345_v12  ;;  %v3982_v32 = vmul.f32 %v3894_v38, %v11345_v12  ;;  %v3983_v10 = vmul.f32 %v3901_v11, %v11345_v12  ;;  %v4152_v20 = vld [vmem:[#allocation5 + $0x118] sm:$0xff] }
 0x433   :  { %v3949_v36 = vrot.slane %v3948_v39, 1  ;;  %v3956_v63 = vrot.slane %v3955_v49, 1  ;;  %v3969_v31 = vadd.f32 %v3968_v21, %v3967_v52  ;;  %v3975_v53 = vrot.slane %v3974_v47, 2  ;;  %v4158_v21 = vld [vmem:[#allocation5 + $0x148] sm:$0xff] }
 0x434   :  { %v3963_v34 = vrot.slane %v3962_v35, 1  ;;  %v3984_v62 = vmul.f32 %v3908_v57, %v11345_v12  ;;  %v3987_v60 = vmul.f32 %v3929_v16, %v11356_v55  ;;  %v3988_v17 = vmul.f32 %v3936_v4, %v11356_v55 }
 0x435   :  { %v3950_v9 = vadd.f32 %v3949_v36, %v3948_v39  ;;  %v3957_v5 = vadd.f32 %v3956_v63, %v3955_v49  ;;  %v3970_v27 = vrot.slane %v3969_v31, 1  ;;  %v3976_v26 = vadd.f32 %v3975_v53, %v3974_v47  ;;  %v4159_v47 = vld [vmem:[#allocation5 + $0x150] sm:$0xff]  ;;  %v11417_v36 = vld [vmem:[#allocation68_spill] sm:$0xff] }
 0x436   :  { %v3964_v38 = vadd.f32 %v3963_v34, %v3962_v35  ;;  %v3989_v44 = vmul.f32 %v3943_v61, %v11356_v55  ;;  %v4115_v22 = vsel %vm2304_vm4, %v3980_v58, %v3979_v2  ;;  %v4122_v41 = vsel %vm2304_vm4, %v3988_v17, %v3987_v60  ;;  %v4157_v61 = vld [vmem:[#allocation5 + $0x140] sm:$0xff]  ;;  %v11413_v2 = vld [vmem:[#allocation58_spill] sm:$0xff] }
 0x437   :  { %v3971_v3 = vadd.f32 %v3970_v27, %v3969_v31  ;;  %v3977_v11 = vrot.slane %v3976_v26, 1  ;;  %v3990_v8 = vmul.f32 %v3950_v9, %v11356_v55  ;;  %v3991_v16 = vmul.f32 %v3957_v5, %v11356_v55  ;;  %v11414_v58 = vld [vmem:[#allocation75_spill] sm:$0xff]  ;;  %v11418_v9 = vld [vmem:[#allocation26_spill] sm:$0xff]  ;;  %v4162_v27 = vld [vmem:[#allocation5 + $0x168] sm:$0xff] }
 0x438   :  { %v3992_v54 = vmul.f32 %v3964_v38, %v11356_v55  ;;  %v4116_v0 = vsel %vm2306_vm5, %v3981_v43, %v4115_v22  ;;  %v4123_v46 = vsel %vm2306_vm5, %v3989_v44, %v4122_v41  ;;  %v7150_v57 = vpack.c.bf16 %v4153_v51, %v4152_v20  ;;  %v11416_v43 = vld [vmem:[#allocation69_spill] sm:$0xff]  ;;  %v4161_v60 = vld [vmem:[#allocation5 + $0x160] sm:$0xff]  ;;  %v4164_v20 = vld [vmem:[#allocation5 + $0x178] sm:$0xff] }
 0x439   :  { %v3978_v48 = vadd.f32 %v3977_v11, %v3976_v26  ;;  %v3993_v24 = vmul.f32 %v3971_v3, %v11356_v55  ;;  %v4117_v59 = vsel %vm2308_vm6, %v3982_v32, %v4116_v0  ;;  %v4124_v28 = vsel %vm2308_vm6, %v3990_v8, %v4123_v46  ;;  %v4163_v26 = vld [vmem:[#allocation5 + $0x170] sm:$0xff]  ;;  %v4165_v51 = vld [vmem:[#allocation5 + $0x180] sm:$0xff]  ;;  %v4166_v38 = vld [vmem:[#allocation5 + $0x188] sm:$0xff] }
 0x43a   :  { %v3985_v45 = vmul.f32 %v3915_v14, %v11345_v12  ;;  %v4118_v7 = vsel %vm2310_vm7, %v3983_v10, %v4117_v59  ;;  %v4125_v4 = vsel %vm2310_vm7, %v3991_v16, %v4124_v28  ;;  %7151 = vmatprep.subr.bf16.mxu0 %v7150_v57  ;;  %v7154_v13 = vpack.c.bf16 %v4155_v6, %v4154_v23  ;;  %v4167_v44 = vld [vmem:[#allocation5 + $0x190] sm:$0xff]  ;;  %v4302_v22 = vld [vmem:[#allocation5 + $0x58] sm:$0xff]  ;;  %v4303_v41 = vld [vmem:[#allocation5 + $0x60] sm:$0xff] }
 0x43b   :  { %v3986_v40 = vmul.f32 %v3922_v33, %v11345_v12  ;;  %v3994_v50 = vmul.f32 %v3978_v48, %v11356_v55  ;;  %v4119_v37 = vsel %vm2312_vm10, %v3984_v62, %v4118_v7  ;;  %v4126_v52 = vsel %vm2312_vm10, %v3992_v54, %v4125_v4  ;;  %7153 = vmatpush3.bf16.msra.mxu0 %v7150_v57  ;;  %v11415_v33 = vld [vmem:[#allocation73_spill] sm:$0xff]  ;;  %v4160_v62 = vld [vmem:[#allocation5 + $0x158] sm:$0xff]  ;;  %v10000_v11 = vld [vmem:[#allocation5 + $0x1c8] ss:$0 sm:$0xff] }
 0x43c   :  { %v4120_v1 = vsel %vm2314_vm11, %v3985_v45, %v4119_v37  ;;  %v4127_v14 = vsel %vm2314_vm11, %v3993_v24, %v4126_v52  ;;  %7155 = vmatprep.subr.bf16.mxu0 %v7154_v13  ;;  %v4018_v39 = vsel %vm2304_vm4, %v11414_v58, %v11413_v2  ;;  %v7158_v10 = vpack.c.bf16 %v4157_v61, %v4156_v19  ;;  %v11419_v54 = vld [vmem:[#allocation28_spill] sm:$0xff]  ;;  %v11420_v46 = vld [vmem:[#allocation18_spill] sm:$0xff]  ;;  %v11421_v4 = vld [vmem:[#allocation19_spill] sm:$0xff] }
 0x43d   :  { %v4121_v12 = vsel %vm2316_vm12, %v3986_v40, %v4120_v1  ;;  %v4128_v55 = vsel %vm2316_vm12, %v3994_v50, %v4127_v14  ;;  %v4019_v49 = vsel %vm2306_vm5, %v11415_v33, %v4018_v39  ;;  %v7162_v53 = vpack.c.bf16 %v4159_v47, %v4158_v21  ;;  %v11422_v40 = vld [vmem:[#allocation30_spill] sm:$0xff]  ;;  %v11423_v2 = vld [vmem:[#allocation39_spill] sm:$0xff]  ;;  %v11424_v39 = vld [vmem:[#allocation36_spill] sm:$0xff] }
 0x43e   :  { %v7276_v35 = vpack.i.bf16 %v4128_v55, %v4121_v12  ;;  %v4020_v32 = vsel %vm2308_vm6, %v11416_v43, %v4019_v49  ;;  %v7166_v5 = vpack.c.bf16 %v4161_v60, %v4160_v62  ;;  %v9997_v3 = vpack.c.bf16 %v4303_v41, %v4302_v22 }
 0x43f   :  { %7157 = vmatpush3.bf16.msra.mxu0 %v7154_v13  ;;  %v4021_v63 = vsel %vm2310_vm7, %v11417_v36, %v4020_v32  ;;  %v11426_v36 = vld [vmem:[#allocation20_spill] sm:$0xff] }
 0x440   :  { %7277 = vrot.lane.b32.xlu1 %v7276_v35, %s7578_s18  ;;  %v4022_v31 = vsel %vm2312_vm10, %v9918_v25, %v4021_v63  ;;  %7159 = vmatprep.subr.bf16.mxu0 %v7158_v10  ;;  %v7170_v25 = vpack.c.bf16 %v4163_v26, %v4162_v27  ;;  %v11425_v35 = vld [vmem:[#allocation21_spill] sm:$0xff] }
 0x441   :  { %v4023_v34 = vsel %vm2314_vm11, %v9887_v42, %v4022_v31  ;;  %v7174_v42 = vpack.c.bf16 %v4165_v51, %v4164_v20  ;;  %v11428_v26 = vld [vmem:[#allocation49_spill] sm:$0xff] }
 0x442   :  { %v9993_v17 = vsel %vm2316_vm12, %v9921_v56, %v4023_v34  ;;  %v7178_v56 = vpack.c.bf16 %v4167_v44, %v4166_v38  ;;  %v11430_v38 = vld [vmem:[#allocation52_spill] sm:$0xff] }
 0x443   :  { %7161 = vmatpush3.bf16.msra.mxu0 %v7158_v10 }
 0x444   :  { %4264 = vrot.lane.b32.xlu1 %v11418_v9, %s7580_s20  ;;  %7163 = vmatprep.subr.bf16.mxu0 %v7162_v53 }
 0x447   :  { %7165 = vmatpush3.bf16.msra.mxu0 %v7162_v53 }
 0x448   :  { %7167 = vmatprep.subr.bf16.mxu0 %v7166_v5 }
 0x44b   :  { %7169 = vmatpush3.bf16.msra.mxu0 %v7166_v5  ;;  %v11427_v5 = vld [vmem:[#allocation22_spill] sm:$0xff] }
 0x44c   :  { %7171 = vmatprep.subr.bf16.mxu0 %v7170_v25 }
 0x44f   :  { %7173 = vmatpush3.bf16.msra.mxu0 %v7170_v25 }
 0x450   :  { %7175 = vmatprep.subr.bf16.mxu0 %v7174_v42 }
 0x453   :  { %7177 = vmatpush3.bf16.msra.mxu0 %v7174_v42  ;;  %v11429_v42 = vld [vmem:[#allocation50_spill] sm:$0xff] }
 0x454   :  { %7179 = vmatprep.subr.bf16.mxu0 %v7178_v56  ;;  %v4011_v44 = vsel %vm2304_vm4, %v11430_v38, %v11429_v42  ;;  %v11439_v42 = vld [vmem:[#allocation67_spill] sm:$0xff] }
 0x457   :  { %7181 = vmatpush3.bf16.msra.mxu0 %v7178_v56 }
 0x458   :  { %7183 = vmatprep.subr.bf16.mxu0 %v9997_v3 }
 0x46b   :  { %v6955_v8 = vpop.f32.mrb[20].mxu1 }
 0x46c   :  { %v10003_v16 = vadd.f32 %v6955_v8, %v10000_v11  ;;  %v3324_v23 = vpop.f32.mrb[21].mxu1  ;;  %v11431_v8 = vld [vmem:[#allocation43_spill] sm:$0xff] }
 0x46d   :  { %v10006_v6 = vadd.f32 %v10000_v11, %v3324_v23  ;;  %v4012_v23 = vsel %vm2306_vm5, %v11431_v8, %v4011_v44  ;;  %v7273_v44 = vpop.permute.xlu0 %7272 }
 0x46e   :  { %v3404_v0 = vmul.f32 %v10003_v16, %v11419_v54 }
 0x46f   :  { %v3403_v57 = vmul.f32 %v10006_v6, %v11420_v46 }
 0x470   :  { %v3420_v48 = vmul.f32 %v3404_v0, %v11259_v29 }
 0x471   :  { %v3419_v24 = vmul.f32 %v3403_v57, %v11259_v29  ;;  %v11432_v57 = vld [vmem:[#allocation24_spill] sm:$0xff] }
 0x472   :  { %6598 = vst.msk [vmem:[#allocation8 + $0x8] sm:$0xff] %vm1491_vm1, %v3420_v48  ;;  %v6958_v59 = vpop.f32.mrb[22].mxu1 }
 0x473   :  { %6597 = vst.msk [vmem:[#allocation8] sm:$0xff] %vm1491_vm1, %v3419_v24  ;;  %v10017_v28 = vadd.f32 %v6958_v59, %v10000_v11  ;;  %v3334_v45 = vpop.f32.mrb[23].mxu1  ;;  %v11433_v24 = vld [vmem:[#allocation23_spill] sm:$0xff] }
 0x474   :  { %v10020_v7 = vadd.f32 %v10000_v11, %v3334_v45 }
 0x475   :  { %v3406_v13 = vmul.f32 %v10017_v28, %v11421_v4 }
 0x476   :  { %v3405_v50 = vmul.f32 %v10020_v7, %v11422_v40 }
 0x477   :  { %v3422_v37 = vmul.f32 %v3406_v13, %v11259_v29  ;;  %v11434_v13 = vld [vmem:[#allocation48_spill] sm:$0xff] }
 0x478   :  { %v3421_v52 = vmul.f32 %v3405_v50, %v11259_v29  ;;  %v4013_v50 = vsel %vm2308_vm6, %v11434_v13, %v4012_v23  ;;  %v11441_v23 = vld [vmem:[#allocation47_spill] sm:$0xff]  ;;  %v7275_v13 = vunpack.i.h.bf16 %v7273_v44 }
 0x479   :  { %6600 = vst.msk [vmem:[#allocation8 + $0x18] sm:$0xff] %vm1491_vm1, %v3422_v37 }
 0x47a   :  { %6599 = vst.msk [vmem:[#allocation8 + $0x10] sm:$0xff] %vm1491_vm1, %v3421_v52 }
 0x47e   :  { %v6961_v19 = vpop.f32.mrb[24].mxu1 }
 0x47f   :  { %v10031_v61 = vadd.f32 %v6961_v19, %v10000_v11  ;;  %v3344_v1 = vpop.f32.mrb[25].mxu1 }
 0x480   :  { %v10034_v14 = vadd.f32 %v10000_v11, %v3344_v1 }
 0x481   :  { %v3408_v58 = vmul.f32 %v10031_v61, %v11423_v2 }
 0x482   :  { %v3407_v12 = vmul.f32 %v10034_v14, %v11424_v39  ;;  %v6964_v55 = vpop.f32.mrb[26].mxu1 }
 0x483   :  { %v3424_v33 = vmul.f32 %v3408_v58, %v11259_v29  ;;  %v10042_v49 = vadd.f32 %v6964_v55, %v10000_v11  ;;  %v3354_v21 = vpop.f32.mrb[27].mxu1 }
 0x484   :  { %v3423_v47 = vmul.f32 %v3407_v12, %v11259_v29  ;;  %v10049_v32 = vadd.f32 %v10000_v11, %v3354_v21  ;;  %v11435_v12 = vld [vmem:[#allocation64_spill] sm:$0xff] }
 0x485   :  { %6602 = vst.msk [vmem:[#allocation8 + $0x28] sm:$0xff] %vm1491_vm1, %v3424_v33  ;;  %v3410_v43 = vmul.f32 %v10042_v49, %v11425_v35  ;;  %v11436_v33 = vld [vmem:[#allocation55_spill] sm:$0xff] }
 0x486   :  { %6601 = vst.msk [vmem:[#allocation8 + $0x20] sm:$0xff] %vm1491_vm1, %v3423_v47  ;;  %v3409_v63 = vmul.f32 %v10049_v32, %v11426_v36  ;;  %v4014_v21 = vsel %vm2310_vm7, %v11436_v33, %v4013_v50  ;;  %v11437_v47 = vld [vmem:[#allocation25_spill] sm:$0xff]  ;;  %v7274_v50 = vunpack.i.l.bf16 %v7273_v44 }
 0x487   :  { %v3426_v10 = vmul.f32 %v3410_v43, %v11259_v29 }
 0x488   :  { %v3425_v31 = vmul.f32 %v3409_v63, %v11259_v29 }
 0x489   :  { %6604 = vst.msk [vmem:[#allocation8 + $0x38] sm:$0xff] %vm1491_vm1, %v3426_v10 }
 0x48a   :  { %6603 = vst.msk [vmem:[#allocation8 + $0x30] sm:$0xff] %vm1491_vm1, %v3425_v31 }
 0x48b   :  { %v6967_v53 = vpop.f32.mrb[28].mxu1 }
 0x48c   :  { %v10058_v34 = vadd.f32 %v6967_v53, %v10000_v11  ;;  %v3364_v62 = vpop.f32.mrb[29].mxu1 }
 0x48d   :  { %v10062_v60 = vadd.f32 %v10000_v11, %v3364_v62 }
 0x48e   :  { %v3412_v27 = vmul.f32 %v10058_v34, %v11427_v5 }
 0x48f   :  { %v3411_v25 = vmul.f32 %v10062_v60, %v11428_v26 }
 0x490   :  { %v3428_v20 = vmul.f32 %v3412_v27, %v11405_v18 }
 0x491   :  { %v3427_v51 = vmul.f32 %v3411_v25, %v11405_v18  ;;  %v11438_v25 = vld [vmem:[#allocation54_spill] sm:$0xff] }
 0x492   :  { %6606 = vst.msk [vmem:[#allocation8 + $0x48] sm:$0xff] %vm1491_vm1, %v3428_v20  ;;  %v4015_v20 = vsel %vm2312_vm10, %v11438_v25, %v4014_v21 }
 0x493   :  { %6605 = vst.msk [vmem:[#allocation8 + $0x40] sm:$0xff] %vm1491_vm1, %v3427_v51  ;;  %v7268_v51 = vpop.permute.xlu1 %7267 }
 0x497   :  { %v6970_v56 = vpop.f32.mrb[30].mxu1 }
 0x498   :  { %v10076_v22 = vadd.f32 %v6970_v56, %v10000_v11  ;;  %v3374_v41 = vpop.f32.mrb[31].mxu1  ;;  %v11440_v56 = vld [vmem:[#allocation66_spill] sm:$0xff] }
 0x499   :  { %v10081_v0 = vadd.f32 %v10000_v11, %v3374_v41 }
 0x49a   :  { %v3414_v48 = vmul.f32 %v10076_v22, %v11432_v57 }
 0x49b   :  { %v3413_v59 = vmul.f32 %v10081_v0, %v11433_v24  ;;  %v6973_v45 = vpop.f32.mrb[32].mxu1 }
 0x49c   :  { %v3430_v37 = vmul.f32 %v3414_v48, %v11405_v18  ;;  %v10091_v52 = vadd.f32 %v6973_v45, %v10000_v11  ;;  %v3384_v19 = vpop.f32.mrb[33].mxu1  ;;  %v7270_v48 = vunpack.i.h.bf16 %v7268_v51 }
 0x49d   :  { %v3429_v1 = vmul.f32 %v3413_v59, %v11405_v18  ;;  %v10095_v58 = vadd.f32 %v10000_v11, %v3384_v19  ;;  %v7269_v59 = vunpack.i.l.bf16 %v7268_v51 }
 0x49e   :  { %6608 = vst.msk [vmem:[#allocation8 + $0x58] sm:$0xff] %vm1491_vm1, %v3430_v37  ;;  %v3416_v55 = vmul.f32 %v10091_v52, %v11435_v12  ;;  %v4136_v19 = vsel %vm1491_vm1, %v9993_v17, %v7270_v48  ;;  %v11443_v48 = vld [vmem:[#allocation40_spill] sm:$0xff] }
 0x49f   :  { %6607 = vst.msk [vmem:[#allocation8 + $0x50] sm:$0xff] %vm1491_vm1, %v3429_v1  ;;  %v3415_v43 = vmul.f32 %v10095_v58, %v11437_v47  ;;  %v6976_v10 = vpop.f32.mrb[34].mxu1 }
 0x4a0   :  { %v3432_v63 = vmul.f32 %v3416_v55, %v11405_v18  ;;  %v10107_v31 = vadd.f32 %v6976_v10, %v10000_v11  ;;  %v3394_v53 = vpop.f32.mrb[35].mxu1  ;;  %v7283_v55 = vpop.permute.xlu0 %7282  ;;  %v4304_v10 = vld [vmem:[#allocation5 + $0x68] sm:$0xff] }
 0x4a1   :  { %v3431_v62 = vmul.f32 %v3415_v43, %v11405_v18  ;;  %v10111_v27 = vadd.f32 %v10000_v11, %v3394_v53  ;;  %v4016_v11 = vsel %vm2314_vm11, %v11441_v23, %v4015_v20  ;;  %v7285_v53 = vunpack.i.h.bf16 %v7283_v55 }
 0x4a2   :  { %6610 = vst.msk [vmem:[#allocation8 + $0x68] sm:$0xff] %vm1491_vm1, %v3432_v63  ;;  %v3418_v38 = vmul.f32 %v10107_v31, %v11439_v42  ;;  %v4017_v37 = vsel %vm2316_vm12, %v9880_v30, %v4016_v11  ;;  %v4305_v63 = vld [vmem:[#allocation5 + $0x70] sm:$0xff]  ;;  %v4138_v20 = vsel %vm1319_vm0, %v4136_v19, %v7275_v13 }
 0x4a3   :  { %6609 = vst.msk [vmem:[#allocation8 + $0x60] sm:$0xff] %vm1491_vm1, %v3431_v62  ;;  %v3417_v41 = vmul.f32 %v10111_v27, %v11440_v56  ;;  %v4135_v1 = vsel %vm1491_vm1, %v4017_v37, %v7269_v59  ;;  %v7284_v62 = vunpack.i.l.bf16 %v7283_v55  ;;  %v11445_v37 = vld [vmem:[#allocation53_spill] sm:$0xff] }
 0x4a4   :  { %v3434_v8 = vmul.f32 %v3418_v38, %v11405_v18  ;;  %v4137_v25 = vsel %vm1319_vm0, %v4135_v1, %v7274_v50  ;;  %v11446_v1 = vmov 0.0  }
 0x4a5   :  { %v3433_v45 = vmul.f32 %v3417_v41, %v11405_v18  ;;  %v7186_v41 = vpack.c.bf16 %v4305_v63, %v4304_v10 }
 0x4a6   :  { %6612 = vst.msk [vmem:[#allocation8 + $0x78] sm:$0xff] %vm1491_vm1, %v3434_v8  ;;  %v11442_v8 = vld [vmem:[#allocation29_spill] sm:$0xff] }
 0x4a7   :  { %6611 = vst.msk [vmem:[#allocation8 + $0x70] sm:$0xff] %vm1491_vm1, %v3433_v45  ;;  %v11444_v45 = vld [vmem:[#allocation34_spill] sm:$0xff] }
 0x4b2   :  { %v7278_v33 = vpop.permute.xlu1 %7277 }
 0x4b3   :  { %v7280_v21 = vunpack.i.h.bf16 %v7278_v33  ;;  %v7279_v43 = vunpack.i.l.bf16 %v7278_v33  ;;  %v11447_v33 = vld [vmem:[#allocation59_spill] sm:$0xff] }
 0x4b5   :  { %v4139_v30 = vsel %vm2439_vm13, %v4137_v25, %v7279_v43  ;;  %v4140_v51 = vsel %vm2439_vm13, %v4138_v20, %v7280_v21  ;;  %v11448_v43 = vld [vmem:[#allocation61_spill] sm:$0xff]  ;;  %v4267_v25 = vpop.permute.xlu0 %4266 }
 0x4b6   :  { %v4265_v17 = vpop.permute.xlu1 %4264  ;;  %v4150_v38 = vsel %vm4149_vm14, %v4139_v30, %v7284_v62  ;;  %v4151_v44 = vsel %vm4149_vm14, %v4140_v51, %v7285_v53  ;;  %v11449_v53 = vld [vmem:[#allocation62_spill] sm:$0xff]  ;;  %v11450_v30 = vld [vmem:[#allocation63_spill] sm:$0xff] }
 0x4b7   :  { %7009 = vmatprep.mubr.f32.mxu0 %v4150_v38  ;;  %v4270_v23 = vmul.f32 %v4265_v17, %v11442_v8  ;;  %v4271_v59 = vmul.f32 %v4265_v17, %v11443_v48  ;;  %v4272_v13 = vmul.f32 %v4265_v17, %v11444_v45  ;;  %v4273_v19 = vmul.f32 %v4265_v17, %v11445_v37 }
 0x4b8   :  { %7010 = vmatmul.mubr.f32.vlgmr.msra.gmra.mrb[16].mxu0 %v4151_v44  ;;  %v4274_v21 = vmul.f32 %v4265_v17, %v11447_v33  ;;  %v4275_v10 = vmul.f32 %v4265_v17, %v11448_v43  ;;  %v4276_v62 = vmul.f32 %v4265_v17, %v11449_v53  ;;  %v4277_v51 = vmul.f32 %v4265_v17, %v11450_v30  ;;  %v11451_v44 = vld [vmem:[#allocation46_spill] sm:$0xff] }
 0x4b9   :  { %7185 = vmatpush3.bf16.msra.mxu0 %v9997_v3  ;;  %v4286_v11 = vmul.f32 0.25, %v4270_v23  ;;  %v4287_v50 = vmul.f32 0.25, %v4271_v59  ;;  %v4288_v55 = vmul.f32 0.25, %v4272_v13  ;;  %v4289_v3 = vmul.f32 0.25, %v4273_v19  ;;  %v11452_v23 = vld [vmem:[#allocation37_spill] sm:$0xff]  ;;  %v11453_v59 = vld [vmem:[#allocation38_spill] sm:$0xff] }
 0x4ba   :  { %7187 = vmatprep.subr.bf16.mxu0 %v7186_v41  ;;  %v4290_v63 = vmul.f32 0.25, %v4274_v21  ;;  %v4291_v20 = vmul.f32 0.25, %v4275_v10  ;;  %v4292_v38 = vmul.f32 0.25, %v4276_v62  ;;  %v4293_v8 = vmul.f32 0.25, %v4277_v51  ;;  %v11455_v19 = vld [vmem:[#allocation51_spill] sm:$0xff]  ;;  %v11456_v21 = vld [vmem:[#allocation57_spill] sm:$0xff] }
 0x4bb   :  { %7020 = vmatprep.mubr.msk.f32.mxu0 %vm1319_vm0, %v4286_v11  ;;  %v4279_v11 = vmul.f32 %v4267_v25, %v11452_v23  ;;  %v4280_v45 = vmul.f32 %v4267_v25, %v11453_v59  ;;  %v11457_v10 = vld [vmem:[#allocation60_spill] sm:$0xff]  ;;  %v11458_v62 = vld [vmem:[#allocation65_spill] sm:$0xff] }
 0x4bd   :  { %7189 = vmatpush3.bf16.msra.mxu0 %v7186_v41  ;;  %v4278_v41 = vmul.f32 %v4267_v25, %v11451_v44  ;;  %v4295_v13 = vmul.f32 0.25, %v4279_v11  ;;  %v4296_v37 = vmul.f32 0.25, %v4280_v45 }
 0x4be   :  { %7064 = vmatprep.subr.mxu0 %v11446_v1 }
 0x4bf   :  { %v4294_v48 = vmul.f32 0.25, %v4278_v41 }
 0x4c0   :  { %7021 = vmatmul.mubr.msk.f32.vlgmr.msra.gmra.mrb[18].mxu0 %vm1319_vm0, %v4287_v50  ;;  %v11454_v50 = vld [vmem:[#allocation44_spill] sm:$0xff] }
 0x4c1   :  { %7023 = vmatprep.mubr.msk.f32.mxu0 %vm1319_vm0, %v4288_v55  ;;  %v4281_v17 = vmul.f32 %v4267_v25, %v11454_v50  ;;  %v4282_v55 = vmul.f32 %v4267_v25, %v11455_v19 }
 0x4c3   :  { %v4297_v33 = vmul.f32 0.25, %v4281_v17  ;;  %v4298_v43 = vmul.f32 0.25, %v4282_v55 }
 0x4c4   :  { %7024 = vmatmul.mubr.msk.f32.gmra.mrb[20].mxu0 %vm1319_vm0, %v4289_v3  ;;  %v4283_v3 = vmul.f32 %v4267_v25, %v11456_v21 }
 0x4c5   :  { %7026 = vmatprep.mubr.msk.f32.mxu0 %vm1319_vm0, %v4290_v63  ;;  %v4284_v63 = vmul.f32 %v4267_v25, %v11457_v10 }
 0x4c6   :  { %v4299_v53 = vmul.f32 0.25, %v4283_v3 }
 0x4c7   :  { %v4300_v30 = vmul.f32 0.25, %v4284_v63 }
 0x4c8   :  { %7027 = vmatmul.mubr.msk.f32.gmra.mrb[22].mxu0 %vm1319_vm0, %v4291_v20  ;;  %v4285_v20 = vmul.f32 %v4267_v25, %v11458_v62 }
 0x4c9   :  { %7029 = vmatprep.mubr.msk.f32.mxu0 %vm1319_vm0, %v4292_v38 }
 0x4ca   :  { %v4301_v51 = vmul.f32 0.25, %v4285_v20 }
 0x4cc   :  { %7030 = vmatmul.mubr.msk.f32.gmra.mrb[24].mxu0 %vm1319_vm0, %v4293_v8 }
 0x4cd   :  { %7032 = vmatprep.mubr.msk.f32.mxu0 %vm1319_vm0, %v4294_v48 }
 0x4d0   :  { %7033 = vmatmul.mubr.msk.f32.gmra.mrb[26].mxu0 %vm1319_vm0, %v4295_v13 }
 0x4d1   :  { %7035 = vmatprep.mubr.msk.f32.mxu0 %vm1319_vm0, %v4296_v37 }
 0x4d4   :  { %7036 = vmatmul.mubr.msk.f32.gmra.mrb[28].mxu0 %vm1319_vm0, %v4297_v33 }
 0x4d5   :  { %7038 = vmatprep.mubr.msk.f32.mxu0 %vm1319_vm0, %v4298_v43 }
 0x4d8   :  { %7039 = vmatmul.mubr.msk.f32.gmra.mrb[30].mxu0 %vm1319_vm0, %v4299_v53 }
 0x4d9   :  { %7041 = vmatprep.mubr.msk.f32.mxu0 %vm1319_vm0, %v4300_v30 }
 0x4dc   :  { %7042 = vmatmul.mubr.msk.f32.gmra.mrb[32].mxu0 %vm1319_vm0, %v4301_v51 }
 0x4dd   :  { %7066 = vmatprep.mubr.msk.f32.mxu0 %vm7574_vm9, %v11446_v1 }
 0x58b   :  { %v10174_v38 = vpop.f32.mrb[16].mxu0 }
 0x58c   :  { %v10176_v44 = vpop.f32.mrb[17].mxu0 }
 0x593   :  { %v7022_v41 = vpop.f32.mrb[18].mxu0 }
 0x594   :  { %v4500_v8 = vmul.f32 %v7022_v41, %v11419_v54  ;;  %v4420_v23 = vpop.f32.mrb[19].mxu0 }
 0x595   :  { %v4499_v25 = vmul.f32 %v4420_v23, %v11420_v46 }
 0x596   :  { %v10181_v11 = vmul.f32 %v4500_v8, %v11259_v29 }
 0x597   :  { %v10184_v48 = vmul.f32 %v4499_v25, %v11259_v29  ;;  %v7025_v59 = vpop.f32.mrb[20].mxu0 }
 0x598   :  { %v4502_v45 = vmul.f32 %v7025_v59, %v11421_v4  ;;  %4549 = vrot.lane.b32.xlu0 %v10181_v11, %s7576_s16  ;;  %v4430_v13 = vpop.f32.mrb[21].mxu0 }
 0x599   :  { %v4501_v50 = vmul.f32 %v4430_v13, %v11422_v40  ;;  %4547 = vrot.lane.b32.xlu1 %v10184_v48, %s7576_s16 }
 0x59a   :  { %v10193_v17 = vmul.f32 %v4502_v45, %v11259_v29 }
 0x59b   :  { %v10196_v37 = vmul.f32 %v4501_v50, %v11259_v29  ;;  %v7028_v19 = vpop.f32.mrb[22].mxu0 }
 0x59c   :  { %v4504_v55 = vmul.f32 %v7028_v19, %v11423_v2  ;;  %4553 = vrot.lane.b32.xlu0 %v10193_v17, %s7576_s16  ;;  %v4440_v33 = vpop.f32.mrb[23].mxu0 }
 0x59d   :  { %v4503_v21 = vmul.f32 %v4440_v33, %v11424_v39  ;;  %4551 = vrot.lane.b32.xlu1 %v10196_v37, %s7576_s16 }
 0x59e   :  { %v10205_v3 = vmul.f32 %v4504_v55, %v11259_v29 }
 0x59f   :  { %v10208_v43 = vmul.f32 %v4503_v21, %v11259_v29  ;;  %v7031_v10 = vpop.f32.mrb[24].mxu0 }
 0x5a0   :  { %v4506_v63 = vmul.f32 %v7031_v10, %v11425_v35  ;;  %4557 = vrot.lane.b32.xlu0 %v10205_v3, %s7576_s16  ;;  %v4450_v53 = vpop.f32.mrb[25].mxu0 }
 0x5a1   :  { %4555 = vrot.lane.b32.xlu1 %v10208_v43, %s7576_s16  ;;  %v4505_v20 = vmul.f32 %v4450_v53, %v11426_v36 }
 0x5a2   :  { %v10216_v62 = vmul.f32 %v4506_v63, %v11259_v29 }
 0x5a3   :  { %v7034_v30 = vpop.f32.mrb[26].mxu0  ;;  %v10226_v23 = vmul.f32 %v4505_v20, %v11259_v29 }
 0x5a4   :  { %v4508_v51 = vmul.f32 %v7034_v30, %v11427_v5  ;;  %v4460_v41 = vpop.f32.mrb[27].mxu0 }
 0x5a5   :  { %4561 = vrot.lane.b32.xlu1 %v10216_v62, %s7576_s16  ;;  %v4507_v25 = vmul.f32 %v4460_v41, %v11428_v26 }
 0x5a6   :  { %v10223_v8 = vmul.f32 %v4508_v51, %v11405_v18 }
 0x5a7   :  { %v7037_v59 = vpop.f32.mrb[28].mxu0  ;;  %v10239_v55 = vmul.f32 %v4507_v25, %v11405_v18 }
 0x5a8   :  { %v4510_v45 = vmul.f32 %v7037_v59, %v11432_v57  ;;  %4565 = vrot.lane.b32.xlu0 %v10223_v8, %s7576_s16  ;;  %v4470_v13 = vpop.f32.mrb[29].mxu0 }
 0x5a9   :  { %4559 = vrot.lane.b32.xlu1 %v10226_v23, %s7576_s16  ;;  %v4509_v19 = vmul.f32 %v4470_v13, %v11433_v24 }
 0x5aa   :  { %v10235_v50 = vmul.f32 %v4510_v45, %v11405_v18 }
 0x5ab   :  { %v7040_v33 = vpop.f32.mrb[30].mxu0  ;;  %v10247_v63 = vmul.f32 %v4509_v19, %v11405_v18 }
 0x5ac   :  { %4569 = vrot.lane.b32.xlu0 %v10235_v50, %s7576_s16  ;;  %v4480_v21 = vpop.f32.mrb[31].mxu0  ;;  %v4512_v53 = vmul.f32 %v7040_v33, %v11435_v12 }
 0x5ad   :  { %v4511_v10 = vmul.f32 %v4480_v21, %v11437_v47  ;;  %4563 = vrot.lane.b32.xlu1 %v10239_v55, %s7576_s16 }
 0x5ae   :  { %v10259_v25 = vmul.f32 %v4512_v53, %v11405_v18 }
 0x5af   :  { %v10251_v20 = vmul.f32 %v4511_v10, %v11405_v18  ;;  %v7043_v30 = vpop.f32.mrb[32].mxu0 }
 0x5b0   :  { %4567 = vrot.lane.b32.xlu0 %v10247_v63, %s7576_s16  ;;  %v4490_v51 = vpop.f32.mrb[33].mxu0  ;;  %v4514_v59 = vmul.f32 %v7043_v30, %v11439_v42 }
 0x5b1   :  { %v4513_v41 = vmul.f32 %v4490_v51, %v11440_v56  ;;  %4571 = vrot.lane.b32.xlu1 %v10251_v20, %s7576_s16 }
 0x5b2   :  { %v10270_v13 = vmul.f32 %v4514_v59, %v11405_v18 }
 0x5b3   :  { %v10263_v45 = vmul.f32 %v4513_v41, %v11405_v18 }
 0x5b4   :  { %4573 = vrot.lane.b32.xlu0 %v10259_v25, %s7576_s16 }
 0x5b5   :  { %4575 = vrot.lane.b32.xlu1 %v10263_v45, %s7576_s16 }
 0x5b8   :  { %4577 = vrot.lane.b32.xlu0 %v10270_v13, %s7576_s16 }
 0x60a   :  { %v4550_v19 = vpop.permute.xlu0 %4549 }
 0x60b   :  { %v4596_v33 = vmul.f32 %v4550_v19, %v10003_v16  ;;  %v4548_v21 = vpop.permute.xlu1 %4547 }
 0x60c   :  { %v4595_v10 = vmul.f32 %v4548_v21, %v10006_v6 }
 0x60d   :  { %4629 = vrot.lane.b32.xlu0 %v4596_v33, %s7577_s17 }
 0x60e   :  { %v4554_v53 = vpop.permute.xlu0 %4553  ;;  %4627 = vrot.lane.b32.xlu1 %v4595_v10, %s7577_s17 }
 0x60f   :  { %v4598_v30 = vmul.f32 %v4554_v53, %v10017_v28  ;;  %v4552_v51 = vpop.permute.xlu1 %4551 }
 0x610   :  { %v4597_v41 = vmul.f32 %v4552_v51, %v10020_v7 }
 0x611   :  { %4633 = vrot.lane.b32.xlu0 %v4598_v30, %s7577_s17 }
 0x612   :  { %v4558_v59 = vpop.permute.xlu0 %4557  ;;  %4631 = vrot.lane.b32.xlu1 %v4597_v41, %s7577_s17 }
 0x613   :  { %v4600_v16 = vmul.f32 %v4558_v59, %v10031_v61  ;;  %v4556_v19 = vpop.permute.xlu1 %4555 }
 0x614   :  { %v4599_v6 = vmul.f32 %v4556_v19, %v10034_v14 }
 0x615   :  { %4637 = vrot.lane.b32.xlu0 %v4600_v16, %s7577_s17 }
 0x616   :  { %4635 = vrot.lane.b32.xlu1 %v4599_v6, %s7577_s17 }
 0x617   :  { %v4562_v33 = vpop.permute.xlu1 %4561 }
 0x618   :  { %v4602_v28 = vmul.f32 %v4562_v33, %v10042_v49 }
 0x61a   :  { %v4566_v21 = vpop.permute.xlu0 %4565  ;;  %4641 = vrot.lane.b32.xlu1 %v4602_v28, %s7577_s17 }
 0x61b   :  { %v4604_v7 = vmul.f32 %v4566_v21, %v10058_v34  ;;  %v4560_v10 = vpop.permute.xlu1 %4559 }
 0x61c   :  { %v4601_v53 = vmul.f32 %v4560_v10, %v10049_v32 }
 0x61d   :  { %4645 = vrot.lane.b32.xlu0 %v4604_v7, %s7577_s17 }
 0x61e   :  { %v4570_v61 = vpop.permute.xlu0 %4569  ;;  %4639 = vrot.lane.b32.xlu1 %v4601_v53, %s7577_s17 }
 0x61f   :  { %v4606_v14 = vmul.f32 %v4570_v61, %v10076_v22  ;;  %v4564_v30 = vpop.permute.xlu1 %4563 }
 0x620   :  { %v4603_v51 = vmul.f32 %v4564_v30, %v10062_v60 }
 0x621   :  { %4649 = vrot.lane.b32.xlu0 %v4606_v14, %s7577_s17 }
 0x622   :  { %v4568_v49 = vpop.permute.xlu0 %4567  ;;  %4643 = vrot.lane.b32.xlu1 %v4603_v51, %s7577_s17 }
 0x623   :  { %v4605_v34 = vmul.f32 %v4568_v49, %v10081_v0  ;;  %v4572_v41 = vpop.permute.xlu1 %4571 }
 0x624   :  { %v4607_v32 = vmul.f32 %v4572_v41, %v10095_v58 }
 0x625   :  { %4647 = vrot.lane.b32.xlu0 %v4605_v34, %s7577_s17 }
 0x626   :  { %v4574_v59 = vpop.permute.xlu0 %4573  ;;  %4651 = vrot.lane.b32.xlu1 %v4607_v32, %s7577_s17 }
 0x627   :  { %v4608_v22 = vmul.f32 %v4574_v59, %v10091_v52  ;;  %v4576_v16 = vpop.permute.xlu1 %4575 }
 0x628   :  { %v4609_v60 = vmul.f32 %v4576_v16, %v10111_v27 }
 0x629   :  { %4653 = vrot.lane.b32.xlu0 %v4608_v22, %s7577_s17 }
 0x62a   :  { %v4578_v19 = vpop.permute.xlu0 %4577  ;;  %4655 = vrot.lane.b32.xlu1 %v4609_v60, %s7577_s17  ;;  %v11460_v60 = vld [vmem:[#allocation76_spill] sm:$0xff] }
 0x62b   :  { %v4610_v0 = vmul.f32 %v4578_v19, %v10107_v31 }
 0x62d   :  { %4657 = vrot.lane.b32.xlu0 %v4610_v0, %s7577_s17 }
 0x67f   :  { %v4630_v58 = vpop.permute.xlu0 %4629 }
 0x680   :  { %v10307_v6 = vadd.f32 %v4630_v58, %v10181_v11  ;;  %v4628_v33 = vpop.permute.xlu1 %4627  ;;  %v11461_v58 = vld [vmem:[#allocation77_spill] sm:$0xff] }
 0x681   :  { %v10310_v28 = vadd.f32 %v4628_v33, %v10184_v48 }
 0x682   :  { %4709 = vrot.lane.b32.xlu0 %v10307_v6, %s7575_s2 }
 0x683   :  { %v4634_v52 = vpop.permute.xlu0 %4633  ;;  %4707 = vrot.lane.b32.xlu1 %v10310_v28, %s7575_s2 }
 0x684   :  { %v10317_v27 = vadd.f32 %v4634_v52, %v10193_v17  ;;  %v4632_v31 = vpop.permute.xlu1 %4631 }
 0x685   :  { %v10320_v21 = vadd.f32 %v4632_v31, %v10196_v37  ;;  %v11462_v31 = vld [vmem:[#allocation16_spill] sm:$0xff] }
 0x686   :  { %4713 = vrot.lane.b32.xlu0 %v10317_v27, %s7575_s2 }
 0x687   :  { %v4638_v11 = vpop.permute.xlu0 %4637  ;;  %4711 = vrot.lane.b32.xlu1 %v10320_v21, %s7575_s2 }
 0x688   :  { %v10327_v48 = vadd.f32 %v4638_v11, %v10205_v3  ;;  %v4636_v7 = vpop.permute.xlu1 %4635 }
 0x689   :  { %v10330_v10 = vadd.f32 %v4636_v7, %v10208_v43 }
 0x68a   :  { %4717 = vrot.lane.b32.xlu0 %v10327_v48, %s7575_s2 }
 0x68b   :  { %4715 = vrot.lane.b32.xlu1 %v10330_v10, %s7575_s2 }
 0x68c   :  { %v4642_v17 = vpop.permute.xlu1 %4641 }
 0x68d   :  { %v10337_v37 = vadd.f32 %v4642_v17, %v10216_v62  ;;  %v11463_v17 = vld [vmem:[#allocation78_spill] sm:$0xff] }
 0x68f   :  { %v4646_v53 = vpop.permute.xlu0 %4645  ;;  %4721 = vrot.lane.b32.xlu1 %v10337_v37, %s7575_s2 }
 0x690   :  { %v10342_v3 = vadd.f32 %v4646_v53, %v10223_v8  ;;  %v4640_v61 = vpop.permute.xlu1 %4639 }
 0x691   :  { %v10345_v43 = vadd.f32 %v4640_v61, %v10226_v23 }
 0x692   :  { %4725 = vrot.lane.b32.xlu0 %v10342_v3, %s7575_s2 }
 0x693   :  { %v4650_v14 = vpop.permute.xlu0 %4649  ;;  %4719 = vrot.lane.b32.xlu1 %v10345_v43, %s7575_s2 }
 0x694   :  { %v10352_v62 = vadd.f32 %v4650_v14, %v10235_v50  ;;  %v4644_v30 = vpop.permute.xlu1 %4643 }
 0x695   :  { %v10355_v51 = vadd.f32 %v4644_v30, %v10239_v55  ;;  %v11465_v30 = vld [vmem:[#allocation84_spill] sm:$0xff] }
 0x696   :  { %4729 = vrot.lane.b32.xlu0 %v10352_v62, %s7575_s2 }
 0x697   :  { %v4648_v8 = vpop.permute.xlu0 %4647  ;;  %4723 = vrot.lane.b32.xlu1 %v10355_v51, %s7575_s2 }
 0x698   :  { %v10362_v23 = vadd.f32 %v4648_v8, %v10247_v63  ;;  %v4652_v49 = vpop.permute.xlu1 %4651  ;;  %v7469_v63 = vld [vmem:[%s11030_s4] sm:$0xff] }
 0x699   :  { %v10365_v34 = vadd.f32 %v4652_v49, %v10251_v20  ;;  %vm4883_vm1 = vcmp.gt.f32.partialorder %v7469_v63, 0.0 }
 0x69a   :  { %4727 = vrot.lane.b32.xlu0 %v10362_v23, %s7575_s2 }
 0x69b   :  { %v4654_v50 = vpop.permute.xlu0 %4653  ;;  %4731 = vrot.lane.b32.xlu1 %v10365_v34, %s7575_s2 }
 0x69c   :  { %v10372_v55 = vadd.f32 %v4654_v50, %v10259_v25  ;;  %v4656_v41 = vpop.permute.xlu1 %4655  ;;  %v11459_v25 = vmov 0   ;;  %v11466_v50 = vld [vmem:[#allocation70_spill] sm:$0xff] }
 0x69d   :  { %v10375_v32 = vadd.f32 %v4656_v41, %v10263_v45  ;;  %v4885_v22 = vsel %vm4883_vm1, 1, %v11459_v25  ;;  %v7470_v45 = vld [vmem:[%s11030_s4 + $0x8] sm:$0xff]  ;;  %s7584_s4 = smov [#allocation8]  }
 0x69e   :  { %4733 = vrot.lane.b32.xlu0 %v10372_v55, %s7575_s2  ;;  %vm4884_vm15 = vcmp.gt.f32.partialorder %v7470_v45, 0.0  ;;  %s6630_s1 = sshll.u32 %s7584_s4, 4  ;;  %s6631_s1 = int_to_ptr.vmem [resolvable:$true] %s6630_s1 }
 0x69f   :  { %v4658_v20 = vpop.permute.xlu0 %4657  ;;  %4735 = vrot.lane.b32.xlu1 %v10375_v32, %s7575_s2  ;;  %v4886_v16 = vsel %vm4884_vm15, 1, %v11459_v25  ;;  %s7515_s25 = scalar_lea.vmem %s6631_s1, 2048  ;;  %p7520_p3 = scmp.lt.s32.totalorder %s6631_s1, %s6631_s1 }
 0x6a0   :  { %v10385_v59 = vadd.f32 %v4658_v20, %v10270_v13  ;;  %v11467_v20 = vld [vmem:[#allocation86_spill] sm:$0xff]  ;;  %p7516_p2 = scmp.ne.s32.totalorder %s6631_s1, %s7515_s25  ;;  %p7521_p4 = scmp.lt.s32.totalorder %s7515_s25, %s7515_s25 }
 0x6a2   :  { %4737 = vrot.lane.b32.xlu0 %v10385_v59, %s7575_s2  ;;  %p7522_p5 = por %p7521_p4, %p7520_p3 }
 0x6a3   :  { %4888 = vperm.xlu1 %7250, %v4885_v22  }
 0x6a4   :  { %p7523_p6 = pnand %p7522_p5, %p7516_p2 }
 0x6a6   :  { %4891 = vperm.xlu0 %7249, %v4886_v16   ;;  %v11468_v16 = vld [vmem:[#allocation85_spill] sm:$0xff] }
 0x6aa   :  { %5289 = vrot.lane.b32.xlu0 %v11418_v9, %s7579_s19 }
 0x6ae   :  { %5435 = vrot.lane.b32.xlu0 %v11401_v15, %s7579_s19  ;;  %v11464_v15 = vld [vmem:[#allocation83_spill] sm:$0xff] }
 0x6f4   :  { %v4710_v13 = vpop.permute.xlu0 %4709 }
 0x6f5   :  { %v4756_v19 = vmul.f32 %v4710_v13, %v11460_v60  ;;  %v4708_v0 = vpop.permute.xlu1 %4707 }
 0x6f6   :  { %v4755_v33 = vmul.f32 %v4708_v0, %v11461_v58 }
 0x6f7   :  { %4789 = vrot.lane.b32.xlu1 %v4756_v19, %s7580_s20  ;;  %v11469_v19 = vld [vmem:[#allocation88_spill] sm:$0xff] }
 0x6f8   :  { %v4714_v52 = vpop.permute.xlu0 %4713  ;;  %4787 = vrot.lane.b32.xlu0 %v4755_v33, %s7580_s20  ;;  %v11470_v33 = vld [vmem:[#allocation87_spill] sm:$0xff] }
 0x6f9   :  { %v4758_v11 = vmul.f32 %v4714_v52, %v11462_v31  ;;  %v4712_v7 = vpop.permute.xlu1 %4711 }
 0x6fa   :  { %v4757_v53 = vmul.f32 %v4712_v7, %v11463_v17 }
 0x6fb   :  { %4793 = vrot.lane.b32.xlu1 %v4758_v11, %s7580_s20  ;;  %v11471_v11 = vld [vmem:[#allocation89_spill] sm:$0xff] }
 0x6fc   :  { %v4718_v9 = vpop.permute.xlu0 %4717  ;;  %4791 = vrot.lane.b32.xlu0 %v4757_v53, %s7580_s20  ;;  %v11472_v53 = vld [vmem:[#allocation91_spill] sm:$0xff] }
 0x6fd   :  { %v4760_v61 = vmul.f32 %v4718_v9, %v11464_v15  ;;  %v4716_v14 = vpop.permute.xlu1 %4715 }
 0x6fe   :  { %v4759_v8 = vmul.f32 %v4716_v14, %v11465_v30 }
 0x700   :  { %4797 = vrot.lane.b32.xlu0 %v4760_v61, %s7580_s20  ;;  %4795 = vrot.lane.b32.xlu1 %v4759_v8, %s7580_s20  ;;  %v11473_v61 = vld [vmem:[#allocation90_spill] sm:$0xff]  ;;  %v11474_v8 = vld [vmem:[#allocation93_spill] sm:$0xff] }
 0x701   :  { %v4722_v49 = vpop.permute.xlu1 %4721 }
 0x702   :  { %v4762_v41 = vmul.f32 %v4722_v49, %v11466_v50 }
 0x704   :  { %v4726_v63 = vpop.permute.xlu0 %4725  ;;  %4801 = vrot.lane.b32.xlu1 %v4762_v41, %s7580_s20  ;;  %v11475_v41 = vld [vmem:[#allocation92_spill] sm:$0xff] }
 0x705   :  { %v4764_v22 = vmul.f32 %v4726_v63, %v11467_v20  ;;  %v4720_v45 = vpop.permute.xlu1 %4719 }
 0x706   :  { %v4761_v13 = vmul.f32 %v4720_v45, %v11468_v16  ;;  %v7581_v45 = vmov 2  }
 0x707   :  { %4805 = vrot.lane.b32.xlu0 %v4764_v22, %s7580_s20  ;;  %7287 = vset.pattern.permute.xlu1 %v7581_v45 }
 0x708   :  { %v4730_v60 = vpop.permute.xlu0 %4729  ;;  %4799 = vrot.lane.b32.xlu1 %v4761_v13, %s7580_s20 }
 0x709   :  { %v4766_v0 = vmul.f32 %v4730_v60, %v11469_v19  ;;  %v4724_v58 = vpop.permute.xlu1 %4723 }
 0x70a   :  { %v4763_v52 = vmul.f32 %v4724_v58, %v11470_v33 }
 0x70b   :  { %4809 = vrot.lane.b32.xlu0 %v4766_v0, %s7580_s20 }
 0x70c   :  { %v4728_v31 = vpop.permute.xlu0 %4727  ;;  %4803 = vrot.lane.b32.xlu1 %v4763_v52, %s7580_s20 }
 0x70d   :  { %v4765_v7 = vmul.f32 %v4728_v31, %v11471_v11  ;;  %v4732_v17 = vpop.permute.xlu1 %4731 }
 0x70e   :  { %v4767_v9 = vmul.f32 %v4732_v17, %v11472_v53 }
 0x70f   :  { %4807 = vrot.lane.b32.xlu0 %v4765_v7, %s7580_s20 }
 0x710   :  { %v4734_v15 = vpop.permute.xlu0 %4733  ;;  %4811 = vrot.lane.b32.xlu1 %v4767_v9, %s7580_s20 }
 0x711   :  { %v4768_v14 = vmul.f32 %v4734_v15, %v11473_v61  ;;  %v4736_v30 = vpop.permute.xlu1 %4735 }
 0x712   :  { %v4769_v49 = vmul.f32 %v4736_v30, %v11474_v8 }
 0x713   :  { %4813 = vrot.lane.b32.xlu0 %v4768_v14, %s7580_s20 }
 0x714   :  { %v4738_v50 = vpop.permute.xlu0 %4737  ;;  %4815 = vrot.lane.b32.xlu1 %v4769_v49, %s7580_s20 }
 0x715   :  { %v4770_v63 = vmul.f32 %v4738_v50, %v11475_v41 }
 0x717   :  { %4817 = vrot.lane.b32.xlu0 %v4770_v63, %s7580_s20 }
 0x722   :  { %v10439_v16 = vpop.permute.xlu1 %4888 }
 0x723   :  { %vm4893_vm3 = vcmp.eq.s32.totalorder %v10439_v16, 1 }
 0x725   :  { %v10430_v20 = vpop.permute.xlu0 %4891 }
 0x726   :  { %vm4894_vm13 = vcmp.eq.s32.totalorder %v10430_v20, 1 }
 0x729   :  { %v10432_v22 = vpop.permute.xlu0 %5289 }
 0x72a   :  { %7045 = vmatpush3.msra.mxu1 %v10432_v22  ;;  %7065 = vmatpush3.msra.mxu0 %v10432_v22 }
 0x72b   :  { %7074 = vmatprep.subr.mxu0 %v11446_v1  ;;  %7049 = vmatprep.subr.mxu1 %v11446_v1 }
 0x72d   :  { %v10441_v13 = vpop.permute.xlu0 %5435 }
 0x769   :  { %v4790_v60 = vpop.permute.xlu1 %4789 }
 0x76a   :  { %v4836_v19 = vadd.f32 %v4790_v60, %v10307_v6  ;;  %v4788_v0 = vpop.permute.xlu0 %4787 }
 0x76b   :  { %v4835_v58 = vadd.f32 %v4788_v0, %v10310_v28 }
 0x76c   :  { %v4852_v33 = vmul.f32 %v4836_v19, %v11419_v54 }
 0x76d   :  { %v4851_v52 = vmul.f32 %v4835_v58, %v11420_v46  ;;  %v4794_v31 = vpop.permute.xlu1 %4793 }
 0x76e   :  { %v4868_v11 = vmul.f32 %v4852_v33, %v11259_v29  ;;  %v4838_v7 = vadd.f32 %v4794_v31, %v10317_v27  ;;  %v4792_v17 = vpop.permute.xlu0 %4791 }
 0x76f   :  { %v4867_v53 = vmul.f32 %v4851_v52, %v11259_v29  ;;  %v4837_v6 = vadd.f32 %v4792_v17, %v10320_v21 }
 0x770   :  { %v4896_v28 = vsel %vm4893_vm3, %v4868_v11, -1e+30  ;;  %v4854_v54 = vmul.f32 %v4838_v7, %v11421_v4 }
 0x771   :  { %v4919_v46 = vsel %vm4911_vm2, %v4896_v28, -inf  ;;  %v4895_v9 = vsel %vm4893_vm3, %v4867_v53, -1e+30  ;;  %v4853_v15 = vmul.f32 %v4837_v6, %v11422_v40 }
 0x772   :  { %v4920_v27 = vrot.slane %v4919_v46, 4  ;;  %v4912_v61 = vsel %vm4911_vm2, %v4895_v9, -inf  ;;  %v4870_v14 = vmul.f32 %v4854_v54, %v11259_v29  ;;  %v4798_v30 = vpop.permute.xlu0 %4797  ;;  %v4796_v8 = vpop.permute.xlu1 %4795 }
 0x773   :  { %v4913_v21 = vrot.slane %v4912_v61, 4  ;;  %v4869_v49 = vmul.f32 %v4853_v15, %v11259_v29  ;;  %v4840_v50 = vadd.f32 %v4798_v30, %v10327_v48 }
 0x774   :  { %v4921_v4 = vmax.f32 %v4919_v46, %v4920_v27  ;;  %v4898_v41 = vsel %vm4893_vm3, %v4870_v14, -1e+30 }
 0x775   :  { %v4914_v63 = vmax.f32 %v4912_v61, %v4913_v21  ;;  %v4933_v60 = vsel %vm4911_vm2, %v4898_v41, -inf  ;;  %v10468_v40 = vsel %vm4893_vm3, %v4869_v49, -1e+30  ;;  %v4856_v19 = vmul.f32 %v4840_v50, %v11423_v2 }
 0x776   :  { %v4922_v0 = vrot.slane %v4921_v4, 2  ;;  %v4934_v58 = vrot.slane %v4933_v60, 4  ;;  %v4926_v33 = vsel %vm4911_vm2, %v10468_v40, -inf  ;;  %v4802_v52 = vpop.permute.xlu1 %4801 }
 0x777   :  { %v4915_v31 = vrot.slane %v4914_v63, 2  ;;  %v4927_v7 = vrot.slane %v4926_v33, 4  ;;  %v4872_v17 = vmul.f32 %v4856_v19, %v11259_v29  ;;  %v4842_v6 = vadd.f32 %v4802_v52, %v10337_v37 }
 0x778   :  { %v4923_v48 = vmax.f32 %v4921_v4, %v4922_v0  ;;  %v4935_v11 = vmax.f32 %v4933_v60, %v4934_v58  ;;  %v4839_v19 = vadd.f32 %v4796_v8, %v10330_v10 }
 0x779   :  { %v4916_v54 = vmax.f32 %v4914_v63, %v4915_v31  ;;  %v4928_v27 = vmax.f32 %v4926_v33, %v4927_v7  ;;  %v10477_v2 = vsel %vm4893_vm3, %v4872_v17, -1e+30  ;;  %v4858_v61 = vmul.f32 %v4842_v6, %v11425_v35 }
 0x77a   :  { %v4924_v53 = vrot.slane %v4923_v48, 1  ;;  %v4936_v15 = vrot.slane %v4935_v11, 2  ;;  %v4947_v30 = vsel %vm4911_vm2, %v10477_v2, -inf  ;;  %v4800_v4 = vpop.permute.xlu1 %4799  ;;  %v4855_v31 = vmul.f32 %v4839_v19, %v11424_v39 }
 0x77b   :  { %v4917_v14 = vrot.slane %v4916_v54, 1  ;;  %v4929_v50 = vrot.slane %v4928_v27, 2  ;;  %v4874_v37 = vmul.f32 %v4858_v61, %v11259_v29  ;;  %v4948_v63 = vrot.slane %v4947_v30, 4 }
 0x77c   :  { %v4925_v46 = vmax.f32 %v4923_v48, %v4924_v53  ;;  %v4937_v49 = vmax.f32 %v4935_v11, %v4936_v15  ;;  %v4841_v0 = vadd.f32 %v4800_v4, %v10345_v43  ;;  %v4806_v43 = vpop.permute.xlu0 %4805  ;;  %v4871_v6 = vmul.f32 %v4855_v31, %v11259_v29 }
 0x77d   :  { %v4918_v60 = vmax.f32 %v4916_v54, %v4917_v14  ;;  %v4930_v52 = vmax.f32 %v4928_v27, %v4929_v50  ;;  %v10487_v35 = vsel %vm4893_vm3, %v4874_v37, -1e+30  ;;  %v4949_v48 = vmax.f32 %v4947_v30, %v4948_v63 }
 0x77e   :  { %v5025_v21 = vsub.f32 %v4896_v28, %v4925_v46  ;;  %v4938_v33 = vrot.slane %v4937_v49, 1  ;;  %v4857_v11 = vmul.f32 %v4841_v0, %v11426_v36  ;;  %v4961_v10 = vsel %vm4911_vm2, %v10487_v35, -inf }
 0x77f   :  { %v5024_v28 = vsub.f32 %v4895_v9, %v4918_v60  ;;  %v4931_v17 = vrot.slane %v4930_v52, 1  ;;  %v4950_v8 = vrot.slane %v4949_v48, 2  ;;  %v4962_v54 = vrot.slane %v4961_v10, 4 }
 0x780   :  { %v5042_v58 = vmul.f32 1.442695, %v5025_v21  ;;  %v4939_v7 = vmax.f32 %v4937_v49, %v4938_v33  ;;  %v4873_v46 = vmul.f32 %v4857_v11, %v11259_v29  ;;  %v4844_v39 = vadd.f32 %v4806_v43, %v10342_v3  ;;  %v4810_v60 = vpop.permute.xlu0 %4809 }
 0x781   :  { %v5040_v53 = vmul.f32 1.442695, %v5024_v28  ;;  %v4932_v9 = vmax.f32 %v4930_v52, %v4931_v17  ;;  %v4951_v27 = vmax.f32 %v4949_v48, %v4950_v8  ;;  %v10498_v36 = vsel %vm4893_vm3, %v4871_v6, -1e+30 }
 0x782   :  { %7405 = vpow2.f32 %v5042_v58  ;;  %v5027_v15 = vsub.f32 %v4898_v41, %v4939_v7  ;;  %v4963_v61 = vmax.f32 %v4961_v10, %v4962_v54  ;;  %v10502_v14 = vsel %vm4893_vm3, %v4873_v46, -1e+30 }
 0x783   :  { %7407 = vpow2.f32 %v5040_v53  ;;  %v5026_v21 = vsub.f32 %v10468_v40, %v4932_v9  ;;  %v4860_v49 = vmul.f32 %v4844_v39, %v11427_v5  ;;  %v4952_v50 = vrot.slane %v4951_v27, 1 }
 0x784   :  { %v5046_v30 = vmul.f32 1.442695, %v5027_v15  ;;  %v4940_v3 = vsel %vm4911_vm2, %v10498_v36, -inf  ;;  %v4954_v4 = vsel %vm4911_vm2, %v10502_v14, -inf  ;;  %v4964_v37 = vrot.slane %v4963_v61, 2  ;;  %v4808_v54 = vpop.permute.xlu0 %4807 }
 0x785   :  { %v5044_v63 = vmul.f32 1.442695, %v5026_v21  ;;  %v4876_v16 = vmul.f32 %v4860_v49, %v11405_v18  ;;  %v4941_v19 = vrot.slane %v4940_v3, 4  ;;  %v4955_v5 = vrot.slane %v4954_v4, 4 }
 0x786   :  { %7409 = vpow2.f32 %v5046_v30  ;;  %v4953_v0 = vmax.f32 %v4951_v27, %v4952_v50  ;;  %v4965_v58 = vmax.f32 %v4963_v61, %v4964_v37  ;;  %v4846_v33 = vadd.f32 %v4810_v60, %v10352_v62 }
 0x787   :  { %7411 = vpow2.f32 %v5044_v63  ;;  %v10519_v48 = vsel %vm4894_vm13, %v4876_v16, -1e+30  ;;  %v4942_v31 = vmax.f32 %v4940_v3, %v4941_v19  ;;  %v4956_v11 = vmax.f32 %v4954_v4, %v4955_v5 }
 0x788   :  { %v5029_v7 = vsub.f32 %v10477_v2, %v4953_v0  ;;  %v4966_v17 = vrot.slane %v4965_v58, 1  ;;  %v4975_v10 = vsel %vm4911_vm2, %v10519_v48, -inf  ;;  %v4862_v43 = vmul.f32 %v4846_v33, %v11432_v57 }
 0x789   :  { %v4943_v53 = vrot.slane %v4942_v31, 2  ;;  %v4957_v6 = vrot.slane %v4956_v11, 2  ;;  %v4976_v9 = vrot.slane %v4975_v10, 4  ;;  %v4845_v61 = vadd.f32 %v4808_v54, %v10362_v23 }
 0x78a   :  { %v5050_v15 = vmul.f32 1.442695, %v5029_v7  ;;  %v4967_v27 = vmax.f32 %v4965_v58, %v4966_v17  ;;  %v4878_v2 = vmul.f32 %v4862_v43, %v11405_v18 }
 0x78b   :  { %v4944_v21 = vmax.f32 %v4942_v31, %v4943_v53  ;;  %v4958_v49 = vmax.f32 %v4956_v11, %v4957_v6  ;;  %v4977_v3 = vmax.f32 %v4975_v10, %v4976_v9  ;;  %v4861_v23 = vmul.f32 %v4845_v61, %v11433_v24  ;;  %v4814_v11 = vpop.permute.xlu0 %4813 }
 0x78c   :  { %v10506_v41 = vpop.eup %7405  ;;  %7413 = vpow2.f32 %v5050_v15  ;;  %v5031_v37 = vsub.f32 %v10487_v35, %v4967_v27  ;;  %v10540_v63 = vsel %vm4894_vm13, %v4878_v2, -1e+30  ;;  %v4848_v54 = vadd.f32 %v4814_v11, %v10372_v55 }
 0x78d   :  { %v5079_v40 = vsel %vm4911_vm2, %v10506_v41, 0.0  ;;  %v10521_v28 = vpop.eup %7407  ;;  %v4945_v19 = vrot.slane %v4944_v21, 1  ;;  %v4959_v5 = vrot.slane %v4958_v49, 1  ;;  %v4978_v58 = vrot.slane %v4977_v3, 2 }
 0x78e   :  { %v5080_v52 = vrot.slane %v5079_v40, 4  ;;  %v5072_v62 = vsel %vm4911_vm2, %v10521_v28, 0.0  ;;  %v4989_v33 = vsel %vm4911_vm2, %v10540_v63, -inf  ;;  %v5054_v31 = vmul.f32 1.442695, %v5031_v37 }
 0x78f   :  { %v5073_v39 = vrot.slane %v5072_v62, 4  ;;  %v4877_v43 = vmul.f32 %v4861_v23, %v11405_v18  ;;  %v4946_v24 = vmax.f32 %v4944_v21, %v4945_v19  ;;  %v4979_v53 = vmax.f32 %v4977_v3, %v4978_v58 }
 0x790   :  { %v5081_v8 = vadd.f32 %v5080_v52, %v5079_v40  ;;  %v10529_v46 = vpop.eup %7409  ;;  %v4804_v52 = vpop.permute.xlu1 %4803  ;;  %v4864_v3 = vmul.f32 %v4848_v54, %v11435_v12 }
 0x791   :  { %v5093_v57 = vsel %vm4911_vm2, %v10529_v46, 0.0  ;;  %v10535_v50 = vpop.eup %7411  ;;  %v5074_v4 = vadd.f32 %v5073_v39, %v5072_v62  ;;  %v4990_v62 = vrot.slane %v4989_v33, 4  ;;  %v4843_v6 = vadd.f32 %v4804_v52, %v10355_v51 }
 0x792   :  { %v5082_v30 = vrot.slane %v5081_v8, 2  ;;  %v5094_v60 = vrot.slane %v5093_v57, 4  ;;  %v5086_v40 = vsel %vm4911_vm2, %v10535_v50, 0.0  ;;  %v10554_v27 = vsel %vm4894_vm13, %v4877_v43, -1e+30 }
 0x793   :  { %v5075_v35 = vrot.slane %v5074_v4, 2  ;;  %v5087_v10 = vrot.slane %v5086_v40, 4  ;;  %v4991_v21 = vmax.f32 %v4989_v33, %v4990_v62  ;;  %v4859_v55 = vmul.f32 %v4843_v6, %v11428_v26 }
 0x794   :  { %v5083_v16 = vadd.f32 %v5082_v30, %v5081_v8  ;;  %v5095_v17 = vadd.f32 %v5094_v60, %v5093_v57  ;;  %v4960_v8 = vmax.f32 %v4958_v49, %v4959_v5  ;;  %v4812_v2 = vpop.permute.xlu1 %4811  ;;  %v5028_v30 = vsub.f32 %v10498_v36, %v4946_v24 }
 0x795   :  { %v5076_v15 = vadd.f32 %v5075_v35, %v5074_v4  ;;  %v5088_v39 = vadd.f32 %v5087_v10, %v5086_v40  ;;  %v4980_v49 = vrot.slane %v4979_v53, 1  ;;  %v4847_v60 = vadd.f32 %v4812_v2, %v10365_v34 }
 0x796   :  { %v5084_v0 = vrot.slane %v5083_v16, 1  ;;  %v10550_v9 = vpop.eup %7413  ;;  %v5096_v61 = vrot.slane %v5095_v17, 2  ;;  %v5030_v57 = vsub.f32 %v10502_v14, %v4960_v8  ;;  %v5048_v14 = vmul.f32 1.442695, %v5028_v30 }
 0x797   :  { %v5077_v51 = vrot.slane %v5076_v15, 1  ;;  %v5107_v37 = vsel %vm4911_vm2, %v10550_v9, 0.0  ;;  %v5089_v36 = vrot.slane %v5088_v39, 2  ;;  %v4992_v5 = vrot.slane %v4991_v21, 2 }
 0x798   :  { %v5085_v7 = vadd.f32 %v5084_v0, %v5083_v16  ;;  %v5097_v4 = vadd.f32 %v5096_v61, %v5095_v17  ;;  %v4982_v16 = vsel %vm4911_vm2, %v10554_v27, -inf  ;;  %v5052_v19 = vmul.f32 1.442695, %v5030_v57 }
 0x799   :  { %v5078_v23 = vadd.f32 %v5077_v51, %v5076_v15  ;;  %v5108_v0 = vrot.slane %v5107_v37, 4  ;;  %v4983_v58 = vrot.slane %v4982_v16, 4  ;;  %v4880_v26 = vmul.f32 %v4864_v3, %v11405_v18 }
 0x79a   :  { %7415 = vrcp.f32 %v5085_v7  ;;  %v5098_v40 = vrot.slane %v5097_v4, 1  ;;  %v4981_v12 = vmax.f32 %v4979_v53, %v4980_v49  ;;  %v4875_v33 = vmul.f32 %v4859_v55, %v11405_v18  ;;  %v4818_v53 = vpop.permute.xlu0 %4817 }
 0x79b   :  { %7417 = vpow2.f32 %v5054_v31  ;;  %v4863_v52 = vmul.f32 %v4847_v60, %v11437_v47  ;;  %v5090_v11 = vadd.f32 %v5089_v36, %v5088_v39  ;;  %v4993_v7 = vmax.f32 %v4991_v21, %v4992_v5 }
 0x79c   :  { %7419 = vrcp.f32 %v5078_v23  ;;  %v5099_v35 = vadd.f32 %v5098_v40, %v5097_v4  ;;  %v5109_v10 = vadd.f32 %v5108_v0, %v5107_v37  ;;  %v4984_v43 = vmax.f32 %v4982_v16, %v4983_v58 }
 0x79d   :  { %7421 = vpow2.f32 %v5052_v19  ;;  %v10573_v24 = vsel %vm4894_vm13, %v4880_v26, -1e+30  ;;  %v5033_v8 = vsub.f32 %v10519_v48, %v4981_v12  ;;  %v10578_v47 = vsel %vm4894_vm13, %v4875_v33, -1e+30 }
 0x79e   :  { %7423 = vpow2.f32 %v5048_v14  ;;  %v4879_v62 = vmul.f32 %v4863_v52, %v11405_v18  ;;  %v5091_v6 = vrot.slane %v5090_v11, 1  ;;  %v4994_v54 = vrot.slane %v4993_v7, 1 }
 0x79f   :  { %7425 = vrcp.f32 %v5099_v35  ;;  %v5003_v15 = vsel %vm4911_vm2, %v10573_v24, -inf  ;;  %v5110_v39 = vrot.slane %v5109_v10, 2  ;;  %v4968_v48 = vsel %vm4911_vm2, %v10578_v47, -inf }
 0x7a0   :  { %v4985_v2 = vrot.slane %v4984_v43, 2  ;;  %v4850_v61 = vadd.f32 %v4818_v53, %v10385_v59  ;;  %v5058_v57 = vmul.f32 1.442695, %v5033_v8  ;;  %v10590_v21 = vsel %vm4894_vm13, %v4879_v62, -1e+30  ;;  %v4816_v8 = vpop.permute.xlu1 %4815 }
 0x7a1   :  { %v7582_v51 = vmov 3   ;;  %v7583_v49 = vmov 1   ;;  %v5004_v3 = vrot.slane %v5003_v15, 4  ;;  %v5092_v4 = vadd.f32 %v5091_v6, %v5090_v11 }
 0x7a2   :  { %v4995_v37 = vmax.f32 %v4993_v7, %v4994_v54  ;;  %v4969_v16 = vrot.slane %v4968_v48, 4  ;;  %v4986_v59 = vmax.f32 %v4984_v43, %v4985_v2  ;;  %v4996_v60 = vsel %vm4911_vm2, %v10590_v21, -inf }
 0x7a3   :  { %v4866_v23 = vmul.f32 %v4850_v61, %v11439_v42  ;;  %v5111_v36 = vadd.f32 %v5110_v39, %v5109_v10  ;;  %7427 = vpow2.f32 %v5058_v57  ;;  %v5005_v0 = vmax.f32 %v5003_v15, %v5004_v3 }
 0x7a4   :  { %v7416_v31 = vpop.eup %7415  ;;  %7429 = vrcp.f32 %v5092_v4  ;;  %v5035_v26 = vsub.f32 %v10540_v63, %v4995_v37  ;;  %v4970_v12 = vmax.f32 %v4968_v48, %v4969_v16  ;;  %v4997_v42 = vrot.slane %v4996_v60, 4 }
 0x7a5   :  { %v10568_v34 = vpop.eup %7417  ;;  %v5201_v17 = vmul.f32 %v7416_v31, %v10506_v41  ;;  %v4987_v52 = vrot.slane %v4986_v59, 1  ;;  %v5112_v35 = vrot.slane %v5111_v36, 1  ;;  %v5006_v7 = vrot.slane %v5005_v0, 2 }
 0x7a6   :  { %v5121_v41 = vsel %vm4911_vm2, %v10568_v34, 0.0  ;;  %v7420_v55 = vpop.eup %7419  ;;  %v5062_v10 = vmul.f32 1.442695, %v5035_v26  ;;  %v4971_v43 = vrot.slane %v4970_v12, 2  ;;  %v4998_v53 = vmax.f32 %v4996_v60, %v4997_v42 }
 0x7a7   :  { %5784 = vperm.xlu1 %7287, %v5201_v17   ;;  %5228 = vperm.xlu0 %7249, %v5201_v17   ;;  %v5122_v30 = vrot.slane %v5121_v41, 4  ;;  %v10597_v40 = vpop.eup %7421  ;;  %v5200_v19 = vmul.f32 %v7420_v55, %v10521_v28  ;;  %v4882_v28 = vmul.f32 %v4866_v23, %v11405_v18  ;;  %v4988_v62 = vmax.f32 %v4986_v59, %v4987_v52 }
 0x7a8   :  { %v10600_v5 = vpop.eup %7423  ;;  %v5114_v33 = vsel %vm4911_vm2, %v10597_v40, 0.0  ;;  %v5113_v6 = vadd.f32 %v5112_v35, %v5111_v36  ;;  %v5007_v15 = vmax.f32 %v5005_v0, %v5006_v7  ;;  %v4849_v39 = vadd.f32 %v4816_v8, %v10375_v32 }
 0x7a9   :  { %v5123_v14 = vadd.f32 %v5122_v30, %v5121_v41  ;;  %v7426_v58 = vpop.eup %7425  ;;  %v5100_v11 = vsel %vm4911_vm2, %v10600_v5, 0.0  ;;  %v5115_v63 = vrot.slane %v5114_v33, 4  ;;  %v10617_v41 = vsel %vm4894_vm13, %v4882_v28, -1e+30 }
 0x7aa   :  { %7431 = vpow2.f32 %v5062_v10  ;;  %v5017_v61 = vsel %vm4911_vm2, %v10617_v41, -inf  ;;  %v4972_v57 = vmax.f32 %v4970_v12, %v4971_v43  ;;  %v5034_v55 = vsub.f32 %v10554_v27, %v4988_v62 }
 0x7ab   :  { %7288 = vset.pattern.permute.xlu1 %v7582_v51  ;;  %7286 = vset.pattern.permute.xlu0 %v7583_v49  ;;  %v5124_v31 = vrot.slane %v5123_v14, 2  ;;  %v5116_v2 = vadd.f32 %v5115_v63, %v5114_v33  ;;  %v4999_v3 = vrot.slane %v4998_v53, 2  ;;  %7433 = vrcp.f32 %v5113_v6 }
 0x7ac   :  { %6054 = vperm.xlu1 %7288, %v5201_v17   ;;  %5514 = vperm.xlu0 %7286, %v5201_v17   ;;  %v10611_v17 = vmul.f32 %v7426_v58, %v10529_v46  ;;  %v5101_v46 = vrot.slane %v5100_v11, 4  ;;  %v5008_v16 = vrot.slane %v5007_v15, 1  ;;  %v4865_v59 = vmul.f32 %v4849_v39, %v11440_v56 }
 0x7ad   :  { %v5125_v54 = vadd.f32 %v5124_v31, %v5123_v14  ;;  %v10621_v48 = vpop.eup %7427  ;;  %v5018_v60 = vrot.slane %v5017_v61, 4  ;;  %v5117_v23 = vrot.slane %v5116_v2, 2  ;;  %v4973_v36 = vrot.slane %v4972_v57, 1 }
 0x7ae   :  { %v7430_v30 = vpop.eup %7429  ;;  %v5102_v4 = vadd.f32 %v5101_v46, %v5100_v11  ;;  %v5135_v37 = vsel %vm4911_vm2, %v10621_v48, 0.0  ;;  %v5060_v14 = vmul.f32 1.442695, %v5034_v55  ;;  %v5000_v0 = vmax.f32 %v4998_v53, %v4999_v3 }
 0x7af   :  { %v5126_v32 = vrot.slane %v5125_v54, 1  ;;  %v5202_v27 = vmul.f32 %v7430_v30, %v10535_v50  ;;  %v5136_v26 = vrot.slane %v5135_v37, 4  ;;  %v5009_v12 = vmax.f32 %v5007_v15, %v5008_v16 }
 0x7b0   :  { %7289 = vset.pattern.permute.xlu1 %v11459_v25  ;;  %7291 = vset.pattern.permute.xlu0 %v7581_v45  ;;  %v5103_v58 = vrot.slane %v5102_v4, 2  ;;  %v4881_v42 = vmul.f32 %v4865_v59, %v11405_v18  ;;  %v5019_v33 = vmax.f32 %v5017_v61, %v5018_v60  ;;  %v5118_v56 = vadd.f32 %v5117_v23, %v5116_v2 }
 0x7b1   :  { %5225 = vperm.xlu1 %7289, %v5200_v19   ;;  %5781 = vperm.xlu0 %7291, %v5200_v19   ;;  %v4974_v52 = vmax.f32 %v4972_v57, %v4973_v36  ;;  %7435 = vpow2.f32 %v5060_v14  ;;  %v5001_v28 = vrot.slane %v5000_v0, 1  ;;  %v5137_v35 = vadd.f32 %v5136_v26, %v5135_v37 }
 0x7b2   :  { %v5104_v31 = vadd.f32 %v5103_v58, %v5102_v4  ;;  %v5037_v7 = vsub.f32 %v10573_v24, %v5009_v12  ;;  %v10642_v63 = vsel %vm4894_vm13, %v4881_v42, -1e+30  ;;  %v5020_v10 = vrot.slane %v5019_v33, 2 }
 0x7b3   :  { %v5119_v43 = vrot.slane %v5118_v56, 1  ;;  %v5032_v62 = vsub.f32 %v10578_v47, %v4974_v52  ;;  %v5002_v53 = vmax.f32 %v5000_v0, %v5001_v28  ;;  %v5138_v6 = vrot.slane %v5137_v35, 2 }
 0x7b4   :  { %v10636_v50 = vpop.eup %7431  ;;  %v5010_v24 = vsel %vm4911_vm2, %v10642_v63, -inf  ;;  %v5105_v46 = vrot.slane %v5104_v31, 1  ;;  %v5021_v15 = vmax.f32 %v5019_v33, %v5020_v10 }
 0x7b5   :  { %7290 = vset.pattern.permute.xlu1 %v7583_v49  ;;  %7293 = vset.pattern.permute.xlu0 %v11459_v25  ;;  %v7434_v11 = vpop.eup %7433  ;;  %v5149_v8 = vsel %vm4911_vm2, %v10636_v50, 0.0  ;;  %v5056_v2 = vmul.f32 1.442695, %v5032_v62  ;;  %v5036_v47 = vsub.f32 %v10590_v21, %v5002_v53  ;;  %v5011_v61 = vrot.slane %v5010_v24, 4 }
 0x7b6   :  { %5511 = vperm.xlu1 %7290, %v5200_v19   ;;  %5234 = vperm.xlu0 %7293, %v10611_v17   ;;  %v5205_v20 = vmul.f32 %v7434_v11, %v10550_v9  ;;  %v5150_v39 = vrot.slane %v5149_v8, 4  ;;  %v5106_v30 = vadd.f32 %v5105_v46, %v5104_v31  ;;  %v5139_v57 = vadd.f32 %v5138_v6, %v5137_v35 }
 0x7b7   :  { %v5022_v9 = vrot.slane %v5021_v15, 1  ;;  %v5012_v37 = vmax.f32 %v5010_v24, %v5011_v61 }
 0x7b8   :  { %v5151_v4 = vadd.f32 %v5150_v39, %v5149_v8  ;;  %v5140_v21 = vrot.slane %v5139_v57, 1 }
 0x7b9   :  { %v5023_v59 = vmax.f32 %v5021_v15, %v5022_v9  ;;  %v5013_v36 = vrot.slane %v5012_v37, 2 }
 0x7ba   :  { %7292 = vset.pattern.permute.xlu1 %v7582_v51  ;;  %7295 = vset.pattern.permute.xlu0 %v7581_v45  ;;  %v5152_v23 = vrot.slane %v5151_v4, 2  ;;  %v5141_v0 = vadd.f32 %v5140_v21, %v5139_v57 }
 0x7bb   :  { %6051 = vperm.xlu1 %7292, %v5200_v19   ;;  %5790 = vperm.xlu0 %7295, %v10611_v17   ;;  %v5127_v19 = vadd.f32 %v5126_v32, %v5125_v54  ;;  %v5066_v54 = vmul.f32 1.442695, %v5037_v7  ;;  %v10655_v55 = vpop.eup %7435  ;;  %v5064_v32 = vmul.f32 1.442695, %v5036_v47 }
 0x7bc   :  { %v5142_v16 = vsel %vm4911_vm2, %v10655_v55, 0.0  ;;  %v5153_v58 = vadd.f32 %v5152_v23, %v5151_v4 }
 0x7bd   :  { %7437 = vrcp.f32 %v5127_v19  ;;  %v5143_v14 = vrot.slane %v5142_v16, 4  ;;  %v5014_v19 = vmax.f32 %v5012_v37, %v5013_v36 }
 0x7be   :  { %7439 = vpow2.f32 %v5066_v54 }
 0x7bf   :  { %7294 = vset.pattern.permute.xlu1 %v7583_v49  ;;  %5787 = vperm.xlu0 %7295, %v5202_v27   ;;  %v5144_v12 = vadd.f32 %v5143_v14, %v5142_v16  ;;  %v5015_v28 = vrot.slane %v5014_v19, 1 }
 0x7c0   :  { %5520 = vperm.xlu1 %7294, %v10611_v17  }
 0x7c1   :  { %v5145_v11 = vrot.slane %v5144_v12, 2 }
 0x7c3   :  { %7299 = vset.pattern.permute.xlu0 %v7582_v51  ;;  %v5146_v6 = vadd.f32 %v5145_v11, %v5144_v12 }
 0x7c4   :  { %7296 = vset.pattern.permute.xlu1 %v7582_v51  ;;  %6057 = vperm.xlu0 %7299, %v5202_v27  }
 0x7c5   :  { %6060 = vperm.xlu1 %7296, %v10611_v17   ;;  %v5120_v17 = vadd.f32 %v5119_v43, %v5118_v56  ;;  %v5147_v15 = vrot.slane %v5146_v6, 1 }
 0x7c7   :  { %v7438_v3 = vpop.eup %7437  ;;  %7441 = vrcp.f32 %v5120_v17  ;;  %v5148_v57 = vadd.f32 %v5147_v15, %v5146_v6  ;;  %v11476_v15 = vlaneseq }
 0x7c8   :  { %7300 = vset.pattern.permute.xlu0 %v11459_v25  ;;  %7443 = vpow2.f32 %v5056_v2  ;;  %v10662_v60 = vmul.f32 %v7438_v3, %v10568_v34  ;;  %v10667_v26 = vpop.eup %7439 }
 0x7c9   :  { %7297 = vset.pattern.permute.xlu1 %v11459_v25  ;;  %5240 = vperm.xlu0 %7300, %v5205_v20   ;;  %7445 = vrcp.f32 %v5106_v30  ;;  %v5163_v52 = vsel %vm4911_vm2, %v10667_v26, 0.0 }
 0x7ca   :  { %5231 = vperm.xlu1 %7297, %v5202_v27   ;;  %7447 = vpow2.f32 %v5064_v32  ;;  %v5164_v43 = vrot.slane %v5163_v52, 4 }
 0x7cb   :  { %7449 = vrcp.f32 %v5141_v0 }
 0x7cd   :  { %7301 = vset.pattern.permute.xlu0 %v7583_v49 }
 0x7ce   :  { %7298 = vset.pattern.permute.xlu1 %v7583_v49  ;;  %5526 = vperm.xlu0 %7301, %v5205_v20  }
 0x7cf   :  { %5517 = vperm.xlu1 %7298, %v5202_v27   ;;  %v5039_v27 = vsub.f32 %v10617_v41, %v5023_v59  ;;  %v5154_v41 = vrot.slane %v5153_v58, 1 }
 0x7d1   :  { %v7442_v34 = vpop.eup %7441  ;;  %v5070_v33 = vmul.f32 1.442695, %v5039_v27  ;;  %v5155_v8 = vadd.f32 %v5154_v41, %v5153_v58 }
 0x7d2   :  { %5532 = vperm.xlu0 %7301, %v10662_v60   ;;  %v10671_v42 = vpop.eup %7443  ;;  %v10677_v35 = vmul.f32 %v7442_v34, %v10597_v40  ;;  %v5016_v40 = vmax.f32 %v5014_v19, %v5015_v28 }
 0x7d3   :  { %7302 = vset.pattern.permute.xlu1 %v7581_v45  ;;  %v7446_v56 = vpop.eup %7445  ;;  %v5128_v31 = vsel %vm4911_vm2, %v10671_v42, 0.0  ;;  %7451 = vpow2.f32 %v5070_v33 }
 0x7d4   :  { %5796 = vperm.xlu1 %7302, %v5205_v20   ;;  %v10682_v7 = vpop.eup %7447  ;;  %v5204_v10 = vmul.f32 %v7446_v56, %v10600_v5  ;;  %v5129_v62 = vrot.slane %v5128_v31, 4  ;;  %7453 = vrcp.f32 %v5155_v8  ;;  %v5038_v54 = vsub.f32 %v10642_v63, %v5016_v40 }
 0x7d5   :  { %v5156_v53 = vsel %vm4911_vm2, %v10682_v7, 0.0  ;;  %v7450_v24 = vpop.eup %7449 }
 0x7d6   :  { %7309 = vset.pattern.permute.xlu0 %v7581_v45  ;;  %v5130_v46 = vadd.f32 %v5129_v62, %v5128_v31  ;;  %v5157_v5 = vrot.slane %v5156_v53, 4  ;;  %v5209_v39 = vmul.f32 %v7450_v24, %v10621_v48  ;;  %v5068_v30 = vmul.f32 1.442695, %v5038_v54 }
 0x7d7   :  { %5802 = vperm.xlu0 %7309, %v10662_v60  }
 0x7d8   :  { %7303 = vset.pattern.permute.xlu1 %v7582_v51  ;;  %v5131_v47 = vrot.slane %v5130_v46, 2  ;;  %v5158_v61 = vadd.f32 %v5157_v5, %v5156_v53  ;;  %7455 = vpow2.f32 %v5068_v30 }
 0x7d9   :  { %6066 = vperm.xlu1 %7303, %v5205_v20   ;;  %v5165_v20 = vadd.f32 %v5164_v43, %v5163_v52  ;;  %7457 = vrcp.f32 %v5148_v57 }
 0x7da   :  { %v5159_v3 = vrot.slane %v5158_v61, 2  ;;  %v5132_v48 = vadd.f32 %v5131_v47, %v5130_v46  ;;  %v11477_v47 = vld [vmem:[#allocation14_spill] sm:$0xff] }
 0x7db   :  { %7310 = vset.pattern.permute.xlu0 %v7583_v49  ;;  %v5166_v17 = vrot.slane %v5165_v20, 2 }
 0x7dc   :  { %5529 = vperm.xlu0 %7310, %v10677_v35   ;;  %v5133_v16 = vrot.slane %v5132_v48, 1  ;;  %v5160_v59 = vadd.f32 %v5159_v3, %v5158_v61 }
 0x7dd   :  { %7304 = vset.pattern.permute.xlu1 %v11459_v25  ;;  %v10695_v2 = vpop.eup %7451  ;;  %v5167_v9 = vadd.f32 %v5166_v17, %v5165_v20 }
 0x7de   :  { %5237 = vperm.xlu1 %7304, %v5204_v10   ;;  %v5177_v63 = vsel %vm4911_vm2, %v10695_v2, 0.0  ;;  %v7454_v4 = vpop.eup %7453  ;;  %v5134_v14 = vadd.f32 %v5133_v16, %v5132_v48  ;;  %v5161_v0 = vrot.slane %v5160_v59, 1 }
 0x7df   :  { %v5178_v32 = vrot.slane %v5177_v63, 4  ;;  %v5168_v37 = vrot.slane %v5167_v9, 1  ;;  %v10703_v21 = vmul.f32 %v7454_v4, %v10636_v50 }
 0x7e0   :  { %7311 = vset.pattern.permute.xlu0 %v7581_v45  ;;  %v5162_v19 = vadd.f32 %v5161_v0, %v5160_v59 }
 0x7e1   :  { %5799 = vperm.xlu0 %7311, %v10677_v35   ;;  %v5179_v23 = vadd.f32 %v5178_v32, %v5177_v63  ;;  %v5169_v36 = vadd.f32 %v5168_v37, %v5167_v9 }
 0x7e2   :  { %7305 = vset.pattern.permute.xlu1 %v7583_v49  ;;  %v10709_v27 = vpop.eup %7455 }
 0x7e3   :  { %5523 = vperm.xlu1 %7305, %v5204_v10   ;;  %v5180_v58 = vrot.slane %v5179_v23, 2  ;;  %v7458_v50 = vpop.eup %7457  ;;  %7459 = vrcp.f32 %v5169_v36  ;;  %v5170_v34 = vsel %vm4911_vm2, %v10709_v27, 0.0 }
 0x7e4   :  { %7461 = vrcp.f32 %v5134_v14  ;;  %v5210_v12 = vmul.f32 %v7458_v50, %v10655_v55  ;;  %v5171_v56 = vrot.slane %v5170_v34, 4 }
 0x7e5   :  { %7312 = vset.pattern.permute.xlu0 %v11459_v25  ;;  %v5181_v33 = vadd.f32 %v5180_v58, %v5179_v23  ;;  %7463 = vrcp.f32 %v5162_v19 }
 0x7e6   :  { %5376 = vperm.xlu0 %7312, %v5209_v39   ;;  %v5172_v52 = vadd.f32 %v5171_v56, %v5170_v34 }
 0x7e7   :  { %7306 = vset.pattern.permute.xlu1 %v7581_v45  ;;  %v5182_v41 = vrot.slane %v5181_v33, 1 }
 0x7e8   :  { %5793 = vperm.xlu1 %7306, %v5204_v10   ;;  %v5173_v11 = vrot.slane %v5172_v52, 2 }
 0x7e9   :  { %v5183_v55 = vadd.f32 %v5182_v41, %v5181_v33 }
 0x7ea   :  { %7314 = vset.pattern.permute.xlu0 %v7581_v45  ;;  %v5174_v62 = vadd.f32 %v5173_v11, %v5172_v52 }
 0x7eb   :  { %5919 = vperm.xlu0 %7314, %v5209_v39   ;;  %7465 = vrcp.f32 %v5183_v55 }
 0x7ec   :  { %7307 = vset.pattern.permute.xlu1 %v7582_v51 }
 0x7ed   :  { %6063 = vperm.xlu1 %7307, %v5204_v10   ;;  %v7460_v28 = vpop.eup %7459 }
 0x7ee   :  { %v7462_v31 = vpop.eup %7461  ;;  %v5213_v10 = vmul.f32 %v7460_v28, %v10667_v26  ;;  %v5175_v26 = vrot.slane %v5174_v62, 1 }
 0x7ef   :  { %7320 = vset.pattern.permute.xlu0 %v11459_v25  ;;  %v5208_v43 = vmul.f32 %v7462_v31, %v10671_v42  ;;  %v7464_v8 = vpop.eup %7463 }
 0x7f0   :  { %5382 = vperm.xlu0 %7320, %v10703_v21   ;;  %v5212_v40 = vmul.f32 %v7464_v8, %v10682_v7  ;;  %v5176_v42 = vadd.f32 %v5175_v26, %v5174_v62 }
 0x7f1   :  { %7308 = vset.pattern.permute.xlu1 %v11459_v25 }
 0x7f2   :  { %5246 = vperm.xlu1 %7308, %v10662_v60   ;;  %7467 = vrcp.f32 %v5176_v42 }
 0x7f4   :  { %7323 = vset.pattern.permute.xlu0 %v7582_v51 }
 0x7f5   :  { %6195 = vperm.xlu0 %7323, %v10703_v21   ;;  %v7466_v53 = vpop.eup %7465 }
 0x7f6   :  { %5243 = vperm.xlu1 %7308, %v10677_v35   ;;  %v10731_v6 = vmul.f32 %v7466_v53, %v10695_v2 }
 0x7f9   :  { %7324 = vset.pattern.permute.xlu0 %v11459_v25 }
 0x7fa   :  { %5379 = vperm.xlu0 %7324, %v5210_v12   ;;  %7313 = vset.pattern.permute.xlu1 %v7583_v49 }
 0x7fb   :  { %5649 = vperm.xlu1 %7313, %v5209_v39  }
 0x7fc   :  { %v7468_v7 = vpop.eup %7467 }
 0x7fd   :  { %v5214_v24 = vmul.f32 %v7468_v7, %v10709_v27 }
 0x7fe   :  { %7327 = vset.pattern.permute.xlu0 %v7582_v51 }
 0x7ff   :  { %6192 = vperm.xlu0 %7327, %v5210_v12   ;;  %7315 = vset.pattern.permute.xlu1 %v7582_v51 }
 0x800   :  { %6189 = vperm.xlu1 %7315, %v5209_v39   ;;  %v5249_v39 = vand.u32 127, %v11476_v15 }
 0x802   :  { %v10756_v61 = vsub.s32 %v5249_v39, %v11477_v47 }
 0x803   :  { %7328 = vset.pattern.permute.xlu0 %v11459_v25 }
 0x804   :  { %5388 = vperm.xlu0 %7328, %v5213_v10   ;;  %7316 = vset.pattern.permute.xlu1 %v11459_v25 }
 0x805   :  { %5373 = vperm.xlu1 %7316, %v5208_v43  }
 0x808   :  { %7333 = vset.pattern.permute.xlu0 %v7581_v45 }
 0x809   :  { %7317 = vset.pattern.permute.xlu1 %v7583_v49  ;;  %5928 = vperm.xlu0 %7333, %v5212_v40  }
 0x80a   :  { %5646 = vperm.xlu1 %7317, %v5208_v43  }
 0x80d   :  { %7334 = vset.pattern.permute.xlu0 %v7582_v51 }
 0x80e   :  { %7318 = vset.pattern.permute.xlu1 %v7581_v45  ;;  %6198 = vperm.xlu0 %7334, %v5212_v40  }
 0x80f   :  { %5916 = vperm.xlu1 %7318, %v5208_v43  }
 0x812   :  { %7335 = vset.pattern.permute.xlu0 %v11459_v25 }
 0x813   :  { %7319 = vset.pattern.permute.xlu1 %v7582_v51  ;;  %5394 = vperm.xlu0 %7335, %v10731_v6  }
 0x814   :  { %6186 = vperm.xlu1 %7319, %v5208_v43  }
 0x817   :  { %7336 = vset.pattern.permute.xlu0 %v7583_v49 }
 0x818   :  { %7321 = vset.pattern.permute.xlu1 %v7583_v49  ;;  %5667 = vperm.xlu0 %7336, %v10731_v6  }
 0x819   :  { %5655 = vperm.xlu1 %7321, %v10703_v21  }
 0x81c   :  { %7340 = vset.pattern.permute.xlu0 %v7582_v51 }
 0x81d   :  { %7322 = vset.pattern.permute.xlu1 %v7581_v45  ;;  %6201 = vperm.xlu0 %7340, %v5213_v10  }
 0x81e   :  { %5925 = vperm.xlu1 %7322, %v10703_v21  }
 0x821   :  { %6204 = vperm.xlu0 %7340, %v5214_v24  }
 0x822   :  { %7325 = vset.pattern.permute.xlu1 %v7583_v49 }
 0x823   :  { %5652 = vperm.xlu1 %7325, %v5210_v12  }
 0x826   :  { %v10745_v20 = vpop.permute.xlu0 %5228  ;;  %v10747_v46 = vpop.permute.xlu1 %5784 }
 0x827   :  { %7326 = vset.pattern.permute.xlu1 %v7581_v45 }
 0x828   :  { %5922 = vperm.xlu1 %7326, %v5210_v12  }
 0x82b   :  { %v5515_v5 = vpop.permute.xlu0 %5514  ;;  %v6055_v54 = vpop.permute.xlu1 %6054 }
 0x82c   :  { %7329 = vset.pattern.permute.xlu1 %v7583_v49  ;;  %v5541_v63 = vrot.slane %v5515_v5, %v10756_v61  ;;  %v6081_v32 = vrot.slane %v6055_v54, %v10756_v61 }
 0x82d   :  { %5661 = vperm.xlu1 %7329, %v5213_v10  }
 0x830   :  { %v5782_v17 = vpop.permute.xlu0 %5781  ;;  %v10752_v2 = vpop.permute.xlu1 %5225 }
 0x831   :  { %7330 = vset.pattern.permute.xlu1 %v7581_v45 }
 0x832   :  { %5931 = vperm.xlu1 %7330, %v5213_v10  }
 0x835   :  { %v10758_v30 = vpop.permute.xlu0 %5234  ;;  %v5512_v57 = vpop.permute.xlu1 %5511 }
 0x836   :  { %v5537_v9 = vrot.slane %v5512_v57, %v10756_v61  ;;  %7331 = vset.pattern.permute.xlu1 %v11459_v25  ;;  %v5253_v57 = vrot.slane %v10752_v2, %v10756_v61 }
 0x837   :  { %5385 = vperm.xlu1 %7331, %v5212_v40  }
 0x838   :  { %v5566_v3 = vsel %vm2304_vm4, %v5541_v63, %v5537_v9 }
 0x83a   :  { %v10764_v48 = vpop.permute.xlu0 %5790  ;;  %v6052_v4 = vpop.permute.xlu1 %6051 }
 0x83b   :  { %v6077_v37 = vrot.slane %v6052_v4, %v10756_v61  ;;  %7332 = vset.pattern.permute.xlu1 %v7583_v49 }
 0x83c   :  { %5658 = vperm.xlu1 %7332, %v5212_v40  }
 0x83d   :  { %v6106_v21 = vsel %vm2304_vm4, %v6081_v32, %v6077_v37  ;;  %v5257_v32 = vrot.slane %v10745_v20, %v10756_v61 }
 0x83e   :  { %v5788_v16 = vpop.permute.xlu0 %5787 }
 0x83f   :  { %v5521_v59 = vpop.permute.xlu1 %5520  ;;  %v5815_v10 = vrot.slane %v5788_v16, %v10756_v61  ;;  %v5282_v2 = vsel %vm2304_vm4, %v5257_v32, %v5253_v57 }
 0x840   :  { %7337 = vset.pattern.permute.xlu1 %v7581_v45 }
 0x841   :  { %5937 = vperm.xlu1 %7337, %v10731_v6  }
 0x843   :  { %v6058_v23 = vpop.permute.xlu0 %6057 }
 0x844   :  { %v6085_v36 = vrot.slane %v6058_v23, %v10756_v61  ;;  %v6061_v14 = vpop.permute.xlu1 %6060 }
 0x845   :  { %v6089_v0 = vrot.slane %v6061_v14, %v10756_v61  ;;  %7338 = vset.pattern.permute.xlu1 %v11459_v25  ;;  %v5549_v25 = vrot.slane %v5521_v59, %v10756_v61  ;;  %v5265_v14 = vrot.slane %v10758_v30, %v10756_v61 }
 0x846   :  { %v6107_v27 = vsel %vm2306_vm5, %v6085_v36, %v6106_v21  ;;  %5391 = vperm.xlu1 %7338, %v5214_v24  }
 0x847   :  { %v6108_v58 = vsel %vm2308_vm6, %v6089_v0, %v6107_v27 }
 0x848   :  { %v10777_v50 = vpop.permute.xlu0 %5240 }
 0x849   :  { %v5232_v19 = vpop.permute.xlu1 %5231 }
 0x84a   :  { %7339 = vset.pattern.permute.xlu1 %v7582_v51 }
 0x84b   :  { %6069 = vperm.xlu1 %7339, %v10677_v35  }
 0x84d   :  { %v5527_v12 = vpop.permute.xlu0 %5526 }
 0x84e   :  { %v5518_v34 = vpop.permute.xlu1 %5517  ;;  %v5557_v62 = vrot.slane %v5527_v12, %v10756_v61 }
 0x84f   :  { %v5545_v33 = vrot.slane %v5518_v34, %v10756_v61  ;;  %7341 = vset.pattern.permute.xlu1 %v7583_v49  ;;  %v5807_v49 = vrot.slane %v5782_v17, %v10756_v61 }
 0x850   :  { %5664 = vperm.xlu1 %7341, %v5214_v24  }
 0x851   :  { %v5567_v56 = vsel %vm2306_vm5, %v5545_v33, %v5566_v3  ;;  %v5533_v28 = vpop.permute.xlu0 %5532  ;;  %v5261_v3 = vrot.slane %v5232_v19, %v10756_v61  ;;  %v5273_v19 = vrot.slane %v10777_v50, %v10756_v61 }
 0x852   :  { %v5568_v41 = vsel %vm2308_vm6, %v5549_v25, %v5567_v56  ;;  %v5565_v53 = vrot.slane %v5533_v28, %v10756_v61 }
 0x853   :  { %v5797_v52 = vpop.permute.xlu1 %5796  ;;  %v5283_v23 = vsel %vm2306_vm5, %v5261_v3, %v5282_v2 }
 0x854   :  { %7342 = vset.pattern.permute.xlu1 %v7581_v45  ;;  %v5811_v45 = vrot.slane %v10747_v46, %v10756_v61  ;;  %v5827_v15 = vrot.slane %v5797_v52, %v10756_v61  ;;  %v5284_v27 = vsel %vm2308_vm6, %v5265_v14, %v5283_v23 }
 0x855   :  { %5934 = vperm.xlu1 %7342, %v5214_v24  }
 0x856   :  { %v5803_v35 = vpop.permute.xlu0 %5802 }
 0x857   :  { %v5835_v63 = vrot.slane %v5803_v35, %v10756_v61 }
 0x858   :  { %v6067_v31 = vpop.permute.xlu1 %6066 }
 0x859   :  { %7343 = vset.pattern.permute.xlu1 %v7582_v51  ;;  %v5836_v51 = vsel %vm2304_vm4, %v5811_v45, %v5807_v49  ;;  %v6097_v16 = vrot.slane %v6067_v31, %v10756_v61 }
 0x85a   :  { %6072 = vperm.xlu1 %7343, %v10662_v60   ;;  %v5837_v26 = vsel %vm2306_vm5, %v5815_v10, %v5836_v51 }
 0x85b   :  { %v5530_v11 = vpop.permute.xlu0 %5529 }
 0x85c   :  { %v5561_v60 = vrot.slane %v5530_v11, %v10756_v61 }
 0x85d   :  { %v5238_v55 = vpop.permute.xlu1 %5237 }
 0x85e   :  { %6207 = vperm.xlu1 %7343, %v10731_v6   ;;  %v5819_v6 = vrot.slane %v10764_v48, %v10756_v61  ;;  %v5269_v20 = vrot.slane %v5238_v55, %v10756_v61 }
 0x860   :  { %v5800_v7 = vpop.permute.xlu0 %5799  ;;  %v5838_v39 = vsel %vm2308_vm6, %v5819_v6, %v5837_v26 }
 0x861   :  { %v5831_v17 = vrot.slane %v5800_v7, %v10756_v61 }
 0x862   :  { %v5524_v43 = vpop.permute.xlu1 %5523 }
 0x863   :  { %v5553_v8 = vrot.slane %v5524_v43, %v10756_v61 }
 0x865   :  { %v5569_v40 = vsel %vm2310_vm7, %v5553_v8, %v5568_v41  ;;  %v5377_v31 = vpop.permute.xlu0 %5376 }
 0x866   :  { %v5570_v42 = vsel %vm2312_vm10, %v5557_v62, %v5569_v40 }
 0x867   :  { %v5794_v24 = vpop.permute.xlu1 %5793  ;;  %v5571_v46 = vsel %vm2314_vm11, %v5561_v60, %v5570_v42 }
 0x868   :  { %v5823_v5 = vrot.slane %v5794_v24, %v10756_v61  ;;  %v10807_v54 = vsel %vm2316_vm12, %v5565_v53, %v5571_v46  ;;  %v5403_v24 = vrot.slane %v5377_v31, %v10756_v61 }
 0x86a   :  { %v5839_v47 = vsel %vm2310_vm7, %v5823_v5, %v5838_v39  ;;  %v5920_v49 = vpop.permute.xlu0 %5919 }
 0x86b   :  { %v5840_v9 = vsel %vm2312_vm10, %v5827_v15, %v5839_v47 }
 0x86c   :  { %v5841_v48 = vsel %vm2314_vm11, %v5831_v17, %v5840_v9  ;;  %v6064_v4 = vpop.permute.xlu1 %6063 }
 0x86d   :  { %v6093_v37 = vrot.slane %v6064_v4, %v10756_v61  ;;  %v5842_v21 = vsel %vm2316_vm12, %v5835_v63, %v5841_v48 }
 0x86e   :  { %7067 = vmatmul.mubr.msk.f32.vlgmr.msra.gmra.mrb[34].mxu0 %vm1410_vm8, %v5842_v21 }
 0x86f   :  { %v6109_v59 = vsel %vm2310_vm7, %v6093_v37, %v6108_v58  ;;  %7075 = vmatpush3.msra.mxu0 %v10432_v22  ;;  %7076 = vmatprep.mubr.msk.f32.mxu0 %vm7574_vm9, %v11446_v1  ;;  %v5285_v58 = vsel %vm2310_vm7, %v5269_v20, %v5284_v27  ;;  %v5383_v10 = vpop.permute.xlu0 %5382 }
 0x870   :  { %v10833_v36 = vsel %vm2312_vm10, %v6097_v16, %v6109_v59  ;;  %v5286_v25 = vsel %vm2312_vm10, %v5273_v19, %v5285_v58  ;;  %v5411_v63 = vrot.slane %v5383_v10, %v10756_v61 }
 0x871   :  { %v5247_v0 = vpop.permute.xlu1 %5246 }
 0x872   :  { %v5281_v33 = vrot.slane %v5247_v0, %v10756_v61 }
 0x874   :  { %v10857_v45 = vpop.permute.xlu0 %6195 }
 0x875   :  { %v5244_v34 = vpop.permute.xlu1 %5243 }
 0x876   :  { %v5277_v12 = vrot.slane %v5244_v34, %v10756_v61 }
 0x878   :  { %v5287_v56 = vsel %vm2314_vm11, %v5277_v12, %v5286_v25  ;;  %v5946_v25 = vrot.slane %v5920_v49, %v10756_v61 }
 0x879   :  { %v5288_v41 = vsel %vm2316_vm12, %v5281_v33, %v5287_v56  ;;  %v5380_v62 = vpop.permute.xlu0 %5379 }
 0x87a   :  { %7047 = vmatmul.mubr.msk.f32.vlgmr.msra.gmra.mrb[36].mxu1 %vm1410_vm8, %v5288_v41  ;;  %v5650_v30 = vpop.permute.xlu1 %5649  ;;  %v5407_v15 = vrot.slane %v5380_v62, %v10756_v61 }
 0x87b   :  { %7050 = vmatpush3.msra.mxu1 %v10441_v13  ;;  %7051 = vmatprep.mubr.msk.f32.mxu1 %vm7574_vm9, %v11446_v1  ;;  %v5676_v2 = vrot.slane %v5650_v30, %v10756_v61 }
 0x87c   :  { %7054 = vmatprep.subr.mxu1 %v11446_v1 }
 0x87e   :  { %v10859_v60 = vpop.permute.xlu0 %6192 }
 0x87f   :  { %v10851_v50 = vpop.permute.xlu1 %6189 }
 0x883   :  { %v5389_v53 = vpop.permute.xlu0 %5388 }
 0x884   :  { %v5374_v52 = vpop.permute.xlu1 %5373  ;;  %v5419_v4 = vrot.slane %v5389_v53, %v10756_v61 }
 0x885   :  { %v5399_v7 = vrot.slane %v5374_v52, %v10756_v61 }
 0x887   :  { %v5428_v5 = vsel %vm2304_vm4, %v5403_v24, %v5399_v7 }
 0x888   :  { %v10863_v6 = vpop.permute.xlu0 %5928  ;;  %v5429_v17 = vsel %vm2306_vm5, %v5407_v15, %v5428_v5 }
 0x889   :  { %v5647_v28 = vpop.permute.xlu1 %5646  ;;  %v5430_v9 = vsel %vm2308_vm6, %v5411_v63, %v5429_v17  ;;  %v6224_v17 = vrot.slane %v10857_v45, %v10756_v61 }
 0x88a   :  { %v5672_v32 = vrot.slane %v5647_v28, %v10756_v61 }
 0x88c   :  { %v5701_v14 = vsel %vm2304_vm4, %v5676_v2, %v5672_v32 }
 0x88d   :  { %v10869_v39 = vpop.permute.xlu0 %6198 }
 0x88e   :  { %v5917_v35 = vpop.permute.xlu1 %5916  ;;  %v6228_v45 = vrot.slane %v10869_v39, %v10756_v61 }
 0x88f   :  { %v5942_v27 = vrot.slane %v5917_v35, %v10756_v61 }
 0x891   :  { %v5971_v30 = vsel %vm2304_vm4, %v5946_v25, %v5942_v27  ;;  %v6355_v27 = vld [vmem:[#allocation5 + $0x98] sm:$0xff] }
 0x892   :  { %v5395_v3 = vpop.permute.xlu0 %5394 }
 0x893   :  { %v10853_v55 = vpop.permute.xlu1 %6186  ;;  %v5427_v59 = vrot.slane %v5395_v3, %v10756_v61 }
 0x894   :  { %v6212_v35 = vrot.slane %v10853_v55, %v10756_v61 }
 0x897   :  { %v5668_v56 = vpop.permute.xlu0 %5667 }
 0x898   :  { %v5656_v11 = vpop.permute.xlu1 %5655 }
 0x899   :  { %v5684_v12 = vrot.slane %v5656_v11, %v10756_v61 }
 0x89c   :  { %v6202_v62 = vpop.permute.xlu0 %6201 }
 0x89d   :  { %v10855_v43 = vpop.permute.xlu1 %5925  ;;  %v6232_v3 = vrot.slane %v6202_v62, %v10756_v61  ;;  %v6364_v62 = vld [vmem:[#allocation5 + $0xe0] sm:$0xff] }
 0x89e   :  { %v5954_v49 = vrot.slane %v10855_v43, %v10756_v61  ;;  %v5958_v43 = vrot.slane %v10863_v6, %v10756_v61 }
 0x8a2   :  { %v5653_v8 = vpop.permute.xlu1 %5652 }
 0x8a3   :  { %v5680_v21 = vrot.slane %v5653_v8, %v10756_v61  ;;  %v6216_v8 = vrot.slane %v10851_v50, %v10756_v61  ;;  %v6220_v50 = vrot.slane %v10859_v60, %v10756_v61 }
 0x8a5   :  { %v5702_v58 = vsel %vm2306_vm5, %v5680_v21, %v5701_v14  ;;  %v6354_v14 = vld [vmem:[#allocation5 + $0x90] sm:$0xff] }
 0x8a6   :  { %v5703_v41 = vsel %vm2308_vm6, %v5684_v12, %v5702_v58  ;;  %v6356_v58 = vld [vmem:[#allocation5 + $0xa0] sm:$0xff] }
 0x8a7   :  { %v5923_v51 = vpop.permute.xlu1 %5922 }
 0x8a8   :  { %v5950_v33 = vrot.slane %v5923_v51, %v10756_v61 }
 0x8aa   :  { %v5972_v28 = vsel %vm2306_vm5, %v5950_v33, %v5971_v30 }
 0x8ab   :  { %v5973_v51 = vsel %vm2308_vm6, %v5954_v49, %v5972_v28  ;;  %v6359_v28 = vld [vmem:[#allocation5 + $0xb8] sm:$0xff] }
 0x8ac   :  { %v5662_v40 = vpop.permute.xlu1 %5661  ;;  %v5974_v24 = vsel %vm2310_vm7, %v5958_v43, %v5973_v51 }
 0x8b1   :  { %v10861_v26 = vpop.permute.xlu1 %5931 }
 0x8b2   :  { %v5962_v55 = vrot.slane %v10861_v26, %v10756_v61 }
 0x8b4   :  { %v5975_v6 = vsel %vm2312_vm10, %v5962_v55, %v5974_v24 }
 0x8b6   :  { %v5386_v42 = vpop.permute.xlu1 %5385 }
 0x8b7   :  { %v5415_v47 = vrot.slane %v5386_v42, %v10756_v61  ;;  %v6241_v42 = vsel %vm2304_vm4, %v6216_v8, %v6212_v35 }
 0x8b8   :  { %v6242_v5 = vsel %vm2306_vm5, %v6220_v50, %v6241_v42  ;;  %v6366_v42 = vld [vmem:[#allocation5 + $0xf0] sm:$0xff] }
 0x8b9   :  { %v5431_v48 = vsel %vm2310_vm7, %v5415_v47, %v5430_v9  ;;  %v6205_v47 = vpop.permute.xlu0 %6204 }
 0x8ba   :  { %v5432_v23 = vsel %vm2312_vm10, %v5419_v4, %v5431_v48  ;;  %v6236_v4 = vrot.slane %v6205_v47, %v10756_v61 }
 0x8bb   :  { %v5659_v46 = vpop.permute.xlu1 %5658 }
 0x8bc   :  { %v5688_v19 = vrot.slane %v5659_v46, %v10756_v61 }
 0x8be   :  { %v5704_v52 = vsel %vm2310_vm7, %v5688_v19, %v5703_v41  ;;  %v7198_v19 = vpack.c.bf16 %v6356_v58, %v6355_v27 }
 0x8c0   :  { %v10873_v57 = vpop.permute.xlu1 %5937 }
 0x8c1   :  { %v5970_v46 = vrot.slane %v10873_v57, %v10756_v61  ;;  %v6243_v57 = vsel %vm2308_vm6, %v6224_v17, %v6242_v5 }
 0x8c2   :  { %v6244_v21 = vsel %vm2310_vm7, %v6228_v45, %v6243_v57 }
 0x8c5   :  { %v5392_v37 = vpop.permute.xlu1 %5391 }
 0x8c6   :  { %v5423_v16 = vrot.slane %v5392_v37, %v10756_v61 }
 0x8c8   :  { %v5433_v20 = vsel %vm2314_vm11, %v5423_v16, %v5432_v23  ;;  %v6245_v16 = vsel %vm2312_vm10, %v6232_v3, %v6244_v21  ;;  %v6352_v23 = vld [vmem:[#allocation5 + $0x80] sm:$0xff] }
 0x8c9   :  { %v5434_v0 = vsel %vm2316_vm12, %v5427_v59, %v5433_v20  ;;  %v6351_v59 = vld [vmem:[#allocation5 + $0x78] sm:$0xff] }
 0x8ca   :  { %7052 = vmatmul.mubr.msk.f32.vlgmr.msra.gmra.mrb[38].mxu1 %vm1410_vm8, %v5434_v0  ;;  %v6070_v34 = vpop.permute.xlu1 %6069  ;;  %v7190_v20 = vpack.c.bf16 %v6352_v23, %v6351_v59 }
 0x8cb   :  { %7055 = vmatpush3.msra.mxu1 %v10432_v22  ;;  %7056 = vmatprep.mubr.msk.f32.mxu1 %vm7574_vm9, %v11446_v1  ;;  %v5692_v22 = vrot.slane %v5662_v40, %v10756_v61  ;;  %v6101_v60 = vrot.slane %v6070_v34, %v10756_v61  ;;  %v6357_v34 = vld [vmem:[#allocation5 + $0xa8] sm:$0xff] }
 0x8cc   :  { %7059 = vmatprep.subr.mxu1 %v11446_v1  ;;  %7191 = vmatprep.subr.bf16.mxu0 %v7190_v20 }
 0x8cd   :  { %v5705_v10 = vsel %vm2312_vm10, %v5692_v22, %v5704_v52  ;;  %v6111_v32 = vsel %vm2314_vm11, %v6101_v60, %v10833_v36  ;;  %v6353_v36 = vld [vmem:[#allocation5 + $0x88] sm:$0xff]  ;;  %v6360_v22 = vld [vmem:[#allocation5 + $0xc0] sm:$0xff] }
 0x8ce   :  { %7057 = vmatmul.mubr.msk.f32.vlgmr.msra.gmra.mrb[40].mxu1 %vm1410_vm8, %v10807_v54  ;;  %v5700_v54 = vrot.slane %v5668_v56, %v10756_v61  ;;  %v7194_v0 = vpack.c.bf16 %v6354_v14, %v6353_v36 }
 0x8cf   :  { %7060 = vmatpush3.msra.mxu1 %v10441_v13  ;;  %v5665_v31 = vpop.permute.xlu1 %5664  ;;  %7061 = vmatprep.mubr.msk.f32.mxu1 %vm7574_vm9, %v11446_v1 }
 0x8d0   :  { %v5696_v11 = vrot.slane %v5665_v31, %v10756_v61  ;;  %7069 = vmatprep.subr.mxu1 %v11446_v1  ;;  %v7206_v31 = vpack.c.bf16 %v6360_v22, %v6359_v28  ;;  %v6504_v28 = vld [vmem:[#allocation5 + $0x100] sm:$0xff] }
 0x8d2   :  { %v5706_v40 = vsel %vm2314_vm11, %v5696_v11, %v5705_v10  ;;  %v6361_v11 = vld [vmem:[#allocation5 + $0xc8] sm:$0xff]  ;;  %v6363_v10 = vld [vmem:[#allocation5 + $0xd8] sm:$0xff] }
 0x8d3   :  { %v5707_v53 = vsel %vm2316_vm12, %v5700_v54, %v5706_v40  ;;  %v6362_v54 = vld [vmem:[#allocation5 + $0xd0] sm:$0xff]  ;;  %v7214_v51 = vpack.c.bf16 %v6364_v62, %v6363_v10  ;;  %v11481_v62 = vld [vmem:[#allocation82_spill] sm:$0xff] }
 0x8d4   :  { %7062 = vmatmul.mubr.msk.f32.vlgmr.msra.gmra.mrb[42].mxu1 %vm1410_vm8, %v5707_v53  ;;  %v5935_v7 = vpop.permute.xlu1 %5934  ;;  %v7210_v8 = vpack.c.bf16 %v6362_v54, %v6361_v11  ;;  %v6365_v53 = vld [vmem:[#allocation5 + $0xe8] sm:$0xff] }
 0x8d5   :  { %7070 = vmatpush3.msra.mxu1 %v10441_v13  ;;  %v5966_v26 = vrot.slane %v5935_v7, %v10756_v61  ;;  %7071 = vmatprep.mubr.msk.f32.mxu1 %vm7574_vm9, %v11446_v1  ;;  %v7218_v7 = vpack.c.bf16 %v6366_v42, %v6365_v53 }
 0x8d6   :  { %7079 = vmatprep.subr.mxu1 %v11446_v1 }
 0x8d7   :  { %v5976_v15 = vsel %vm2314_vm11, %v5966_v26, %v5975_v6 }
 0x8d8   :  { %v5977_v63 = vsel %vm2316_vm12, %v5970_v46, %v5976_v15 }
 0x8d9   :  { %7072 = vmatmul.mubr.msk.f32.vlgmr.msra.gmra.mrb[44].mxu1 %vm1410_vm8, %v5977_v63  ;;  %v6073_v9 = vpop.permute.xlu1 %6072 }
 0x8da   :  { %7080 = vmatpush3.msra.mxu1 %v10441_v13  ;;  %v6105_v48 = vrot.slane %v6073_v9, %v10756_v61  ;;  %7081 = vmatprep.mubr.msk.f32.mxu1 %vm7574_vm9, %v11446_v1  ;;  %v6246_v1 = vsel %vm2314_vm11, %v6236_v4, %v6245_v16 }
 0x8dc   :  { %v6112_v37 = vsel %vm2316_vm12, %v6105_v48, %v6111_v32 }
 0x8dd   :  { %7077 = vmatmul.mubr.msk.f32.vlgmr.msra.gmra.mrb[36].mxu0 %vm1410_vm8, %v6112_v37  ;;  %v6208_v13 = vpop.permute.xlu1 %6207 }
 0x8de   :  { %v6240_v2 = vrot.slane %v6208_v13, %v10756_v61  ;;  %7193 = vmatpush3.bf16.msra.mxu0 %v7190_v20  ;;  %v6358_v61 = vld [vmem:[#allocation5 + $0xb0] sm:$0xff] }
 0x8df   :  { %7195 = vmatprep.subr.bf16.mxu0 %v7194_v0  ;;  %v7202_v12 = vpack.c.bf16 %v6358_v61, %v6357_v34  ;;  %v11478_v61 = vld [vmem:[#allocation80_spill] sm:$0xff] }
 0x8e0   :  { %v6247_v39 = vsel %vm2316_vm12, %v6240_v2, %v6246_v1  ;;  %v6733_v1 = vld [vmem:[#allocation5 + $0x1d8] ss:$0 sm:$0xff] }
 0x8e1   :  { %7082 = vmatmul.mubr.msk.f32.vlgmr.msra.gmra.mrb[46].mxu1 %vm1410_vm8, %v6247_v39  ;;  %vm6348_vm8 = vcmask 785408   ;;  %v6708_v39 = vld [vmem:[#allocation5 + $0x1e8] ss:$0 sm:$0xff] }
 0x8e2   :  { %7197 = vmatpush3.bf16.msra.mxu0 %v7194_v0  ;;  %v4245_v14 = vadd.f32 %v10174_v38, %v6708_v39  ;;  %v4240_v27 = vadd.f32 %v6708_v39, %v10176_v44  ;;  %v6503_v44 = vld [vmem:[#allocation5 + $0xf8] sm:$0xff] }
 0x8e3   :  { %7199 = vmatprep.subr.bf16.mxu0 %v7198_v19  ;;  %v7222_v22 = vpack.c.bf16 %v6504_v28, %v6503_v44 }
 0x8e5   :  { %7223 = vmatprep.subr.bf16.mxu1 %v7222_v22 }
 0x8e6   :  { %7201 = vmatpush3.bf16.msra.mxu0 %v7198_v19  ;;  %7225 = vmatpush3.bf16.msra.mxu1 %v7222_v22 }
 0x8e7   :  { %7203 = vmatprep.subr.bf16.mxu0 %v7202_v12 }
 0x8ea   :  { %7205 = vmatpush3.bf16.msra.mxu0 %v7202_v12  ;;  %v6476_v12 = vadd.f32 1.0, %v11478_v61 }
 0x8eb   :  { %7207 = vmatprep.subr.bf16.mxu0 %v7206_v31 }
 0x8ee   :  { %7209 = vmatpush3.bf16.msra.mxu0 %v7206_v31  ;;  %v6505_v31 = vld [vmem:[#allocation5 + $0x108] sm:$0xff] }
 0x8ef   :  { %7211 = vmatprep.subr.bf16.mxu0 %v7210_v8 }
 0x8f2   :  { %7213 = vmatpush3.bf16.msra.mxu0 %v7210_v8 }
 0x8f3   :  { %7215 = vmatprep.subr.bf16.mxu0 %v7214_v51 }
 0x8f6   :  { %7217 = vmatpush3.bf16.msra.mxu0 %v7214_v51  ;;  %v11482_v51 = vld [vmem:[#allocation81_spill] sm:$0xff] }
 0x8f7   :  { %7219 = vmatprep.subr.bf16.mxu0 %v7218_v7 }
 0x8fa   :  { %7221 = vmatpush3.bf16.msra.mxu0 %v7218_v7 }
 0x941   :  { %v5911_v33 = vpop.f32.mrb[34].mxu0 }
 0x942   :  { %v7068_v25 = vpop.f32.mrb[35].mxu0 }
 0x943   :  { %v11479_v25 = vld [vmem:[#allocation79_spill] sm:$0xff] }
 0x94d   :  { %v5360_v56 = vpop.f32.mrb[36].mxu1 }
 0x94e   :  { %v7048_v41 = vpop.f32.mrb[37].mxu1 }
 0x99d   :  { %v5506_v30 = vpop.f32.mrb[38].mxu1 }
 0x99e   :  { %v7053_v52 = vpop.f32.mrb[39].mxu1 }
 0x9a1   :  { %v5641_v35 = vpop.f32.mrb[40].mxu1 }
 0x9a2   :  { %v7058_v49 = vpop.f32.mrb[41].mxu1 }
 0x9a7   :  { %v5776_v55 = vpop.f32.mrb[42].mxu1 }
 0x9a8   :  { %v7344_v40 = vpack.i.bf16 %v5776_v55, %v5641_v35  ;;  %v7063_v43 = vpop.f32.mrb[43].mxu1  ;;  %v6506_v35 = vld [vmem:[#allocation5 + $0x110] sm:$0xff] }
 0x9a9   :  { %v7226_v49 = vpack.c.bf16 %v6506_v35, %v6505_v31 }
 0x9aa   :  { %7345 = vrot.lane.b32.xlu0 %v7344_v40, %s7575_s2 }
 0x9ab   :  { %7227 = vmatprep.subr.bf16.mxu1 %v7226_v49 }
 0x9ac   :  { %v6046_v50 = vpop.f32.mrb[44].mxu1  ;;  %7229 = vmatpush3.bf16.msra.mxu1 %v7226_v49 }
 0x9ad   :  { %v7349_v24 = vpack.i.bf16 %v6046_v50, %v5911_v33  ;;  %v7073_v26 = vpop.f32.mrb[45].mxu1 }
 0x9af   :  { %7350 = vrot.lane.b32.xlu1 %v7349_v24, %s7579_s19 }
 0x9b0   :  { %v6181_v6 = vpop.f32.mrb[36].mxu0 }
 0x9b1   :  { %v7078_v46 = vpop.f32.mrb[37].mxu0 }
 0x9b4   :  { %v6316_v5 = vpop.f32.mrb[46].mxu1 }
 0x9b5   :  { %v7354_v60 = vpack.i.bf16 %v6316_v5, %v6181_v6  ;;  %v7083_v15 = vpop.f32.mrb[47].mxu1 }
 0x9b7   :  { %7355 = vrot.lane.b32.xlu0 %v7354_v60, %s7580_s20 }
 0xa1c   :  { %v7346_v17 = vpop.permute.xlu0 %7345 }
 0xa1d   :  { %v7348_v63 = vunpack.i.h.bf16 %v7346_v17  ;;  %v7347_v9 = vunpack.i.l.bf16 %v7346_v17 }
 0xa1f   :  { %v6345_v45 = vsel %vm1319_vm0, %v5506_v30, %v7348_v63  ;;  %v6344_v37 = vsel %vm1319_vm0, %v5360_v56, %v7347_v9  ;;  %v6475_v56 = vadd.f32 1.0, %v11479_v25  ;;  %v11480_v30 = vld [vmem:[#allocation15_spill] sm:$0xff] }
 0xa20   :  { %v6486_v38 = vrot.slane %v6476_v12, %v11480_v30 }
 0xa21   :  { %v7351_v47 = vpop.permute.xlu1 %7350  ;;  %v6482_v52 = vrot.slane %v6475_v56, %v11480_v30 }
 0xa22   :  { %v7353_v3 = vunpack.i.h.bf16 %v7351_v47  ;;  %v7352_v57 = vunpack.i.l.bf16 %v7351_v47 }
 0xa24   :  { %v6346_v21 = vsel %vm4149_vm14, %v6344_v37, %v7352_v57  ;;  %v6347_v13 = vsel %vm4149_vm14, %v6345_v45, %v7353_v3 }
 0xa29   :  { %v7356_v48 = vpop.permute.xlu0 %7355 }
 0xa2a   :  { %v7358_v4 = vunpack.i.h.bf16 %v7356_v48  ;;  %v7357_v32 = vunpack.i.l.bf16 %v7356_v48 }
 0xa2c   :  { %v6349_v16 = vsel %vm6348_vm8, %v6346_v21, %v7357_v32  ;;  %v6350_v2 = vsel %vm6348_vm8, %v6347_v13, %v7358_v4 }
 0xa2d   :  { %7116 = vmatprep.mubr.f32.mxu0 %v6349_v16 }
 0xa2e   :  { %7117 = vmatmul.mubr.f32.vlgmr.msra.gmra.mrb[38].mxu0 %v6350_v2 }
 0xb01   :  { %v7118_v59 = vpop.f32.mrb[38].mxu0 }
 0xb02   :  { %v6444_v23 = vadd.f32 %v7118_v59, %v6733_v1  ;;  %v6438_v36 = vpop.f32.mrb[39].mxu0 }
 0xb03   :  { %v6439_v20 = vadd.f32 %v6733_v1, %v6438_v36 }
 0xb04   :  { %v6448_v0 = vmul.f32 %v6444_v23, %v11405_v18 }
 0xb05   :  { %v6447_v58 = vmul.f32 %v6439_v20, %v11259_v29 }
 0xb06   :  { %v6450_v19 = vmul.f32 %v6448_v0, %v4245_v14 }
 0xb07   :  { %v6449_v34 = vmul.f32 %v6447_v58, %v4240_v27 }
 0xb08   :  { %v6452_v33 = vadd.f32 %v6450_v19, %v6448_v0 }
 0xb09   :  { %v6451_v41 = vadd.f32 %v6449_v34, %v6447_v58 }
 0xb0a   :  { %6457 = vrot.lane.b32.xlu0 %v6452_v33, %s7575_s2 }
 0xb0b   :  { %6455 = vrot.lane.b32.xlu1 %v6451_v41, %s7575_s2 }
 0xb0e   :  { %6489 = vrot.lane.b32.xlu0 %v6486_v38, %s7580_s20 }
 0xb0f   :  { %6487 = vrot.lane.b32.xlu1 %v6482_v52, %s7580_s20 }
 0xb7c   :  { %v6458_v11 = vpop.permute.xlu0 %6457 }
 0xb7d   :  { %v6462_v54 = vmul.f32 %v6458_v11, %v4245_v14  ;;  %v6456_v10 = vpop.permute.xlu1 %6455 }
 0xb7e   :  { %v6461_v8 = vmul.f32 %v6456_v10, %v4240_v27 }
 0xb7f   :  { %6467 = vrot.lane.b32.xlu0 %v6462_v54, %s7580_s20 }
 0xb80   :  { %6465 = vrot.lane.b32.xlu1 %v6461_v8, %s7580_s20  ;;  %v6490_v55 = vpop.permute.xlu0 %6489 }
 0xb81   :  { %v6488_v40 = vpop.permute.xlu1 %6487 }
 0xb83   :  { %6497 = vrot.lane.b32.xlu0 %v11481_v62, %s7579_s19 }
 0xb84   :  { %6495 = vrot.lane.b32.xlu1 %v11482_v51, %s7579_s19 }
 0xbf1   :  { %v6468_v43 = vpop.permute.xlu0 %6467 }
 0xbf2   :  { %v6472_v53 = vadd.f32 %v6468_v43, %v6452_v33  ;;  %v6466_v42 = vpop.permute.xlu1 %6465 }
 0xbf3   :  { %v6471_v7 = vadd.f32 %v6466_v42, %v6451_v41 }
 0xbf4   :  { %v6494_v50 = vmul.f32 %v6490_v55, %v6472_v53 }
 0xbf5   :  { %v6498_v24 = vpop.permute.xlu0 %6497  ;;  %v6493_v26 = vmul.f32 %v6488_v40, %v6471_v7 }
 0xbf6   :  { %v6496_v6 = vpop.permute.xlu1 %6495  ;;  %v6502_v5 = vadd.f32 %v6498_v24, %v6494_v50 }
 0xbf7   :  { %v6501_v46 = vadd.f32 %v6496_v6, %v6493_v26 }
 0xbf9   :  { %7127 = vmatprep.mubr.msk.f32.mxu1 %vm1319_vm0, %v6501_v46 }
 0xbfa   :  { %7128 = vmatmul.mubr.msk.f32.vlgmr.msra.gmra.mrb[48].mxu1 %vm1319_vm0, %v6502_v5 }
 0xbfb   :  { %7526 = shalt.err (!%p7523_p6)
}
 0xbfc   :  { %s7527_s27 = scalar_lea.hbm %s11033_s7, 2048 }
 0xbfd   :  { %p7528_p7 = scmp.ne.s32.totalorder %s11033_s7, %s7527_s27  ;;  %p7531_p8 = scmp.lt.u32.totalorder %s7527_s27, %s11033_s7 }
 0xbff   :  { %p7533_p9 = pnand %p7531_p8, %p7528_p7 }
 0xc01   :  { %7536 = shalt.err (!%p7533_p9)
}
 0xc02   :  { %6636 = dma.vmem_to_hbm [thread:$0]  %s6631_s1, 2048, %s11033_s7, [#allocation9], %s7568_s11, %s7568_s11, %s7569_s12   ;;  %v6734_v60 = vld [vmem:[#allocation5 + $0x1e0] ss:$0 sm:$0xff] }
 0xc03   :  { %s7585_s10 = smov [#allocation7]  }
 0xc04   :  { %s6618_s13 = sshll.u32 %s7585_s10, 4  ;;  %s6619_s13 = int_to_ptr.vmem [resolvable:$true] %s6618_s13 }
 0xc05   :  { %s7537_s14 = scalar_lea.vmem %s6619_s13, 256  ;;  %p7542_p11 = scmp.lt.s32.totalorder %s6619_s13, %s6619_s13 }
 0xc06   :  { %p7538_p10 = scmp.ne.s32.totalorder %s6619_s13, %s7537_s14  ;;  %p7543_p12 = scmp.lt.s32.totalorder %s7537_s14, %s7537_s14 }
 0xc08   :  { %p7544_p13 = por %p7543_p12, %p7542_p11 }
 0xc0a   :  { %p7545_p0 = pnand %p7544_p13, %p7538_p10 }
 0xccd   :  { %v7129_v15 = vpop.f32.mrb[48].mxu1 }
 0xcce   :  { %v6590_v17 = vadd.f32 %v7129_v15, %v6734_v60  ;;  %v6584_v47 = vpop.f32.mrb[49].mxu1 }
 0xccf   :  { %v6585_v63 = vadd.f32 %v6734_v60, %v6584_v47 }
 0xcd0   :  { %v6594_v9 = vmul.f32 %v6590_v17, %v11405_v18 }
 0xcd1   :  { %v6593_v3 = vmul.f32 %v6585_v63, %v11259_v29 }
 0xcd2   :  { %6596 = vst.msk [vmem:[#allocation7 + $0x8] sm:$0xff] %vm1319_vm0, %v6594_v9 }
 0xcd3   :  { %6595 = vst.msk [vmem:[#allocation7] sm:$0xff] %vm1319_vm0, %v6593_v3 }
 0xcd4   :  { %7548 = shalt.err (!%p7545_p0)
}
 0xcd5   :  { %s7549_s15 = scalar_lea.hbm %s11032_s6, 256 }
 0xcd6   :  { %p7550_p1 = scmp.ne.s32.totalorder %s11032_s6, %s7549_s15  ;;  %p7553_p2 = scmp.lt.u32.totalorder %s7549_s15, %s11032_s6 }
 0xcd8   :  { %p7555_p3 = pnand %p7553_p2, %p7550_p1 }
 0xcda   :  { %7558 = shalt.err (!%p7555_p3)
}
 0xcdb   :  { %6624 = dma.vmem_to_hbm [thread:$0]  %s6619_s13, 256, %s11032_s6, [#allocation4], %s7568_s11, %s7568_s11, %s7569_s12  }
 0xcdc   :  { %7563 = dma.done.wait [#allocation4], 256  }
 0xcdd   :  { %7564 = vsyncadd [#allocation4], 4294967040 }
 0xcde   :  { %7565 = dma.done.wait [#allocation9], 2048  }
 0xcdf   :  { %7566 = vsyncadd [#allocation9], 4294965248 }
 0xce0   :  { %6643 = vsyncpa [#allocation3], 1 }
 0xce1   :  { %6644 = vsyncpa [#allocation6], 1 }
 0xce2   :  { %6645 = vsyncpa [#allocation4], 1 }
 0xce3   :  { %6646 = vsyncpa [#allocation9], 1 }

</bundles_post_ra>
